<compile_context>
chip_gen: v7x
topology: tpu7x:2x2x1
jax: 0.10.0
libtpu: 0.0.40
codegen_flags: <defaults>
</compile_context>

<pallas_src>
import jax
import jax.numpy as jnp
from jax.experimental import pallas as pl
from jax.experimental.pallas import tpu as pltpu

STATE_DIM = 384
HIDDEN = 512
HEAD_HIDDEN = 128
ACTION_DIM = 64
NUM_RES_BLOCKS = 10
BLOCKS_PER_STEP = 5          # fuse 5 residual blocks per grid step (grid inner = 2)
OUT_SLAB = 2 * ACTION_DIM    # 128-lane output slab: [policy | value | pad]
BN_EPS = 1e-5


def hiv_kernel(
    x_ref,          # (TB, STATE_DIM)                      f32
    w_in_ref,       # (STATE_DIM, HIDDEN)                  bf16, BN scale folded
    sh_in_ref,      # (1, HIDDEN)                          f32 shift (bias+BN)
    w_rb_ref,       # (BLOCKS_PER_STEP, 2, HIDDEN, HIDDEN) bf16 merged W1/W2
    sh_rb_ref,      # (BLOCKS_PER_STEP, 2, 1, HIDDEN)      f32 merged shifts
    wph_ref,        # (HIDDEN, 2*HEAD_HIDDEN)              bf16 fused [policy|value] L1
    bph_ref,        # (1, 2*HEAD_HIDDEN)                   f32
    whd2_ref,       # (2*HEAD_HIDDEN, OUT_SLAB)            bf16 block-diag [wp2 | wv2]
    bhd2_ref,       # (1, OUT_SLAB)                        f32
    out_ref,        # (TB, OUT_SLAB)                       f32 output slab
    h_ref,          # VMEM scratch (TB, HIDDEN) f32, carried across inner axis
):
    i = pl.program_id(1)   # residual-chain axis (inner, "arbitrary")

    # ---- input layer: Linear -> BN -> ReLU (first inner step of each batch tile) ----
    @pl.when(i == 0)
    def _():
        x = x_ref[...].astype(jnp.bfloat16)
        z = jnp.dot(x, w_in_ref[...], preferred_element_type=jnp.float32)
        h_ref[...] = jnp.maximum(z + sh_in_ref[...], 0.0)

    # ---- BLOCKS_PER_STEP fused residual blocks: h += BN(W2 ReLU(BN(W1 h))) ----
    h = h_ref[...]
    for j in range(BLOCKS_PER_STEP):     # static unroll
        z = jnp.dot(h.astype(jnp.bfloat16), w_rb_ref[j, 0],
                    preferred_element_type=jnp.float32)
        z = jnp.maximum(z + sh_rb_ref[j, 0], 0.0)
        z = jnp.dot(z.astype(jnp.bfloat16), w_rb_ref[j, 1],
                    preferred_element_type=jnp.float32)
        h = h + (z + sh_rb_ref[j, 1])
    h_ref[...] = h

    # ---- heads (last inner step): fused L1 + block-diagonal fused L2 ----
    @pl.when(i == pl.num_programs(1) - 1)
    def _():
        # fused first layer of both heads: one (TB,512)@(512,256) MXU pass
        hh = jnp.dot(h.astype(jnp.bfloat16), wph_ref[...],
                     preferred_element_type=jnp.float32) + bph_ref[...]
        hh = jnp.maximum(hh, 0.0)

        # fused second layer: (TB,256)@(256,128) block-diagonal weight
        # z[:, :64] = policy logits, z[:, 64] = value pre-tanh, rest = 0
        z = jnp.dot(hh.astype(jnp.bfloat16), whd2_ref[...],
                    preferred_element_type=jnp.float32) + bhd2_ref[...]

        col = jax.lax.broadcasted_iota(jnp.int32, z.shape, 1)
        is_pol = col < ACTION_DIM

        # softmax over policy lanes only (whole-vreg masked math, lane-dense)
        masked = jnp.where(is_pol, z, -jnp.inf)
        m = jnp.max(masked, axis=1, keepdims=True)
        e = jnp.exp(masked - m)                      # value/pad lanes -> exp(-inf)=0
        pol = e / jnp.sum(e, axis=1, keepdims=True)

        val = jnp.tanh(z)                            # correct in the value lane

        out_ref[...] = jnp.where(is_pol, pol, val)   # single lane-dense 128-wide store


def hiv_forward(x, params, *, batch_block=None):
    B = x.shape[0]
    if batch_block is None:
        # one batch tile for small B; tile (megacore "parallel") for large B
        batch_block = B if B <= 256 else 256
    assert B % batch_block == 0, "B must be a multiple of batch_block"
    grid = (B // batch_block, NUM_RES_BLOCKS // BLOCKS_PER_STEP)

    def const(shape):
        n = len(shape)
        return pl.BlockSpec(shape, lambda b, i, _n=n: (0,) * _n)

    def stacked(shape):
        n = len(shape)
        return pl.BlockSpec(shape, lambda b, i, _n=n: (i,) + (0,) * (_n - 1))

    in_specs = [
        pl.BlockSpec((batch_block, STATE_DIM), lambda b, i: (b, 0)),       # x
        const((STATE_DIM, HIDDEN)),                                        # w_in
        const((1, HIDDEN)),                                                # sh_in
        stacked((BLOCKS_PER_STEP, 2, HIDDEN, HIDDEN)),                     # merged W1/W2
        stacked((BLOCKS_PER_STEP, 2, 1, HIDDEN)),                          # merged shifts
        const((HIDDEN, 2 * HEAD_HIDDEN)),                                  # wph (fused heads L1)
        const((1, 2 * HEAD_HIDDEN)),                                       # bph
        const((2 * HEAD_HIDDEN, OUT_SLAB)),                                # whd2 (block-diag L2)
        const((1, OUT_SLAB)),                                              # bhd2
    ]
    out_specs = pl.BlockSpec((batch_block, OUT_SLAB), lambda b, i: (b, 0))
    out_shape = jax.ShapeDtypeStruct((B, OUT_SLAB), jnp.float32)

    out = pl.pallas_call(
        hiv_kernel,
        out_shape=out_shape,
        grid_spec=pltpu.PrefetchScalarGridSpec(
            num_scalar_prefetch=0,
            grid=grid,
            in_specs=in_specs,
            out_specs=out_specs,
            scratch_shapes=[pltpu.VMEM((batch_block, HIDDEN), jnp.float32)],
        ),
        compiler_params=pltpu.CompilerParams(
            dimension_semantics=("parallel", "arbitrary"),
            vmem_limit_bytes=32 << 20,   # ~11 MiB actual footprint; v7x-safe
        ),
    )(
        x,
        params["w_in"], params["sh_in"],
        params["w_rb"], params["sh_rb"],
        params["wph"], params["bph"],
        params["whd2"], params["bhd2"],
    )

    policy = out[:, :ACTION_DIM]
    value = out[:, ACTION_DIM:ACTION_DIM + 1]
    return policy, value


# ----------------------- deterministic parameter setup -----------------------

def _linear_init(key, fan_in, fan_out):
    """PyTorch nn.Linear default init: U(-1/sqrt(fan_in), 1/sqrt(fan_in))."""
    kw, kb = jax.random.split(key)
    bound = 1.0 / jnp.sqrt(float(fan_in))
    w = jax.random.uniform(kw, (fan_in, fan_out), jnp.float32, -bound, bound)
    b = jax.random.uniform(kb, (fan_out,), jnp.float32, -bound, bound)
    return w, b


def _bn_init(key, dim):
    kg, kb, km, kv = jax.random.split(key, 4)
    gamma = 1.0 + 0.1 * jax.random.normal(kg, (dim,), jnp.float32)
    beta = 0.1 * jax.random.normal(kb, (dim,), jnp.float32)
    mean = 0.1 * jax.random.normal(km, (dim,), jnp.float32)
    var = jnp.exp(0.1 * jax.random.normal(kv, (dim,), jnp.float32))  # > 0
    return gamma, beta, mean, var


def _fold_linear_bn(w, b, gamma, beta, mean, var):
    """Fold Linear + eval-mode BatchNorm1d into (W*scale [bf16], shift [f32])."""
    scale = gamma / jnp.sqrt(var + BN_EPS)                 # (dim,)
    w_folded = (w * scale[None, :]).astype(jnp.bfloat16)   # scale into columns
    shift = ((b - mean) * scale + beta).reshape(1, -1)     # (1, dim) f32
    return w_folded, shift


def make_params(seed=0):
    key = jax.random.PRNGKey(seed)
    keys = jax.random.split(key, 64)
    ki = iter(range(64))

    p = {}

    # input layer
    w_in, b_in = _linear_init(keys[next(ki)], STATE_DIM, HIDDEN)
    g, b, m, v = _bn_init(keys[next(ki)], HIDDEN)
    p["w_in"], p["sh_in"] = _fold_linear_bn(w_in, b_in, g, b, m, v)

    # res blocks: merged W1/W2 stack (10, 2, 512, 512) + shift stack (10, 2, 1, 512)
    w_rb, sh_rb = [], []
    for _ in range(NUM_RES_BLOCKS):
        w1, b1 = _linear_init(keys[next(ki)], HIDDEN, HIDDEN)
        g1, be1, m1, v1 = _bn_init(keys[next(ki)], HIDDEN)
        w2, b2 = _linear_init(keys[next(ki)], HIDDEN, HIDDEN)
        g2, be2, m2, v2 = _bn_init(keys[next(ki)], HIDDEN)
        w1f, s1 = _fold_linear_bn(w1, b1, g1, be1, m1, v1)
        w2f, s2 = _fold_linear_bn(w2, b2, g2, be2, m2, v2)
        w_rb.append(jnp.stack([w1f, w2f]))        # (2, 512, 512) bf16
        sh_rb.append(jnp.stack([s1, s2]))         # (2, 1, 512)   f32
    p["w_rb"] = jnp.stack(w_rb)                   # (10, 2, 512, 512) bf16
    p["sh_rb"] = jnp.stack(sh_rb)                 # (10, 2, 1, 512)   f32

    # heads
    wp1, bp1 = _linear_init(keys[next(ki)], HIDDEN, HEAD_HIDDEN)
    wp2, bp2 = _linear_init(keys[next(ki)], HEAD_HIDDEN, ACTION_DIM)
    wv1, bv1 = _linear_init(keys[next(ki)], HIDDEN, HEAD_HIDDEN)
    wv2, bv2 = _linear_init(keys[next(ki)], HEAD_HIDDEN, 1)

    # fused first layers: one (512, 256) matmul
    p["wph"] = jnp.concatenate([wp1, wv1], axis=1).astype(jnp.bfloat16)
    p["bph"] = jnp.concatenate([bp1, bv1]).reshape(1, -1)

    # fused second layers: block-diagonal (256, 128) [[wp2, 0], [0, wv2|pad]]
    whd2 = jnp.zeros((2 * HEAD_HIDDEN, OUT_SLAB), jnp.float32)
    whd2 = whd2.at[:HEAD_HIDDEN, :ACTION_DIM].set(wp2)
    whd2 = whd2.at[HEAD_HIDDEN:, ACTION_DIM:ACTION_DIM + 1].set(wv2)
    p["whd2"] = whd2.astype(jnp.bfloat16)
    bhd2 = jnp.zeros((1, OUT_SLAB), jnp.float32)
    bhd2 = bhd2.at[0, :ACTION_DIM].set(bp2)
    bhd2 = bhd2.at[0, ACTION_DIM].set(bv2[0])
    p["bhd2"] = bhd2
    return p


# ------------------------------ pure-JAX reference ----------------------------

def ref_forward(x, p):
    """Mirrors the kernel numerics (bf16 operands, f32 accumulation)."""
    def bdot(a, w):
        return jnp.dot(a.astype(jnp.bfloat16), w,
                       preferred_element_type=jnp.float32)

    h = jnp.maximum(bdot(x, p["w_in"]) + p["sh_in"], 0.0)
    for i in range(NUM_RES_BLOCKS):
        z = jnp.maximum(bdot(h, p["w_rb"][i, 0]) + p["sh_rb"][i, 0], 0.0)
        z = bdot(z, p["w_rb"][i, 1]) + p["sh_rb"][i, 1]
        h = h + z
    hh = jnp.maximum(bdot(h, p["wph"]) + p["bph"], 0.0)
    z = bdot(hh, p["whd2"]) + p["bhd2"]
    policy = jax.nn.softmax(z[:, :ACTION_DIM], axis=1)
    value = jnp.tanh(z[:, ACTION_DIM:ACTION_DIM + 1])
    return policy, value


if __name__ == "__main__":
    B = 16   # small demo batch (multiple of 16 for bf16 sublane packing)
    key = jax.random.PRNGKey(0)
    k_x, _ = jax.random.split(key)
    x = jax.random.normal(k_x, (B, STATE_DIM), jnp.float32)
    params = make_params(seed=0)

    policy, value = jax.jit(hiv_forward)(x, params)
    jax.block_until_ready((policy, value))

    policy_ref, value_ref = ref_forward(x, params)
    assert policy.shape == (B, ACTION_DIM) and value.shape == (B, 1)
    assert jnp.allclose(jnp.sum(policy, axis=1), 1.0, atol=1e-4)
    assert jnp.max(jnp.abs(value)) <= 1.0 + 1e-6
    assert jnp.max(jnp.abs(policy - policy_ref)) < 2e-2
    assert jnp.max(jnp.abs(value - value_ref)) < 2e-2

    print("KERNEL_OK")
</pallas_src>

<mosaic_0001>
module attributes {stable_mosaic.version = 11 : i64} {
  func.func @hiv_kernel(%arg0: i32, %arg1: i32, %arg2: memref<16x384xf32, #tpu.memory_space<vmem>>, %arg3: memref<384x512xbf16, #tpu.memory_space<vmem>>, %arg4: memref<1x512xf32, #tpu.memory_space<vmem>>, %arg5: memref<5x2x512x512xbf16, #tpu.memory_space<vmem>>, %arg6: memref<5x2x1x512xf32, #tpu.memory_space<vmem>>, %arg7: memref<512x256xbf16, #tpu.memory_space<vmem>>, %arg8: memref<1x256xf32, #tpu.memory_space<vmem>>, %arg9: memref<256x128xbf16, #tpu.memory_space<vmem>>, %arg10: memref<1x128xf32, #tpu.memory_space<vmem>>, %arg11: memref<16x128xf32, #tpu.memory_space<vmem>>, %arg12: memref<16x512xf32, #tpu.memory_space<vmem>>) attributes {dimension_semantics = [#tpu.dimension_semantics<parallel>, #tpu.dimension_semantics<arbitrary>], iteration_bounds = array<i64: 1, 2>, scalar_prefetch = 0 : i64, scratch_operands = 1 : i64, tpu.core_type = #tpu.core_type<tc>, window_params = [{transform_indices = @transform_0, window_bounds = array<i64: 16, 384>}, {pipeline_mode = #tpu.pipeline_mode<synchronous>, transform_indices = @transform_1, window_bounds = array<i64: 384, 512>}, {pipeline_mode = #tpu.pipeline_mode<synchronous>, transform_indices = @transform_2, window_bounds = array<i64: 1, 512>}, {transform_indices = @transform_3, window_bounds = array<i64: 5, 2, 512, 512>}, {transform_indices = @transform_4, window_bounds = array<i64: 5, 2, 1, 512>}, {pipeline_mode = #tpu.pipeline_mode<synchronous>, transform_indices = @transform_5, window_bounds = array<i64: 512, 256>}, {pipeline_mode = #tpu.pipeline_mode<synchronous>, transform_indices = @transform_6, window_bounds = array<i64: 1, 256>}, {pipeline_mode = #tpu.pipeline_mode<synchronous>, transform_indices = @transform_7, window_bounds = array<i64: 256, 128>}, {pipeline_mode = #tpu.pipeline_mode<synchronous>, transform_indices = @transform_8, window_bounds = array<i64: 1, 128>}, {transform_indices = @transform_9, window_bounds = array<i64: 16, 128>}]} {
    %c0_i32 = arith.constant 0 : i32
    %0 = arith.cmpi eq, %arg1, %c0_i32 : i32
    %1 = arith.extui %0 : i1 to i32
    %c0_i32_0 = arith.constant 0 : i32
    %2 = arith.cmpi ne, %1, %c0_i32_0 : i32
    scf.if %2 {
      %c0_95 = arith.constant 0 : index
      %c0_96 = arith.constant 0 : index
      %103 = vector.load %arg2[%c0_95, %c0_96] : memref<16x384xf32, #tpu.memory_space<vmem>>, vector<16x384xf32>
      %104 = arith.truncf %103 : vector<16x384xf32> to vector<16x384xbf16>
      %c0_97 = arith.constant 0 : index
      %c0_98 = arith.constant 0 : index
      %105 = vector.load %arg3[%c0_97, %c0_98] : memref<384x512xbf16, #tpu.memory_space<vmem>>, vector<384x512xbf16>
      %cst_99 = arith.constant dense<0.000000e+00> : vector<16x512xf32>
      %106 = tpu.matmul %104, %105, %cst_99 {dimension_numbers = #tpu.dot_dimension_numbers<[1], [0], [0], [1], [0, 0, 1, 1], [], []>} : vector<16x384xbf16>, vector<384x512xbf16>, vector<16x512xf32> -> vector<16x512xf32>
      %c0_100 = arith.constant 0 : index
      %c0_101 = arith.constant 0 : index
      %107 = vector.load %arg4[%c0_100, %c0_101] : memref<1x512xf32, #tpu.memory_space<vmem>>, vector<1x512xf32>
      %108 = vector.broadcast %107 : vector<1x512xf32> to vector<16x512xf32>
      %109 = arith.addf %106, %108 : vector<16x512xf32>
      %cst_102 = arith.constant 0.000000e+00 : f32
      %110 = vector.broadcast %cst_102 : f32 to vector<16x512xf32>
      %111 = arith.maximumf %109, %110 : vector<16x512xf32>
      %c0_103 = arith.constant 0 : index
      %c0_104 = arith.constant 0 : index
      %112 = vector.load %arg12[%c0_103, %c0_104] : memref<16x512xf32, #tpu.memory_space<vmem>>, vector<16x512xf32>
      tpu.vector_store %arg12[%c0_103, %c0_104], %111 {strides = array<i32>} : memref<16x512xf32, #tpu.memory_space<vmem>>, vector<16x512xf32>,
    } else {
    }
    %c0 = arith.constant 0 : index
    %c0_1 = arith.constant 0 : index
    %3 = vector.load %arg12[%c0, %c0_1] : memref<16x512xf32, #tpu.memory_space<vmem>>, vector<16x512xf32>
    %4 = arith.truncf %3 : vector<16x512xf32> to vector<16x512xbf16>
    %c0_2 = arith.constant 0 : index
    %c0_3 = arith.constant 0 : index
    %c0_4 = arith.constant 0 : index
    %c0_5 = arith.constant 0 : index
    %5 = vector.load %arg5[%c0_2, %c0_3, %c0_4, %c0_5] : memref<5x2x512x512xbf16, #tpu.memory_space<vmem>>, vector<1x1x512x512xbf16>
    %6 = vector.shape_cast %5 : vector<1x1x512x512xbf16> to vector<512x512xbf16>
    %cst = arith.constant dense<0.000000e+00> : vector<16x512xf32>
    %7 = tpu.matmul %4, %6, %cst {dimension_numbers = #tpu.dot_dimension_numbers<[1], [0], [0], [1], [0, 0, 1, 1], [], []>} : vector<16x512xbf16>, vector<512x512xbf16>, vector<16x512xf32> -> vector<16x512xf32>
    %c0_6 = arith.constant 0 : index
    %c0_7 = arith.constant 0 : index
    %c0_8 = arith.constant 0 : index
    %c0_9 = arith.constant 0 : index
    %8 = vector.load %arg6[%c0_6, %c0_7, %c0_8, %c0_9] : memref<5x2x1x512xf32, #tpu.memory_space<vmem>>, vector<1x1x1x512xf32>
    %9 = vector.shape_cast %8 : vector<1x1x1x512xf32> to vector<1x512xf32>
    %10 = vector.broadcast %9 : vector<1x512xf32> to vector<16x512xf32>
    %11 = arith.addf %7, %10 : vector<16x512xf32>
    %cst_10 = arith.constant 0.000000e+00 : f32
    %12 = vector.broadcast %cst_10 : f32 to vector<16x512xf32>
    %13 = arith.maximumf %11, %12 : vector<16x512xf32>
    %14 = arith.truncf %13 : vector<16x512xf32> to vector<16x512xbf16>
    %c0_11 = arith.constant 0 : index
    %c1 = arith.constant 1 : index
    %c0_12 = arith.constant 0 : index
    %c0_13 = arith.constant 0 : index
    %15 = vector.load %arg5[%c0_11, %c1, %c0_12, %c0_13] : memref<5x2x512x512xbf16, #tpu.memory_space<vmem>>, vector<1x1x512x512xbf16>
    %16 = vector.shape_cast %15 : vector<1x1x512x512xbf16> to vector<512x512xbf16>
    %cst_14 = arith.constant dense<0.000000e+00> : vector<16x512xf32>
    %17 = tpu.matmul %14, %16, %cst_14 {dimension_numbers = #tpu.dot_dimension_numbers<[1], [0], [0], [1], [0, 0, 1, 1], [], []>} : vector<16x512xbf16>, vector<512x512xbf16>, vector<16x512xf32> -> vector<16x512xf32>
    %c0_15 = arith.constant 0 : index
    %c1_16 = arith.constant 1 : index
    %c0_17 = arith.constant 0 : index
    %c0_18 = arith.constant 0 : index
    %18 = vector.load %arg6[%c0_15, %c1_16, %c0_17, %c0_18] : memref<5x2x1x512xf32, #tpu.memory_space<vmem>>, vector<1x1x1x512xf32>
    %19 = vector.shape_cast %18 : vector<1x1x1x512xf32> to vector<1x512xf32>
    %20 = vector.broadcast %19 : vector<1x512xf32> to vector<16x512xf32>
    %21 = arith.addf %17, %20 : vector<16x512xf32>
    %22 = arith.addf %3, %21 : vector<16x512xf32>
    %23 = arith.truncf %22 : vector<16x512xf32> to vector<16x512xbf16>
    %c1_19 = arith.constant 1 : index
    %c0_20 = arith.constant 0 : index
    %c0_21 = arith.constant 0 : index
    %c0_22 = arith.constant 0 : index
    %24 = vector.load %arg5[%c1_19, %c0_20, %c0_21, %c0_22] : memref<5x2x512x512xbf16, #tpu.memory_space<vmem>>, vector<1x1x512x512xbf16>
    %25 = vector.shape_cast %24 : vector<1x1x512x512xbf16> to vector<512x512xbf16>
    %cst_23 = arith.constant dense<0.000000e+00> : vector<16x512xf32>
    %26 = tpu.matmul %23, %25, %cst_23 {dimension_numbers = #tpu.dot_dimension_numbers<[1], [0], [0], [1], [0, 0, 1, 1], [], []>} : vector<16x512xbf16>, vector<512x512xbf16>, vector<16x512xf32> -> vector<16x512xf32>
    %c1_24 = arith.constant 1 : index
    %c0_25 = arith.constant 0 : index
    %c0_26 = arith.constant 0 : index
    %c0_27 = arith.constant 0 : index
    %27 = vector.load %arg6[%c1_24, %c0_25, %c0_26, %c0_27] : memref<5x2x1x512xf32, #tpu.memory_space<vmem>>, vector<1x1x1x512xf32>
    %28 = vector.shape_cast %27 : vector<1x1x1x512xf32> to vector<1x512xf32>
    %29 = vector.broadcast %28 : vector<1x512xf32> to vector<16x512xf32>
    %30 = arith.addf %26, %29 : vector<16x512xf32>
    %cst_28 = arith.constant 0.000000e+00 : f32
    %31 = vector.broadcast %cst_28 : f32 to vector<16x512xf32>
    %32 = arith.maximumf %30, %31 : vector<16x512xf32>
    %33 = arith.truncf %32 : vector<16x512xf32> to vector<16x512xbf16>
    %c1_29 = arith.constant 1 : index
    %c1_30 = arith.constant 1 : index
    %c0_31 = arith.constant 0 : index
    %c0_32 = arith.constant 0 : index
    %34 = vector.load %arg5[%c1_29, %c1_30, %c0_31, %c0_32] : memref<5x2x512x512xbf16, #tpu.memory_space<vmem>>, vector<1x1x512x512xbf16>
    %35 = vector.shape_cast %34 : vector<1x1x512x512xbf16> to vector<512x512xbf16>
    %cst_33 = arith.constant dense<0.000000e+00> : vector<16x512xf32>
    %36 = tpu.matmul %33, %35, %cst_33 {dimension_numbers = #tpu.dot_dimension_numbers<[1], [0], [0], [1], [0, 0, 1, 1], [], []>} : vector<16x512xbf16>, vector<512x512xbf16>, vector<16x512xf32> -> vector<16x512xf32>
    %c1_34 = arith.constant 1 : index
    %c1_35 = arith.constant 1 : index
    %c0_36 = arith.constant 0 : index
    %c0_37 = arith.constant 0 : index
    %37 = vector.load %arg6[%c1_34, %c1_35, %c0_36, %c0_37] : memref<5x2x1x512xf32, #tpu.memory_space<vmem>>, vector<1x1x1x512xf32>
    %38 = vector.shape_cast %37 : vector<1x1x1x512xf32> to vector<1x512xf32>
    %39 = vector.broadcast %38 : vector<1x512xf32> to vector<16x512xf32>
    %40 = arith.addf %36, %39 : vector<16x512xf32>
    %41 = arith.addf %22, %40 : vector<16x512xf32>
    %42 = arith.truncf %41 : vector<16x512xf32> to vector<16x512xbf16>
    %c2 = arith.constant 2 : index
    %c0_38 = arith.constant 0 : index
    %c0_39 = arith.constant 0 : index
    %c0_40 = arith.constant 0 : index
    %43 = vector.load %arg5[%c2, %c0_38, %c0_39, %c0_40] : memref<5x2x512x512xbf16, #tpu.memory_space<vmem>>, vector<1x1x512x512xbf16>
    %44 = vector.shape_cast %43 : vector<1x1x512x512xbf16> to vector<512x512xbf16>
    %cst_41 = arith.constant dense<0.000000e+00> : vector<16x512xf32>
    %45 = tpu.matmul %42, %44, %cst_41 {dimension_numbers = #tpu.dot_dimension_numbers<[1], [0], [0], [1], [0, 0, 1, 1], [], []>} : vector<16x512xbf16>, vector<512x512xbf16>, vector<16x512xf32> -> vector<16x512xf32>
    %c2_42 = arith.constant 2 : index
    %c0_43 = arith.constant 0 : index
    %c0_44 = arith.constant 0 : index
    %c0_45 = arith.constant 0 : index
    %46 = vector.load %arg6[%c2_42, %c0_43, %c0_44, %c0_45] : memref<5x2x1x512xf32, #tpu.memory_space<vmem>>, vector<1x1x1x512xf32>
    %47 = vector.shape_cast %46 : vector<1x1x1x512xf32> to vector<1x512xf32>
    %48 = vector.broadcast %47 : vector<1x512xf32> to vector<16x512xf32>
    %49 = arith.addf %45, %48 : vector<16x512xf32>
    %cst_46 = arith.constant 0.000000e+00 : f32
    %50 = vector.broadcast %cst_46 : f32 to vector<16x512xf32>
    %51 = arith.maximumf %49, %50 : vector<16x512xf32>
    %52 = arith.truncf %51 : vector<16x512xf32> to vector<16x512xbf16>
    %c2_47 = arith.constant 2 : index
    %c1_48 = arith.constant 1 : index
    %c0_49 = arith.constant 0 : index
    %c0_50 = arith.constant 0 : index
    %53 = vector.load %arg5[%c2_47, %c1_48, %c0_49, %c0_50] : memref<5x2x512x512xbf16, #tpu.memory_space<vmem>>, vector<1x1x512x512xbf16>
    %54 = vector.shape_cast %53 : vector<1x1x512x512xbf16> to vector<512x512xbf16>
    %cst_51 = arith.constant dense<0.000000e+00> : vector<16x512xf32>
    %55 = tpu.matmul %52, %54, %cst_51 {dimension_numbers = #tpu.dot_dimension_numbers<[1], [0], [0], [1], [0, 0, 1, 1], [], []>} : vector<16x512xbf16>, vector<512x512xbf16>, vector<16x512xf32> -> vector<16x512xf32>
    %c2_52 = arith.constant 2 : index
    %c1_53 = arith.constant 1 : index
    %c0_54 = arith.constant 0 : index
    %c0_55 = arith.constant 0 : index
    %56 = vector.load %arg6[%c2_52, %c1_53, %c0_54, %c0_55] : memref<5x2x1x512xf32, #tpu.memory_space<vmem>>, vector<1x1x1x512xf32>
    %57 = vector.shape_cast %56 : vector<1x1x1x512xf32> to vector<1x512xf32>
    %58 = vector.broadcast %57 : vector<1x512xf32> to vector<16x512xf32>
    %59 = arith.addf %55, %58 : vector<16x512xf32>
    %60 = arith.addf %41, %59 : vector<16x512xf32>
    %61 = arith.truncf %60 : vector<16x512xf32> to vector<16x512xbf16>
    %c3 = arith.constant 3 : index
    %c0_56 = arith.constant 0 : index
    %c0_57 = arith.constant 0 : index
    %c0_58 = arith.constant 0 : index
    %62 = vector.load %arg5[%c3, %c0_56, %c0_57, %c0_58] : memref<5x2x512x512xbf16, #tpu.memory_space<vmem>>, vector<1x1x512x512xbf16>
    %63 = vector.shape_cast %62 : vector<1x1x512x512xbf16> to vector<512x512xbf16>
    %cst_59 = arith.constant dense<0.000000e+00> : vector<16x512xf32>
    %64 = tpu.matmul %61, %63, %cst_59 {dimension_numbers = #tpu.dot_dimension_numbers<[1], [0], [0], [1], [0, 0, 1, 1], [], []>} : vector<16x512xbf16>, vector<512x512xbf16>, vector<16x512xf32> -> vector<16x512xf32>
    %c3_60 = arith.constant 3 : index
    %c0_61 = arith.constant 0 : index
    %c0_62 = arith.constant 0 : index
    %c0_63 = arith.constant 0 : index
    %65 = vector.load %arg6[%c3_60, %c0_61, %c0_62, %c0_63] : memref<5x2x1x512xf32, #tpu.memory_space<vmem>>, vector<1x1x1x512xf32>
    %66 = vector.shape_cast %65 : vector<1x1x1x512xf32> to vector<1x512xf32>
    %67 = vector.broadcast %66 : vector<1x512xf32> to vector<16x512xf32>
    %68 = arith.addf %64, %67 : vector<16x512xf32>
    %cst_64 = arith.constant 0.000000e+00 : f32
    %69 = vector.broadcast %cst_64 : f32 to vector<16x512xf32>
    %70 = arith.maximumf %68, %69 : vector<16x512xf32>
    %71 = arith.truncf %70 : vector<16x512xf32> to vector<16x512xbf16>
    %c3_65 = arith.constant 3 : index
    %c1_66 = arith.constant 1 : index
    %c0_67 = arith.constant 0 : index
    %c0_68 = arith.constant 0 : index
    %72 = vector.load %arg5[%c3_65, %c1_66, %c0_67, %c0_68] : memref<5x2x512x512xbf16, #tpu.memory_space<vmem>>, vector<1x1x512x512xbf16>
    %73 = vector.shape_cast %72 : vector<1x1x512x512xbf16> to vector<512x512xbf16>
    %cst_69 = arith.constant dense<0.000000e+00> : vector<16x512xf32>
    %74 = tpu.matmul %71, %73, %cst_69 {dimension_numbers = #tpu.dot_dimension_numbers<[1], [0], [0], [1], [0, 0, 1, 1], [], []>} : vector<16x512xbf16>, vector<512x512xbf16>, vector<16x512xf32> -> vector<16x512xf32>
    %c3_70 = arith.constant 3 : index
    %c1_71 = arith.constant 1 : index
    %c0_72 = arith.constant 0 : index
    %c0_73 = arith.constant 0 : index
    %75 = vector.load %arg6[%c3_70, %c1_71, %c0_72, %c0_73] : memref<5x2x1x512xf32, #tpu.memory_space<vmem>>, vector<1x1x1x512xf32>
    %76 = vector.shape_cast %75 : vector<1x1x1x512xf32> to vector<1x512xf32>
    %77 = vector.broadcast %76 : vector<1x512xf32> to vector<16x512xf32>
    %78 = arith.addf %74, %77 : vector<16x512xf32>
    %79 = arith.addf %60, %78 : vector<16x512xf32>
    %80 = arith.truncf %79 : vector<16x512xf32> to vector<16x512xbf16>
    %c4 = arith.constant 4 : index
    %c0_74 = arith.constant 0 : index
    %c0_75 = arith.constant 0 : index
    %c0_76 = arith.constant 0 : index
    %81 = vector.load %arg5[%c4, %c0_74, %c0_75, %c0_76] : memref<5x2x512x512xbf16, #tpu.memory_space<vmem>>, vector<1x1x512x512xbf16>
    %82 = vector.shape_cast %81 : vector<1x1x512x512xbf16> to vector<512x512xbf16>
    %cst_77 = arith.constant dense<0.000000e+00> : vector<16x512xf32>
    %83 = tpu.matmul %80, %82, %cst_77 {dimension_numbers = #tpu.dot_dimension_numbers<[1], [0], [0], [1], [0, 0, 1, 1], [], []>} : vector<16x512xbf16>, vector<512x512xbf16>, vector<16x512xf32> -> vector<16x512xf32>
    %c4_78 = arith.constant 4 : index
    %c0_79 = arith.constant 0 : index
    %c0_80 = arith.constant 0 : index
    %c0_81 = arith.constant 0 : index
    %84 = vector.load %arg6[%c4_78, %c0_79, %c0_80, %c0_81] : memref<5x2x1x512xf32, #tpu.memory_space<vmem>>, vector<1x1x1x512xf32>
    %85 = vector.shape_cast %84 : vector<1x1x1x512xf32> to vector<1x512xf32>
    %86 = vector.broadcast %85 : vector<1x512xf32> to vector<16x512xf32>
    %87 = arith.addf %83, %86 : vector<16x512xf32>
    %cst_82 = arith.constant 0.000000e+00 : f32
    %88 = vector.broadcast %cst_82 : f32 to vector<16x512xf32>
    %89 = arith.maximumf %87, %88 : vector<16x512xf32>
    %90 = arith.truncf %89 : vector<16x512xf32> to vector<16x512xbf16>
    %c4_83 = arith.constant 4 : index
    %c1_84 = arith.constant 1 : index
    %c0_85 = arith.constant 0 : index
    %c0_86 = arith.constant 0 : index
    %91 = vector.load %arg5[%c4_83, %c1_84, %c0_85, %c0_86] : memref<5x2x512x512xbf16, #tpu.memory_space<vmem>>, vector<1x1x512x512xbf16>
    %92 = vector.shape_cast %91 : vector<1x1x512x512xbf16> to vector<512x512xbf16>
    %cst_87 = arith.constant dense<0.000000e+00> : vector<16x512xf32>
    %93 = tpu.matmul %90, %92, %cst_87 {dimension_numbers = #tpu.dot_dimension_numbers<[1], [0], [0], [1], [0, 0, 1, 1], [], []>} : vector<16x512xbf16>, vector<512x512xbf16>, vector<16x512xf32> -> vector<16x512xf32>
    %c4_88 = arith.constant 4 : index
    %c1_89 = arith.constant 1 : index
    %c0_90 = arith.constant 0 : index
    %c0_91 = arith.constant 0 : index
    %94 = vector.load %arg6[%c4_88, %c1_89, %c0_90, %c0_91] : memref<5x2x1x512xf32, #tpu.memory_space<vmem>>, vector<1x1x1x512xf32>
    %95 = vector.shape_cast %94 : vector<1x1x1x512xf32> to vector<1x512xf32>
    %96 = vector.broadcast %95 : vector<1x512xf32> to vector<16x512xf32>
    %97 = arith.addf %93, %96 : vector<16x512xf32>
    %98 = arith.addf %79, %97 : vector<16x512xf32>
    %c0_92 = arith.constant 0 : index
    %c0_93 = arith.constant 0 : index
    %99 = vector.load %arg12[%c0_92, %c0_93] : memref<16x512xf32, #tpu.memory_space<vmem>>, vector<16x512xf32>
    tpu.vector_store %arg12[%c0_92, %c0_93], %98 {strides = array<i32>} : memref<16x512xf32, #tpu.memory_space<vmem>>, vector<16x512xf32>,
    %c1_i32 = arith.constant 1 : i32
    %100 = arith.cmpi eq, %arg1, %c1_i32 : i32
    %101 = arith.extui %100 : i1 to i32
    %c0_i32_94 = arith.constant 0 : i32
    %102 = arith.cmpi ne, %101, %c0_i32_94 : i32
    scf.if %102 {
      %103 = arith.truncf %98 : vector<16x512xf32> to vector<16x512xbf16>
      %c0_95 = arith.constant 0 : index
      %c0_96 = arith.constant 0 : index
      %104 = vector.load %arg7[%c0_95, %c0_96] : memref<512x256xbf16, #tpu.memory_space<vmem>>, vector<512x256xbf16>
      %cst_97 = arith.constant dense<0.000000e+00> : vector<16x256xf32>
      %105 = tpu.matmul %103, %104, %cst_97 {dimension_numbers = #tpu.dot_dimension_numbers<[1], [0], [0], [1], [0, 0, 1, 1], [], []>} : vector<16x512xbf16>, vector<512x256xbf16>, vector<16x256xf32> -> vector<16x256xf32>
      %c0_98 = arith.constant 0 : index
      %c0_99 = arith.constant 0 : index
      %106 = vector.load %arg8[%c0_98, %c0_99] : memref<1x256xf32, #tpu.memory_space<vmem>>, vector<1x256xf32>
      %107 = vector.broadcast %106 : vector<1x256xf32> to vector<16x256xf32>
      %108 = arith.addf %105, %107 : vector<16x256xf32>
      %cst_100 = arith.constant 0.000000e+00 : f32
      %109 = vector.broadcast %cst_100 : f32 to vector<16x256xf32>
      %110 = arith.maximumf %108, %109 : vector<16x256xf32>
      %111 = arith.truncf %110 : vector<16x256xf32> to vector<16x256xbf16>
      %c0_101 = arith.constant 0 : index
      %c0_102 = arith.constant 0 : index
      %112 = vector.load %arg9[%c0_101, %c0_102] : memref<256x128xbf16, #tpu.memory_space<vmem>>, vector<256x128xbf16>
      %cst_103 = arith.constant dense<0.000000e+00> : vector<16x128xf32>
      %113 = tpu.matmul %111, %112, %cst_103 {dimension_numbers = #tpu.dot_dimension_numbers<[1], [0], [0], [1], [0, 0, 1, 1], [], []>} : vector<16x256xbf16>, vector<256x128xbf16>, vector<16x128xf32> -> vector<16x128xf32>
      %c0_104 = arith.constant 0 : index
      %c0_105 = arith.constant 0 : index
      %114 = vector.load %arg10[%c0_104, %c0_105] : memref<1x128xf32, #tpu.memory_space<vmem>>, vector<1x128xf32>
      %115 = vector.broadcast %114 : vector<1x128xf32> to vector<16x128xf32>
      %116 = arith.addf %113, %115 : vector<16x128xf32>
      %117 = tpu.iota {dimensions = array<i32: 1>} : vector<16x128xi32>
      %c64_i32 = arith.constant 64 : i32
      %118 = vector.broadcast %c64_i32 : i32 to vector<16x128xi32>
      %119 = arith.cmpi slt, %117, %118 : vector<16x128xi32>
      %cst_106 = arith.constant 0xFF800000 : f32
      %120 = vector.broadcast %cst_106 : f32 to vector<16x128xf32>
      %121 = arith.select %119, %116, %120 : vector<16x128xi1>, vector<16x128xf32>
      %cst_107 = arith.constant dense<0xFF800000> : vector<16xf32>
      %122 = vector.multi_reduction <maximumf>, %121, %cst_107 [1] : vector<16x128xf32> to vector<16xf32>
      %123 = vector.shape_cast %122 : vector<16xf32> to vector<16x1xf32>
      %124 = vector.broadcast %123 : vector<16x1xf32> to vector<16x128xf32>
      %125 = arith.subf %121, %124 : vector<16x128xf32>
      %126 = math.exp %125 : vector<16x128xf32>
      %cst_108 = arith.constant dense<0.000000e+00> : vector<16xf32>
      %127 = vector.multi_reduction <add>, %126, %cst_108 [1] : vector<16x128xf32> to vector<16xf32>
      %128 = vector.shape_cast %127 : vector<16xf32> to vector<16x1xf32>
      %129 = vector.broadcast %128 : vector<16x1xf32> to vector<16x128xf32>
      %130 = arith.divf %126, %129 : vector<16x128xf32>
      %131 = math.tanh %116 : vector<16x128xf32>
      %132 = arith.select %119, %130, %131 : vector<16x128xi1>, vector<16x128xf32>
      %c0_109 = arith.constant 0 : index
      %c0_110 = arith.constant 0 : index
      %133 = vector.load %arg11[%c0_109, %c0_110] : memref<16x128xf32, #tpu.memory_space<vmem>>, vector<16x128xf32>
      tpu.vector_store %arg11[%c0_109, %c0_110], %132 {strides = array<i32>} : memref<16x128xf32, #tpu.memory_space<vmem>>, vector<16x128xf32>,
    } else {
    }
    return
  }
  func.func @transform_0(%arg0: i32, %arg1: i32) -> (i32, i32) {
    %c0_i32 = arith.constant 0 : i32
    %c0_i32_0 = arith.constant 0 : i32
    return %arg0, %c0_i32 : i32, i32
  }
  func.func @transform_1(%arg0: i32, %arg1: i32) -> (i32, i32) {
    %c0_i32 = arith.constant 0 : i32
    %c0_i32_0 = arith.constant 0 : i32
    %c0_i32_1 = arith.constant 0 : i32
    return %c0_i32, %c0_i32_0 : i32, i32
  }
  func.func @transform_2(%arg0: i32, %arg1: i32) -> (i32, i32) {
    %c0_i32 = arith.constant 0 : i32
    %c0_i32_0 = arith.constant 0 : i32
    %c0_i32_1 = arith.constant 0 : i32
    return %c0_i32, %c0_i32_0 : i32, i32
  }
  func.func @transform_3(%arg0: i32, %arg1: i32) -> (i32, i32, i32, i32) {
    %c0_i32 = arith.constant 0 : i32
    %c0_i32_0 = arith.constant 0 : i32
    %c0_i32_1 = arith.constant 0 : i32
    %c0_i32_2 = arith.constant 0 : i32
    return %arg1, %c0_i32, %c0_i32_0, %c0_i32_1 : i32, i32, i32, i32
  }
  func.func @transform_4(%arg0: i32, %arg1: i32) -> (i32, i32, i32, i32) {
    %c0_i32 = arith.constant 0 : i32
    %c0_i32_0 = arith.constant 0 : i32
    %c0_i32_1 = arith.constant 0 : i32
    %c0_i32_2 = arith.constant 0 : i32
    return %arg1, %c0_i32, %c0_i32_0, %c0_i32_1 : i32, i32, i32, i32
  }
  func.func @transform_5(%arg0: i32, %arg1: i32) -> (i32, i32) {
    %c0_i32 = arith.constant 0 : i32
    %c0_i32_0 = arith.constant 0 : i32
    %c0_i32_1 = arith.constant 0 : i32
    return %c0_i32, %c0_i32_0 : i32, i32
  }
  func.func @transform_6(%arg0: i32, %arg1: i32) -> (i32, i32) {
    %c0_i32 = arith.constant 0 : i32
    %c0_i32_0 = arith.constant 0 : i32
    %c0_i32_1 = arith.constant 0 : i32
    return %c0_i32, %c0_i32_0 : i32, i32
  }
  func.func @transform_7(%arg0: i32, %arg1: i32) -> (i32, i32) {
    %c0_i32 = arith.constant 0 : i32
    %c0_i32_0 = arith.constant 0 : i32
    %c0_i32_1 = arith.constant 0 : i32
    return %c0_i32, %c0_i32_0 : i32, i32
  }
  func.func @transform_8(%arg0: i32, %arg1: i32) -> (i32, i32) {
    %c0_i32 = arith.constant 0 : i32
    %c0_i32_0 = arith.constant 0 : i32
    %c0_i32_1 = arith.constant 0 : i32
    return %c0_i32, %c0_i32_0 : i32, i32
  }
  func.func @transform_9(%arg0: i32, %arg1: i32) -> (i32, i32) {
    %c0_i32 = arith.constant 0 : i32
    %c0_i32_0 = arith.constant 0 : i32
    return %arg0, %c0_i32 : i32, i32
  }
}

</mosaic_0001>

<bundles_post_ra>
// kernel: hiv_forward.1
= control target key start
LH: loop header
LB: loop body
LE: loop exit
PB: predicated region body
PF: predicated region fallthrough
CT: control target
= control target key end

     0   :  { %s19472_s0 = inlined_call_operand.hbm [shape: f32[16,384], index: 0, kind: input, shape index: {}]   ;;  %s19473_s1 = inlined_call_operand.hbm [shape: bf16[384,512], index: 1, kind: input, shape index: {}]   ;;  %s19474_s2 = inlined_call_operand.hbm [shape: f32[1,512], index: 2, kind: input, shape index: {}]   ;;  %s19475_s3 = inlined_call_operand.hbm [shape: bf16[10,2,512,512], index: 3, kind: input, shape index: {}]   ;;  %s19476_s4 = inlined_call_operand.hbm [shape: f32[10,2,1,512], index: 4, kind: input, shape index: {}]   ;;  %s19477_s5 = inlined_call_operand.hbm [shape: bf16[512,256], index: 5, kind: input, shape index: {}]   ;;  %s19478_s6 = inlined_call_operand.hbm [shape: f32[1,256], index: 6, kind: input, shape index: {}]   ;;  %s19479_s7 = inlined_call_operand.hbm [shape: bf16[256,128], index: 7, kind: input, shape index: {}]   ;;  %s19480_s8 = inlined_call_operand.hbm [shape: f32[1,128], index: 8, kind: input, shape index: {}]   ;;  %s19481_s9 = inlined_call_operand.vmem [shape: f32[16,128], index: 9, kind: output, shape index: {}]  }
   0x1   :  { %19499 = sst [smem:[#allocation25_spill]] %s19473_s1 }
   0x2   :  { %19500 = sst [smem:[#allocation26_spill]] %s19475_s3 }
   0x3   :  { %19501 = sst [smem:[#allocation27_spill]] %s19477_s5 }
   0x4   :  { %19502 = sst [smem:[#allocation28_spill]] %s19479_s7 }
   0x5   :  { %19503 = sst [smem:[#allocation29_spill]] %s19481_s9 }
   0x6   :  { %14 = vsyncpa [#allocation4], 0 }
   0x7   :  { %15 = vsyncpa [#allocation6], 0 }
   0x8   :  { %16 = vsyncpa [#allocation9], 0 }
   0x9   :  { %18 = vsyncpa [#allocation9 + $0x1], 0 }
   0xa   :  { %19 = vsyncpa [#allocation12], 0 }
   0xb   :  { %20 = vsyncpa [#allocation15], 0  ;;  %s17542_s30 = smov 0   ;;  %s17544_s10 = smov 0  }
   0xc   :  { %s17546_s11 = smov 0   ;;  %s17548_s12 = smov 0  }
   0xd   :  { %s17550_s13 = smov 0   ;;  %s17552_s14 = smov 0  }
   0xe LB: > { %19504 = sst [smem:[#allocation22_spill]] %s17464_s12  ;;  %s17474_s15 = smov [#allocation5]   ;;  %s17472_s14 = sphi %s17552_s14, %s26_s14   ;;  %s17468_s13 = sphi %s17550_s13, %s19539_s13   ;;  %s17464_s12 = sphi %s17548_s12, %s19538_s12   ;;  %s17460_s11 = sphi %s17546_s11, %s19537_s11   ;;  %s17456_s10 = sphi %s17544_s10, %s19536_s10   ;;  %s17452_s30 = sphi %s17542_s30, %s19535_s30  }
   0xf   : > { %s302_s16 = sshll.u32 %s17474_s15, 4  ;;  %s19482_s17 = sadd.s32 4294967295, %s17472_s14   ;;  %s17581_s16 = int_to_ptr.vmem [resolvable:$true] %s302_s16 }
  0x10   : > { %p11953_p0 = scmp.ge.s32.totalorder %s17472_s14, 1  ;;  %p17576_p1 = scmp.eq.s32.totalorder %s19482_s17, 0 }
  0x11   : > { %p273_p2 = scmp.lt.s32.totalorder %s17472_s14, 3  ;;  %s17475_s20 = smov [#allocation11]  }
  0x12   : > { %s19505_s18 = scalar_select %p17576_p1, 1, 0 }
  0x13   : > { %p17583_p3 = pnand %p11953_p0, %p273_p2  ;;  %s326_s21 = sshll.u32 %s17475_s20, 4  ;;  %s17595_s21 = int_to_ptr.vmem [resolvable:$true] %s326_s21 }
  0x14   : > { %s17476_s23 = smov [#allocation14]   ;;  %s19509_s1 = sld [smem:[#allocation25_spill]] }
  0x15   : > { %s19506_s19 = scalar_select %p17583_p3, 1, 0 }
  0x16   : > { %p14846_p4 = pneg %p17583_p3  ;;  %s17597_s24 = sshll.u32 %s17476_s23, 4  ;;  %s351_s24 = int_to_ptr.vmem [resolvable:$true] %s17597_s24 }
  0x17   : > { %19507 = sst [smem:[#allocation23_spill]] %s19506_s19 }
  0x18   : > { %p17591_p5 = pnand %p14846_p4, %p17576_p1 }
  0x1a   : > { %s19508_s22 = scalar_select %p17591_p5, 1, 0 }
  0x1b   : > { %s17150_s27 = scalar_lea.hbm %s19509_s1, 12288  ;;  %p17607_p7 = pneg %p17591_p5 }
  0x1c   : > { %p17151_p6 = scmp.ne.s32.totalorder %s19509_s1, %s17150_s27  ;;  %p17157_p10 = scmp.lt.u32.totalorder %s17150_s27, %s19509_s1 }
  0x1e   : > { %p17153_p8 = pnand %p17607_p7, %p17151_p6 }
  0x20   : > { %p17154_p9 = pneg %p17153_p8 }
  0x22   : > { %p17159_p11 = pnand %p17157_p10, %p17154_p9 }
  0x24   : > { %17162 = shalt.err (!%p17159_p11)
}
  0x25   : > { %s17163_s25 = scalar_lea.vmem %s17581_s16, 12288  ;;  %p17171_p2 = scmp.lt.s32.totalorder %s17581_s16, %s17581_s16 }
  0x26   : > { %p17164_p12 = scmp.ne.s32.totalorder %s17581_s16, %s17163_s25  ;;  %p17172_p4 = scmp.lt.s32.totalorder %s17163_s25, %s17163_s25 }
  0x28   : > { %p17166_p13 = pnand %p17164_p12, %p17607_p7  ;;  %p17173_p6 = por %p17172_p4, %p17171_p2 }
  0x2a   : > { %p17167_p0 = pneg %p17166_p13 }
  0x2c   : > { %p17174_p8 = pnand %p17173_p6, %p17167_p0 }
  0x2e   : > { %17177 = shalt.err (!%p17174_p8)
}
  0x2f   : > { %s19485_s26 = smov 256   ;;  %s19491_s27 = smov 16  }
  0x30   : > { %14852 = dma.hbm_to_vmem [thread:$0]  (!%p17591_p5), %s19509_s1, 12288, %s17581_s16, [#allocation6], %s19485_s26, %s19485_s26, %s19491_s27  }
  0x31   : > { %s19511_s5 = sld [smem:[#allocation27_spill]] }
  0x37   : > { %s17178_s25 = scalar_lea.hbm %s19511_s5, 8192 }
  0x38   : > { %p17179_p9 = scmp.ne.s32.totalorder %s19511_s5, %s17178_s25  ;;  %p17185_p12 = scmp.lt.u32.totalorder %s17178_s25, %s19511_s5 }
  0x3a   : > { %p17181_p10 = pnand %p17179_p9, %p17607_p7 }
  0x3c   : > { %p17182_p11 = pneg %p17181_p10 }
  0x3e   : > { %p17187_p13 = pnand %p17185_p12, %p17182_p11 }
  0x40   : > { %17190 = shalt.err (!%p17187_p13)
}
  0x41   : > { %s17191_s16 = scalar_lea.vmem %s17595_s21, 8192  ;;  %p17199_p6 = scmp.lt.s32.totalorder %s17595_s21, %s17595_s21 }
  0x42   : > { %p17192_p0 = scmp.ne.s32.totalorder %s17595_s21, %s17191_s16  ;;  %p17200_p8 = scmp.lt.s32.totalorder %s17191_s16, %s17191_s16 }
  0x44   : > { %p17194_p2 = pnand %p17192_p0, %p17607_p7  ;;  %p17201_p9 = por %p17200_p8, %p17199_p6 }
  0x46   : > { %p17195_p4 = pneg %p17194_p2 }
  0x48   : > { %p17202_p10 = pnand %p17201_p9, %p17195_p4 }
  0x4a   : > { %17205 = shalt.err (!%p17202_p10)
}
  0x4b   : > { %s17479_s9 = smov 128   ;;  %s17480_s12 = smov 8  }
  0x4c   : > { %14858 = dma.hbm_to_vmem [thread:$0]  (!%p17591_p5), %s19511_s5, 8192, %s17595_s21, [#allocation12], %s17479_s9, %s17479_s9, %s17480_s12  }
  0x4d   : > { %s19512_s7 = sld [smem:[#allocation28_spill]] }
  0x53   : > { %s17206_s20 = scalar_lea.hbm %s19512_s7, 2048 }
  0x54   : > { %p17207_p11 = scmp.ne.s32.totalorder %s19512_s7, %s17206_s20  ;;  %p17213_p0 = scmp.lt.u32.totalorder %s17206_s20, %s19512_s7 }
  0x56   : > { %p17209_p12 = pnand %p17207_p11, %p17607_p7 }
  0x58   : > { %p17210_p13 = pneg %p17209_p12 }
  0x5a   : > { %p17215_p2 = pnand %p17213_p0, %p17210_p13 }
  0x5c   : > { %17218 = shalt.err (!%p17215_p2)
}
  0x5d   : > { %s17219_s17 = scalar_lea.vmem %s351_s24, 2048  ;;  %p17227_p9 = scmp.lt.s32.totalorder %s351_s24, %s351_s24 }
  0x5e   : > { %p17220_p4 = scmp.ne.s32.totalorder %s351_s24, %s17219_s17  ;;  %p17228_p10 = scmp.lt.s32.totalorder %s17219_s17, %s17219_s17 }
  0x60   : > { %p17222_p6 = pnand %p17220_p4, %p17607_p7  ;;  %p17229_p3 = por %p17228_p10, %p17227_p9 }
  0x62   : > { %p17223_p8 = pneg %p17222_p6 }
  0x64   : > { %p17230_p1 = pnand %p17229_p3, %p17223_p8 }
  0x66   : > { %17233 = shalt.err (!%p17230_p1)
}
  0x67   : > { %s19489_s21 = smov 64   ;;  %s19490_s26 = smov 4  }
  0x68   : > { %14864 = dma.hbm_to_vmem [thread:$0]  (!%p17591_p5), %s19512_s7, 2048, %s351_s24, [#allocation15], %s19489_s21, %s19489_s21, %s19490_s26  }
  0x69   : > { %s35_s19 = sadd.s32 1, %s17468_s13  ;;  %s113_s28 = sadd.s32 1, %s17460_s11 }
  0x6a   : > { %p36_p1 = scmp.ge.s32.totalorder %s35_s19, 2  ;;  %p120_p3 = scmp.ne.s32.totalorder %s17460_s11, %s17456_s10 }
  0x6b   : > { %p121_p11 = scmp.eq.s32.totalorder %s17472_s14, 0  ;;  %p126_p13 = scmp.ne.s32.totalorder %s17456_s10, %s17452_s30 }
  0x6c   : > { %s19541_s19 = smov (%p36_p1, %s35_s19), 0  ;;  %p14882_p0 = scmp.lt.s32.totalorder %s17472_s14, 2 }
  0x6d   : > { %19513 = sst [smem:[#allocation24_spill]] %s19541_s19  ;;  %p122_p12 = por %p121_p11, %p120_p3 }
  0x6e   : > { %s110_s29 = ssub.s32 %s17468_s13, %s19541_s19  ;;  %p19514_p4 = scmp.ne.s32.totalorder %s19505_s18, 0 }
  0x6f   : > { %p111_p2 = scmp.eq.s32.totalorder %s110_s29, 0  ;;  %s375_s24 = sand.u32 1, %s17472_s14  }
  0x70   : > { %p17690_p6 = por %p19514_p4, %p126_p13  ;;  %s377_s23 = sand.u32 1, %s17460_s11  }
  0x71   : > { %s17697_s25 = scalar_select %p111_p2, %s17460_s11, %s113_s28  }
  0x72   : > { %s19515_s20 = scalar_select %p17690_p6, 1, 0 }
  0x73   : > { %s14810_s16 = smul.u32 10240, %s377_s23  ;;  %p17700_p8 = pnand %p14882_p0, %p122_p12 }
  0x74   : > { %s14602_s17 = smul.u32 163840, %s17468_s13  ;;  %s19517_s3 = sld [smem:[#allocation26_spill]] }
  0x75   : > { %s19516_s9 = scalar_select %p17700_p8, 1, 0 }
  0x76   : > { %s17704_s30 = smul.u32 40, %s377_s23  ;;  %s379_s28 = scalar_lea.vmem [#allocation8], %s14810_s16 }
  0x77   : > { %s387_s26 = sshll.u32 %s379_s28, 4  ;;  %s17713_s27 = scalar_lea.sflag [#allocation9], %s375_s24  ;;  %s17711_s26 = int_to_ptr.vmem [resolvable:$true] %s387_s26 }
  0x78   : > { %p19495_p10 = pneg %p17700_p8 }
  0x7a   : > { %s17709_s21 = scalar_lea.hbm %s19517_s3, %s14602_s17  ;;  %s17239_s12 = scalar_lea.hbm %s19517_s3, 327680 }
  0x7b   : > { %s17234_s1 = scalar_lea.hbm %s17709_s21, 163840  ;;  %p17240_p11 = scmp.lt.u32.totalorder %s17709_s21, %s19517_s3 }
  0x7c   : > { %p17235_p9 = scmp.ne.s32.totalorder %s17709_s21, %s17234_s1  ;;  %p17241_p12 = scmp.lt.u32.totalorder %s17239_s12, %s17234_s1 }
  0x7d   : > { %p17243_p0 = scmp.lt.u32.totalorder %s17234_s1, %s17709_s21 }
  0x7e   : > { %p17237_p1 = pnand %p19495_p10, %p17235_p9  ;;  %p17242_p13 = por %p17241_p12, %p17240_p11 }
  0x80   : > { %p17238_p3 = pneg %p17237_p1  ;;  %p17244_p2 = por %p17243_p0, %p17242_p13 }
  0x82   : > { %p17245_p4 = pnand %p17244_p2, %p17238_p3 }
  0x84   : > { %17248 = shalt.err (!%p17245_p4)
}
  0x85   : > { %s17249_s24 = scalar_lea.vmem %s17711_s26, 163840  ;;  %s17483_s16 = smov [#allocation8]  }
  0x86   : > { %p17250_p9 = scmp.ne.s32.totalorder %s17711_s26, %s17249_s24  ;;  %s17254_s28 = sshll.u32 %s17483_s16, 4  ;;  %s17255_s28 = int_to_ptr.vmem [resolvable:$false] %s17254_s28 }
  0x87   : > { %s17256_s5 = scalar_lea.vmem %s17255_s28, 327680  ;;  %p17257_p5 = scmp.lt.s32.totalorder %s17711_s26, %s17255_s28 }
  0x88   : > { %p17252_p1 = pnand %p17250_p9, %p19495_p10  ;;  %p17258_p11 = scmp.lt.s32.totalorder %s17256_s5, %s17249_s24 }
  0x8a   : > { %p17253_p6 = pneg %p17252_p1  ;;  %p17259_p12 = por %p17258_p11, %p17257_p5 }
  0x8c   : > { %p17260_p13 = pnand %p17259_p12, %p17253_p6 }
  0x8e   : > { %17263 = shalt.err (!%p17260_p13)
}
  0x8f   : > { %s19518_s1 = smov 16   ;;  %s19519_s23 = smov 256  }
  0x90   : > { %14871 = dma.hbm_to_vmem [thread:$0]  (!%p17700_p8), %s17709_s21, 163840, %s17711_s26, %s17713_s27, %s19519_s23, %s19519_s23, %s19518_s1  }
  0x91   : > { %s17484_s17 = smov [#allocation3]   ;;  %s17264_s24 = scalar_lea.hbm %s19472_s0, 768 }
  0x92   : > { %s289_s12 = sshll.u32 %s17484_s17, 4  ;;  %p17265_p5 = scmp.ne.s32.totalorder %s19472_s0, %s17264_s24  ;;  %s290_s12 = int_to_ptr.vmem [resolvable:$true] %s289_s12 }
  0x93   : > { %p17271_p0 = scmp.lt.u32.totalorder %s17264_s24, %s19472_s0 }
  0x94   : > { %p17267_p6 = pnand %p17265_p5, %p17607_p7 }
  0x96   : > { %p17268_p3 = pneg %p17267_p6 }
  0x98   : > { %p17273_p2 = pnand %p17271_p0, %p17268_p3 }
  0x9a   : > { %17276 = shalt.err (!%p17273_p2)
}
  0x9b   : > { %s17277_s21 = scalar_lea.vmem %s290_s12, 768  ;;  %p17285_p11 = scmp.lt.s32.totalorder %s290_s12, %s290_s12 }
  0x9c   : > { %p17278_p4 = scmp.ne.s32.totalorder %s290_s12, %s17277_s21  ;;  %p17286_p12 = scmp.lt.s32.totalorder %s17277_s21, %s17277_s21 }
  0x9e   : > { %p17280_p9 = pnand %p17278_p4, %p17607_p7  ;;  %p17287_p13 = por %p17286_p12, %p17285_p11 }
  0xa0   : > { %p17281_p1 = pneg %p17280_p9 }
  0xa2   : > { %p17288_p10 = pnand %p17287_p13, %p17281_p1 }
  0xa4   : > { %17291 = shalt.err (!%p17288_p10)
}
  0xa5   : > { %s17485_s26 = smov 384   ;;  %s17486_s1 = smov 24  }
  0xa6   : > { %p19520_p5 = scmp.ne.s32.totalorder %s19508_s22, 0  ;;  %s17487_s23 = smov [#allocation7]  }
  0xa7   : > { %s316_s17 = sshll.u32 %s17487_s23, 4  ;;  %s17488_s29 = smov [#allocation13]   ;;  %s317_s17 = int_to_ptr.vmem [resolvable:$true] %s316_s17 }
  0xa8   : > { %14849 = dma.hbm_to_vmem [thread:$0]  (!%p19520_p5), %s19472_s0, 768, %s290_s12, [#allocation4], %s17485_s26, %s17485_s26, %s17486_s1  }
  0xa9   : > { %s340_s16 = sshll.u32 %s17488_s29, 4  ;;  %s17292_s5 = scalar_lea.hbm %s19474_s2, 64  ;;  %s17762_s16 = int_to_ptr.vmem [resolvable:$true] %s340_s16 }
  0xaa   : > { %p17293_p10 = scmp.ne.s32.totalorder %s19474_s2, %s17292_s5  ;;  %p17299_p0 = scmp.lt.u32.totalorder %s17292_s5, %s19474_s2 }
  0xac   : > { %p17295_p6 = pnand %p17293_p10, %p17607_p7 }
  0xae   : > { %p17296_p3 = pneg %p17295_p6 }
  0xb0   : > { %p17301_p2 = pnand %p17299_p0, %p17296_p3 }
  0xb2   : > { %17304 = shalt.err (!%p17301_p2)
}
  0xb3   : > { %s17305_s26 = scalar_lea.vmem %s317_s17, 64  ;;  %p17313_p11 = scmp.lt.s32.totalorder %s317_s17, %s317_s17 }
  0xb4   : > { %p17306_p4 = scmp.ne.s32.totalorder %s317_s17, %s17305_s26  ;;  %p17314_p12 = scmp.lt.s32.totalorder %s17305_s26, %s17305_s26 }
  0xb6   : > { %p17308_p9 = pnand %p17306_p4, %p17607_p7  ;;  %p17315_p13 = por %p17314_p12, %p17313_p11 }
  0xb8   : > { %p17309_p1 = pneg %p17308_p9 }
  0xba   : > { %p17316_p8 = pnand %p17315_p13, %p17309_p1 }
  0xbc   : > { %17319 = shalt.err (!%p17316_p8)
}
  0xbd   : > { %14855 = dma.hbm_to_vmem [thread:$0]  (!%p19520_p5), %s19474_s2, 64, %s317_s17, [#allocation6]  }
  0xbe   : > { %s17320_s29 = scalar_lea.hbm %s19478_s6, 32 }
  0xbf   : > { %p17321_p10 = scmp.ne.s32.totalorder %s19478_s6, %s17320_s29  ;;  %p17327_p8 = scmp.lt.u32.totalorder %s17320_s29, %s19478_s6 }
  0xc1   : > { %p17323_p6 = pnand %p17321_p10, %p17607_p7 }
  0xc3   : > { %p17324_p3 = pneg %p17323_p6 }
  0xc5   : > { %p17329_p0 = pnand %p17327_p8, %p17324_p3 }
  0xc7   : > { %17332 = shalt.err (!%p17329_p0)
}
  0xc8   : > { %s17333_s17 = scalar_lea.vmem %s17762_s16, 32  ;;  %p17341_p1 = scmp.lt.s32.totalorder %s17762_s16, %s17762_s16 }
  0xc9   : > { %p17334_p2 = scmp.ne.s32.totalorder %s17762_s16, %s17333_s17  ;;  %p17342_p11 = scmp.lt.s32.totalorder %s17333_s17, %s17333_s17 }
  0xcb   : > { %p17336_p4 = pnand %p17334_p2, %p17607_p7  ;;  %p17343_p12 = por %p17342_p11, %p17341_p1 }
  0xcd   : > { %p17337_p9 = pneg %p17336_p4 }
  0xcf   : > { %p17344_p13 = pnand %p17343_p12, %p17337_p9 }
  0xd1   : > { %17347 = shalt.err (!%p17344_p13)
}
  0xd2   : > { %14861 = dma.hbm_to_vmem [thread:$0]  (!%p19520_p5), %s19478_s6, 32, %s17762_s16, [#allocation12]  }
  0xd3   : > { %s14603_s26 = smul.u32 640, %s17468_s13  ;;  %s17489_s19 = smov [#allocation16]  }
  0xd4   : > { %s364_s1 = sshll.u32 %s17489_s19, 4  ;;  %s401_s7 = scalar_lea.vmem [#allocation10], %s17704_s30  ;;  %s365_s1 = int_to_ptr.vmem [resolvable:$true] %s364_s1 }
  0xd5   : > { %s409_s23 = sshll.u32 %s401_s7, 4  ;;  %s17810_s28 = scalar_lea.hbm %s19476_s4, %s14603_s26  ;;  %s17830_s23 = int_to_ptr.vmem [resolvable:$true] %s409_s23 }
  0xd6   : > { %s17348_s17 = scalar_lea.hbm %s19480_s8, 16 }
  0xd7   : > { %p17349_p10 = scmp.ne.s32.totalorder %s19480_s8, %s17348_s17  ;;  %p17355_p8 = scmp.lt.u32.totalorder %s17348_s17, %s19480_s8 }
  0xd9   : > { %p17351_p6 = pnand %p17349_p10, %p17607_p7 }
  0xdb   : > { %p17352_p3 = pneg %p17351_p6 }
  0xdd   : > { %p17357_p0 = pnand %p17355_p8, %p17352_p3 }
  0xdf   : > { %17360 = shalt.err (!%p17357_p0)
}
  0xe0   : > { %s17361_s19 = scalar_lea.vmem %s365_s1, 16  ;;  %s17368_s26 = scalar_lea.vmem %s365_s1, 32 }
  0xe1   : > { %p17362_p2 = scmp.ne.s32.totalorder %s365_s1, %s17361_s19  ;;  %p17369_p1 = scmp.lt.s32.totalorder %s365_s1, %s365_s1 }
  0xe2   : > { %p17370_p11 = scmp.lt.s32.totalorder %s17368_s26, %s17361_s19 }
  0xe3   : > { %p17364_p4 = pnand %p17362_p2, %p17607_p7 }
  0xe4   : > { %p17371_p12 = por %p17370_p11, %p17369_p1 }
  0xe5   : > { %p17365_p9 = pneg %p17364_p4 }
  0xe7   : > { %p17372_p13 = pnand %p17371_p12, %p17365_p9 }
  0xe9   : > { %17375 = shalt.err (!%p17372_p13)
}
  0xea   : > { %14867 = dma.hbm_to_vmem [thread:$0]  (!%p19520_p5), %s19480_s8, 16, %s365_s1, [#allocation15]  }
  0xeb   : > { %s17376_s15 = scalar_lea.hbm %s17810_s28, 640  ;;  %p19521_p10 = scmp.ne.s32.totalorder %s19516_s9, 0 }
  0xec   : > { %p17377_p7 = scmp.ne.s32.totalorder %s17810_s28, %s17376_s15  ;;  %s17381_s22 = scalar_lea.hbm %s19476_s4, 1280 }
  0xed   : > { %p19522_p6 = pneg %p19521_p10  ;;  %p17382_p0 = scmp.lt.u32.totalorder %s17810_s28, %s19476_s4 }
  0xee   : > { %p17383_p2 = scmp.lt.u32.totalorder %s17381_s22, %s17376_s15  ;;  %p17385_p9 = scmp.lt.u32.totalorder %s17376_s15, %s17810_s28 }
  0xef   : > { %p17379_p3 = pnand %p17377_p7, %p19522_p6 }
  0xf0   : > { %p17384_p4 = por %p17383_p2, %p17382_p0 }
  0xf1   : > { %p17380_p8 = pneg %p17379_p3 }
  0xf2   : > { %p17386_p5 = por %p17385_p9, %p17384_p4 }
  0xf4   : > { %p17387_p1 = pnand %p17386_p5, %p17380_p8 }
  0xf6   : > { %17390 = shalt.err (!%p17387_p1)
}
  0xf7   : > { %s17391_s1 = scalar_lea.vmem %s17830_s23, 640  ;;  %p19523_p12 = pmov %p19522_p6 }
  0xf8   : > { %p17392_p11 = scmp.ne.s32.totalorder %s17830_s23, %s17391_s1  ;;  %s17490_s3 = smov [#allocation10]  }
  0xf9   : > { %s17396_s12 = sshll.u32 %s17490_s3, 4  ;;  %s17397_s12 = int_to_ptr.vmem [resolvable:$false] %s17396_s12 }
  0xfa   : > { %p17394_p13 = pnand %p17392_p11, %p19523_p12  ;;  %s17398_s16 = scalar_lea.vmem %s17397_s12, 1280 }
  0xfb   : > { %p17399_p6 = scmp.lt.s32.totalorder %s17830_s23, %s17397_s12  ;;  %p17400_p3 = scmp.lt.s32.totalorder %s17398_s16, %s17391_s1 }
  0xfc   : > { %p17395_p7 = pneg %p17394_p13 }
  0xfd   : > { %p17401_p0 = por %p17400_p3, %p17399_p6 }
  0xff   : > { %p17402_p2 = pnand %p17401_p0, %p17395_p7 }
 0x101   : > { %17405 = shalt.err (!%p17402_p2)
}
 0x102   : > { %s19524_s30 = smov 4   ;;  %s19525_s19 = smov 64  }
 0x103   : > { %14874 = dma.hbm_to_vmem [thread:$0]  (!%p19521_p10), %s17810_s28, 640, %s17830_s23, %s17713_s27, %s19525_s19, %s19525_s19, %s19524_s30  }
 0x104   : > { %s19526_s26 = sld [smem:[#allocation23_spill]] }
 0x10a   : > { %p19527_p8 = scmp.ne.s32.totalorder %s19526_s26, 0 }
 0x10b   : > { %p19528_p4 = scmp.ne.s32.totalorder (!%p19527_p8), %s19505_s18, 0 }
 0x10c   : > { %421 = sbr.rel (%p19527_p8) target bundleno = 4357 (0x1105), region = 56 }
 0x113   : > { %17431 = dma.done.wait (%p19528_p4), [#allocation4], 768  }
 0x114   : > { %17433 = vsyncadd (%p19528_p4), [#allocation4], 4294966528 }
 0x115   : > { %17435 = dma.done.wait (%p19528_p4), [#allocation6], 12352  }
 0x116   : > { %17437 = vsyncadd (%p19528_p4), [#allocation6], 4294954944  ;;  %s19529_s9 = sadd.s32 4294967295, %s17472_s14   ;;  %s437_s23 = sand.u32 1, %s17456_s10  }
 0x117   : > { %s435_s27 = sand.u32 1, %s19529_s9   ;;  %s14812_s28 = smul.u32 10240, %s437_s23 }
 0x118   : > { %s436_s7 = scalar_lea.sflag [#allocation9], %s435_s27  ;;  %p19530_p10 = scmp.ne.s32.totalorder %s19515_s20, 0 }
 0x119   : > { %s17872_s29 = scalar_lea.vmem [#allocation8], %s14812_s28 }
 0x11a   : > { %17439 = dma.done.wait (%p19530_p10), %s436_s7, 164480  }
 0x11b   : > { %17441 = vsyncadd (%p19530_p10), %s436_s7, 4294802816  ;;  %s14813_s15 = smul.u32 40, %s437_s23 }
 0x11d   : > { %s17878_s24 = scalar_lea.vmem [#allocation10], %s14813_s15 }
 0x11e   : > { %17443 = dma.done.wait (%p19528_p4), [#allocation12], 8224  }
 0x11f   : > { %17445 = vsyncadd (%p19528_p4), [#allocation12], 4294959072 }
 0x120   : > { %17447 = dma.done.wait (%p19528_p4), [#allocation15], 2064  }
 0x121   : > { %17449 = vsyncadd (%p19528_p4), [#allocation15], 4294965232  ;;  %s19531_s5 = sld [smem:[#allocation22_spill]] }
 0x127   : > { %p11974_p9 = scmp.ne.s32.totalorder %s19531_s5, 0 }
 0x128   : > { %v14954_v0 = vld [vmem:[#allocation5 + $0x4] ss:$16 sps:$4 sm:$0xff] (!%p11974_p9)   ;;  %v14956_v1 = vld [vmem:[#allocation5 + $0xc] ss:$16 sps:$4 sm:$0xff] (!%p11974_p9)   ;;  %v14958_v2 = vld [vmem:[#allocation5] ss:$16 sps:$4 sm:$0xff] (!%p11974_p9)  }
 0x129   : > { %517 = sbr.rel (%p11974_p9) target bundleno = 613 (0x265), region = 96  ;;  %1125 = vmatprep.subr.bf16.mxu0 (!%p11974_p9), %v14954_v0  ;;  %v14959_v3 = vld [vmem:[#allocation5 + $0x8] ss:$16 sps:$4 sm:$0xff] (!%p11974_p9)   ;;  %1211 = vmatprep.subr.bf16.mxu1 (!%p11974_p9), %v14956_v1  ;;  %v14960_v4 = vld [vmem:[#allocation5 + $0x24] ss:$16 sps:$4 sm:$0xff] (!%p11974_p9)  }
 0x12a   : > { %1126 = vmatpush1.bf16.msra.mxu0 (!%p11974_p9), %v14958_v2  ;;  %1212 = vmatpush1.bf16.msra.mxu1 (!%p11974_p9), %v14959_v3  ;;  %v14962_v5 = vld [vmem:[#allocation5 + $0x2c] ss:$16 sps:$4 sm:$0xff] (!%p11974_p9)   ;;  %v14964_v6 = vld [vmem:[#allocation5 + $0x20] ss:$16 sps:$4 sm:$0xff] (!%p11974_p9)   ;;  %v14965_v7 = vld [vmem:[#allocation5 + $0x28] ss:$16 sps:$4 sm:$0xff] (!%p11974_p9)  }
 0x12b   : > { %1127 = vmatprep.subr.bf16.mxu0 (!%p11974_p9), %v14960_v4  ;;  %1213 = vmatprep.subr.bf16.mxu1 (!%p11974_p9), %v14962_v5  ;;  %v14966_v8 = vld [vmem:[#allocation5 + $0x44] ss:$16 sps:$4 sm:$0xff] (!%p11974_p9)   ;;  %v14968_v9 = vld [vmem:[#allocation5 + $0x4c] ss:$16 sps:$4 sm:$0xff] (!%p11974_p9)   ;;  %v14970_v10 = vld [vmem:[#allocation5 + $0x40] ss:$16 sps:$4 sm:$0xff] (!%p11974_p9)  }
 0x12c   : > { %v14971_v11 = vld [vmem:[#allocation5 + $0x48] ss:$16 sps:$4 sm:$0xff] (!%p11974_p9)   ;;  %v14972_v12 = vld [vmem:[#allocation5 + $0x64] ss:$16 sps:$4 sm:$0xff] (!%p11974_p9)   ;;  %v14974_v13 = vld [vmem:[#allocation5 + $0x6c] ss:$16 sps:$4 sm:$0xff] (!%p11974_p9)  }
 0x12d   : > { %v14976_v14 = vld [vmem:[#allocation5 + $0x60] ss:$16 sps:$4 sm:$0xff] (!%p11974_p9)   ;;  %v14977_v15 = vld [vmem:[#allocation5 + $0x68] ss:$16 sps:$4 sm:$0xff] (!%p11974_p9)   ;;  %v14978_v16 = vld [vmem:[#allocation5 + $0x84] ss:$16 sps:$4 sm:$0xff] (!%p11974_p9)  }
 0x12e   : > { %1128 = vmatpush1.bf16.msra.mxu0 (!%p11974_p9), %v14964_v6  ;;  %1214 = vmatpush1.bf16.msra.mxu1 (!%p11974_p9), %v14965_v7  ;;  %v14980_v17 = vld [vmem:[#allocation5 + $0x8c] ss:$16 sps:$4 sm:$0xff] (!%p11974_p9)   ;;  %v14982_v18 = vld [vmem:[#allocation5 + $0x80] ss:$16 sps:$4 sm:$0xff] (!%p11974_p9)   ;;  %v14983_v19 = vld [vmem:[#allocation5 + $0x88] ss:$16 sps:$4 sm:$0xff] (!%p11974_p9)  }
 0x12f   : > { %1129 = vmatprep.subr.bf16.mxu0 (!%p11974_p9), %v14966_v8  ;;  %1215 = vmatprep.subr.bf16.mxu1 (!%p11974_p9), %v14968_v9  ;;  %v14984_v20 = vld [vmem:[#allocation5 + $0xa4] ss:$16 sps:$4 sm:$0xff] (!%p11974_p9)   ;;  %v14986_v21 = vld [vmem:[#allocation5 + $0xac] ss:$16 sps:$4 sm:$0xff] (!%p11974_p9)   ;;  %v14988_v22 = vld [vmem:[#allocation5 + $0xa0] ss:$16 sps:$4 sm:$0xff] (!%p11974_p9)  }
 0x130   : > { %v14989_v23 = vld [vmem:[#allocation5 + $0xa8] ss:$16 sps:$4 sm:$0xff]   ;;  %v14990_v24 = vld [vmem:[#allocation5 + $0xc4] ss:$16 sps:$4 sm:$0xff]   ;;  %v14992_v25 = vld [vmem:[#allocation5 + $0xcc] ss:$16 sps:$4 sm:$0xff]  }
 0x131   : > { %v14994_v26 = vld [vmem:[#allocation5 + $0xc0] ss:$16 sps:$4 sm:$0xff]   ;;  %v14995_v27 = vld [vmem:[#allocation5 + $0xc8] ss:$16 sps:$4 sm:$0xff]   ;;  %v14996_v28 = vld [vmem:[#allocation5 + $0xe4] ss:$16 sps:$4 sm:$0xff]  }
 0x132   : > { %1130 = vmatpush1.bf16.msra.mxu0 %v14970_v10  ;;  %1216 = vmatpush1.bf16.msra.mxu1 %v14971_v11  ;;  %v14998_v29 = vld [vmem:[#allocation5 + $0xec] ss:$16 sps:$4 sm:$0xff]   ;;  %v15000_v30 = vld [vmem:[#allocation5 + $0xe0] ss:$16 sps:$4 sm:$0xff]   ;;  %v15001_v31 = vld [vmem:[#allocation5 + $0xe8] ss:$16 sps:$4 sm:$0xff]  }
 0x133   : > { %1131 = vmatprep.subr.bf16.mxu0 %v14972_v12  ;;  %1217 = vmatprep.subr.bf16.mxu1 %v14974_v13  ;;  %v15002_v32 = vld [vmem:[#allocation5 + $0x104] ss:$16 sps:$4 sm:$0xff]   ;;  %v15004_v33 = vld [vmem:[#allocation5 + $0x10c] ss:$16 sps:$4 sm:$0xff]   ;;  %v15006_v34 = vld [vmem:[#allocation5 + $0x100] ss:$16 sps:$4 sm:$0xff]  }
 0x134   : > { %v15007_v35 = vld [vmem:[#allocation5 + $0x108] ss:$16 sps:$4 sm:$0xff]   ;;  %v15008_v36 = vld [vmem:[#allocation5 + $0x124] ss:$16 sps:$4 sm:$0xff]   ;;  %v15010_v37 = vld [vmem:[#allocation5 + $0x12c] ss:$16 sps:$4 sm:$0xff]  }
 0x135   : > { %v15012_v38 = vld [vmem:[#allocation5 + $0x120] ss:$16 sps:$4 sm:$0xff]   ;;  %v15013_v39 = vld [vmem:[#allocation5 + $0x128] ss:$16 sps:$4 sm:$0xff]   ;;  %v15014_v40 = vld [vmem:[#allocation5 + $0x144] ss:$16 sps:$4 sm:$0xff]  }
 0x136   : > { %1132 = vmatpush1.bf16.msra.mxu0 %v14976_v14  ;;  %1218 = vmatpush1.bf16.msra.mxu1 %v14977_v15  ;;  %v15016_v41 = vld [vmem:[#allocation5 + $0x14c] ss:$16 sps:$4 sm:$0xff]   ;;  %v15018_v42 = vld [vmem:[#allocation5 + $0x140] ss:$16 sps:$4 sm:$0xff]   ;;  %v15019_v43 = vld [vmem:[#allocation5 + $0x148] ss:$16 sps:$4 sm:$0xff]  }
 0x137   : > { %1133 = vmatprep.subr.bf16.mxu0 %v14978_v16  ;;  %1219 = vmatprep.subr.bf16.mxu1 %v14980_v17  ;;  %v15020_v44 = vld [vmem:[#allocation5 + $0x164] ss:$16 sps:$4 sm:$0xff]   ;;  %v15022_v45 = vld [vmem:[#allocation5 + $0x16c] ss:$16 sps:$4 sm:$0xff]   ;;  %v15024_v48 = vld [vmem:[#allocation5 + $0x160] ss:$16 sps:$4 sm:$0xff]  }
 0x138   : > { %v519_v46 = vld [vmem:[#allocation3 + $0x8] sm:$0xff]  ;;  %v522_v47 = vld [vmem:[#allocation3 + $0x20] sm:$0xff]  ;;  %v521_v5 = vld [vmem:[#allocation3 + $0x18] sm:$0xff]  ;;  %v17491_v16 = vmov 0  }
 0x139   : > { %v15025_v49 = vld [vmem:[#allocation5 + $0x168] ss:$16 sps:$4 sm:$0xff]   ;;  %v525_v50 = vpack.c.bf16 %v522_v47, %v519_v46  ;;  %v15026_v51 = vld [vmem:[#allocation5 + $0x184] ss:$16 sps:$4 sm:$0xff]   ;;  %v15028_v52 = vld [vmem:[#allocation5 + $0x18c] ss:$16 sps:$4 sm:$0xff]  }
 0x13a   : > { %1134 = vmatpush1.bf16.msra.mxu0 %v14982_v18  ;;  %1220 = vmatpush1.bf16.msra.mxu1 %v14983_v19  ;;  %v15030_v53 = vld [vmem:[#allocation5 + $0x180] ss:$16 sps:$4 sm:$0xff]   ;;  %v15031_v54 = vld [vmem:[#allocation5 + $0x188] ss:$16 sps:$4 sm:$0xff]   ;;  %v15032_v55 = vld [vmem:[#allocation5 + $0x1a4] ss:$16 sps:$4 sm:$0xff]  }
 0x13b   : > { %1135 = vmatprep.subr.bf16.mxu0 %v14984_v20  ;;  %1221 = vmatprep.subr.bf16.mxu1 %v14986_v21  ;;  %v15034_v56 = vld [vmem:[#allocation5 + $0x1ac] ss:$16 sps:$4 sm:$0xff]   ;;  %v15036_v57 = vld [vmem:[#allocation5 + $0x1a0] ss:$16 sps:$4 sm:$0xff]   ;;  %v15037_v58 = vld [vmem:[#allocation5 + $0x1a8] ss:$16 sps:$4 sm:$0xff]  }
 0x13c   : > { %1157 = vmatprep.mubr.bf16.mxu0 %v525_v50  ;;  %1243 = vmatprep.mubr.bf16.mxu1 %v525_v50  ;;  %v15038_v59 = vld [vmem:[#allocation5 + $0x1c4] ss:$16 sps:$4 sm:$0xff]   ;;  %v15040_v60 = vld [vmem:[#allocation5 + $0x1cc] ss:$16 sps:$4 sm:$0xff]   ;;  %v15042_v61 = vld [vmem:[#allocation5 + $0x1c0] ss:$16 sps:$4 sm:$0xff]  }
 0x13d   : > { %v15043_v62 = vld [vmem:[#allocation5 + $0x1c8] ss:$16 sps:$4 sm:$0xff]   ;;  %v15044_v63 = vld [vmem:[#allocation5 + $0x1e4] ss:$16 sps:$4 sm:$0xff]   ;;  %v15046_v0 = vld [vmem:[#allocation5 + $0x1ec] ss:$16 sps:$4 sm:$0xff]  }
 0x13e   : > { %1136 = vmatpush1.bf16.msra.mxu0 %v14988_v22  ;;  %1222 = vmatpush1.bf16.msra.mxu1 %v14989_v23  ;;  %v15048_v1 = vld [vmem:[#allocation5 + $0x1e0] ss:$16 sps:$4 sm:$0xff]   ;;  %v15049_v2 = vld [vmem:[#allocation5 + $0x1e8] ss:$16 sps:$4 sm:$0xff]   ;;  %v15052_v3 = vld [vmem:[#allocation5 + $0x204] ss:$16 sps:$4 sm:$0xff]  }
 0x13f   : > { %1137 = vmatprep.subr.bf16.mxu0 %v14990_v24  ;;  %1223 = vmatprep.subr.bf16.mxu1 %v14992_v25  ;;  %v518_v4 = vld [vmem:[#allocation3] sm:$0xff]  ;;  %v15055_v6 = vld [vmem:[#allocation5 + $0x20c] ss:$16 sps:$4 sm:$0xff]   ;;  %v15053_v9 = vld [vmem:[#allocation5 + $0x208] ss:$16 sps:$4 sm:$0xff]  }
 0x140   : > { %v15050_v7 = vld [vmem:[#allocation5 + $0x200] ss:$16 sps:$4 sm:$0xff]   ;;  %v524_v8 = vpack.c.bf16 %v521_v5, %v518_v4  ;;  %v15058_v10 = vld [vmem:[#allocation5 + $0x224] ss:$16 sps:$4 sm:$0xff]   ;;  %v15061_v11 = vld [vmem:[#allocation5 + $0x22c] ss:$16 sps:$4 sm:$0xff]  }
 0x141   : > { %v15056_v12 = vld [vmem:[#allocation5 + $0x220] ss:$16 sps:$4 sm:$0xff]   ;;  %v15059_v13 = vld [vmem:[#allocation5 + $0x228] ss:$16 sps:$4 sm:$0xff]   ;;  %v15064_v14 = vld [vmem:[#allocation5 + $0x244] ss:$16 sps:$4 sm:$0xff]  }
 0x142   : > { %1138 = vmatpush1.bf16.msra.mxu0 %v14994_v26  ;;  %1224 = vmatpush1.bf16.msra.mxu1 %v14995_v27  ;;  %v15067_v15 = vld [vmem:[#allocation5 + $0x24c] ss:$16 sps:$4 sm:$0xff]   ;;  %v15062_v17 = vld [vmem:[#allocation5 + $0x240] ss:$16 sps:$4 sm:$0xff]   ;;  %v15065_v18 = vld [vmem:[#allocation5 + $0x248] ss:$16 sps:$4 sm:$0xff]  }
 0x143   : > { %1139 = vmatprep.subr.bf16.mxu0 %v14996_v28  ;;  %1225 = vmatprep.subr.bf16.mxu1 %v14998_v29  ;;  %v15070_v19 = vld [vmem:[#allocation5 + $0x264] ss:$16 sps:$4 sm:$0xff]   ;;  %v15073_v20 = vld [vmem:[#allocation5 + $0x26c] ss:$16 sps:$4 sm:$0xff]   ;;  %v15068_v21 = vld [vmem:[#allocation5 + $0x260] ss:$16 sps:$4 sm:$0xff]  }
 0x144   : > { %v15071_v22 = vld [vmem:[#allocation5 + $0x268] ss:$16 sps:$4 sm:$0xff]   ;;  %v15076_v23 = vld [vmem:[#allocation5 + $0x284] ss:$16 sps:$4 sm:$0xff]   ;;  %v15079_v24 = vld [vmem:[#allocation5 + $0x28c] ss:$16 sps:$4 sm:$0xff]  }
 0x145   : > { %v15074_v25 = vld [vmem:[#allocation5 + $0x280] ss:$16 sps:$4 sm:$0xff]   ;;  %v15077_v26 = vld [vmem:[#allocation5 + $0x288] ss:$16 sps:$4 sm:$0xff]   ;;  %v15082_v27 = vld [vmem:[#allocation5 + $0x2a4] ss:$16 sps:$4 sm:$0xff]  }
 0x146   : > { %1140 = vmatpush1.bf16.msra.mxu0 %v15000_v30  ;;  %1226 = vmatpush1.bf16.msra.mxu1 %v15001_v31  ;;  %v15085_v28 = vld [vmem:[#allocation5 + $0x2ac] ss:$16 sps:$4 sm:$0xff]   ;;  %v15080_v29 = vld [vmem:[#allocation5 + $0x2a0] ss:$16 sps:$4 sm:$0xff]   ;;  %v15083_v30 = vld [vmem:[#allocation5 + $0x2a8] ss:$16 sps:$4 sm:$0xff]  }
 0x147   : > { %1141 = vmatprep.subr.bf16.mxu0 %v15002_v32  ;;  %1227 = vmatprep.subr.bf16.mxu1 %v15004_v33  ;;  %v15088_v31 = vld [vmem:[#allocation5 + $0x2c4] ss:$16 sps:$4 sm:$0xff]   ;;  %v15091_v32 = vld [vmem:[#allocation5 + $0x2cc] ss:$16 sps:$4 sm:$0xff]   ;;  %v15086_v33 = vld [vmem:[#allocation5 + $0x2c0] ss:$16 sps:$4 sm:$0xff]  }
 0x148   : > { %v623_v46 = vld [vmem:[#allocation7] sm:$0xf] }
 0x14a   : > { %1142 = vmatpush1.bf16.msra.mxu0 %v15006_v34  ;;  %1228 = vmatpush1.bf16.msra.mxu1 %v15007_v35  ;;  %v15089_v34 = vld [vmem:[#allocation5 + $0x2c8] ss:$16 sps:$4 sm:$0xff]   ;;  %v15094_v35 = vld [vmem:[#allocation5 + $0x2e4] ss:$16 sps:$4 sm:$0xff]  }
 0x14b   : > { %1143 = vmatprep.subr.bf16.mxu0 %v15008_v36  ;;  %1229 = vmatprep.subr.bf16.mxu1 %v15010_v37  ;;  %v15097_v36 = vld [vmem:[#allocation5 + $0x2ec] ss:$16 sps:$4 sm:$0xff]   ;;  %v15092_v37 = vld [vmem:[#allocation5 + $0x2e0] ss:$16 sps:$4 sm:$0xff]  }
 0x14e   : > { %1144 = vmatpush1.bf16.msra.mxu0 %v15012_v38  ;;  %1230 = vmatpush1.bf16.msra.mxu1 %v15013_v39  ;;  %v15095_v38 = vld [vmem:[#allocation5 + $0x2e8] ss:$16 sps:$4 sm:$0xff]   ;;  %v520_v39 = vld [vmem:[#allocation3 + $0x10] sm:$0xff] }
 0x14f   : > { %1145 = vmatprep.subr.bf16.mxu0 %v15014_v40  ;;  %1231 = vmatprep.subr.bf16.mxu1 %v15016_v41  ;;  %v523_v40 = vld [vmem:[#allocation3 + $0x28] sm:$0xff] }
 0x150   : > { %v526_v41 = vpack.c.bf16 %v523_v40, %v520_v39 }
 0x152   : > { %1146 = vmatpush1.bf16.msra.mxu0 %v15018_v42  ;;  %1232 = vmatpush1.bf16.msra.mxu1 %v15019_v43  ;;  %v625_v42 = vlaneseq }
 0x153   : > { %1147 = vmatprep.subr.bf16.mxu0 %v15020_v44  ;;  %1233 = vmatprep.subr.bf16.mxu1 %v15022_v45 }
 0x154   : > { %v626_v43 = vshrl.u32 %v625_v42, 7 }
 0x156   : > { %1148 = vmatpush1.bf16.msra.mxu0 %v15024_v48  ;;  %1234 = vmatpush1.bf16.msra.mxu1 %v15025_v49  ;;  %v627_v44 = vsub.s32 0, %v626_v43  ;;  %v635_v45 = vsub.s32 2, %v626_v43  ;;  %v631_v47 = vsub.s32 1, %v626_v43  ;;  %v639_v48 = vsub.s32 3, %v626_v43 }
 0x157   : > { %1149 = vmatprep.subr.bf16.mxu0 %v15026_v51  ;;  %1235 = vmatprep.subr.bf16.mxu1 %v15028_v52 }
 0x158   : > { %v628_v49 = vrot.slane %v623_v46, %v627_v44  ;;  %v636_v50 = vrot.slane %v623_v46, %v635_v45  ;;  %v632_v51 = vrot.slane %v623_v46, %v631_v47  ;;  %v640_v52 = vrot.slane %v623_v46, %v639_v48 }
 0x15a   : > { %1150 = vmatpush1.bf16.msra.mxu0 %v15030_v53  ;;  %1236 = vmatpush1.bf16.msra.mxu1 %v15031_v54 }
 0x15b   : > { %1151 = vmatprep.subr.bf16.mxu0 %v15032_v55  ;;  %1237 = vmatprep.subr.bf16.mxu1 %v15034_v56 }
 0x15e   : > { %1152 = vmatpush1.bf16.msra.mxu0 %v15036_v57  ;;  %1238 = vmatpush1.bf16.msra.mxu1 %v15037_v58 }
 0x15f   : > { %1153 = vmatprep.subr.bf16.mxu0 %v15038_v59  ;;  %1239 = vmatprep.subr.bf16.mxu1 %v15040_v60 }
 0x162   : > { %1154 = vmatpush1.bf16.msra.mxu0 %v15042_v61  ;;  %1240 = vmatpush1.bf16.msra.mxu1 %v15043_v62 }
 0x163   : > { %1155 = vmatprep.subr.bf16.mxu0 %v15044_v63  ;;  %1241 = vmatprep.subr.bf16.mxu1 %v15046_v0 }
 0x166   : > { %1156 = vmatpush1.bf16.msra.mxu0 %v15048_v1  ;;  %1242 = vmatpush1.bf16.msra.mxu1 %v15049_v2 }
 0x167   : > { %1168 = vmatprep.subr.bf16.mxu0 %v15052_v3  ;;  %1254 = vmatprep.subr.bf16.mxu1 %v15055_v6 }
 0x169   : > { %1158 = vmatmul.mubr.bf16.vlgmr.msra.gmra.mrb[0].mxu0 %v524_v8  ;;  %1244 = vmatmul.mubr.bf16.vlgmr.msra.gmra.mrb[0].mxu1 %v524_v8 }
 0x16a   : > { %1169 = vmatpush1.bf16.msra.mxu0 %v15050_v7  ;;  %1255 = vmatpush1.bf16.msra.mxu1 %v15053_v9 }
 0x16b   : > { %1170 = vmatprep.subr.bf16.mxu0 %v15058_v10  ;;  %1256 = vmatprep.subr.bf16.mxu1 %v15061_v11 }
 0x16c   : > { %1200 = vmatprep.mubr.bf16.mxu0 %v17491_v16  ;;  %1286 = vmatprep.mubr.bf16.mxu1 %v17491_v16 }
 0x16e   : > { %1171 = vmatpush1.bf16.msra.mxu0 %v15056_v12  ;;  %1257 = vmatpush1.bf16.msra.mxu1 %v15059_v13 }
 0x16f   : > { %1172 = vmatprep.subr.bf16.mxu0 %v15064_v14  ;;  %1258 = vmatprep.subr.bf16.mxu1 %v15067_v15 }
 0x172   : > { %1173 = vmatpush1.bf16.msra.mxu0 %v15062_v17  ;;  %1259 = vmatpush1.bf16.msra.mxu1 %v15065_v18 }
 0x173   : > { %1174 = vmatprep.subr.bf16.mxu0 %v15070_v19  ;;  %1260 = vmatprep.subr.bf16.mxu1 %v15073_v20 }
 0x176   : > { %1175 = vmatpush1.bf16.msra.mxu0 %v15068_v21  ;;  %1261 = vmatpush1.bf16.msra.mxu1 %v15071_v22 }
 0x177   : > { %1176 = vmatprep.subr.bf16.mxu0 %v15076_v23  ;;  %1262 = vmatprep.subr.bf16.mxu1 %v15079_v24 }
 0x17a   : > { %1177 = vmatpush1.bf16.msra.mxu0 %v15074_v25  ;;  %1263 = vmatpush1.bf16.msra.mxu1 %v15077_v26 }
 0x17b   : > { %1178 = vmatprep.subr.bf16.mxu0 %v15082_v27  ;;  %1264 = vmatprep.subr.bf16.mxu1 %v15085_v28 }
 0x17e   : > { %1179 = vmatpush1.bf16.msra.mxu0 %v15080_v29  ;;  %1265 = vmatpush1.bf16.msra.mxu1 %v15083_v30 }
 0x17f   : > { %1180 = vmatprep.subr.bf16.mxu0 %v15088_v31  ;;  %1266 = vmatprep.subr.bf16.mxu1 %v15091_v32 }
 0x182   : > { %1181 = vmatpush1.bf16.msra.mxu0 %v15086_v33  ;;  %1267 = vmatpush1.bf16.msra.mxu1 %v15089_v34 }
 0x183   : > { %1182 = vmatprep.subr.bf16.mxu0 %v15094_v35  ;;  %1268 = vmatprep.subr.bf16.mxu1 %v15097_v36 }
 0x186   : > { %1183 = vmatpush1.bf16.msra.mxu0 %v15092_v37  ;;  %1269 = vmatpush1.bf16.msra.mxu1 %v15095_v38 }
 0x189   : > { %1201 = vmatmul.mubr.bf16.vlgmr.msra.gmra.mrb[0].mxu0 %v526_v41  ;;  %1287 = vmatmul.mubr.bf16.vlgmr.msra.gmra.mrb[0].mxu1 %v526_v41 }
 0x25c   : > { %v1202_v53 = vpop.f32.mrb[0].mxu0  ;;  %v1288_v54 = vpop.f32.mrb[0].mxu1 }
 0x25d   : > { %v14626_v55 = vadd.f32 %v1202_v53, %v628_v49  ;;  %v14630_v56 = vadd.f32 %v1288_v54, %v636_v50  ;;  %v1204_v57 = vpop.f32.mrb[1].mxu0  ;;  %v1290_v58 = vpop.f32.mrb[1].mxu1 }
 0x25e   : > { %v14627_v59 = vadd.f32 %v1204_v57, %v632_v51  ;;  %v14631_v60 = vadd.f32 %v1290_v58, %v640_v52  ;;  %v1206_v61 = vpop.f32.mrb[2].mxu0  ;;  %v1292_v62 = vpop.f32.mrb[2].mxu1 }
 0x25f   : > { %v1297_v63 = vmax.f32 %v14626_v55, 0.0  ;;  %v1299_v0 = vmax.f32 %v14630_v56, 0.0  ;;  %v14628_v1 = vadd.f32 %v1206_v61, %v628_v49  ;;  %v14632_v2 = vadd.f32 %v1292_v62, %v636_v50  ;;  %v1208_v3 = vpop.f32.mrb[3].mxu0  ;;  %v1294_v4 = vpop.f32.mrb[3].mxu1 }
 0x260   : > { %v1298_v5 = vmax.f32 %v14627_v59, 0.0  ;;  %v1300_v6 = vmax.f32 %v14631_v60, 0.0  ;;  %v14629_v7 = vadd.f32 %v1208_v3, %v632_v51  ;;  %v14633_v8 = vadd.f32 %v1294_v4, %v640_v52 }
 0x261   : > { %1305 = vst [vmem:[#allocation2] sm:$0xff] %v1297_v63  ;;  %1307 = vst [vmem:[#allocation2 + $0x10] sm:$0xff] %v1299_v0  ;;  %v1301_v9 = vmax.f32 %v14628_v1, 0.0  ;;  %v1303_v10 = vmax.f32 %v14632_v2, 0.0 }
 0x262   : > { %1306 = vst [vmem:[#allocation2 + $0x8] sm:$0xff] %v1298_v5  ;;  %1308 = vst [vmem:[#allocation2 + $0x18] sm:$0xff] %v1300_v6  ;;  %v1302_v11 = vmax.f32 %v14629_v7, 0.0  ;;  %v1304_v12 = vmax.f32 %v14633_v8, 0.0 }
 0x263   : > { %1309 = vst [vmem:[#allocation2 + $0x20] sm:$0xff] %v1301_v9  ;;  %1311 = vst [vmem:[#allocation2 + $0x30] sm:$0xff] %v1303_v10 }
 0x264   : > { %1310 = vst [vmem:[#allocation2 + $0x28] sm:$0xff] %v1302_v11  ;;  %1312 = vst [vmem:[#allocation2 + $0x38] sm:$0xff] %v1304_v12 }
 0x265 PF: > { %v15098_v13 = vld [vmem:[%s17872_s29 + $0x4] ss:$16 sps:$4 sm:$0xff]   ;;  %v15100_v14 = vld [vmem:[%s17872_s29 + $0xc] ss:$16 sps:$4 sm:$0xff]   ;;  %v15102_v15 = vld [vmem:[%s17872_s29] ss:$16 sps:$4 sm:$0xff]  }
 0x266   : > { %2115 = vmatprep.subr.bf16.mxu0 %v15098_v13  ;;  %v15103_v16 = vld [vmem:[%s17872_s29 + $0x8] ss:$16 sps:$4 sm:$0xff]   ;;  %2201 = vmatprep.subr.bf16.mxu1 %v15100_v14  ;;  %v15104_v17 = vld [vmem:[%s17872_s29 + $0x24] ss:$16 sps:$4 sm:$0xff]   ;;  %v15106_v18 = vld [vmem:[%s17872_s29 + $0x2c] ss:$16 sps:$4 sm:$0xff]  }
 0x267   : > { %2116 = vmatpush1.bf16.msra.mxu0 %v15102_v15  ;;  %2202 = vmatpush1.bf16.msra.mxu1 %v15103_v16  ;;  %v15108_v19 = vld [vmem:[%s17872_s29 + $0x20] ss:$16 sps:$4 sm:$0xff]   ;;  %v15109_v20 = vld [vmem:[%s17872_s29 + $0x28] ss:$16 sps:$4 sm:$0xff]   ;;  %v15110_v21 = vld [vmem:[%s17872_s29 + $0x44] ss:$16 sps:$4 sm:$0xff]  }
 0x268   : > { %2117 = vmatprep.subr.bf16.mxu0 %v15104_v17  ;;  %2203 = vmatprep.subr.bf16.mxu1 %v15106_v18  ;;  %v15112_v22 = vld [vmem:[%s17872_s29 + $0x4c] ss:$16 sps:$4 sm:$0xff]   ;;  %v15114_v23 = vld [vmem:[%s17872_s29 + $0x40] ss:$16 sps:$4 sm:$0xff]   ;;  %v15115_v24 = vld [vmem:[%s17872_s29 + $0x48] ss:$16 sps:$4 sm:$0xff]  }
 0x269   : > { %v15116_v25 = vld [vmem:[%s17872_s29 + $0x64] ss:$16 sps:$4 sm:$0xff]   ;;  %v15118_v26 = vld [vmem:[%s17872_s29 + $0x6c] ss:$16 sps:$4 sm:$0xff]   ;;  %v15120_v27 = vld [vmem:[%s17872_s29 + $0x60] ss:$16 sps:$4 sm:$0xff]  }
 0x26a   : > { %v15121_v28 = vld [vmem:[%s17872_s29 + $0x68] ss:$16 sps:$4 sm:$0xff]   ;;  %v15122_v29 = vld [vmem:[%s17872_s29 + $0x84] ss:$16 sps:$4 sm:$0xff]   ;;  %v15124_v30 = vld [vmem:[%s17872_s29 + $0x8c] ss:$16 sps:$4 sm:$0xff]  }
 0x26b   : > { %2118 = vmatpush1.bf16.msra.mxu0 %v15108_v19  ;;  %2204 = vmatpush1.bf16.msra.mxu1 %v15109_v20  ;;  %v15126_v31 = vld [vmem:[%s17872_s29 + $0x80] ss:$16 sps:$4 sm:$0xff]   ;;  %v15127_v32 = vld [vmem:[%s17872_s29 + $0x88] ss:$16 sps:$4 sm:$0xff]   ;;  %v15128_v33 = vld [vmem:[%s17872_s29 + $0xa4] ss:$16 sps:$4 sm:$0xff]  }
 0x26c   : > { %2119 = vmatprep.subr.bf16.mxu0 %v15110_v21  ;;  %2205 = vmatprep.subr.bf16.mxu1 %v15112_v22  ;;  %v15130_v34 = vld [vmem:[%s17872_s29 + $0xac] ss:$16 sps:$4 sm:$0xff]   ;;  %v15132_v35 = vld [vmem:[%s17872_s29 + $0xa0] ss:$16 sps:$4 sm:$0xff]   ;;  %v15133_v36 = vld [vmem:[%s17872_s29 + $0xa8] ss:$16 sps:$4 sm:$0xff]  }
 0x26d   : > { %v15134_v37 = vld [vmem:[%s17872_s29 + $0xc4] ss:$16 sps:$4 sm:$0xff]   ;;  %v15136_v38 = vld [vmem:[%s17872_s29 + $0xcc] ss:$16 sps:$4 sm:$0xff]   ;;  %v15138_v39 = vld [vmem:[%s17872_s29 + $0xc0] ss:$16 sps:$4 sm:$0xff]  }
 0x26e   : > { %v15139_v40 = vld [vmem:[%s17872_s29 + $0xc8] ss:$16 sps:$4 sm:$0xff]   ;;  %v15140_v41 = vld [vmem:[%s17872_s29 + $0xe4] ss:$16 sps:$4 sm:$0xff]   ;;  %v15142_v42 = vld [vmem:[%s17872_s29 + $0xec] ss:$16 sps:$4 sm:$0xff]  }
 0x26f   : > { %2120 = vmatpush1.bf16.msra.mxu0 %v15114_v23  ;;  %2206 = vmatpush1.bf16.msra.mxu1 %v15115_v24  ;;  %v15144_v43 = vld [vmem:[%s17872_s29 + $0xe0] ss:$16 sps:$4 sm:$0xff]   ;;  %v15145_v44 = vld [vmem:[%s17872_s29 + $0xe8] ss:$16 sps:$4 sm:$0xff]   ;;  %v15146_v45 = vld [vmem:[%s17872_s29 + $0x104] ss:$16 sps:$4 sm:$0xff]  }
 0x270   : > { %2121 = vmatprep.subr.bf16.mxu0 %v15116_v25  ;;  %2207 = vmatprep.subr.bf16.mxu1 %v15118_v26  ;;  %v15148_v46 = vld [vmem:[%s17872_s29 + $0x10c] ss:$16 sps:$4 sm:$0xff]   ;;  %v15150_v47 = vld [vmem:[%s17872_s29 + $0x100] ss:$16 sps:$4 sm:$0xff]   ;;  %v15151_v48 = vld [vmem:[%s17872_s29 + $0x108] ss:$16 sps:$4 sm:$0xff]  }
 0x271   : > { %v15152_v49 = vld [vmem:[%s17872_s29 + $0x124] ss:$16 sps:$4 sm:$0xff]   ;;  %v15154_v50 = vld [vmem:[%s17872_s29 + $0x12c] ss:$16 sps:$4 sm:$0xff]   ;;  %v15156_v51 = vld [vmem:[%s17872_s29 + $0x120] ss:$16 sps:$4 sm:$0xff]  }
 0x272   : > { %v15157_v52 = vld [vmem:[%s17872_s29 + $0x128] ss:$16 sps:$4 sm:$0xff]   ;;  %v15158_v53 = vld [vmem:[%s17872_s29 + $0x144] ss:$16 sps:$4 sm:$0xff]   ;;  %v15160_v54 = vld [vmem:[%s17872_s29 + $0x14c] ss:$16 sps:$4 sm:$0xff]  }
 0x273   : > { %2122 = vmatpush1.bf16.msra.mxu0 %v15120_v27  ;;  %2208 = vmatpush1.bf16.msra.mxu1 %v15121_v28  ;;  %v15162_v55 = vld [vmem:[%s17872_s29 + $0x140] ss:$16 sps:$4 sm:$0xff]   ;;  %v15163_v56 = vld [vmem:[%s17872_s29 + $0x148] ss:$16 sps:$4 sm:$0xff]   ;;  %v15164_v57 = vld [vmem:[%s17872_s29 + $0x164] ss:$16 sps:$4 sm:$0xff]  }
 0x274   : > { %2123 = vmatprep.subr.bf16.mxu0 %v15122_v29  ;;  %2209 = vmatprep.subr.bf16.mxu1 %v15124_v30  ;;  %v15166_v58 = vld [vmem:[%s17872_s29 + $0x16c] ss:$16 sps:$4 sm:$0xff]   ;;  %v1314_v59 = vld [vmem:[#allocation2 + $0x8] sm:$0xff]  ;;  %v15168_v61 = vld [vmem:[%s17872_s29 + $0x160] ss:$16 sps:$4 sm:$0xff]   ;;  %s19532_s18 = sld [smem:[#allocation22_spill]] }
 0x275   : > { %v1318_v60 = vld [vmem:[#allocation2 + $0x28] sm:$0xff]  ;;  %v15172_v1 = vld [vmem:[%s17872_s29 + $0x18c] ss:$16 sps:$4 sm:$0xff]   ;;  %v15174_v2 = vld [vmem:[%s17872_s29 + $0x180] ss:$16 sps:$4 sm:$0xff]  }
 0x276   : > { %v15169_v62 = vld [vmem:[%s17872_s29 + $0x168] ss:$16 sps:$4 sm:$0xff]   ;;  %v1322_v63 = vpack.c.bf16 %v1318_v60, %v1314_v59  ;;  %v15170_v0 = vld [vmem:[%s17872_s29 + $0x184] ss:$16 sps:$4 sm:$0xff]   ;;  %v15178_v5 = vld [vmem:[%s17872_s29 + $0x1ac] ss:$16 sps:$4 sm:$0xff]  }
 0x277   : > { %2124 = vmatpush1.bf16.msra.mxu0 %v15126_v31  ;;  %2210 = vmatpush1.bf16.msra.mxu1 %v15127_v32  ;;  %v15175_v3 = vld [vmem:[%s17872_s29 + $0x188] ss:$16 sps:$4 sm:$0xff]   ;;  %v15176_v4 = vld [vmem:[%s17872_s29 + $0x1a4] ss:$16 sps:$4 sm:$0xff]   ;;  %v15180_v6 = vld [vmem:[%s17872_s29 + $0x1a0] ss:$16 sps:$4 sm:$0xff]  }
 0x278   : > { %2125 = vmatprep.subr.bf16.mxu0 %v15128_v33  ;;  %2211 = vmatprep.subr.bf16.mxu1 %v15130_v34  ;;  %v15181_v7 = vld [vmem:[%s17872_s29 + $0x1a8] ss:$16 sps:$4 sm:$0xff]   ;;  %v15182_v8 = vld [vmem:[%s17872_s29 + $0x1c4] ss:$16 sps:$4 sm:$0xff]   ;;  %v15184_v9 = vld [vmem:[%s17872_s29 + $0x1cc] ss:$16 sps:$4 sm:$0xff]  }
 0x279   : > { %2147 = vmatprep.mubr.bf16.mxu0 %v1322_v63  ;;  %2233 = vmatprep.mubr.bf16.mxu1 %v1322_v63  ;;  %v15186_v10 = vld [vmem:[%s17872_s29 + $0x1c0] ss:$16 sps:$4 sm:$0xff]   ;;  %v15187_v11 = vld [vmem:[%s17872_s29 + $0x1c8] ss:$16 sps:$4 sm:$0xff]   ;;  %v15188_v12 = vld [vmem:[%s17872_s29 + $0x1e4] ss:$16 sps:$4 sm:$0xff]  }
 0x27a   : > { %v15190_v13 = vld [vmem:[%s17872_s29 + $0x1ec] ss:$16 sps:$4 sm:$0xff]   ;;  %v15192_v14 = vld [vmem:[%s17872_s29 + $0x1e0] ss:$16 sps:$4 sm:$0xff]   ;;  %v15193_v15 = vld [vmem:[%s17872_s29 + $0x1e8] ss:$16 sps:$4 sm:$0xff]  }
 0x27b   : > { %2126 = vmatpush1.bf16.msra.mxu0 %v15132_v35  ;;  %2212 = vmatpush1.bf16.msra.mxu1 %v15133_v36  ;;  %v15196_v16 = vld [vmem:[%s17872_s29 + $0x204] ss:$16 sps:$4 sm:$0xff]   ;;  %v1313_v17 = vld [vmem:[#allocation2] sm:$0xff]  ;;  %v15197_v21 = vld [vmem:[%s17872_s29 + $0x208] ss:$16 sps:$4 sm:$0xff]   ;;  %p14512_p5 = scmp.ne.s32.totalorder %s19532_s18, 1 }
 0x27c   : > { %2127 = vmatprep.subr.bf16.mxu0 %v15134_v37  ;;  %2213 = vmatprep.subr.bf16.mxu1 %v15136_v38  ;;  %v1317_v18 = vld [vmem:[#allocation2 + $0x20] sm:$0xff]  ;;  %v15202_v23 = vld [vmem:[%s17872_s29 + $0x224] ss:$16 sps:$4 sm:$0xff]   ;;  %v15203_v26 = vld [vmem:[%s17872_s29 + $0x228] ss:$16 sps:$4 sm:$0xff]   ;;  %s19533_s21 = sld [smem:[#allocation29_spill]] (!%p14512_p5) }
 0x27d   : > { %v15199_v19 = vld [vmem:[%s17872_s29 + $0x20c] ss:$16 sps:$4 sm:$0xff]   ;;  %v15194_v20 = vld [vmem:[%s17872_s29 + $0x200] ss:$16 sps:$4 sm:$0xff]   ;;  %v1321_v22 = vpack.c.bf16 %v1317_v18, %v1313_v17  ;;  %v15208_v27 = vld [vmem:[%s17872_s29 + $0x244] ss:$16 sps:$4 sm:$0xff]  }
 0x27e   : > { %v15205_v24 = vld [vmem:[%s17872_s29 + $0x22c] ss:$16 sps:$4 sm:$0xff]   ;;  %v15200_v25 = vld [vmem:[%s17872_s29 + $0x220] ss:$16 sps:$4 sm:$0xff]   ;;  %v15209_v30 = vld [vmem:[%s17872_s29 + $0x248] ss:$16 sps:$4 sm:$0xff]  }
 0x27f   : > { %2128 = vmatpush1.bf16.msra.mxu0 %v15138_v39  ;;  %2214 = vmatpush1.bf16.msra.mxu1 %v15139_v40  ;;  %v15211_v28 = vld [vmem:[%s17872_s29 + $0x24c] ss:$16 sps:$4 sm:$0xff]   ;;  %v15206_v29 = vld [vmem:[%s17872_s29 + $0x240] ss:$16 sps:$4 sm:$0xff]   ;;  %v15214_v31 = vld [vmem:[%s17872_s29 + $0x264] ss:$16 sps:$4 sm:$0xff]  }
 0x280   : > { %2129 = vmatprep.subr.bf16.mxu0 %v15140_v41  ;;  %2215 = vmatprep.subr.bf16.mxu1 %v15142_v42  ;;  %v15217_v32 = vld [vmem:[%s17872_s29 + $0x26c] ss:$16 sps:$4 sm:$0xff]   ;;  %v15212_v33 = vld [vmem:[%s17872_s29 + $0x260] ss:$16 sps:$4 sm:$0xff]   ;;  %v15215_v34 = vld [vmem:[%s17872_s29 + $0x268] ss:$16 sps:$4 sm:$0xff]  }
 0x281   : > { %v15220_v35 = vld [vmem:[%s17872_s29 + $0x284] ss:$16 sps:$4 sm:$0xff]   ;;  %v15223_v36 = vld [vmem:[%s17872_s29 + $0x28c] ss:$16 sps:$4 sm:$0xff]   ;;  %v15218_v37 = vld [vmem:[%s17872_s29 + $0x280] ss:$16 sps:$4 sm:$0xff]  }
 0x282   : > { %v15221_v38 = vld [vmem:[%s17872_s29 + $0x288] ss:$16 sps:$4 sm:$0xff]   ;;  %v15226_v39 = vld [vmem:[%s17872_s29 + $0x2a4] ss:$16 sps:$4 sm:$0xff]   ;;  %v15229_v40 = vld [vmem:[%s17872_s29 + $0x2ac] ss:$16 sps:$4 sm:$0xff]  }
 0x283   : > { %2130 = vmatpush1.bf16.msra.mxu0 %v15144_v43  ;;  %2216 = vmatpush1.bf16.msra.mxu1 %v15145_v44  ;;  %v15224_v41 = vld [vmem:[%s17872_s29 + $0x2a0] ss:$16 sps:$4 sm:$0xff]   ;;  %v15227_v42 = vld [vmem:[%s17872_s29 + $0x2a8] ss:$16 sps:$4 sm:$0xff]   ;;  %v15232_v43 = vld [vmem:[%s17872_s29 + $0x2c4] ss:$16 sps:$4 sm:$0xff]  }
 0x284   : > { %2131 = vmatprep.subr.bf16.mxu0 %v15146_v45  ;;  %2217 = vmatprep.subr.bf16.mxu1 %v15148_v46  ;;  %v15235_v44 = vld [vmem:[%s17872_s29 + $0x2cc] ss:$16 sps:$4 sm:$0xff]   ;;  %v1316_v45 = vld [vmem:[#allocation2 + $0x18] sm:$0xff]  ;;  %v15230_v46 = vld [vmem:[%s17872_s29 + $0x2c0] ss:$16 sps:$4 sm:$0xff]  }
 0x285   : > { %v15253_v59 = vld [vmem:[%s17872_s29 + $0x32c] ss:$16 sps:$4 sm:$0xff]   ;;  %v15248_v60 = vld [vmem:[%s17872_s29 + $0x320] ss:$16 sps:$4 sm:$0xff]   ;;  %v15281_v17 = vld [vmem:[%s17872_s29 + $0x3c8] ss:$16 sps:$4 sm:$0xff]  }
 0x286   : > { %v15259_v63 = vld [vmem:[%s17872_s29 + $0x34c] ss:$16 sps:$4 sm:$0xff]   ;;  %v15286_v18 = vld [vmem:[%s17872_s29 + $0x3e4] ss:$16 sps:$4 sm:$0xff]  }
 0x287   : > { %2132 = vmatpush1.bf16.msra.mxu0 %v15150_v47  ;;  %2218 = vmatpush1.bf16.msra.mxu1 %v15151_v48  ;;  %v15233_v47 = vld [vmem:[%s17872_s29 + $0x2c8] ss:$16 sps:$4 sm:$0xff]  }
 0x288   : > { %2133 = vmatprep.subr.bf16.mxu0 %v15152_v49  ;;  %2219 = vmatprep.subr.bf16.mxu1 %v15154_v50  ;;  %v1320_v48 = vld [vmem:[#allocation2 + $0x38] sm:$0xff] }
 0x289   : > { %v15238_v49 = vld [vmem:[%s17872_s29 + $0x2e4] ss:$16 sps:$4 sm:$0xff]   ;;  %v1324_v50 = vpack.c.bf16 %v1320_v48, %v1316_v45  ;;  %v15323_v48 = vld [vmem:[%s17872_s29 + $0x4a8] ss:$16 sps:$4 sm:$0xff]  }
 0x28a   : > { %v15322_v45 = vld [vmem:[%s17872_s29 + $0x4a4] ss:$16 sps:$4 sm:$0xff]  }
 0x28b   : > { %2134 = vmatpush1.bf16.msra.mxu0 %v15156_v51  ;;  %2220 = vmatpush1.bf16.msra.mxu1 %v15157_v52  ;;  %v15241_v51 = vld [vmem:[%s17872_s29 + $0x2ec] ss:$16 sps:$4 sm:$0xff]   ;;  %v15236_v52 = vld [vmem:[%s17872_s29 + $0x2e0] ss:$16 sps:$4 sm:$0xff]  }
 0x28c   : > { %2135 = vmatprep.subr.bf16.mxu0 %v15158_v53  ;;  %2221 = vmatprep.subr.bf16.mxu1 %v15160_v54  ;;  %v15239_v53 = vld [vmem:[%s17872_s29 + $0x2e8] ss:$16 sps:$4 sm:$0xff]   ;;  %v15244_v54 = vld [vmem:[%s17872_s29 + $0x304] ss:$16 sps:$4 sm:$0xff]  }
 0x28f   : > { %2136 = vmatpush1.bf16.msra.mxu0 %v15162_v55  ;;  %2222 = vmatpush1.bf16.msra.mxu1 %v15163_v56  ;;  %v15247_v55 = vld [vmem:[%s17872_s29 + $0x30c] ss:$16 sps:$4 sm:$0xff]   ;;  %v15242_v56 = vld [vmem:[%s17872_s29 + $0x300] ss:$16 sps:$4 sm:$0xff]  }
 0x290   : > { %2137 = vmatprep.subr.bf16.mxu0 %v15164_v57  ;;  %2223 = vmatprep.subr.bf16.mxu1 %v15166_v58  ;;  %v15245_v57 = vld [vmem:[%s17872_s29 + $0x308] ss:$16 sps:$4 sm:$0xff]   ;;  %v15250_v58 = vld [vmem:[%s17872_s29 + $0x324] ss:$16 sps:$4 sm:$0xff]  }
 0x293   : > { %2138 = vmatpush1.bf16.msra.mxu0 %v15168_v61  ;;  %2224 = vmatpush1.bf16.msra.mxu1 %v15169_v62  ;;  %v15251_v61 = vld [vmem:[%s17872_s29 + $0x328] ss:$16 sps:$4 sm:$0xff]   ;;  %v15256_v62 = vld [vmem:[%s17872_s29 + $0x344] ss:$16 sps:$4 sm:$0xff]  }
 0x294   : > { %2139 = vmatprep.subr.bf16.mxu0 %v15170_v0  ;;  %2225 = vmatprep.subr.bf16.mxu1 %v15172_v1  ;;  %v15254_v0 = vld [vmem:[%s17872_s29 + $0x340] ss:$16 sps:$4 sm:$0xff]   ;;  %v15257_v1 = vld [vmem:[%s17872_s29 + $0x348] ss:$16 sps:$4 sm:$0xff]  }
 0x297   : > { %2140 = vmatpush1.bf16.msra.mxu0 %v15174_v2  ;;  %2226 = vmatpush1.bf16.msra.mxu1 %v15175_v3  ;;  %v15262_v2 = vld [vmem:[%s17872_s29 + $0x364] ss:$16 sps:$4 sm:$0xff]   ;;  %v15265_v3 = vld [vmem:[%s17872_s29 + $0x36c] ss:$16 sps:$4 sm:$0xff]  }
 0x298   : > { %2141 = vmatprep.subr.bf16.mxu0 %v15176_v4  ;;  %2227 = vmatprep.subr.bf16.mxu1 %v15178_v5  ;;  %v15260_v4 = vld [vmem:[%s17872_s29 + $0x360] ss:$16 sps:$4 sm:$0xff]   ;;  %v15263_v5 = vld [vmem:[%s17872_s29 + $0x368] ss:$16 sps:$4 sm:$0xff]  }
 0x29b   : > { %2142 = vmatpush1.bf16.msra.mxu0 %v15180_v6  ;;  %2228 = vmatpush1.bf16.msra.mxu1 %v15181_v7  ;;  %v15268_v6 = vld [vmem:[%s17872_s29 + $0x384] ss:$16 sps:$4 sm:$0xff]   ;;  %v15271_v7 = vld [vmem:[%s17872_s29 + $0x38c] ss:$16 sps:$4 sm:$0xff]  }
 0x29c   : > { %2143 = vmatprep.subr.bf16.mxu0 %v15182_v8  ;;  %2229 = vmatprep.subr.bf16.mxu1 %v15184_v9  ;;  %v15266_v8 = vld [vmem:[%s17872_s29 + $0x380] ss:$16 sps:$4 sm:$0xff]   ;;  %v15269_v9 = vld [vmem:[%s17872_s29 + $0x388] ss:$16 sps:$4 sm:$0xff]  }
 0x29f   : > { %2144 = vmatpush1.bf16.msra.mxu0 %v15186_v10  ;;  %2230 = vmatpush1.bf16.msra.mxu1 %v15187_v11  ;;  %v15274_v10 = vld [vmem:[%s17872_s29 + $0x3a4] ss:$16 sps:$4 sm:$0xff]   ;;  %v15277_v11 = vld [vmem:[%s17872_s29 + $0x3ac] ss:$16 sps:$4 sm:$0xff]  }
 0x2a0   : > { %2145 = vmatprep.subr.bf16.mxu0 %v15188_v12  ;;  %2231 = vmatprep.subr.bf16.mxu1 %v15190_v13  ;;  %v15272_v12 = vld [vmem:[%s17872_s29 + $0x3a0] ss:$16 sps:$4 sm:$0xff]   ;;  %v15275_v13 = vld [vmem:[%s17872_s29 + $0x3a8] ss:$16 sps:$4 sm:$0xff]  }
 0x2a3   : > { %2146 = vmatpush1.bf16.msra.mxu0 %v15192_v14  ;;  %2232 = vmatpush1.bf16.msra.mxu1 %v15193_v15  ;;  %v15280_v14 = vld [vmem:[%s17872_s29 + $0x3c4] ss:$16 sps:$4 sm:$0xff]   ;;  %v15283_v15 = vld [vmem:[%s17872_s29 + $0x3cc] ss:$16 sps:$4 sm:$0xff]  }
 0x2a4   : > { %2158 = vmatprep.subr.bf16.mxu0 %v15196_v16  ;;  %2244 = vmatprep.subr.bf16.mxu1 %v15199_v19  ;;  %v15278_v16 = vld [vmem:[%s17872_s29 + $0x3c0] ss:$16 sps:$4 sm:$0xff]   ;;  %v15289_v19 = vld [vmem:[%s17872_s29 + $0x3ec] ss:$16 sps:$4 sm:$0xff]  }
 0x2a6   : > { %2148 = vmatmul.mubr.bf16.vlgmr.msra.gmra.mrb[0].mxu0 %v1321_v22  ;;  %2234 = vmatmul.mubr.bf16.vlgmr.msra.gmra.mrb[0].mxu1 %v1321_v22  ;;  %v1315_v22 = vld [vmem:[#allocation2 + $0x10] sm:$0xff] }
 0x2a7   : > { %2159 = vmatpush1.bf16.msra.mxu0 %v15194_v20  ;;  %2245 = vmatpush1.bf16.msra.mxu1 %v15197_v21  ;;  %v15284_v20 = vld [vmem:[%s17872_s29 + $0x3e0] ss:$16 sps:$4 sm:$0xff]   ;;  %v15287_v21 = vld [vmem:[%s17872_s29 + $0x3e8] ss:$16 sps:$4 sm:$0xff]  }
 0x2a8   : > { %2160 = vmatprep.subr.bf16.mxu0 %v15202_v23  ;;  %2246 = vmatprep.subr.bf16.mxu1 %v15205_v24  ;;  %v1319_v23 = vld [vmem:[#allocation2 + $0x30] sm:$0xff]  ;;  %v15292_v24 = vld [vmem:[%s17872_s29 + $0x404] ss:$16 sps:$4 sm:$0xff]  }
 0x2a9   : > { %2190 = vmatprep.mubr.bf16.mxu0 %v1324_v50  ;;  %2276 = vmatprep.mubr.bf16.mxu1 %v1324_v50  ;;  %v15331_v50 = vld [vmem:[%s17872_s29 + $0x4cc] ss:$16 sps:$4 sm:$0xff]  }
 0x2ab   : > { %2161 = vmatpush1.bf16.msra.mxu0 %v15200_v25  ;;  %2247 = vmatpush1.bf16.msra.mxu1 %v15203_v26  ;;  %v15295_v25 = vld [vmem:[%s17872_s29 + $0x40c] ss:$16 sps:$4 sm:$0xff]   ;;  %v15290_v26 = vld [vmem:[%s17872_s29 + $0x400] ss:$16 sps:$4 sm:$0xff]  }
 0x2ac   : > { %2162 = vmatprep.subr.bf16.mxu0 %v15208_v27  ;;  %2248 = vmatprep.subr.bf16.mxu1 %v15211_v28  ;;  %v15293_v27 = vld [vmem:[%s17872_s29 + $0x408] ss:$16 sps:$4 sm:$0xff]   ;;  %v1323_v28 = vpack.c.bf16 %v1319_v23, %v1315_v22  ;;  %v15385_v22 = vld [vmem:[%s17872_s29 + $0x5ec] ss:$16 sps:$4 sm:$0xff]   ;;  %v15380_v23 = vld [vmem:[%s17872_s29 + $0x5e0] ss:$16 sps:$4 sm:$0xff]  }
 0x2af   : > { %2163 = vmatpush1.bf16.msra.mxu0 %v15206_v29  ;;  %2249 = vmatpush1.bf16.msra.mxu1 %v15209_v30  ;;  %v15298_v29 = vld [vmem:[%s17872_s29 + $0x424] ss:$16 sps:$4 sm:$0xff]   ;;  %v15301_v30 = vld [vmem:[%s17872_s29 + $0x42c] ss:$16 sps:$4 sm:$0xff]  }
 0x2b0   : > { %2164 = vmatprep.subr.bf16.mxu0 %v15214_v31  ;;  %2250 = vmatprep.subr.bf16.mxu1 %v15217_v32  ;;  %v15296_v31 = vld [vmem:[%s17872_s29 + $0x420] ss:$16 sps:$4 sm:$0xff]   ;;  %v15299_v32 = vld [vmem:[%s17872_s29 + $0x428] ss:$16 sps:$4 sm:$0xff]  }
 0x2b3   : > { %2165 = vmatpush1.bf16.msra.mxu0 %v15212_v33  ;;  %2251 = vmatpush1.bf16.msra.mxu1 %v15215_v34  ;;  %v15304_v33 = vld [vmem:[%s17872_s29 + $0x444] ss:$16 sps:$4 sm:$0xff]   ;;  %v15307_v34 = vld [vmem:[%s17872_s29 + $0x44c] ss:$16 sps:$4 sm:$0xff]  }
 0x2b4   : > { %2166 = vmatprep.subr.bf16.mxu0 %v15220_v35  ;;  %2252 = vmatprep.subr.bf16.mxu1 %v15223_v36  ;;  %v15302_v35 = vld [vmem:[%s17872_s29 + $0x440] ss:$16 sps:$4 sm:$0xff]   ;;  %v15305_v36 = vld [vmem:[%s17872_s29 + $0x448] ss:$16 sps:$4 sm:$0xff]  }
 0x2b7   : > { %2167 = vmatpush1.bf16.msra.mxu0 %v15218_v37  ;;  %2253 = vmatpush1.bf16.msra.mxu1 %v15221_v38  ;;  %v15310_v37 = vld [vmem:[%s17872_s29 + $0x464] ss:$16 sps:$4 sm:$0xff]   ;;  %v15313_v38 = vld [vmem:[%s17872_s29 + $0x46c] ss:$16 sps:$4 sm:$0xff]  }
 0x2b8   : > { %2168 = vmatprep.subr.bf16.mxu0 %v15226_v39  ;;  %2254 = vmatprep.subr.bf16.mxu1 %v15229_v40  ;;  %v15308_v39 = vld [vmem:[%s17872_s29 + $0x460] ss:$16 sps:$4 sm:$0xff]   ;;  %v15311_v40 = vld [vmem:[%s17872_s29 + $0x468] ss:$16 sps:$4 sm:$0xff]  }
 0x2bb   : > { %2169 = vmatpush1.bf16.msra.mxu0 %v15224_v41  ;;  %2255 = vmatpush1.bf16.msra.mxu1 %v15227_v42  ;;  %v15316_v41 = vld [vmem:[%s17872_s29 + $0x484] ss:$16 sps:$4 sm:$0xff]   ;;  %v15319_v42 = vld [vmem:[%s17872_s29 + $0x48c] ss:$16 sps:$4 sm:$0xff]  }
 0x2bc   : > { %2170 = vmatprep.subr.bf16.mxu0 %v15232_v43  ;;  %2256 = vmatprep.subr.bf16.mxu1 %v15235_v44  ;;  %v15314_v43 = vld [vmem:[%s17872_s29 + $0x480] ss:$16 sps:$4 sm:$0xff]   ;;  %v15317_v44 = vld [vmem:[%s17872_s29 + $0x488] ss:$16 sps:$4 sm:$0xff]  }
 0x2bf   : > { %2171 = vmatpush1.bf16.msra.mxu0 %v15230_v46  ;;  %2257 = vmatpush1.bf16.msra.mxu1 %v15233_v47  ;;  %v15325_v46 = vld [vmem:[%s17872_s29 + $0x4ac] ss:$16 sps:$4 sm:$0xff]   ;;  %v15320_v47 = vld [vmem:[%s17872_s29 + $0x4a0] ss:$16 sps:$4 sm:$0xff]  }
 0x2c0   : > { %2172 = vmatprep.subr.bf16.mxu0 %v15238_v49  ;;  %2258 = vmatprep.subr.bf16.mxu1 %v15241_v51  ;;  %v15328_v49 = vld [vmem:[%s17872_s29 + $0x4c4] ss:$16 sps:$4 sm:$0xff]   ;;  %v15326_v51 = vld [vmem:[%s17872_s29 + $0x4c0] ss:$16 sps:$4 sm:$0xff]  }
 0x2c3   : > { %2173 = vmatpush1.bf16.msra.mxu0 %v15236_v52  ;;  %2259 = vmatpush1.bf16.msra.mxu1 %v15239_v53  ;;  %v15329_v52 = vld [vmem:[%s17872_s29 + $0x4c8] ss:$16 sps:$4 sm:$0xff]   ;;  %v15334_v53 = vld [vmem:[%s17872_s29 + $0x4e4] ss:$16 sps:$4 sm:$0xff]  }
 0x2c4   : > { %2174 = vmatprep.subr.bf16.mxu0 %v15244_v54  ;;  %2260 = vmatprep.subr.bf16.mxu1 %v15247_v55  ;;  %v15337_v54 = vld [vmem:[%s17872_s29 + $0x4ec] ss:$16 sps:$4 sm:$0xff]   ;;  %v15332_v55 = vld [vmem:[%s17872_s29 + $0x4e0] ss:$16 sps:$4 sm:$0xff]  }
 0x2c7   : > { %2175 = vmatpush1.bf16.msra.mxu0 %v15242_v56  ;;  %2261 = vmatpush1.bf16.msra.mxu1 %v15245_v57  ;;  %v15335_v56 = vld [vmem:[%s17872_s29 + $0x4e8] ss:$16 sps:$4 sm:$0xff]   ;;  %v15340_v57 = vld [vmem:[%s17872_s29 + $0x504] ss:$16 sps:$4 sm:$0xff]  }
 0x2c8   : > { %2176 = vmatprep.subr.bf16.mxu0 %v15250_v58  ;;  %2262 = vmatprep.subr.bf16.mxu1 %v15253_v59  ;;  %v15343_v58 = vld [vmem:[%s17872_s29 + $0x50c] ss:$16 sps:$4 sm:$0xff]   ;;  %v15338_v59 = vld [vmem:[%s17872_s29 + $0x500] ss:$16 sps:$4 sm:$0xff]  }
 0x2cb   : > { %2177 = vmatpush1.bf16.msra.mxu0 %v15248_v60  ;;  %2263 = vmatpush1.bf16.msra.mxu1 %v15251_v61  ;;  %v15341_v60 = vld [vmem:[%s17872_s29 + $0x508] ss:$16 sps:$4 sm:$0xff]   ;;  %v15346_v61 = vld [vmem:[%s17872_s29 + $0x524] ss:$16 sps:$4 sm:$0xff]  }
 0x2cc   : > { %2178 = vmatprep.subr.bf16.mxu0 %v15256_v62  ;;  %2264 = vmatprep.subr.bf16.mxu1 %v15259_v63  ;;  %v15349_v62 = vld [vmem:[%s17872_s29 + $0x52c] ss:$16 sps:$4 sm:$0xff]   ;;  %v15344_v63 = vld [vmem:[%s17872_s29 + $0x520] ss:$16 sps:$4 sm:$0xff]  }
 0x2cf   : > { %2179 = vmatpush1.bf16.msra.mxu0 %v15254_v0  ;;  %2265 = vmatpush1.bf16.msra.mxu1 %v15257_v1  ;;  %v15347_v0 = vld [vmem:[%s17872_s29 + $0x528] ss:$16 sps:$4 sm:$0xff]   ;;  %v15352_v1 = vld [vmem:[%s17872_s29 + $0x544] ss:$16 sps:$4 sm:$0xff]  }
 0x2d0   : > { %2180 = vmatprep.subr.bf16.mxu0 %v15262_v2  ;;  %2266 = vmatprep.subr.bf16.mxu1 %v15265_v3  ;;  %v15355_v2 = vld [vmem:[%s17872_s29 + $0x54c] ss:$16 sps:$4 sm:$0xff]   ;;  %v15350_v3 = vld [vmem:[%s17872_s29 + $0x540] ss:$16 sps:$4 sm:$0xff]  }
 0x2d3   : > { %2181 = vmatpush1.bf16.msra.mxu0 %v15260_v4  ;;  %2267 = vmatpush1.bf16.msra.mxu1 %v15263_v5  ;;  %v15353_v4 = vld [vmem:[%s17872_s29 + $0x548] ss:$16 sps:$4 sm:$0xff]   ;;  %v15358_v5 = vld [vmem:[%s17872_s29 + $0x564] ss:$16 sps:$4 sm:$0xff]  }
 0x2d4   : > { %2182 = vmatprep.subr.bf16.mxu0 %v15268_v6  ;;  %2268 = vmatprep.subr.bf16.mxu1 %v15271_v7  ;;  %v15361_v6 = vld [vmem:[%s17872_s29 + $0x56c] ss:$16 sps:$4 sm:$0xff]   ;;  %v15356_v7 = vld [vmem:[%s17872_s29 + $0x560] ss:$16 sps:$4 sm:$0xff]  }
 0x2d7   : > { %2183 = vmatpush1.bf16.msra.mxu0 %v15266_v8  ;;  %2269 = vmatpush1.bf16.msra.mxu1 %v15269_v9  ;;  %v15359_v8 = vld [vmem:[%s17872_s29 + $0x568] ss:$16 sps:$4 sm:$0xff]   ;;  %v15364_v9 = vld [vmem:[%s17872_s29 + $0x584] ss:$16 sps:$4 sm:$0xff]  }
 0x2d8   : > { %2184 = vmatprep.subr.bf16.mxu0 %v15274_v10  ;;  %2270 = vmatprep.subr.bf16.mxu1 %v15277_v11  ;;  %v15367_v10 = vld [vmem:[%s17872_s29 + $0x58c] ss:$16 sps:$4 sm:$0xff]   ;;  %v15362_v11 = vld [vmem:[%s17872_s29 + $0x580] ss:$16 sps:$4 sm:$0xff]  }
 0x2db   : > { %2185 = vmatpush1.bf16.msra.mxu0 %v15272_v12  ;;  %2271 = vmatpush1.bf16.msra.mxu1 %v15275_v13  ;;  %v15365_v12 = vld [vmem:[%s17872_s29 + $0x588] ss:$16 sps:$4 sm:$0xff]   ;;  %v15370_v13 = vld [vmem:[%s17872_s29 + $0x5a4] ss:$16 sps:$4 sm:$0xff]  }
 0x2dc   : > { %2186 = vmatprep.subr.bf16.mxu0 %v15280_v14  ;;  %2272 = vmatprep.subr.bf16.mxu1 %v15283_v15  ;;  %v15373_v14 = vld [vmem:[%s17872_s29 + $0x5ac] ss:$16 sps:$4 sm:$0xff]   ;;  %v15368_v15 = vld [vmem:[%s17872_s29 + $0x5a0] ss:$16 sps:$4 sm:$0xff]  }
 0x2df   : > { %2187 = vmatpush1.bf16.msra.mxu0 %v15278_v16  ;;  %2273 = vmatpush1.bf16.msra.mxu1 %v15281_v17  ;;  %v15371_v16 = vld [vmem:[%s17872_s29 + $0x5a8] ss:$16 sps:$4 sm:$0xff]   ;;  %v15376_v17 = vld [vmem:[%s17872_s29 + $0x5c4] ss:$16 sps:$4 sm:$0xff]  }
 0x2e0   : > { %2188 = vmatprep.subr.bf16.mxu0 %v15286_v18  ;;  %2274 = vmatprep.subr.bf16.mxu1 %v15289_v19  ;;  %v15379_v18 = vld [vmem:[%s17872_s29 + $0x5cc] ss:$16 sps:$4 sm:$0xff]   ;;  %v15374_v19 = vld [vmem:[%s17872_s29 + $0x5c0] ss:$16 sps:$4 sm:$0xff]  }
 0x2e3   : > { %2189 = vmatpush1.bf16.msra.mxu0 %v15284_v20  ;;  %2275 = vmatpush1.bf16.msra.mxu1 %v15287_v21  ;;  %v15377_v20 = vld [vmem:[%s17872_s29 + $0x5c8] ss:$16 sps:$4 sm:$0xff]   ;;  %v15382_v21 = vld [vmem:[%s17872_s29 + $0x5e4] ss:$16 sps:$4 sm:$0xff]  }
 0x2e4   : > { %3091 = vmatprep.subr.bf16.mxu0 %v15292_v24  ;;  %3177 = vmatprep.subr.bf16.mxu1 %v15295_v25  ;;  %v15383_v24 = vld [vmem:[%s17872_s29 + $0x5e8] ss:$16 sps:$4 sm:$0xff]   ;;  %v15388_v25 = vld [vmem:[%s17872_s29 + $0x604] ss:$16 sps:$4 sm:$0xff]  }
 0x2e6   : > { %2191 = vmatmul.mubr.bf16.vlgmr.msra.gmra.mrb[0].mxu0 %v1323_v28  ;;  %2277 = vmatmul.mubr.bf16.vlgmr.msra.gmra.mrb[0].mxu1 %v1323_v28 }
 0x2e7   : > { %3092 = vmatpush1.bf16.msra.mxu0 %v15290_v26  ;;  %3178 = vmatpush1.bf16.msra.mxu1 %v15293_v27  ;;  %v15391_v26 = vld [vmem:[%s17872_s29 + $0x60c] ss:$16 sps:$4 sm:$0xff]   ;;  %v1455_v27 = vlaneseq }
 0x2e8   : > { %3093 = vmatprep.subr.bf16.mxu0 %v15298_v29  ;;  %3179 = vmatprep.subr.bf16.mxu1 %v15301_v30  ;;  %v1453_v29 = vld [vmem:[%s17878_s24] sm:$0xf] }
 0x2e9   : > { %v1456_v28 = vshrl.u32 %v1455_v27, 7 }
 0x2eb   : > { %3094 = vmatpush1.bf16.msra.mxu0 %v15296_v31  ;;  %3180 = vmatpush1.bf16.msra.mxu1 %v15299_v32  ;;  %v18085_v30 = vsub.s32 0, %v1456_v28  ;;  %v18087_v31 = vsub.s32 2, %v1456_v28  ;;  %v18089_v32 = vsub.s32 1, %v1456_v28 }
 0x2ec   : > { %3095 = vmatprep.subr.bf16.mxu0 %v15304_v33  ;;  %3181 = vmatprep.subr.bf16.mxu1 %v15307_v34  ;;  %v18091_v33 = vsub.s32 3, %v1456_v28  ;;  %v15425_v28 = vld [vmem:[%s17872_s29 + $0x6c8] ss:$16 sps:$4 sm:$0xff]  }
 0x2ed   : > { %v1458_v34 = vrot.slane %v1453_v29, %v18085_v30 }
 0x2ef   : > { %3096 = vmatpush1.bf16.msra.mxu0 %v15302_v35  ;;  %3182 = vmatpush1.bf16.msra.mxu1 %v15305_v36  ;;  %v1466_v35 = vrot.slane %v1453_v29, %v18087_v31  ;;  %v1462_v36 = vrot.slane %v1453_v29, %v18089_v32 }
 0x2f0   : > { %3097 = vmatprep.subr.bf16.mxu0 %v15310_v37  ;;  %3183 = vmatprep.subr.bf16.mxu1 %v15313_v38  ;;  %v1470_v37 = vrot.slane %v1453_v29, %v18091_v33  ;;  %v15430_v29 = vld [vmem:[%s17872_s29 + $0x6e4] ss:$16 sps:$4 sm:$0xff]  }
 0x2f3   : > { %3098 = vmatpush1.bf16.msra.mxu0 %v15308_v39  ;;  %3184 = vmatpush1.bf16.msra.mxu1 %v15311_v40 }
 0x2f4   : > { %3099 = vmatprep.subr.bf16.mxu0 %v15316_v41  ;;  %3185 = vmatprep.subr.bf16.mxu1 %v15319_v42 }
 0x2f7   : > { %3100 = vmatpush1.bf16.msra.mxu0 %v15314_v43  ;;  %3186 = vmatpush1.bf16.msra.mxu1 %v15317_v44 }
 0x2f8   : > { %3101 = vmatprep.subr.bf16.mxu0 %v15322_v45  ;;  %3187 = vmatprep.subr.bf16.mxu1 %v15325_v46 }
 0x2fb   : > { %3102 = vmatpush1.bf16.msra.mxu0 %v15320_v47  ;;  %3188 = vmatpush1.bf16.msra.mxu1 %v15323_v48 }
 0x2fc   : > { %3103 = vmatprep.subr.bf16.mxu0 %v15328_v49  ;;  %3189 = vmatprep.subr.bf16.mxu1 %v15331_v50 }
 0x2ff   : > { %3104 = vmatpush1.bf16.msra.mxu0 %v15326_v51  ;;  %3190 = vmatpush1.bf16.msra.mxu1 %v15329_v52 }
 0x300   : > { %3105 = vmatprep.subr.bf16.mxu0 %v15334_v53  ;;  %3191 = vmatprep.subr.bf16.mxu1 %v15337_v54 }
 0x303   : > { %3106 = vmatpush1.bf16.msra.mxu0 %v15332_v55  ;;  %3192 = vmatpush1.bf16.msra.mxu1 %v15335_v56 }
 0x304   : > { %3107 = vmatprep.subr.bf16.mxu0 %v15340_v57  ;;  %3193 = vmatprep.subr.bf16.mxu1 %v15343_v58 }
 0x307   : > { %3108 = vmatpush1.bf16.msra.mxu0 %v15338_v59  ;;  %3194 = vmatpush1.bf16.msra.mxu1 %v15341_v60 }
 0x308   : > { %3109 = vmatprep.subr.bf16.mxu0 %v15346_v61  ;;  %3195 = vmatprep.subr.bf16.mxu1 %v15349_v62  ;;  %v15386_v62 = vld [vmem:[%s17872_s29 + $0x600] ss:$16 sps:$4 sm:$0xff]  }
 0x30b   : > { %3110 = vmatpush1.bf16.msra.mxu0 %v15344_v63  ;;  %3196 = vmatpush1.bf16.msra.mxu1 %v15347_v0  ;;  %v15389_v63 = vld [vmem:[%s17872_s29 + $0x608] ss:$16 sps:$4 sm:$0xff]  }
 0x30c   : > { %3111 = vmatprep.subr.bf16.mxu0 %v15352_v1  ;;  %3197 = vmatprep.subr.bf16.mxu1 %v15355_v2 }
 0x30f   : > { %3112 = vmatpush1.bf16.msra.mxu0 %v15350_v3  ;;  %3198 = vmatpush1.bf16.msra.mxu1 %v15353_v4  ;;  %v15394_v4 = vld [vmem:[%s17872_s29 + $0x624] ss:$16 sps:$4 sm:$0xff]  }
 0x310   : > { %3113 = vmatprep.subr.bf16.mxu0 %v15358_v5  ;;  %3199 = vmatprep.subr.bf16.mxu1 %v15361_v6  ;;  %v15397_v5 = vld [vmem:[%s17872_s29 + $0x62c] ss:$16 sps:$4 sm:$0xff]   ;;  %v15392_v6 = vld [vmem:[%s17872_s29 + $0x620] ss:$16 sps:$4 sm:$0xff]  }
 0x313   : > { %3114 = vmatpush1.bf16.msra.mxu0 %v15356_v7  ;;  %3200 = vmatpush1.bf16.msra.mxu1 %v15359_v8  ;;  %v15395_v7 = vld [vmem:[%s17872_s29 + $0x628] ss:$16 sps:$4 sm:$0xff]   ;;  %v15400_v8 = vld [vmem:[%s17872_s29 + $0x644] ss:$16 sps:$4 sm:$0xff]  }
 0x314   : > { %3115 = vmatprep.subr.bf16.mxu0 %v15364_v9  ;;  %3201 = vmatprep.subr.bf16.mxu1 %v15367_v10  ;;  %v15403_v9 = vld [vmem:[%s17872_s29 + $0x64c] ss:$16 sps:$4 sm:$0xff]   ;;  %v15398_v10 = vld [vmem:[%s17872_s29 + $0x640] ss:$16 sps:$4 sm:$0xff]  }
 0x317   : > { %3116 = vmatpush1.bf16.msra.mxu0 %v15362_v11  ;;  %3202 = vmatpush1.bf16.msra.mxu1 %v15365_v12  ;;  %v15401_v11 = vld [vmem:[%s17872_s29 + $0x648] ss:$16 sps:$4 sm:$0xff]   ;;  %v15406_v12 = vld [vmem:[%s17872_s29 + $0x664] ss:$16 sps:$4 sm:$0xff]  }
 0x318   : > { %3117 = vmatprep.subr.bf16.mxu0 %v15370_v13  ;;  %3203 = vmatprep.subr.bf16.mxu1 %v15373_v14  ;;  %v15409_v13 = vld [vmem:[%s17872_s29 + $0x66c] ss:$16 sps:$4 sm:$0xff]   ;;  %v15404_v14 = vld [vmem:[%s17872_s29 + $0x660] ss:$16 sps:$4 sm:$0xff]  }
 0x31b   : > { %3118 = vmatpush1.bf16.msra.mxu0 %v15368_v15  ;;  %3204 = vmatpush1.bf16.msra.mxu1 %v15371_v16  ;;  %v15407_v15 = vld [vmem:[%s17872_s29 + $0x668] ss:$16 sps:$4 sm:$0xff]   ;;  %v15412_v16 = vld [vmem:[%s17872_s29 + $0x684] ss:$16 sps:$4 sm:$0xff]  }
 0x31c   : > { %3119 = vmatprep.subr.bf16.mxu0 %v15376_v17  ;;  %3205 = vmatprep.subr.bf16.mxu1 %v15379_v18  ;;  %v15415_v17 = vld [vmem:[%s17872_s29 + $0x68c] ss:$16 sps:$4 sm:$0xff]   ;;  %v15410_v18 = vld [vmem:[%s17872_s29 + $0x680] ss:$16 sps:$4 sm:$0xff]  }
 0x31f   : > { %3120 = vmatpush1.bf16.msra.mxu0 %v15374_v19  ;;  %3206 = vmatpush1.bf16.msra.mxu1 %v15377_v20  ;;  %v15413_v19 = vld [vmem:[%s17872_s29 + $0x688] ss:$16 sps:$4 sm:$0xff]   ;;  %v15418_v20 = vld [vmem:[%s17872_s29 + $0x6a4] ss:$16 sps:$4 sm:$0xff]  }
 0x320   : > { %3121 = vmatprep.subr.bf16.mxu0 %v15382_v21  ;;  %3207 = vmatprep.subr.bf16.mxu1 %v15385_v22  ;;  %v15421_v21 = vld [vmem:[%s17872_s29 + $0x6ac] ss:$16 sps:$4 sm:$0xff]   ;;  %v15416_v22 = vld [vmem:[%s17872_s29 + $0x6a0] ss:$16 sps:$4 sm:$0xff]  }
 0x323   : > { %3122 = vmatpush1.bf16.msra.mxu0 %v15380_v23  ;;  %3208 = vmatpush1.bf16.msra.mxu1 %v15383_v24  ;;  %v15419_v23 = vld [vmem:[%s17872_s29 + $0x6a8] ss:$16 sps:$4 sm:$0xff]   ;;  %v15424_v24 = vld [vmem:[%s17872_s29 + $0x6c4] ss:$16 sps:$4 sm:$0xff]  }
 0x324   : > { %3134 = vmatprep.subr.bf16.mxu0 %v15388_v25  ;;  %3220 = vmatprep.subr.bf16.mxu1 %v15391_v26  ;;  %v15427_v25 = vld [vmem:[%s17872_s29 + $0x6cc] ss:$16 sps:$4 sm:$0xff]   ;;  %v15422_v26 = vld [vmem:[%s17872_s29 + $0x6c0] ss:$16 sps:$4 sm:$0xff]  }
 0x3b9   : > { %v2192_v38 = vpop.f32.mrb[0].mxu0  ;;  %v2278_v39 = vpop.f32.mrb[0].mxu1 }
 0x3ba   : > { %v14642_v40 = vadd.f32 %v2192_v38, %v1458_v34  ;;  %v14646_v41 = vadd.f32 %v2278_v39, %v1466_v35  ;;  %v2194_v42 = vpop.f32.mrb[1].mxu0  ;;  %v2280_v43 = vpop.f32.mrb[1].mxu1  ;;  %v15439_v38 = vld [vmem:[%s17872_s29 + $0x70c] ss:$16 sps:$4 sm:$0xff]   ;;  %v15434_v39 = vld [vmem:[%s17872_s29 + $0x700] ss:$16 sps:$4 sm:$0xff]  }
 0x3bb   : > { %v14643_v44 = vadd.f32 %v2194_v42, %v1462_v36  ;;  %v14647_v45 = vadd.f32 %v2280_v43, %v1470_v37  ;;  %v2196_v46 = vpop.f32.mrb[2].mxu0  ;;  %v2282_v47 = vpop.f32.mrb[2].mxu1  ;;  %v15445_v42 = vld [vmem:[%s17872_s29 + $0x72c] ss:$16 sps:$4 sm:$0xff]   ;;  %v15440_v43 = vld [vmem:[%s17872_s29 + $0x720] ss:$16 sps:$4 sm:$0xff]  }
 0x3bc   : > { %v14644_v48 = vadd.f32 %v2196_v46, %v1458_v34  ;;  %v14648_v49 = vadd.f32 %v2282_v47, %v1466_v35  ;;  %v2198_v50 = vpop.f32.mrb[3].mxu0  ;;  %v2284_v51 = vpop.f32.mrb[3].mxu1  ;;  %v2287_v52 = vmax.f32 %v14642_v40, 0.0  ;;  %v2289_v53 = vmax.f32 %v14646_v41, 0.0  ;;  %v15433_v34 = vld [vmem:[%s17872_s29 + $0x6ec] ss:$16 sps:$4 sm:$0xff]  }
 0x3bd   : > { %v14645_v54 = vadd.f32 %v2198_v50, %v1462_v36  ;;  %v14649_v55 = vadd.f32 %v2284_v51, %v1470_v37  ;;  %v2288_v56 = vmax.f32 %v14643_v44, 0.0  ;;  %v2290_v59 = vmax.f32 %v14647_v45, 0.0  ;;  %v15428_v35 = vld [vmem:[%s17872_s29 + $0x6e0] ss:$16 sps:$4 sm:$0xff]   ;;  %v15431_v36 = vld [vmem:[%s17872_s29 + $0x6e8] ss:$16 sps:$4 sm:$0xff]  }
 0x3be   : > { %v2291_v57 = vmax.f32 %v14644_v48, 0.0  ;;  %v2293_v58 = vmax.f32 %v14648_v49, 0.0  ;;  %v15436_v37 = vld [vmem:[%s17872_s29 + $0x704] ss:$16 sps:$4 sm:$0xff]   ;;  %v15437_v40 = vld [vmem:[%s17872_s29 + $0x708] ss:$16 sps:$4 sm:$0xff]  }
 0x3bf   : > { %v2292_v60 = vmax.f32 %v14645_v54, 0.0  ;;  %v2294_v61 = vmax.f32 %v14649_v55, 0.0  ;;  %v15442_v41 = vld [vmem:[%s17872_s29 + $0x724] ss:$16 sps:$4 sm:$0xff]   ;;  %v15443_v44 = vld [vmem:[%s17872_s29 + $0x728] ss:$16 sps:$4 sm:$0xff]  }
 0x3c0   : > { %v2295_v0 = vpack.c.bf16 %v2291_v57, %v2287_v52  ;;  %v18099_v1 = vpack.c.bf16 %v2293_v58, %v2289_v53  ;;  %v15448_v45 = vld [vmem:[%s17872_s29 + $0x744] ss:$16 sps:$4 sm:$0xff]   ;;  %v15451_v46 = vld [vmem:[%s17872_s29 + $0x74c] ss:$16 sps:$4 sm:$0xff]   ;;  %v15446_v47 = vld [vmem:[%s17872_s29 + $0x740] ss:$16 sps:$4 sm:$0xff]  }
 0x3c1   : > { %v2296_v2 = vpack.c.bf16 %v2292_v60, %v2288_v56  ;;  %v2298_v3 = vpack.c.bf16 %v2294_v61, %v2290_v59  ;;  %v15449_v48 = vld [vmem:[%s17872_s29 + $0x748] ss:$16 sps:$4 sm:$0xff]   ;;  %v15454_v49 = vld [vmem:[%s17872_s29 + $0x764] ss:$16 sps:$4 sm:$0xff]   ;;  %v15457_v50 = vld [vmem:[%s17872_s29 + $0x76c] ss:$16 sps:$4 sm:$0xff]  }
 0x3c2   : > { %v15452_v51 = vld [vmem:[%s17872_s29 + $0x760] ss:$16 sps:$4 sm:$0xff]   ;;  %v15455_v52 = vld [vmem:[%s17872_s29 + $0x768] ss:$16 sps:$4 sm:$0xff]   ;;  %v15460_v53 = vld [vmem:[%s17872_s29 + $0x784] ss:$16 sps:$4 sm:$0xff]  }
 0x3c3   : > { %3123 = vmatprep.mubr.bf16.mxu0 %v2296_v2  ;;  %3209 = vmatprep.mubr.bf16.mxu1 %v2296_v2  ;;  %v15463_v54 = vld [vmem:[%s17872_s29 + $0x78c] ss:$16 sps:$4 sm:$0xff]   ;;  %v15458_v55 = vld [vmem:[%s17872_s29 + $0x780] ss:$16 sps:$4 sm:$0xff]   ;;  %v15461_v56 = vld [vmem:[%s17872_s29 + $0x788] ss:$16 sps:$4 sm:$0xff]  }
 0x3c4   : > { %3124 = vmatmul.mubr.bf16.vlgmr.msra.gmra.mrb[4].mxu0 %v2295_v0  ;;  %3210 = vmatmul.mubr.bf16.vlgmr.msra.gmra.mrb[4].mxu1 %v2295_v0  ;;  %v15466_v57 = vld [vmem:[%s17872_s29 + $0x7a4] ss:$16 sps:$4 sm:$0xff]   ;;  %v15469_v58 = vld [vmem:[%s17872_s29 + $0x7ac] ss:$16 sps:$4 sm:$0xff]   ;;  %v15464_v59 = vld [vmem:[%s17872_s29 + $0x7a0] ss:$16 sps:$4 sm:$0xff]  }
 0x3c5   : > { %3135 = vmatpush1.bf16.msra.mxu0 %v15386_v62  ;;  %3221 = vmatpush1.bf16.msra.mxu1 %v15389_v63  ;;  %v15467_v60 = vld [vmem:[%s17872_s29 + $0x7a8] ss:$16 sps:$4 sm:$0xff]   ;;  %v15472_v61 = vld [vmem:[%s17872_s29 + $0x7c4] ss:$16 sps:$4 sm:$0xff]   ;;  %v15475_v62 = vld [vmem:[%s17872_s29 + $0x7cc] ss:$16 sps:$4 sm:$0xff]  }
 0x3c6   : > { %3166 = vmatprep.mubr.bf16.mxu0 %v2298_v3  ;;  %3252 = vmatprep.mubr.bf16.mxu1 %v2298_v3  ;;  %v15470_v63 = vld [vmem:[%s17872_s29 + $0x7c0] ss:$16 sps:$4 sm:$0xff]   ;;  %v15473_v0 = vld [vmem:[%s17872_s29 + $0x7c8] ss:$16 sps:$4 sm:$0xff]   ;;  %v15478_v2 = vld [vmem:[%s17872_s29 + $0x7e4] ss:$16 sps:$4 sm:$0xff]  }
 0x3c7   : > { %3136 = vmatprep.subr.bf16.mxu0 %v15394_v4  ;;  %3222 = vmatprep.subr.bf16.mxu1 %v15397_v5  ;;  %v15481_v3 = vld [vmem:[%s17872_s29 + $0x7ec] ss:$16 sps:$4 sm:$0xff]   ;;  %v15476_v4 = vld [vmem:[%s17872_s29 + $0x7e0] ss:$16 sps:$4 sm:$0xff]   ;;  %v15479_v5 = vld [vmem:[%s17872_s29 + $0x7e8] ss:$16 sps:$4 sm:$0xff]  }
 0x3c9   : > { %3137 = vmatpush1.bf16.msra.mxu0 %v15392_v6  ;;  %3223 = vmatpush1.bf16.msra.mxu1 %v15395_v7  ;;  %v15484_v6 = vld [vmem:[%s17872_s29 + $0x804] ss:$16 sps:$4 sm:$0xff]   ;;  %v15487_v7 = vld [vmem:[%s17872_s29 + $0x80c] ss:$16 sps:$4 sm:$0xff]  }
 0x3ca   : > { %3138 = vmatprep.subr.bf16.mxu0 %v15400_v8  ;;  %3224 = vmatprep.subr.bf16.mxu1 %v15403_v9  ;;  %v15482_v8 = vld [vmem:[%s17872_s29 + $0x800] ss:$16 sps:$4 sm:$0xff]   ;;  %v15485_v9 = vld [vmem:[%s17872_s29 + $0x808] ss:$16 sps:$4 sm:$0xff]  }
 0x3cd   : > { %3139 = vmatpush1.bf16.msra.mxu0 %v15398_v10  ;;  %3225 = vmatpush1.bf16.msra.mxu1 %v15401_v11  ;;  %v15490_v10 = vld [vmem:[%s17872_s29 + $0x824] ss:$16 sps:$4 sm:$0xff]   ;;  %v15493_v11 = vld [vmem:[%s17872_s29 + $0x82c] ss:$16 sps:$4 sm:$0xff]  }
 0x3ce   : > { %3140 = vmatprep.subr.bf16.mxu0 %v15406_v12  ;;  %3226 = vmatprep.subr.bf16.mxu1 %v15409_v13  ;;  %v15488_v12 = vld [vmem:[%s17872_s29 + $0x820] ss:$16 sps:$4 sm:$0xff]   ;;  %v15491_v13 = vld [vmem:[%s17872_s29 + $0x828] ss:$16 sps:$4 sm:$0xff]  }
 0x3d1   : > { %3141 = vmatpush1.bf16.msra.mxu0 %v15404_v14  ;;  %3227 = vmatpush1.bf16.msra.mxu1 %v15407_v15  ;;  %v15496_v14 = vld [vmem:[%s17872_s29 + $0x844] ss:$16 sps:$4 sm:$0xff]   ;;  %v15499_v15 = vld [vmem:[%s17872_s29 + $0x84c] ss:$16 sps:$4 sm:$0xff]  }
 0x3d2   : > { %3142 = vmatprep.subr.bf16.mxu0 %v15412_v16  ;;  %3228 = vmatprep.subr.bf16.mxu1 %v15415_v17  ;;  %v15494_v16 = vld [vmem:[%s17872_s29 + $0x840] ss:$16 sps:$4 sm:$0xff]   ;;  %v15497_v17 = vld [vmem:[%s17872_s29 + $0x848] ss:$16 sps:$4 sm:$0xff]  }
 0x3d5   : > { %3143 = vmatpush1.bf16.msra.mxu0 %v15410_v18  ;;  %3229 = vmatpush1.bf16.msra.mxu1 %v15413_v19  ;;  %v15502_v18 = vld [vmem:[%s17872_s29 + $0x864] ss:$16 sps:$4 sm:$0xff]   ;;  %v15505_v19 = vld [vmem:[%s17872_s29 + $0x86c] ss:$16 sps:$4 sm:$0xff]  }
 0x3d6   : > { %3144 = vmatprep.subr.bf16.mxu0 %v15418_v20  ;;  %3230 = vmatprep.subr.bf16.mxu1 %v15421_v21  ;;  %v15503_v20 = vld [vmem:[%s17872_s29 + $0x868] ss:$16 sps:$4 sm:$0xff]   ;;  %v15508_v21 = vld [vmem:[%s17872_s29 + $0x884] ss:$16 sps:$4 sm:$0xff]  }
 0x3d9   : > { %3145 = vmatpush1.bf16.msra.mxu0 %v15416_v22  ;;  %3231 = vmatpush1.bf16.msra.mxu1 %v15419_v23  ;;  %v15511_v22 = vld [vmem:[%s17872_s29 + $0x88c] ss:$16 sps:$4 sm:$0xff]   ;;  %v15506_v23 = vld [vmem:[%s17872_s29 + $0x880] ss:$16 sps:$4 sm:$0xff]  }
 0x3da   : > { %3146 = vmatprep.subr.bf16.mxu0 %v15424_v24  ;;  %3232 = vmatprep.subr.bf16.mxu1 %v15427_v25  ;;  %v15509_v24 = vld [vmem:[%s17872_s29 + $0x888] ss:$16 sps:$4 sm:$0xff]   ;;  %v15514_v25 = vld [vmem:[%s17872_s29 + $0x8a4] ss:$16 sps:$4 sm:$0xff]  }
 0x3dd   : > { %3147 = vmatpush1.bf16.msra.mxu0 %v15422_v26  ;;  %3233 = vmatpush1.bf16.msra.mxu1 %v15425_v28  ;;  %v15517_v26 = vld [vmem:[%s17872_s29 + $0x8ac] ss:$16 sps:$4 sm:$0xff]   ;;  %v15512_v28 = vld [vmem:[%s17872_s29 + $0x8a0] ss:$16 sps:$4 sm:$0xff]  }
 0x3de   : > { %3148 = vmatprep.subr.bf16.mxu0 %v15430_v29  ;;  %3234 = vmatprep.subr.bf16.mxu1 %v15433_v34  ;;  %v15515_v29 = vld [vmem:[%s17872_s29 + $0x8a8] ss:$16 sps:$4 sm:$0xff]   ;;  %v15520_v34 = vld [vmem:[%s17872_s29 + $0x8c4] ss:$16 sps:$4 sm:$0xff]  }
 0x3e1   : > { %3149 = vmatpush1.bf16.msra.mxu0 %v15428_v35  ;;  %3235 = vmatpush1.bf16.msra.mxu1 %v15431_v36  ;;  %v15523_v35 = vld [vmem:[%s17872_s29 + $0x8cc] ss:$16 sps:$4 sm:$0xff]   ;;  %v15518_v36 = vld [vmem:[%s17872_s29 + $0x8c0] ss:$16 sps:$4 sm:$0xff]  }
 0x3e2   : > { %3150 = vmatprep.subr.bf16.mxu0 %v15436_v37  ;;  %3236 = vmatprep.subr.bf16.mxu1 %v15439_v38  ;;  %v15521_v37 = vld [vmem:[%s17872_s29 + $0x8c8] ss:$16 sps:$4 sm:$0xff]   ;;  %v15526_v38 = vld [vmem:[%s17872_s29 + $0x8e4] ss:$16 sps:$4 sm:$0xff]  }
 0x3e5   : > { %3151 = vmatpush1.bf16.msra.mxu0 %v15434_v39  ;;  %3237 = vmatpush1.bf16.msra.mxu1 %v15437_v40  ;;  %v15529_v39 = vld [vmem:[%s17872_s29 + $0x8ec] ss:$16 sps:$4 sm:$0xff]   ;;  %v15524_v40 = vld [vmem:[%s17872_s29 + $0x8e0] ss:$16 sps:$4 sm:$0xff]  }
 0x3e6   : > { %3152 = vmatprep.subr.bf16.mxu0 %v15442_v41  ;;  %3238 = vmatprep.subr.bf16.mxu1 %v15445_v42  ;;  %v15527_v41 = vld [vmem:[%s17872_s29 + $0x8e8] ss:$16 sps:$4 sm:$0xff]   ;;  %v15532_v42 = vld [vmem:[%s17872_s29 + $0x904] ss:$16 sps:$4 sm:$0xff]  }
 0x3e9   : > { %3153 = vmatpush1.bf16.msra.mxu0 %v15440_v43  ;;  %3239 = vmatpush1.bf16.msra.mxu1 %v15443_v44  ;;  %v15535_v43 = vld [vmem:[%s17872_s29 + $0x90c] ss:$16 sps:$4 sm:$0xff]   ;;  %v15530_v44 = vld [vmem:[%s17872_s29 + $0x900] ss:$16 sps:$4 sm:$0xff]  }
 0x3ea   : > { %3154 = vmatprep.subr.bf16.mxu0 %v15448_v45  ;;  %3240 = vmatprep.subr.bf16.mxu1 %v15451_v46  ;;  %v15533_v45 = vld [vmem:[%s17872_s29 + $0x908] ss:$16 sps:$4 sm:$0xff]   ;;  %v15538_v46 = vld [vmem:[%s17872_s29 + $0x924] ss:$16 sps:$4 sm:$0xff]  }
 0x3ed   : > { %3155 = vmatpush1.bf16.msra.mxu0 %v15446_v47  ;;  %3241 = vmatpush1.bf16.msra.mxu1 %v15449_v48  ;;  %v15541_v47 = vld [vmem:[%s17872_s29 + $0x92c] ss:$16 sps:$4 sm:$0xff]   ;;  %v15536_v48 = vld [vmem:[%s17872_s29 + $0x920] ss:$16 sps:$4 sm:$0xff]  }
 0x3ee   : > { %3156 = vmatprep.subr.bf16.mxu0 %v15454_v49  ;;  %3242 = vmatprep.subr.bf16.mxu1 %v15457_v50  ;;  %v15539_v49 = vld [vmem:[%s17872_s29 + $0x928] ss:$16 sps:$4 sm:$0xff]   ;;  %v15544_v50 = vld [vmem:[%s17872_s29 + $0x944] ss:$16 sps:$4 sm:$0xff]  }
 0x3f1   : > { %3157 = vmatpush1.bf16.msra.mxu0 %v15452_v51  ;;  %3243 = vmatpush1.bf16.msra.mxu1 %v15455_v52  ;;  %v15547_v51 = vld [vmem:[%s17872_s29 + $0x94c] ss:$16 sps:$4 sm:$0xff]   ;;  %v15542_v52 = vld [vmem:[%s17872_s29 + $0x940] ss:$16 sps:$4 sm:$0xff]  }
 0x3f2   : > { %3158 = vmatprep.subr.bf16.mxu0 %v15460_v53  ;;  %3244 = vmatprep.subr.bf16.mxu1 %v15463_v54  ;;  %v15545_v53 = vld [vmem:[%s17872_s29 + $0x948] ss:$16 sps:$4 sm:$0xff]   ;;  %v15550_v54 = vld [vmem:[%s17872_s29 + $0x964] ss:$16 sps:$4 sm:$0xff]  }
 0x3f5   : > { %3159 = vmatpush1.bf16.msra.mxu0 %v15458_v55  ;;  %3245 = vmatpush1.bf16.msra.mxu1 %v15461_v56  ;;  %v15553_v55 = vld [vmem:[%s17872_s29 + $0x96c] ss:$16 sps:$4 sm:$0xff]   ;;  %v15548_v56 = vld [vmem:[%s17872_s29 + $0x960] ss:$16 sps:$4 sm:$0xff]  }
 0x3f6   : > { %3160 = vmatprep.subr.bf16.mxu0 %v15466_v57  ;;  %3246 = vmatprep.subr.bf16.mxu1 %v15469_v58  ;;  %v15551_v57 = vld [vmem:[%s17872_s29 + $0x968] ss:$16 sps:$4 sm:$0xff]   ;;  %v15556_v58 = vld [vmem:[%s17872_s29 + $0x984] ss:$16 sps:$4 sm:$0xff]  }
 0x3f9   : > { %3161 = vmatpush1.bf16.msra.mxu0 %v15464_v59  ;;  %3247 = vmatpush1.bf16.msra.mxu1 %v15467_v60  ;;  %v15559_v59 = vld [vmem:[%s17872_s29 + $0x98c] ss:$16 sps:$4 sm:$0xff]   ;;  %v15554_v60 = vld [vmem:[%s17872_s29 + $0x980] ss:$16 sps:$4 sm:$0xff]  }
 0x3fa   : > { %3162 = vmatprep.subr.bf16.mxu0 %v15472_v61  ;;  %3248 = vmatprep.subr.bf16.mxu1 %v15475_v62  ;;  %v15557_v61 = vld [vmem:[%s17872_s29 + $0x988] ss:$16 sps:$4 sm:$0xff]   ;;  %v15562_v62 = vld [vmem:[%s17872_s29 + $0x9a4] ss:$16 sps:$4 sm:$0xff]  }
 0x3fd   : > { %3163 = vmatpush1.bf16.msra.mxu0 %v15470_v63  ;;  %3249 = vmatpush1.bf16.msra.mxu1 %v15473_v0  ;;  %v15565_v63 = vld [vmem:[%s17872_s29 + $0x9ac] ss:$16 sps:$4 sm:$0xff]   ;;  %v15560_v0 = vld [vmem:[%s17872_s29 + $0x9a0] ss:$16 sps:$4 sm:$0xff]  }
 0x3fe   : > { %3164 = vmatprep.subr.bf16.mxu0 %v15478_v2  ;;  %3250 = vmatprep.subr.bf16.mxu1 %v15481_v3  ;;  %v15563_v2 = vld [vmem:[%s17872_s29 + $0x9a8] ss:$16 sps:$4 sm:$0xff]   ;;  %v15568_v3 = vld [vmem:[%s17872_s29 + $0x9c4] ss:$16 sps:$4 sm:$0xff]  }
 0x401   : > { %3165 = vmatpush1.bf16.msra.mxu0 %v15476_v4  ;;  %3251 = vmatpush1.bf16.msra.mxu1 %v15479_v5  ;;  %v15571_v4 = vld [vmem:[%s17872_s29 + $0x9cc] ss:$16 sps:$4 sm:$0xff]   ;;  %v15566_v5 = vld [vmem:[%s17872_s29 + $0x9c0] ss:$16 sps:$4 sm:$0xff]  }
 0x402   : > { %4067 = vmatprep.subr.bf16.mxu0 %v15484_v6  ;;  %4153 = vmatprep.subr.bf16.mxu1 %v15487_v7  ;;  %v15569_v6 = vld [vmem:[%s17872_s29 + $0x9c8] ss:$16 sps:$4 sm:$0xff]   ;;  %v15574_v7 = vld [vmem:[%s17872_s29 + $0x9e4] ss:$16 sps:$4 sm:$0xff]  }
 0x404   : > { %3167 = vmatmul.mubr.bf16.vlgmr.msra.gmra.mrb[4].mxu0 %v18099_v1  ;;  %3253 = vmatmul.mubr.bf16.vlgmr.msra.gmra.mrb[4].mxu1 %v18099_v1  ;;  %v15500_v1 = vld [vmem:[%s17872_s29 + $0x860] ss:$16 sps:$4 sm:$0xff]  }
 0x405   : > { %4068 = vmatpush1.bf16.msra.mxu0 %v15482_v8  ;;  %4154 = vmatpush1.bf16.msra.mxu1 %v15485_v9  ;;  %v15577_v8 = vld [vmem:[%s17872_s29 + $0x9ec] ss:$16 sps:$4 sm:$0xff]   ;;  %v15572_v9 = vld [vmem:[%s17872_s29 + $0x9e0] ss:$16 sps:$4 sm:$0xff]  }
 0x406   : > { %4069 = vmatprep.subr.bf16.mxu0 %v15490_v10  ;;  %4155 = vmatprep.subr.bf16.mxu1 %v15493_v11  ;;  %v15575_v10 = vld [vmem:[%s17872_s29 + $0x9e8] ss:$16 sps:$4 sm:$0xff]   ;;  %v15580_v11 = vld [vmem:[%s17872_s29 + $0xa04] ss:$16 sps:$4 sm:$0xff]  }
 0x409   : > { %4070 = vmatpush1.bf16.msra.mxu0 %v15488_v12  ;;  %4156 = vmatpush1.bf16.msra.mxu1 %v15491_v13  ;;  %v15583_v12 = vld [vmem:[%s17872_s29 + $0xa0c] ss:$16 sps:$4 sm:$0xff]  }
 0x40a   : > { %4071 = vmatprep.subr.bf16.mxu0 %v15496_v14  ;;  %4157 = vmatprep.subr.bf16.mxu1 %v15499_v15  ;;  %v18230_v13 = vld [vmem:[%s17878_s24 + $0x4] sm:$0xf] }
 0x40b   : > { %v2438_v14 = vrot.slane %v18230_v13, %v18089_v32  ;;  %v2434_v15 = vrot.slane %v18230_v13, %v18085_v30 }
 0x40d   : > { %4072 = vmatpush1.bf16.msra.mxu0 %v15494_v16  ;;  %4158 = vmatpush1.bf16.msra.mxu1 %v15497_v17 }
 0x40e   : > { %4073 = vmatprep.subr.bf16.mxu0 %v15502_v18  ;;  %4159 = vmatprep.subr.bf16.mxu1 %v15505_v19  ;;  %v2446_v19 = vrot.slane %v18230_v13, %v18091_v33 }
 0x411   : > { %4074 = vmatpush1.bf16.msra.mxu0 %v15500_v1  ;;  %4160 = vmatpush1.bf16.msra.mxu1 %v15503_v20 }
 0x412   : > { %4075 = vmatprep.subr.bf16.mxu0 %v15508_v21  ;;  %4161 = vmatprep.subr.bf16.mxu1 %v15511_v22 }
 0x415   : > { %4076 = vmatpush1.bf16.msra.mxu0 %v15506_v23  ;;  %4162 = vmatpush1.bf16.msra.mxu1 %v15509_v24 }
 0x416   : > { %4077 = vmatprep.subr.bf16.mxu0 %v15514_v25  ;;  %4163 = vmatprep.subr.bf16.mxu1 %v15517_v26 }
 0x419   : > { %4078 = vmatpush1.bf16.msra.mxu0 %v15512_v28  ;;  %4164 = vmatpush1.bf16.msra.mxu1 %v15515_v29 }
 0x41a   : > { %4079 = vmatprep.subr.bf16.mxu0 %v15520_v34  ;;  %4165 = vmatprep.subr.bf16.mxu1 %v15523_v35  ;;  %v17018_v35 = vld [vmem:[#allocation2 + $0x20] sm:$0xff] }
 0x41d   : > { %4080 = vmatpush1.bf16.msra.mxu0 %v15518_v36  ;;  %4166 = vmatpush1.bf16.msra.mxu1 %v15521_v37  ;;  %v17019_v37 = vld [vmem:[#allocation2 + $0x8] sm:$0xff] }
 0x41e   : > { %4081 = vmatprep.subr.bf16.mxu0 %v15526_v38  ;;  %4167 = vmatprep.subr.bf16.mxu1 %v15529_v39  ;;  %v17020_v39 = vld [vmem:[#allocation2 + $0x28] sm:$0xff] }
 0x421   : > { %4082 = vmatpush1.bf16.msra.mxu0 %v15524_v40  ;;  %4168 = vmatpush1.bf16.msra.mxu1 %v15527_v41  ;;  %v17021_v41 = vld [vmem:[#allocation2] sm:$0xff] }
 0x422   : > { %4083 = vmatprep.subr.bf16.mxu0 %v15532_v42  ;;  %4169 = vmatprep.subr.bf16.mxu1 %v15535_v43  ;;  %v17022_v43 = vld [vmem:[#allocation2 + $0x38] sm:$0xff] }
 0x425   : > { %4084 = vmatpush1.bf16.msra.mxu0 %v15530_v44  ;;  %4170 = vmatpush1.bf16.msra.mxu1 %v15533_v45 }
 0x426   : > { %4085 = vmatprep.subr.bf16.mxu0 %v15538_v46  ;;  %4171 = vmatprep.subr.bf16.mxu1 %v15541_v47  ;;  %v15578_v46 = vld [vmem:[%s17872_s29 + $0xa00] ss:$16 sps:$4 sm:$0xff]   ;;  %v15581_v47 = vld [vmem:[%s17872_s29 + $0xa08] ss:$16 sps:$4 sm:$0xff]  }
 0x429   : > { %4086 = vmatpush1.bf16.msra.mxu0 %v15536_v48  ;;  %4172 = vmatpush1.bf16.msra.mxu1 %v15539_v49  ;;  %v17023_v48 = vld [vmem:[#allocation2 + $0x18] sm:$0xff] }
 0x42a   : > { %4087 = vmatprep.subr.bf16.mxu0 %v15544_v50  ;;  %4173 = vmatprep.subr.bf16.mxu1 %v15547_v51  ;;  %v15586_v51 = vld [vmem:[%s17872_s29 + $0xa24] ss:$16 sps:$4 sm:$0xff]  }
 0x42d   : > { %4088 = vmatpush1.bf16.msra.mxu0 %v15542_v52  ;;  %4174 = vmatpush1.bf16.msra.mxu1 %v15545_v53  ;;  %v15589_v52 = vld [vmem:[%s17872_s29 + $0xa2c] ss:$16 sps:$4 sm:$0xff]  }
 0x42e   : > { %4089 = vmatprep.subr.bf16.mxu0 %v15550_v54  ;;  %4175 = vmatprep.subr.bf16.mxu1 %v15553_v55  ;;  %v15584_v54 = vld [vmem:[%s17872_s29 + $0xa20] ss:$16 sps:$4 sm:$0xff]   ;;  %v15587_v55 = vld [vmem:[%s17872_s29 + $0xa28] ss:$16 sps:$4 sm:$0xff]  }
 0x431   : > { %4090 = vmatpush1.bf16.msra.mxu0 %v15548_v56  ;;  %4176 = vmatpush1.bf16.msra.mxu1 %v15551_v57  ;;  %v15592_v56 = vld [vmem:[%s17872_s29 + $0xa44] ss:$16 sps:$4 sm:$0xff]   ;;  %v15595_v57 = vld [vmem:[%s17872_s29 + $0xa4c] ss:$16 sps:$4 sm:$0xff]  }
 0x432   : > { %4091 = vmatprep.subr.bf16.mxu0 %v15556_v58  ;;  %4177 = vmatprep.subr.bf16.mxu1 %v15559_v59  ;;  %v15590_v58 = vld [vmem:[%s17872_s29 + $0xa40] ss:$16 sps:$4 sm:$0xff]   ;;  %v15593_v59 = vld [vmem:[%s17872_s29 + $0xa48] ss:$16 sps:$4 sm:$0xff]  }
 0x435   : > { %4092 = vmatpush1.bf16.msra.mxu0 %v15554_v60  ;;  %4178 = vmatpush1.bf16.msra.mxu1 %v15557_v61  ;;  %v15598_v60 = vld [vmem:[%s17872_s29 + $0xa64] ss:$16 sps:$4 sm:$0xff]   ;;  %v15601_v61 = vld [vmem:[%s17872_s29 + $0xa6c] ss:$16 sps:$4 sm:$0xff]  }
 0x436   : > { %4093 = vmatprep.subr.bf16.mxu0 %v15562_v62  ;;  %4179 = vmatprep.subr.bf16.mxu1 %v15565_v63  ;;  %v15596_v62 = vld [vmem:[%s17872_s29 + $0xa60] ss:$16 sps:$4 sm:$0xff]   ;;  %v15599_v63 = vld [vmem:[%s17872_s29 + $0xa68] ss:$16 sps:$4 sm:$0xff]  }
 0x439   : > { %4094 = vmatpush1.bf16.msra.mxu0 %v15560_v0  ;;  %4180 = vmatpush1.bf16.msra.mxu1 %v15563_v2  ;;  %v15604_v0 = vld [vmem:[%s17872_s29 + $0xa84] ss:$16 sps:$4 sm:$0xff]   ;;  %v15607_v2 = vld [vmem:[%s17872_s29 + $0xa8c] ss:$16 sps:$4 sm:$0xff]  }
 0x43a   : > { %4095 = vmatprep.subr.bf16.mxu0 %v15568_v3  ;;  %4181 = vmatprep.subr.bf16.mxu1 %v15571_v4  ;;  %v15602_v3 = vld [vmem:[%s17872_s29 + $0xa80] ss:$16 sps:$4 sm:$0xff]   ;;  %v15605_v4 = vld [vmem:[%s17872_s29 + $0xa88] ss:$16 sps:$4 sm:$0xff]  }
 0x43d   : > { %4096 = vmatpush1.bf16.msra.mxu0 %v15566_v5  ;;  %4182 = vmatpush1.bf16.msra.mxu1 %v15569_v6  ;;  %v15610_v5 = vld [vmem:[%s17872_s29 + $0xaa4] ss:$16 sps:$4 sm:$0xff]   ;;  %v15613_v6 = vld [vmem:[%s17872_s29 + $0xaac] ss:$16 sps:$4 sm:$0xff]  }
 0x43e   : > { %4097 = vmatprep.subr.bf16.mxu0 %v15574_v7  ;;  %4183 = vmatprep.subr.bf16.mxu1 %v15577_v8  ;;  %v15608_v7 = vld [vmem:[%s17872_s29 + $0xaa0] ss:$16 sps:$4 sm:$0xff]   ;;  %v15611_v8 = vld [vmem:[%s17872_s29 + $0xaa8] ss:$16 sps:$4 sm:$0xff]  }
 0x441   : > { %4098 = vmatpush1.bf16.msra.mxu0 %v15572_v9  ;;  %4184 = vmatpush1.bf16.msra.mxu1 %v15575_v10  ;;  %v15616_v9 = vld [vmem:[%s17872_s29 + $0xac4] ss:$16 sps:$4 sm:$0xff]   ;;  %v15619_v10 = vld [vmem:[%s17872_s29 + $0xacc] ss:$16 sps:$4 sm:$0xff]  }
 0x442   : > { %4110 = vmatprep.subr.bf16.mxu0 %v15580_v11  ;;  %4196 = vmatprep.subr.bf16.mxu1 %v15583_v12  ;;  %v15614_v11 = vld [vmem:[%s17872_s29 + $0xac0] ss:$16 sps:$4 sm:$0xff]   ;;  %v15617_v12 = vld [vmem:[%s17872_s29 + $0xac8] ss:$16 sps:$4 sm:$0xff]  }
 0x4d7   : > { %v3168_v16 = vpop.f32.mrb[4].mxu0  ;;  %v18236_v17 = vpop.f32.mrb[4].mxu1 }
 0x4d8   : > { %v3170_v18 = vpop.f32.mrb[5].mxu0  ;;  %v3256_v1 = vpop.f32.mrb[5].mxu1  ;;  %v14650_v23 = vadd.f32 %v3168_v16, %v2434_v15  ;;  %v15620_v16 = vld [vmem:[%s17872_s29 + $0xae0] ss:$16 sps:$4 sm:$0xff]  }
 0x4d9   : > { %v14651_v20 = vadd.f32 %v3170_v18, %v2438_v14  ;;  %v3172_v21 = vpop.f32.mrb[6].mxu0  ;;  %v18240_v22 = vpop.f32.mrb[6].mxu1  ;;  %v14655_v34 = vadd.f32 %v3256_v1, %v2446_v19  ;;  %v15623_v18 = vld [vmem:[%s17872_s29 + $0xae8] ss:$16 sps:$4 sm:$0xff]   ;;  %v15631_v1 = vld [vmem:[%s17872_s29 + $0xb0c] ss:$16 sps:$4 sm:$0xff]  }
 0x4da   : > { %v14652_v24 = vadd.f32 %v3172_v21, %v2434_v15  ;;  %v3174_v25 = vpop.f32.mrb[7].mxu0  ;;  %v3260_v26 = vpop.f32.mrb[7].mxu1  ;;  %v18248_v42 = vadd.f32 %v17021_v41, %v14650_v23  ;;  %v15625_v15 = vld [vmem:[%s17872_s29 + $0xaec] ss:$16 sps:$4 sm:$0xff]   ;;  %v15629_v21 = vld [vmem:[%s17872_s29 + $0xb08] ss:$16 sps:$4 sm:$0xff]  }
 0x4db   : > { %v14653_v28 = vadd.f32 %v3174_v25, %v2438_v14  ;;  %v14657_v29 = vadd.f32 %v3260_v26, %v2446_v19  ;;  %v18244_v38 = vadd.f32 %v17019_v37, %v14651_v20  ;;  %v18256_v49 = vadd.f32 %v17023_v48, %v14655_v34  ;;  %v15622_v14 = vld [vmem:[%s17872_s29 + $0xae4] ss:$16 sps:$4 sm:$0xff]   ;;  %v15626_v20 = vld [vmem:[%s17872_s29 + $0xb00] ss:$16 sps:$4 sm:$0xff]   ;;  %v15635_v26 = vld [vmem:[%s17872_s29 + $0xb28] ss:$16 sps:$4 sm:$0xff]  }
 0x4dc   : > { %v18242_v36 = vadd.f32 %v17018_v35, %v14652_v24  ;;  %v15628_v19 = vld [vmem:[%s17872_s29 + $0xb04] ss:$16 sps:$4 sm:$0xff]   ;;  %v15637_v24 = vld [vmem:[%s17872_s29 + $0xb2c] ss:$16 sps:$4 sm:$0xff]   ;;  %v15632_v25 = vld [vmem:[%s17872_s29 + $0xb20] ss:$16 sps:$4 sm:$0xff]  }
 0x4dd   : > { %v18246_v40 = vadd.f32 %v17020_v39, %v14653_v28  ;;  %v18250_v44 = vadd.f32 %v17022_v43, %v14657_v29  ;;  %v15634_v23 = vld [vmem:[%s17872_s29 + $0xb24] ss:$16 sps:$4 sm:$0xff]   ;;  %v15643_v29 = vld [vmem:[%s17872_s29 + $0xb4c] ss:$16 sps:$4 sm:$0xff]   ;;  %v15638_v34 = vld [vmem:[%s17872_s29 + $0xb40] ss:$16 sps:$4 sm:$0xff]  }
 0x4de   : > { %v3271_v50 = vpack.c.bf16 %v18242_v36, %v18248_v42  ;;  %v15640_v28 = vld [vmem:[%s17872_s29 + $0xb44] ss:$16 sps:$4 sm:$0xff]   ;;  %v15641_v35 = vld [vmem:[%s17872_s29 + $0xb48] ss:$16 sps:$4 sm:$0xff]   ;;  %v15649_v39 = vld [vmem:[%s17872_s29 + $0xb6c] ss:$16 sps:$4 sm:$0xff]  }
 0x4df   : > { %v3272_v45 = vpack.c.bf16 %v18246_v40, %v18244_v38  ;;  %v3274_v53 = vpack.c.bf16 %v18250_v44, %v18256_v49  ;;  %v15646_v37 = vld [vmem:[%s17872_s29 + $0xb64] ss:$16 sps:$4 sm:$0xff]   ;;  %v15644_v41 = vld [vmem:[%s17872_s29 + $0xb60] ss:$16 sps:$4 sm:$0xff]   ;;  %v15647_v43 = vld [vmem:[%s17872_s29 + $0xb68] ss:$16 sps:$4 sm:$0xff]  }
 0x4e0   : > { %v15653_v48 = vld [vmem:[%s17872_s29 + $0xb88] ss:$16 sps:$4 sm:$0xff]  }
 0x4e1   : > { %4099 = vmatprep.mubr.bf16.mxu0 %v3272_v45  ;;  %4185 = vmatprep.mubr.bf16.mxu1 %v3272_v45  ;;  %v15652_v45 = vld [vmem:[%s17872_s29 + $0xb84] ss:$16 sps:$4 sm:$0xff]  }
 0x4e2   : > { %4100 = vmatmul.mubr.bf16.vlgmr.msra.gmra.mrb[8].mxu0 %v3271_v50  ;;  %4186 = vmatmul.mubr.bf16.vlgmr.msra.gmra.mrb[8].mxu1 %v3271_v50  ;;  %v15658_v50 = vld [vmem:[%s17872_s29 + $0xba4] ss:$16 sps:$4 sm:$0xff]  }
 0x4e3   : > { %4111 = vmatpush1.bf16.msra.mxu0 %v15578_v46  ;;  %4197 = vmatpush1.bf16.msra.mxu1 %v15581_v47  ;;  %v15655_v46 = vld [vmem:[%s17872_s29 + $0xb8c] ss:$16 sps:$4 sm:$0xff]   ;;  %v15650_v47 = vld [vmem:[%s17872_s29 + $0xb80] ss:$16 sps:$4 sm:$0xff]  }
 0x4e4   : > { %4142 = vmatprep.mubr.bf16.mxu0 %v3274_v53  ;;  %4228 = vmatprep.mubr.bf16.mxu1 %v3274_v53  ;;  %v15659_v53 = vld [vmem:[%s17872_s29 + $0xba8] ss:$16 sps:$4 sm:$0xff]  }
 0x4e5   : > { %4112 = vmatprep.subr.bf16.mxu0 %v15586_v51  ;;  %4198 = vmatprep.subr.bf16.mxu1 %v15589_v52  ;;  %v15661_v51 = vld [vmem:[%s17872_s29 + $0xbac] ss:$16 sps:$4 sm:$0xff]   ;;  %v15656_v52 = vld [vmem:[%s17872_s29 + $0xba0] ss:$16 sps:$4 sm:$0xff]  }
 0x4e7   : > { %4113 = vmatpush1.bf16.msra.mxu0 %v15584_v54  ;;  %4199 = vmatpush1.bf16.msra.mxu1 %v15587_v55  ;;  %v15664_v54 = vld [vmem:[%s17872_s29 + $0xbc4] ss:$16 sps:$4 sm:$0xff]   ;;  %v15667_v55 = vld [vmem:[%s17872_s29 + $0xbcc] ss:$16 sps:$4 sm:$0xff]  }
 0x4e8   : > { %4114 = vmatprep.subr.bf16.mxu0 %v15592_v56  ;;  %4200 = vmatprep.subr.bf16.mxu1 %v15595_v57  ;;  %v2442_v56 = vrot.slane %v18230_v13, %v18087_v31  ;;  %v15662_v57 = vld [vmem:[%s17872_s29 + $0xbc0] ss:$16 sps:$4 sm:$0xff]   ;;  %v15671_v13 = vld [vmem:[%s17872_s29 + $0xbe8] ss:$16 sps:$4 sm:$0xff]  }
 0x4eb   : > { %4115 = vmatpush1.bf16.msra.mxu0 %v15590_v58  ;;  %4201 = vmatpush1.bf16.msra.mxu1 %v15593_v59  ;;  %v15665_v58 = vld [vmem:[%s17872_s29 + $0xbc8] ss:$16 sps:$4 sm:$0xff]   ;;  %v14656_v59 = vadd.f32 %v18240_v22, %v2442_v56  ;;  %v15676_v22 = vld [vmem:[%s17872_s29 + $0xc04] ss:$16 sps:$4 sm:$0xff]  }
 0x4ec   : > { %4116 = vmatprep.subr.bf16.mxu0 %v15598_v60  ;;  %4202 = vmatprep.subr.bf16.mxu1 %v15601_v61  ;;  %v15670_v60 = vld [vmem:[%s17872_s29 + $0xbe4] ss:$16 sps:$4 sm:$0xff]   ;;  %v15673_v61 = vld [vmem:[%s17872_s29 + $0xbec] ss:$16 sps:$4 sm:$0xff]  }
 0x4ef   : > { %4117 = vmatpush1.bf16.msra.mxu0 %v15596_v62  ;;  %4203 = vmatpush1.bf16.msra.mxu1 %v15599_v63  ;;  %v14654_v62 = vadd.f32 %v18236_v17, %v2442_v56  ;;  %v15668_v63 = vld [vmem:[%s17872_s29 + $0xbe0] ss:$16 sps:$4 sm:$0xff]   ;;  %v15731_v56 = vld [vmem:[%s17872_s29 + $0xd28] ss:$16 sps:$4 sm:$0xff]  }
 0x4f0   : > { %4118 = vmatprep.subr.bf16.mxu0 %v15604_v0  ;;  %4204 = vmatprep.subr.bf16.mxu1 %v15607_v2  ;;  %v17024_v0 = vld [vmem:[#allocation2 + $0x30] sm:$0xff] }
 0x4f1   : > { %v18326_v2 = vadd.f32 %v17024_v0, %v14656_v59  ;;  %v15674_v17 = vld [vmem:[%s17872_s29 + $0xc00] ss:$16 sps:$4 sm:$0xff]   ;;  %v15748_v0 = vld [vmem:[%s17872_s29 + $0xd84] ss:$16 sps:$4 sm:$0xff]  }
 0x4f2   : > { %v15734_v59 = vld [vmem:[%s17872_s29 + $0xd40] ss:$16 sps:$4 sm:$0xff]  }
 0x4f3   : > { %4119 = vmatpush1.bf16.msra.mxu0 %v15602_v3  ;;  %4205 = vmatpush1.bf16.msra.mxu1 %v15605_v4  ;;  %v15679_v3 = vld [vmem:[%s17872_s29 + $0xc0c] ss:$16 sps:$4 sm:$0xff]  }
 0x4f4   : > { %4120 = vmatprep.subr.bf16.mxu0 %v15610_v5  ;;  %4206 = vmatprep.subr.bf16.mxu1 %v15613_v6  ;;  %v17025_v4 = vld [vmem:[#allocation2 + $0x10] sm:$0xff]  ;;  %v15677_v6 = vld [vmem:[%s17872_s29 + $0xc08] ss:$16 sps:$4 sm:$0xff]  }
 0x4f5   : > { %v18330_v5 = vadd.f32 %v17025_v4, %v14654_v62  ;;  %v15745_v62 = vld [vmem:[%s17872_s29 + $0xd6c] ss:$16 sps:$4 sm:$0xff]   ;;  %v15749_v4 = vld [vmem:[%s17872_s29 + $0xd88] ss:$16 sps:$4 sm:$0xff]  }
 0x4f7   : > { %4121 = vmatpush1.bf16.msra.mxu0 %v15608_v7  ;;  %4207 = vmatpush1.bf16.msra.mxu1 %v15611_v8  ;;  %v3273_v7 = vpack.c.bf16 %v18326_v2, %v18330_v5  ;;  %v15682_v8 = vld [vmem:[%s17872_s29 + $0xc24] ss:$16 sps:$4 sm:$0xff]  }
 0x4f8   : > { %4122 = vmatprep.subr.bf16.mxu0 %v15616_v9  ;;  %4208 = vmatprep.subr.bf16.mxu1 %v15619_v10  ;;  %v15685_v9 = vld [vmem:[%s17872_s29 + $0xc2c] ss:$16 sps:$4 sm:$0xff]   ;;  %v15680_v10 = vld [vmem:[%s17872_s29 + $0xc20] ss:$16 sps:$4 sm:$0xff]  }
 0x4fb   : > { %4123 = vmatpush1.bf16.msra.mxu0 %v15614_v11  ;;  %4209 = vmatpush1.bf16.msra.mxu1 %v15617_v12  ;;  %v15683_v11 = vld [vmem:[%s17872_s29 + $0xc28] ss:$16 sps:$4 sm:$0xff]   ;;  %v15688_v12 = vld [vmem:[%s17872_s29 + $0xc44] ss:$16 sps:$4 sm:$0xff]  }
 0x4fc   : > { %4124 = vmatprep.subr.bf16.mxu0 %v15622_v14  ;;  %4210 = vmatprep.subr.bf16.mxu1 %v15625_v15  ;;  %v15691_v14 = vld [vmem:[%s17872_s29 + $0xc4c] ss:$16 sps:$4 sm:$0xff]   ;;  %v15686_v15 = vld [vmem:[%s17872_s29 + $0xc40] ss:$16 sps:$4 sm:$0xff]  }
 0x4ff   : > { %4125 = vmatpush1.bf16.msra.mxu0 %v15620_v16  ;;  %4211 = vmatpush1.bf16.msra.mxu1 %v15623_v18  ;;  %v15689_v16 = vld [vmem:[%s17872_s29 + $0xc48] ss:$16 sps:$4 sm:$0xff]   ;;  %v15694_v18 = vld [vmem:[%s17872_s29 + $0xc64] ss:$16 sps:$4 sm:$0xff]  }
 0x500   : > { %4126 = vmatprep.subr.bf16.mxu0 %v15628_v19  ;;  %4212 = vmatprep.subr.bf16.mxu1 %v15631_v1  ;;  %v15697_v19 = vld [vmem:[%s17872_s29 + $0xc6c] ss:$16 sps:$4 sm:$0xff]   ;;  %v15692_v1 = vld [vmem:[%s17872_s29 + $0xc60] ss:$16 sps:$4 sm:$0xff]  }
 0x503   : > { %4127 = vmatpush1.bf16.msra.mxu0 %v15626_v20  ;;  %4213 = vmatpush1.bf16.msra.mxu1 %v15629_v21  ;;  %v15695_v20 = vld [vmem:[%s17872_s29 + $0xc68] ss:$16 sps:$4 sm:$0xff]   ;;  %v15700_v21 = vld [vmem:[%s17872_s29 + $0xc84] ss:$16 sps:$4 sm:$0xff]  }
 0x504   : > { %4128 = vmatprep.subr.bf16.mxu0 %v15634_v23  ;;  %4214 = vmatprep.subr.bf16.mxu1 %v15637_v24  ;;  %v15703_v23 = vld [vmem:[%s17872_s29 + $0xc8c] ss:$16 sps:$4 sm:$0xff]   ;;  %v15698_v24 = vld [vmem:[%s17872_s29 + $0xc80] ss:$16 sps:$4 sm:$0xff]  }
 0x507   : > { %4129 = vmatpush1.bf16.msra.mxu0 %v15632_v25  ;;  %4215 = vmatpush1.bf16.msra.mxu1 %v15635_v26  ;;  %v15701_v25 = vld [vmem:[%s17872_s29 + $0xc88] ss:$16 sps:$4 sm:$0xff]   ;;  %v15706_v26 = vld [vmem:[%s17872_s29 + $0xca4] ss:$16 sps:$4 sm:$0xff]  }
 0x508   : > { %4130 = vmatprep.subr.bf16.mxu0 %v15640_v28  ;;  %4216 = vmatprep.subr.bf16.mxu1 %v15643_v29  ;;  %v15709_v28 = vld [vmem:[%s17872_s29 + $0xcac] ss:$16 sps:$4 sm:$0xff]   ;;  %v15704_v29 = vld [vmem:[%s17872_s29 + $0xca0] ss:$16 sps:$4 sm:$0xff]  }
 0x50b   : > { %4131 = vmatpush1.bf16.msra.mxu0 %v15638_v34  ;;  %4217 = vmatpush1.bf16.msra.mxu1 %v15641_v35  ;;  %v15707_v34 = vld [vmem:[%s17872_s29 + $0xca8] ss:$16 sps:$4 sm:$0xff]   ;;  %v15712_v35 = vld [vmem:[%s17872_s29 + $0xcc4] ss:$16 sps:$4 sm:$0xff]  }
 0x50c   : > { %4132 = vmatprep.subr.bf16.mxu0 %v15646_v37  ;;  %4218 = vmatprep.subr.bf16.mxu1 %v15649_v39  ;;  %v15715_v37 = vld [vmem:[%s17872_s29 + $0xccc] ss:$16 sps:$4 sm:$0xff]   ;;  %v15710_v39 = vld [vmem:[%s17872_s29 + $0xcc0] ss:$16 sps:$4 sm:$0xff]  }
 0x50f   : > { %4133 = vmatpush1.bf16.msra.mxu0 %v15644_v41  ;;  %4219 = vmatpush1.bf16.msra.mxu1 %v15647_v43  ;;  %v15713_v41 = vld [vmem:[%s17872_s29 + $0xcc8] ss:$16 sps:$4 sm:$0xff]   ;;  %v15718_v43 = vld [vmem:[%s17872_s29 + $0xce4] ss:$16 sps:$4 sm:$0xff]  }
 0x510   : > { %4134 = vmatprep.subr.bf16.mxu0 %v15652_v45  ;;  %4220 = vmatprep.subr.bf16.mxu1 %v15655_v46  ;;  %v15721_v45 = vld [vmem:[%s17872_s29 + $0xcec] ss:$16 sps:$4 sm:$0xff]   ;;  %v15716_v46 = vld [vmem:[%s17872_s29 + $0xce0] ss:$16 sps:$4 sm:$0xff]  }
 0x513   : > { %4135 = vmatpush1.bf16.msra.mxu0 %v15650_v47  ;;  %4221 = vmatpush1.bf16.msra.mxu1 %v15653_v48  ;;  %v15719_v47 = vld [vmem:[%s17872_s29 + $0xce8] ss:$16 sps:$4 sm:$0xff]   ;;  %v15724_v48 = vld [vmem:[%s17872_s29 + $0xd04] ss:$16 sps:$4 sm:$0xff]  }
 0x514   : > { %4136 = vmatprep.subr.bf16.mxu0 %v15658_v50  ;;  %4222 = vmatprep.subr.bf16.mxu1 %v15661_v51  ;;  %v15727_v50 = vld [vmem:[%s17872_s29 + $0xd0c] ss:$16 sps:$4 sm:$0xff]   ;;  %v15722_v51 = vld [vmem:[%s17872_s29 + $0xd00] ss:$16 sps:$4 sm:$0xff]  }
 0x517   : > { %4137 = vmatpush1.bf16.msra.mxu0 %v15656_v52  ;;  %4223 = vmatpush1.bf16.msra.mxu1 %v15659_v53  ;;  %v15725_v52 = vld [vmem:[%s17872_s29 + $0xd08] ss:$16 sps:$4 sm:$0xff]   ;;  %v15730_v53 = vld [vmem:[%s17872_s29 + $0xd24] ss:$16 sps:$4 sm:$0xff]  }
 0x518   : > { %4138 = vmatprep.subr.bf16.mxu0 %v15664_v54  ;;  %4224 = vmatprep.subr.bf16.mxu1 %v15667_v55  ;;  %v15733_v54 = vld [vmem:[%s17872_s29 + $0xd2c] ss:$16 sps:$4 sm:$0xff]   ;;  %v15728_v55 = vld [vmem:[%s17872_s29 + $0xd20] ss:$16 sps:$4 sm:$0xff]  }
 0x51b   : > { %4139 = vmatpush1.bf16.msra.mxu0 %v15662_v57  ;;  %4225 = vmatpush1.bf16.msra.mxu1 %v15665_v58  ;;  %v15736_v57 = vld [vmem:[%s17872_s29 + $0xd44] ss:$16 sps:$4 sm:$0xff]   ;;  %v15739_v58 = vld [vmem:[%s17872_s29 + $0xd4c] ss:$16 sps:$4 sm:$0xff]  }
 0x51c   : > { %4140 = vmatprep.subr.bf16.mxu0 %v15670_v60  ;;  %4226 = vmatprep.subr.bf16.mxu1 %v15673_v61  ;;  %v15737_v60 = vld [vmem:[%s17872_s29 + $0xd48] ss:$16 sps:$4 sm:$0xff]   ;;  %v15742_v61 = vld [vmem:[%s17872_s29 + $0xd64] ss:$16 sps:$4 sm:$0xff]  }
 0x51f   : > { %4141 = vmatpush1.bf16.msra.mxu0 %v15668_v63  ;;  %4227 = vmatpush1.bf16.msra.mxu1 %v15671_v13  ;;  %v15740_v63 = vld [vmem:[%s17872_s29 + $0xd60] ss:$16 sps:$4 sm:$0xff]   ;;  %v15743_v13 = vld [vmem:[%s17872_s29 + $0xd68] ss:$16 sps:$4 sm:$0xff]  }
 0x520   : > { %5043 = vmatprep.subr.bf16.mxu0 %v15676_v22  ;;  %5129 = vmatprep.subr.bf16.mxu1 %v15679_v3  ;;  %v15751_v22 = vld [vmem:[%s17872_s29 + $0xd8c] ss:$16 sps:$4 sm:$0xff]   ;;  %v15746_v3 = vld [vmem:[%s17872_s29 + $0xd80] ss:$16 sps:$4 sm:$0xff]  }
 0x522   : > { %4143 = vmatmul.mubr.bf16.vlgmr.msra.gmra.mrb[8].mxu0 %v3273_v7  ;;  %4229 = vmatmul.mubr.bf16.vlgmr.msra.gmra.mrb[8].mxu1 %v3273_v7  ;;  %v15752_v7 = vld [vmem:[%s17872_s29 + $0xda0] ss:$16 sps:$4 sm:$0xff]  }
 0x523   : > { %5044 = vmatpush1.bf16.msra.mxu0 %v15674_v17  ;;  %5130 = vmatpush1.bf16.msra.mxu1 %v15677_v6  ;;  %v15754_v17 = vld [vmem:[%s17872_s29 + $0xda4] ss:$16 sps:$4 sm:$0xff]   ;;  %v15757_v6 = vld [vmem:[%s17872_s29 + $0xdac] ss:$16 sps:$4 sm:$0xff]  }
 0x524   : > { %5045 = vmatprep.subr.bf16.mxu0 %v15682_v8  ;;  %5131 = vmatprep.subr.bf16.mxu1 %v15685_v9  ;;  %v15755_v8 = vld [vmem:[%s17872_s29 + $0xda8] ss:$16 sps:$4 sm:$0xff]   ;;  %v15760_v9 = vld [vmem:[%s17872_s29 + $0xdc4] ss:$16 sps:$4 sm:$0xff]  }
 0x527   : > { %5046 = vmatpush1.bf16.msra.mxu0 %v15680_v10  ;;  %5132 = vmatpush1.bf16.msra.mxu1 %v15683_v11  ;;  %v15763_v10 = vld [vmem:[%s17872_s29 + $0xdcc] ss:$16 sps:$4 sm:$0xff]   ;;  %v15758_v11 = vld [vmem:[%s17872_s29 + $0xdc0] ss:$16 sps:$4 sm:$0xff]  }
 0x528   : > { %5047 = vmatprep.subr.bf16.mxu0 %v15688_v12  ;;  %5133 = vmatprep.subr.bf16.mxu1 %v15691_v14  ;;  %v15761_v12 = vld [vmem:[%s17872_s29 + $0xdc8] ss:$16 sps:$4 sm:$0xff]   ;;  %v15766_v14 = vld [vmem:[%s17872_s29 + $0xde4] ss:$16 sps:$4 sm:$0xff]  }
 0x52b   : > { %5048 = vmatpush1.bf16.msra.mxu0 %v15686_v15  ;;  %5134 = vmatpush1.bf16.msra.mxu1 %v15689_v16  ;;  %v15769_v15 = vld [vmem:[%s17872_s29 + $0xdec] ss:$16 sps:$4 sm:$0xff]   ;;  %v15764_v16 = vld [vmem:[%s17872_s29 + $0xde0] ss:$16 sps:$4 sm:$0xff]  }
 0x52c   : > { %5049 = vmatprep.subr.bf16.mxu0 %v15694_v18  ;;  %5135 = vmatprep.subr.bf16.mxu1 %v15697_v19  ;;  %v15767_v18 = vld [vmem:[%s17872_s29 + $0xde8] ss:$16 sps:$4 sm:$0xff]   ;;  %v15772_v19 = vld [vmem:[%s17872_s29 + $0xe04] ss:$16 sps:$4 sm:$0xff]  }
 0x52f   : > { %5050 = vmatpush1.bf16.msra.mxu0 %v15692_v1  ;;  %5136 = vmatpush1.bf16.msra.mxu1 %v15695_v20  ;;  %v15775_v1 = vld [vmem:[%s17872_s29 + $0xe0c] ss:$16 sps:$4 sm:$0xff]   ;;  %v12584_v20 = vld [vmem:[%s17878_s24 + $0x8] sm:$0xf] }
 0x530   : > { %5051 = vmatprep.subr.bf16.mxu0 %v15700_v21  ;;  %5137 = vmatprep.subr.bf16.mxu1 %v15703_v23  ;;  %v3410_v21 = vrot.slane %v12584_v20, %v18085_v30  ;;  %v3418_v23 = vrot.slane %v12584_v20, %v18087_v31 }
 0x533   : > { %5052 = vmatpush1.bf16.msra.mxu0 %v15698_v24  ;;  %5138 = vmatpush1.bf16.msra.mxu1 %v15701_v25  ;;  %v3414_v24 = vrot.slane %v12584_v20, %v18089_v32  ;;  %v3422_v25 = vrot.slane %v12584_v20, %v18091_v33  ;;  %v15802_v20 = vld [vmem:[%s17872_s29 + $0xea4] ss:$16 sps:$4 sm:$0xff]  }
 0x534   : > { %5053 = vmatprep.subr.bf16.mxu0 %v15706_v26  ;;  %5139 = vmatprep.subr.bf16.mxu1 %v15709_v28 }
 0x537   : > { %5054 = vmatpush1.bf16.msra.mxu0 %v15704_v29  ;;  %5140 = vmatpush1.bf16.msra.mxu1 %v15707_v34 }
 0x538   : > { %5055 = vmatprep.subr.bf16.mxu0 %v15712_v35  ;;  %5141 = vmatprep.subr.bf16.mxu1 %v15715_v37 }
 0x53b   : > { %5056 = vmatpush1.bf16.msra.mxu0 %v15710_v39  ;;  %5142 = vmatpush1.bf16.msra.mxu1 %v15713_v41 }
 0x53c   : > { %5057 = vmatprep.subr.bf16.mxu0 %v15718_v43  ;;  %5143 = vmatprep.subr.bf16.mxu1 %v15721_v45 }
 0x53f   : > { %5058 = vmatpush1.bf16.msra.mxu0 %v15716_v46  ;;  %5144 = vmatpush1.bf16.msra.mxu1 %v15719_v47 }
 0x540   : > { %5059 = vmatprep.subr.bf16.mxu0 %v15724_v48  ;;  %5145 = vmatprep.subr.bf16.mxu1 %v15727_v50 }
 0x543   : > { %5060 = vmatpush1.bf16.msra.mxu0 %v15722_v51  ;;  %5146 = vmatpush1.bf16.msra.mxu1 %v15725_v52 }
 0x544   : > { %5061 = vmatprep.subr.bf16.mxu0 %v15730_v53  ;;  %5147 = vmatprep.subr.bf16.mxu1 %v15733_v54 }
 0x547   : > { %5062 = vmatpush1.bf16.msra.mxu0 %v15728_v55  ;;  %5148 = vmatpush1.bf16.msra.mxu1 %v15731_v56 }
 0x548   : > { %5063 = vmatprep.subr.bf16.mxu0 %v15736_v57  ;;  %5149 = vmatprep.subr.bf16.mxu1 %v15739_v58 }
 0x54b   : > { %5064 = vmatpush1.bf16.msra.mxu0 %v15734_v59  ;;  %5150 = vmatpush1.bf16.msra.mxu1 %v15737_v60 }
 0x54c   : > { %5065 = vmatprep.subr.bf16.mxu0 %v15742_v61  ;;  %5151 = vmatprep.subr.bf16.mxu1 %v15745_v62 }
 0x54f   : > { %5066 = vmatpush1.bf16.msra.mxu0 %v15740_v63  ;;  %5152 = vmatpush1.bf16.msra.mxu1 %v15743_v13 }
 0x550   : > { %5067 = vmatprep.subr.bf16.mxu0 %v15748_v0  ;;  %5153 = vmatprep.subr.bf16.mxu1 %v15751_v22  ;;  %v15770_v0 = vld [vmem:[%s17872_s29 + $0xe00] ss:$16 sps:$4 sm:$0xff]   ;;  %v15773_v22 = vld [vmem:[%s17872_s29 + $0xe08] ss:$16 sps:$4 sm:$0xff]  }
 0x553   : > { %5068 = vmatpush1.bf16.msra.mxu0 %v15746_v3  ;;  %5154 = vmatpush1.bf16.msra.mxu1 %v15749_v4  ;;  %v15778_v3 = vld [vmem:[%s17872_s29 + $0xe24] ss:$16 sps:$4 sm:$0xff]   ;;  %v15781_v4 = vld [vmem:[%s17872_s29 + $0xe2c] ss:$16 sps:$4 sm:$0xff]  }
 0x554   : > { %5069 = vmatprep.subr.bf16.mxu0 %v15754_v17  ;;  %5155 = vmatprep.subr.bf16.mxu1 %v15757_v6  ;;  %v15776_v17 = vld [vmem:[%s17872_s29 + $0xe20] ss:$16 sps:$4 sm:$0xff]   ;;  %v15779_v6 = vld [vmem:[%s17872_s29 + $0xe28] ss:$16 sps:$4 sm:$0xff]  }
 0x557   : > { %5070 = vmatpush1.bf16.msra.mxu0 %v15752_v7  ;;  %5156 = vmatpush1.bf16.msra.mxu1 %v15755_v8  ;;  %v15784_v7 = vld [vmem:[%s17872_s29 + $0xe44] ss:$16 sps:$4 sm:$0xff]   ;;  %v15787_v8 = vld [vmem:[%s17872_s29 + $0xe4c] ss:$16 sps:$4 sm:$0xff]  }
 0x558   : > { %5071 = vmatprep.subr.bf16.mxu0 %v15760_v9  ;;  %5157 = vmatprep.subr.bf16.mxu1 %v15763_v10  ;;  %v15782_v9 = vld [vmem:[%s17872_s29 + $0xe40] ss:$16 sps:$4 sm:$0xff]   ;;  %v15785_v10 = vld [vmem:[%s17872_s29 + $0xe48] ss:$16 sps:$4 sm:$0xff]  }
 0x55b   : > { %5072 = vmatpush1.bf16.msra.mxu0 %v15758_v11  ;;  %5158 = vmatpush1.bf16.msra.mxu1 %v15761_v12  ;;  %v15790_v11 = vld [vmem:[%s17872_s29 + $0xe64] ss:$16 sps:$4 sm:$0xff]   ;;  %v15793_v12 = vld [vmem:[%s17872_s29 + $0xe6c] ss:$16 sps:$4 sm:$0xff]  }
 0x55c   : > { %5073 = vmatprep.subr.bf16.mxu0 %v15766_v14  ;;  %5159 = vmatprep.subr.bf16.mxu1 %v15769_v15  ;;  %v15788_v14 = vld [vmem:[%s17872_s29 + $0xe60] ss:$16 sps:$4 sm:$0xff]   ;;  %v15791_v15 = vld [vmem:[%s17872_s29 + $0xe68] ss:$16 sps:$4 sm:$0xff]  }
 0x55f   : > { %5074 = vmatpush1.bf16.msra.mxu0 %v15764_v16  ;;  %5160 = vmatpush1.bf16.msra.mxu1 %v15767_v18  ;;  %v15796_v16 = vld [vmem:[%s17872_s29 + $0xe84] ss:$16 sps:$4 sm:$0xff]   ;;  %v15799_v18 = vld [vmem:[%s17872_s29 + $0xe8c] ss:$16 sps:$4 sm:$0xff]  }
 0x560   : > { %5086 = vmatprep.subr.bf16.mxu0 %v15772_v19  ;;  %5172 = vmatprep.subr.bf16.mxu1 %v15775_v1  ;;  %v15794_v19 = vld [vmem:[%s17872_s29 + $0xe80] ss:$16 sps:$4 sm:$0xff]   ;;  %v15797_v1 = vld [vmem:[%s17872_s29 + $0xe88] ss:$16 sps:$4 sm:$0xff]  }
 0x5f5   : > { %v4144_v26 = vpop.f32.mrb[8].mxu0  ;;  %v4230_v28 = vpop.f32.mrb[8].mxu1 }
 0x5f6   : > { %v14658_v29 = vadd.f32 %v4144_v26, %v3410_v21  ;;  %v14662_v34 = vadd.f32 %v4230_v28, %v3418_v23  ;;  %v4146_v35 = vpop.f32.mrb[9].mxu0  ;;  %v4232_v37 = vpop.f32.mrb[9].mxu1  ;;  %v15811_v26 = vld [vmem:[%s17872_s29 + $0xecc] ss:$16 sps:$4 sm:$0xff]   ;;  %v15806_v28 = vld [vmem:[%s17872_s29 + $0xec0] ss:$16 sps:$4 sm:$0xff]  }
 0x5f7   : > { %v14659_v39 = vadd.f32 %v4146_v35, %v3414_v24  ;;  %v14663_v41 = vadd.f32 %v4232_v37, %v3422_v25  ;;  %v4148_v43 = vpop.f32.mrb[10].mxu0  ;;  %v4234_v45 = vpop.f32.mrb[10].mxu1  ;;  %v15817_v35 = vld [vmem:[%s17872_s29 + $0xeec] ss:$16 sps:$4 sm:$0xff]   ;;  %v15812_v37 = vld [vmem:[%s17872_s29 + $0xee0] ss:$16 sps:$4 sm:$0xff]  }
 0x5f8   : > { %v14660_v46 = vadd.f32 %v4148_v43, %v3410_v21  ;;  %v14664_v47 = vadd.f32 %v4234_v45, %v3418_v23  ;;  %v4150_v48 = vpop.f32.mrb[11].mxu0  ;;  %v4236_v50 = vpop.f32.mrb[11].mxu1  ;;  %v4239_v53 = vmax.f32 %v14658_v29, 0.0  ;;  %v4241_v54 = vmax.f32 %v14662_v34, 0.0  ;;  %v15805_v21 = vld [vmem:[%s17872_s29 + $0xeac] ss:$16 sps:$4 sm:$0xff]  }
 0x5f9   : > { %v14661_v51 = vadd.f32 %v4150_v48, %v3414_v24  ;;  %v14665_v52 = vadd.f32 %v4236_v50, %v3422_v25  ;;  %v4240_v57 = vmax.f32 %v14659_v39, 0.0  ;;  %v4242_v58 = vmax.f32 %v14663_v41, 0.0  ;;  %v15800_v23 = vld [vmem:[%s17872_s29 + $0xea0] ss:$16 sps:$4 sm:$0xff]   ;;  %v15803_v24 = vld [vmem:[%s17872_s29 + $0xea8] ss:$16 sps:$4 sm:$0xff]  }
 0x5fa   : > { %v4243_v55 = vmax.f32 %v14660_v46, 0.0  ;;  %v4245_v56 = vmax.f32 %v14664_v47, 0.0  ;;  %v15808_v25 = vld [vmem:[%s17872_s29 + $0xec4] ss:$16 sps:$4 sm:$0xff]   ;;  %v15809_v29 = vld [vmem:[%s17872_s29 + $0xec8] ss:$16 sps:$4 sm:$0xff]  }
 0x5fb   : > { %v4244_v59 = vmax.f32 %v14661_v51, 0.0  ;;  %v4246_v60 = vmax.f32 %v14665_v52, 0.0  ;;  %v15814_v34 = vld [vmem:[%s17872_s29 + $0xee4] ss:$16 sps:$4 sm:$0xff]   ;;  %v15815_v39 = vld [vmem:[%s17872_s29 + $0xee8] ss:$16 sps:$4 sm:$0xff]  }
 0x5fc   : > { %v4247_v61 = vpack.c.bf16 %v4243_v55, %v4239_v53  ;;  %v18403_v62 = vpack.c.bf16 %v4245_v56, %v4241_v54  ;;  %v15820_v41 = vld [vmem:[%s17872_s29 + $0xf04] ss:$16 sps:$4 sm:$0xff]   ;;  %v15823_v43 = vld [vmem:[%s17872_s29 + $0xf0c] ss:$16 sps:$4 sm:$0xff]   ;;  %v15818_v45 = vld [vmem:[%s17872_s29 + $0xf00] ss:$16 sps:$4 sm:$0xff]  }
 0x5fd   : > { %v4248_v63 = vpack.c.bf16 %v4244_v59, %v4240_v57  ;;  %v4250_v13 = vpack.c.bf16 %v4246_v60, %v4242_v58  ;;  %v15821_v46 = vld [vmem:[%s17872_s29 + $0xf08] ss:$16 sps:$4 sm:$0xff]   ;;  %v15826_v47 = vld [vmem:[%s17872_s29 + $0xf24] ss:$16 sps:$4 sm:$0xff]   ;;  %v15829_v48 = vld [vmem:[%s17872_s29 + $0xf2c] ss:$16 sps:$4 sm:$0xff]  }
 0x5fe   : > { %v15824_v50 = vld [vmem:[%s17872_s29 + $0xf20] ss:$16 sps:$4 sm:$0xff]   ;;  %v15827_v51 = vld [vmem:[%s17872_s29 + $0xf28] ss:$16 sps:$4 sm:$0xff]   ;;  %v15832_v52 = vld [vmem:[%s17872_s29 + $0xf44] ss:$16 sps:$4 sm:$0xff]  }
 0x5ff   : > { %5075 = vmatprep.mubr.bf16.mxu0 %v4248_v63  ;;  %5161 = vmatprep.mubr.bf16.mxu1 %v4248_v63  ;;  %v15835_v53 = vld [vmem:[%s17872_s29 + $0xf4c] ss:$16 sps:$4 sm:$0xff]   ;;  %v15830_v54 = vld [vmem:[%s17872_s29 + $0xf40] ss:$16 sps:$4 sm:$0xff]   ;;  %v15833_v55 = vld [vmem:[%s17872_s29 + $0xf48] ss:$16 sps:$4 sm:$0xff]  }
 0x600   : > { %5076 = vmatmul.mubr.bf16.vlgmr.msra.gmra.mrb[12].mxu0 %v4247_v61  ;;  %5162 = vmatmul.mubr.bf16.vlgmr.msra.gmra.mrb[12].mxu1 %v4247_v61  ;;  %v15838_v56 = vld [vmem:[%s17872_s29 + $0xf64] ss:$16 sps:$4 sm:$0xff]   ;;  %v15841_v57 = vld [vmem:[%s17872_s29 + $0xf6c] ss:$16 sps:$4 sm:$0xff]   ;;  %v15836_v58 = vld [vmem:[%s17872_s29 + $0xf60] ss:$16 sps:$4 sm:$0xff]  }
 0x601   : > { %5087 = vmatpush1.bf16.msra.mxu0 %v15770_v0  ;;  %5173 = vmatpush1.bf16.msra.mxu1 %v15773_v22  ;;  %v15839_v59 = vld [vmem:[%s17872_s29 + $0xf68] ss:$16 sps:$4 sm:$0xff]   ;;  %v15844_v60 = vld [vmem:[%s17872_s29 + $0xf84] ss:$16 sps:$4 sm:$0xff]   ;;  %v15847_v61 = vld [vmem:[%s17872_s29 + $0xf8c] ss:$16 sps:$4 sm:$0xff]  }
 0x602   : > { %5118 = vmatprep.mubr.bf16.mxu0 %v4250_v13  ;;  %5204 = vmatprep.mubr.bf16.mxu1 %v4250_v13  ;;  %v15842_v63 = vld [vmem:[%s17872_s29 + $0xf80] ss:$16 sps:$4 sm:$0xff]   ;;  %v15845_v13 = vld [vmem:[%s17872_s29 + $0xf88] ss:$16 sps:$4 sm:$0xff]   ;;  %v15850_v0 = vld [vmem:[%s17872_s29 + $0xfa4] ss:$16 sps:$4 sm:$0xff]  }
 0x603   : > { %5088 = vmatprep.subr.bf16.mxu0 %v15778_v3  ;;  %5174 = vmatprep.subr.bf16.mxu1 %v15781_v4  ;;  %v15853_v22 = vld [vmem:[%s17872_s29 + $0xfac] ss:$16 sps:$4 sm:$0xff]   ;;  %v15848_v3 = vld [vmem:[%s17872_s29 + $0xfa0] ss:$16 sps:$4 sm:$0xff]   ;;  %v15851_v4 = vld [vmem:[%s17872_s29 + $0xfa8] ss:$16 sps:$4 sm:$0xff]  }
 0x605   : > { %5089 = vmatpush1.bf16.msra.mxu0 %v15776_v17  ;;  %5175 = vmatpush1.bf16.msra.mxu1 %v15779_v6  ;;  %v15856_v17 = vld [vmem:[%s17872_s29 + $0xfc4] ss:$16 sps:$4 sm:$0xff]   ;;  %v15859_v6 = vld [vmem:[%s17872_s29 + $0xfcc] ss:$16 sps:$4 sm:$0xff]  }
 0x606   : > { %5090 = vmatprep.subr.bf16.mxu0 %v15784_v7  ;;  %5176 = vmatprep.subr.bf16.mxu1 %v15787_v8  ;;  %v15854_v7 = vld [vmem:[%s17872_s29 + $0xfc0] ss:$16 sps:$4 sm:$0xff]   ;;  %v15857_v8 = vld [vmem:[%s17872_s29 + $0xfc8] ss:$16 sps:$4 sm:$0xff]  }
 0x609   : > { %5091 = vmatpush1.bf16.msra.mxu0 %v15782_v9  ;;  %5177 = vmatpush1.bf16.msra.mxu1 %v15785_v10  ;;  %v15862_v9 = vld [vmem:[%s17872_s29 + $0xfe4] ss:$16 sps:$4 sm:$0xff]   ;;  %v15865_v10 = vld [vmem:[%s17872_s29 + $0xfec] ss:$16 sps:$4 sm:$0xff]  }
 0x60a   : > { %5092 = vmatprep.subr.bf16.mxu0 %v15790_v11  ;;  %5178 = vmatprep.subr.bf16.mxu1 %v15793_v12  ;;  %v15860_v11 = vld [vmem:[%s17872_s29 + $0xfe0] ss:$16 sps:$4 sm:$0xff]   ;;  %v15863_v12 = vld [vmem:[%s17872_s29 + $0xfe8] ss:$16 sps:$4 sm:$0xff]  }
 0x60d   : > { %5093 = vmatpush1.bf16.msra.mxu0 %v15788_v14  ;;  %5179 = vmatpush1.bf16.msra.mxu1 %v15791_v15  ;;  %v15868_v14 = vld [vmem:[%s17872_s29 + $0x1004] ss:$16 sps:$4 sm:$0xff]   ;;  %v15871_v15 = vld [vmem:[%s17872_s29 + $0x100c] ss:$16 sps:$4 sm:$0xff]  }
 0x60e   : > { %5094 = vmatprep.subr.bf16.mxu0 %v15796_v16  ;;  %5180 = vmatprep.subr.bf16.mxu1 %v15799_v18  ;;  %v15866_v16 = vld [vmem:[%s17872_s29 + $0x1000] ss:$16 sps:$4 sm:$0xff]   ;;  %v15869_v18 = vld [vmem:[%s17872_s29 + $0x1008] ss:$16 sps:$4 sm:$0xff]  }
 0x611   : > { %5095 = vmatpush1.bf16.msra.mxu0 %v15794_v19  ;;  %5181 = vmatpush1.bf16.msra.mxu1 %v15797_v1  ;;  %v15874_v19 = vld [vmem:[%s17872_s29 + $0x1024] ss:$16 sps:$4 sm:$0xff]   ;;  %v15877_v1 = vld [vmem:[%s17872_s29 + $0x102c] ss:$16 sps:$4 sm:$0xff]  }
 0x612   : > { %5096 = vmatprep.subr.bf16.mxu0 %v15802_v20  ;;  %5182 = vmatprep.subr.bf16.mxu1 %v15805_v21  ;;  %v15872_v20 = vld [vmem:[%s17872_s29 + $0x1020] ss:$16 sps:$4 sm:$0xff]   ;;  %v15875_v21 = vld [vmem:[%s17872_s29 + $0x1028] ss:$16 sps:$4 sm:$0xff]  }
 0x615   : > { %5097 = vmatpush1.bf16.msra.mxu0 %v15800_v23  ;;  %5183 = vmatpush1.bf16.msra.mxu1 %v15803_v24  ;;  %v15880_v23 = vld [vmem:[%s17872_s29 + $0x1044] ss:$16 sps:$4 sm:$0xff]   ;;  %v15883_v24 = vld [vmem:[%s17872_s29 + $0x104c] ss:$16 sps:$4 sm:$0xff]  }
 0x616   : > { %5098 = vmatprep.subr.bf16.mxu0 %v15808_v25  ;;  %5184 = vmatprep.subr.bf16.mxu1 %v15811_v26  ;;  %v15878_v25 = vld [vmem:[%s17872_s29 + $0x1040] ss:$16 sps:$4 sm:$0xff]   ;;  %v15881_v26 = vld [vmem:[%s17872_s29 + $0x1048] ss:$16 sps:$4 sm:$0xff]  }
 0x619   : > { %5099 = vmatpush1.bf16.msra.mxu0 %v15806_v28  ;;  %5185 = vmatpush1.bf16.msra.mxu1 %v15809_v29  ;;  %v15889_v28 = vld [vmem:[%s17872_s29 + $0x106c] ss:$16 sps:$4 sm:$0xff]   ;;  %v15884_v29 = vld [vmem:[%s17872_s29 + $0x1060] ss:$16 sps:$4 sm:$0xff]  }
 0x61a   : > { %5100 = vmatprep.subr.bf16.mxu0 %v15814_v34  ;;  %5186 = vmatprep.subr.bf16.mxu1 %v15817_v35  ;;  %v15887_v34 = vld [vmem:[%s17872_s29 + $0x1068] ss:$16 sps:$4 sm:$0xff]   ;;  %v15892_v35 = vld [vmem:[%s17872_s29 + $0x1084] ss:$16 sps:$4 sm:$0xff]  }
 0x61d   : > { %5101 = vmatpush1.bf16.msra.mxu0 %v15812_v37  ;;  %5187 = vmatpush1.bf16.msra.mxu1 %v15815_v39  ;;  %v15895_v37 = vld [vmem:[%s17872_s29 + $0x108c] ss:$16 sps:$4 sm:$0xff]   ;;  %v15890_v39 = vld [vmem:[%s17872_s29 + $0x1080] ss:$16 sps:$4 sm:$0xff]  }
 0x61e   : > { %5102 = vmatprep.subr.bf16.mxu0 %v15820_v41  ;;  %5188 = vmatprep.subr.bf16.mxu1 %v15823_v43  ;;  %v15893_v41 = vld [vmem:[%s17872_s29 + $0x1088] ss:$16 sps:$4 sm:$0xff]   ;;  %v15898_v43 = vld [vmem:[%s17872_s29 + $0x10a4] ss:$16 sps:$4 sm:$0xff]  }
 0x621   : > { %5103 = vmatpush1.bf16.msra.mxu0 %v15818_v45  ;;  %5189 = vmatpush1.bf16.msra.mxu1 %v15821_v46  ;;  %v15901_v45 = vld [vmem:[%s17872_s29 + $0x10ac] ss:$16 sps:$4 sm:$0xff]   ;;  %v15896_v46 = vld [vmem:[%s17872_s29 + $0x10a0] ss:$16 sps:$4 sm:$0xff]  }
 0x622   : > { %5104 = vmatprep.subr.bf16.mxu0 %v15826_v47  ;;  %5190 = vmatprep.subr.bf16.mxu1 %v15829_v48  ;;  %v15899_v47 = vld [vmem:[%s17872_s29 + $0x10a8] ss:$16 sps:$4 sm:$0xff]   ;;  %v15904_v48 = vld [vmem:[%s17872_s29 + $0x10c4] ss:$16 sps:$4 sm:$0xff]  }
 0x625   : > { %5105 = vmatpush1.bf16.msra.mxu0 %v15824_v50  ;;  %5191 = vmatpush1.bf16.msra.mxu1 %v15827_v51  ;;  %v15907_v50 = vld [vmem:[%s17872_s29 + $0x10cc] ss:$16 sps:$4 sm:$0xff]   ;;  %v15902_v51 = vld [vmem:[%s17872_s29 + $0x10c0] ss:$16 sps:$4 sm:$0xff]  }
 0x626   : > { %5106 = vmatprep.subr.bf16.mxu0 %v15832_v52  ;;  %5192 = vmatprep.subr.bf16.mxu1 %v15835_v53  ;;  %v15905_v52 = vld [vmem:[%s17872_s29 + $0x10c8] ss:$16 sps:$4 sm:$0xff]   ;;  %v15910_v53 = vld [vmem:[%s17872_s29 + $0x10e4] ss:$16 sps:$4 sm:$0xff]  }
 0x629   : > { %5107 = vmatpush1.bf16.msra.mxu0 %v15830_v54  ;;  %5193 = vmatpush1.bf16.msra.mxu1 %v15833_v55  ;;  %v15913_v54 = vld [vmem:[%s17872_s29 + $0x10ec] ss:$16 sps:$4 sm:$0xff]   ;;  %v15908_v55 = vld [vmem:[%s17872_s29 + $0x10e0] ss:$16 sps:$4 sm:$0xff]  }
 0x62a   : > { %5108 = vmatprep.subr.bf16.mxu0 %v15838_v56  ;;  %5194 = vmatprep.subr.bf16.mxu1 %v15841_v57  ;;  %v15911_v56 = vld [vmem:[%s17872_s29 + $0x10e8] ss:$16 sps:$4 sm:$0xff]   ;;  %v15916_v57 = vld [vmem:[%s17872_s29 + $0x1104] ss:$16 sps:$4 sm:$0xff]  }
 0x62d   : > { %5109 = vmatpush1.bf16.msra.mxu0 %v15836_v58  ;;  %5195 = vmatpush1.bf16.msra.mxu1 %v15839_v59  ;;  %v15919_v58 = vld [vmem:[%s17872_s29 + $0x110c] ss:$16 sps:$4 sm:$0xff]   ;;  %v15914_v59 = vld [vmem:[%s17872_s29 + $0x1100] ss:$16 sps:$4 sm:$0xff]  }
 0x62e   : > { %5110 = vmatprep.subr.bf16.mxu0 %v15844_v60  ;;  %5196 = vmatprep.subr.bf16.mxu1 %v15847_v61  ;;  %v15917_v60 = vld [vmem:[%s17872_s29 + $0x1108] ss:$16 sps:$4 sm:$0xff]   ;;  %v15922_v61 = vld [vmem:[%s17872_s29 + $0x1124] ss:$16 sps:$4 sm:$0xff]  }
 0x631   : > { %5111 = vmatpush1.bf16.msra.mxu0 %v15842_v63  ;;  %5197 = vmatpush1.bf16.msra.mxu1 %v15845_v13  ;;  %v15925_v63 = vld [vmem:[%s17872_s29 + $0x112c] ss:$16 sps:$4 sm:$0xff]   ;;  %v15920_v13 = vld [vmem:[%s17872_s29 + $0x1120] ss:$16 sps:$4 sm:$0xff]  }
 0x632   : > { %5112 = vmatprep.subr.bf16.mxu0 %v15850_v0  ;;  %5198 = vmatprep.subr.bf16.mxu1 %v15853_v22  ;;  %v15923_v0 = vld [vmem:[%s17872_s29 + $0x1128] ss:$16 sps:$4 sm:$0xff]   ;;  %v15928_v22 = vld [vmem:[%s17872_s29 + $0x1144] ss:$16 sps:$4 sm:$0xff]  }
 0x635   : > { %5113 = vmatpush1.bf16.msra.mxu0 %v15848_v3  ;;  %5199 = vmatpush1.bf16.msra.mxu1 %v15851_v4  ;;  %v15931_v3 = vld [vmem:[%s17872_s29 + $0x114c] ss:$16 sps:$4 sm:$0xff]   ;;  %v15926_v4 = vld [vmem:[%s17872_s29 + $0x1140] ss:$16 sps:$4 sm:$0xff]  }
 0x636   : > { %5114 = vmatprep.subr.bf16.mxu0 %v15856_v17  ;;  %5200 = vmatprep.subr.bf16.mxu1 %v15859_v6  ;;  %v15929_v17 = vld [vmem:[%s17872_s29 + $0x1148] ss:$16 sps:$4 sm:$0xff]   ;;  %v15934_v6 = vld [vmem:[%s17872_s29 + $0x1164] ss:$16 sps:$4 sm:$0xff]  }
 0x639   : > { %5115 = vmatpush1.bf16.msra.mxu0 %v15854_v7  ;;  %5201 = vmatpush1.bf16.msra.mxu1 %v15857_v8  ;;  %v15937_v7 = vld [vmem:[%s17872_s29 + $0x116c] ss:$16 sps:$4 sm:$0xff]   ;;  %v15932_v8 = vld [vmem:[%s17872_s29 + $0x1160] ss:$16 sps:$4 sm:$0xff]  }
 0x63a   : > { %5116 = vmatprep.subr.bf16.mxu0 %v15862_v9  ;;  %5202 = vmatprep.subr.bf16.mxu1 %v15865_v10  ;;  %v15935_v9 = vld [vmem:[%s17872_s29 + $0x1168] ss:$16 sps:$4 sm:$0xff]   ;;  %v15940_v10 = vld [vmem:[%s17872_s29 + $0x1184] ss:$16 sps:$4 sm:$0xff]  }
 0x63d   : > { %5117 = vmatpush1.bf16.msra.mxu0 %v15860_v11  ;;  %5203 = vmatpush1.bf16.msra.mxu1 %v15863_v12  ;;  %v15943_v11 = vld [vmem:[%s17872_s29 + $0x118c] ss:$16 sps:$4 sm:$0xff]   ;;  %v15938_v12 = vld [vmem:[%s17872_s29 + $0x1180] ss:$16 sps:$4 sm:$0xff]  }
 0x63e   : > { %6019 = vmatprep.subr.bf16.mxu0 %v15868_v14  ;;  %6105 = vmatprep.subr.bf16.mxu1 %v15871_v15  ;;  %v15941_v14 = vld [vmem:[%s17872_s29 + $0x1188] ss:$16 sps:$4 sm:$0xff]   ;;  %v15946_v15 = vld [vmem:[%s17872_s29 + $0x11a4] ss:$16 sps:$4 sm:$0xff]  }
 0x640   : > { %5119 = vmatmul.mubr.bf16.vlgmr.msra.gmra.mrb[12].mxu0 %v18403_v62  ;;  %5205 = vmatmul.mubr.bf16.vlgmr.msra.gmra.mrb[12].mxu1 %v18403_v62  ;;  %v15886_v62 = vld [vmem:[%s17872_s29 + $0x1064] ss:$16 sps:$4 sm:$0xff]  }
 0x641   : > { %6020 = vmatpush1.bf16.msra.mxu0 %v15866_v16  ;;  %6106 = vmatpush1.bf16.msra.mxu1 %v15869_v18  ;;  %v15949_v16 = vld [vmem:[%s17872_s29 + $0x11ac] ss:$16 sps:$4 sm:$0xff]   ;;  %v15944_v18 = vld [vmem:[%s17872_s29 + $0x11a0] ss:$16 sps:$4 sm:$0xff]  }
 0x642   : > { %6021 = vmatprep.subr.bf16.mxu0 %v15874_v19  ;;  %6107 = vmatprep.subr.bf16.mxu1 %v15877_v1  ;;  %v15947_v19 = vld [vmem:[%s17872_s29 + $0x11a8] ss:$16 sps:$4 sm:$0xff]   ;;  %v15952_v1 = vld [vmem:[%s17872_s29 + $0x11c4] ss:$16 sps:$4 sm:$0xff]  }
 0x645   : > { %6022 = vmatpush1.bf16.msra.mxu0 %v15872_v20  ;;  %6108 = vmatpush1.bf16.msra.mxu1 %v15875_v21  ;;  %v15955_v20 = vld [vmem:[%s17872_s29 + $0x11cc] ss:$16 sps:$4 sm:$0xff]   ;;  %v15950_v21 = vld [vmem:[%s17872_s29 + $0x11c0] ss:$16 sps:$4 sm:$0xff]  }
 0x646   : > { %6023 = vmatprep.subr.bf16.mxu0 %v15880_v23  ;;  %6109 = vmatprep.subr.bf16.mxu1 %v15883_v24  ;;  %v15953_v23 = vld [vmem:[%s17872_s29 + $0x11c8] ss:$16 sps:$4 sm:$0xff]   ;;  %v15958_v24 = vld [vmem:[%s17872_s29 + $0x11e4] ss:$16 sps:$4 sm:$0xff]  }
 0x649   : > { %6024 = vmatpush1.bf16.msra.mxu0 %v15878_v25  ;;  %6110 = vmatpush1.bf16.msra.mxu1 %v15881_v26  ;;  %v15961_v25 = vld [vmem:[%s17872_s29 + $0x11ec] ss:$16 sps:$4 sm:$0xff]   ;;  %v15956_v26 = vld [vmem:[%s17872_s29 + $0x11e0] ss:$16 sps:$4 sm:$0xff]  }
 0x64a   : > { %6025 = vmatprep.subr.bf16.mxu0 %v15886_v62  ;;  %6111 = vmatprep.subr.bf16.mxu1 %v15889_v28  ;;  %v15959_v62 = vld [vmem:[%s17872_s29 + $0x11e8] ss:$16 sps:$4 sm:$0xff]   ;;  %v15964_v28 = vld [vmem:[%s17872_s29 + $0x1204] ss:$16 sps:$4 sm:$0xff]  }
 0x64d   : > { %6026 = vmatpush1.bf16.msra.mxu0 %v15884_v29  ;;  %6112 = vmatpush1.bf16.msra.mxu1 %v15887_v34  ;;  %v15967_v29 = vld [vmem:[%s17872_s29 + $0x120c] ss:$16 sps:$4 sm:$0xff]  }
 0x64e   : > { %6027 = vmatprep.subr.bf16.mxu0 %v15892_v35  ;;  %6113 = vmatprep.subr.bf16.mxu1 %v15895_v37  ;;  %v18536_v34 = vld [vmem:[%s17878_s24 + $0xc] sm:$0xf] }
 0x64f   : > { %v4390_v35 = vrot.slane %v18536_v34, %v18089_v32  ;;  %v4386_v37 = vrot.slane %v18536_v34, %v18085_v30 }
 0x651   : > { %6028 = vmatpush1.bf16.msra.mxu0 %v15890_v39  ;;  %6114 = vmatpush1.bf16.msra.mxu1 %v15893_v41 }
 0x652   : > { %6029 = vmatprep.subr.bf16.mxu0 %v15898_v43  ;;  %6115 = vmatprep.subr.bf16.mxu1 %v15901_v45  ;;  %v4398_v45 = vrot.slane %v18536_v34, %v18091_v33 }
 0x655   : > { %6030 = vmatpush1.bf16.msra.mxu0 %v15896_v46  ;;  %6116 = vmatpush1.bf16.msra.mxu1 %v15899_v47 }
 0x656   : > { %6031 = vmatprep.subr.bf16.mxu0 %v15904_v48  ;;  %6117 = vmatprep.subr.bf16.mxu1 %v15907_v50 }
 0x659   : > { %6032 = vmatpush1.bf16.msra.mxu0 %v15902_v51  ;;  %6118 = vmatpush1.bf16.msra.mxu1 %v15905_v52 }
 0x65a   : > { %6033 = vmatprep.subr.bf16.mxu0 %v15910_v53  ;;  %6119 = vmatprep.subr.bf16.mxu1 %v15913_v54 }
 0x65d   : > { %6034 = vmatpush1.bf16.msra.mxu0 %v15908_v55  ;;  %6120 = vmatpush1.bf16.msra.mxu1 %v15911_v56 }
 0x65e   : > { %6035 = vmatprep.subr.bf16.mxu0 %v15916_v57  ;;  %6121 = vmatprep.subr.bf16.mxu1 %v15919_v58 }
 0x661   : > { %6036 = vmatpush1.bf16.msra.mxu0 %v15914_v59  ;;  %6122 = vmatpush1.bf16.msra.mxu1 %v15917_v60 }
 0x662   : > { %6037 = vmatprep.subr.bf16.mxu0 %v15922_v61  ;;  %6123 = vmatprep.subr.bf16.mxu1 %v15925_v63 }
 0x665   : > { %6038 = vmatpush1.bf16.msra.mxu0 %v15920_v13  ;;  %6124 = vmatpush1.bf16.msra.mxu1 %v15923_v0  ;;  %v15962_v0 = vld [vmem:[%s17872_s29 + $0x1200] ss:$16 sps:$4 sm:$0xff]  }
 0x666   : > { %6039 = vmatprep.subr.bf16.mxu0 %v15928_v22  ;;  %6125 = vmatprep.subr.bf16.mxu1 %v15931_v3  ;;  %v15973_v22 = vld [vmem:[%s17872_s29 + $0x122c] ss:$16 sps:$4 sm:$0xff]   ;;  %v15971_v3 = vld [vmem:[%s17872_s29 + $0x1228] ss:$16 sps:$4 sm:$0xff]  }
 0x669   : > { %6040 = vmatpush1.bf16.msra.mxu0 %v15926_v4  ;;  %6126 = vmatpush1.bf16.msra.mxu1 %v15929_v17  ;;  %v15976_v4 = vld [vmem:[%s17872_s29 + $0x1244] ss:$16 sps:$4 sm:$0xff]   ;;  %v15979_v17 = vld [vmem:[%s17872_s29 + $0x124c] ss:$16 sps:$4 sm:$0xff]  }
 0x66a   : > { %6041 = vmatprep.subr.bf16.mxu0 %v15934_v6  ;;  %6127 = vmatprep.subr.bf16.mxu1 %v15937_v7  ;;  %v15974_v6 = vld [vmem:[%s17872_s29 + $0x1240] ss:$16 sps:$4 sm:$0xff]   ;;  %v15977_v7 = vld [vmem:[%s17872_s29 + $0x1248] ss:$16 sps:$4 sm:$0xff]  }
 0x66d   : > { %6042 = vmatpush1.bf16.msra.mxu0 %v15932_v8  ;;  %6128 = vmatpush1.bf16.msra.mxu1 %v15935_v9  ;;  %v15982_v8 = vld [vmem:[%s17872_s29 + $0x1264] ss:$16 sps:$4 sm:$0xff]   ;;  %v15985_v9 = vld [vmem:[%s17872_s29 + $0x126c] ss:$16 sps:$4 sm:$0xff]  }
 0x66e   : > { %6043 = vmatprep.subr.bf16.mxu0 %v15940_v10  ;;  %6129 = vmatprep.subr.bf16.mxu1 %v15943_v11  ;;  %v15980_v10 = vld [vmem:[%s17872_s29 + $0x1260] ss:$16 sps:$4 sm:$0xff]   ;;  %v15983_v11 = vld [vmem:[%s17872_s29 + $0x1268] ss:$16 sps:$4 sm:$0xff]  }
 0x671   : > { %6044 = vmatpush1.bf16.msra.mxu0 %v15938_v12  ;;  %6130 = vmatpush1.bf16.msra.mxu1 %v15941_v14  ;;  %v15988_v12 = vld [vmem:[%s17872_s29 + $0x1284] ss:$16 sps:$4 sm:$0xff]   ;;  %v15991_v14 = vld [vmem:[%s17872_s29 + $0x128c] ss:$16 sps:$4 sm:$0xff]  }
 0x672   : > { %6045 = vmatprep.subr.bf16.mxu0 %v15946_v15  ;;  %6131 = vmatprep.subr.bf16.mxu1 %v15949_v16  ;;  %v15986_v15 = vld [vmem:[%s17872_s29 + $0x1280] ss:$16 sps:$4 sm:$0xff]   ;;  %v15989_v16 = vld [vmem:[%s17872_s29 + $0x1288] ss:$16 sps:$4 sm:$0xff]  }
 0x675   : > { %6046 = vmatpush1.bf16.msra.mxu0 %v15944_v18  ;;  %6132 = vmatpush1.bf16.msra.mxu1 %v15947_v19  ;;  %v15994_v18 = vld [vmem:[%s17872_s29 + $0x12a4] ss:$16 sps:$4 sm:$0xff]   ;;  %v15997_v19 = vld [vmem:[%s17872_s29 + $0x12ac] ss:$16 sps:$4 sm:$0xff]  }
 0x676   : > { %6047 = vmatprep.subr.bf16.mxu0 %v15952_v1  ;;  %6133 = vmatprep.subr.bf16.mxu1 %v15955_v20  ;;  %v15992_v1 = vld [vmem:[%s17872_s29 + $0x12a0] ss:$16 sps:$4 sm:$0xff]   ;;  %v15995_v20 = vld [vmem:[%s17872_s29 + $0x12a8] ss:$16 sps:$4 sm:$0xff]  }
 0x679   : > { %6048 = vmatpush1.bf16.msra.mxu0 %v15950_v21  ;;  %6134 = vmatpush1.bf16.msra.mxu1 %v15953_v23  ;;  %v16000_v21 = vld [vmem:[%s17872_s29 + $0x12c4] ss:$16 sps:$4 sm:$0xff]   ;;  %v16003_v23 = vld [vmem:[%s17872_s29 + $0x12cc] ss:$16 sps:$4 sm:$0xff]  }
 0x67a   : > { %6049 = vmatprep.subr.bf16.mxu0 %v15958_v24  ;;  %6135 = vmatprep.subr.bf16.mxu1 %v15961_v25  ;;  %v15998_v24 = vld [vmem:[%s17872_s29 + $0x12c0] ss:$16 sps:$4 sm:$0xff]   ;;  %v16001_v25 = vld [vmem:[%s17872_s29 + $0x12c8] ss:$16 sps:$4 sm:$0xff]  }
 0x67d   : > { %6050 = vmatpush1.bf16.msra.mxu0 %v15956_v26  ;;  %6136 = vmatpush1.bf16.msra.mxu1 %v15959_v62  ;;  %v16006_v26 = vld [vmem:[%s17872_s29 + $0x12e4] ss:$16 sps:$4 sm:$0xff]   ;;  %v16009_v62 = vld [vmem:[%s17872_s29 + $0x12ec] ss:$16 sps:$4 sm:$0xff]  }
 0x67e   : > { %6062 = vmatprep.subr.bf16.mxu0 %v15964_v28  ;;  %6148 = vmatprep.subr.bf16.mxu1 %v15967_v29  ;;  %v16004_v28 = vld [vmem:[%s17872_s29 + $0x12e0] ss:$16 sps:$4 sm:$0xff]   ;;  %v16007_v29 = vld [vmem:[%s17872_s29 + $0x12e8] ss:$16 sps:$4 sm:$0xff]  }
 0x713   : > { %v5120_v39 = vpop.f32.mrb[12].mxu0  ;;  %v18542_v41 = vpop.f32.mrb[12].mxu1 }
 0x714   : > { %v5122_v43 = vpop.f32.mrb[13].mxu0  ;;  %v5208_v46 = vpop.f32.mrb[13].mxu1  ;;  %v14666_v51 = vadd.f32 %v5120_v39, %v4386_v37  ;;  %v16010_v39 = vld [vmem:[%s17872_s29 + $0x1300] ss:$16 sps:$4 sm:$0xff]  }
 0x715   : > { %v14667_v47 = vadd.f32 %v5122_v43, %v4390_v35  ;;  %v5124_v48 = vpop.f32.mrb[14].mxu0  ;;  %v18546_v50 = vpop.f32.mrb[14].mxu1  ;;  %v14671_v57 = vadd.f32 %v5208_v46, %v4398_v45  ;;  %v16013_v43 = vld [vmem:[%s17872_s29 + $0x1308] ss:$16 sps:$4 sm:$0xff]   ;;  %v16021_v46 = vld [vmem:[%s17872_s29 + $0x132c] ss:$16 sps:$4 sm:$0xff]  }
 0x716   : > { %v14668_v52 = vadd.f32 %v5124_v48, %v4386_v37  ;;  %v5126_v53 = vpop.f32.mrb[15].mxu0  ;;  %v5212_v54 = vpop.f32.mrb[15].mxu1  ;;  %v18558_v61 = vadd.f32 %v14666_v51, %v18248_v42  ;;  %v15970_v42 = vld [vmem:[%s17872_s29 + $0x1224] ss:$16 sps:$4 sm:$0xff]   ;;  %v16015_v37 = vld [vmem:[%s17872_s29 + $0x130c] ss:$16 sps:$4 sm:$0xff]  }
 0x717   : > { %v14669_v55 = vadd.f32 %v5126_v53, %v4390_v35  ;;  %v14673_v56 = vadd.f32 %v5212_v54, %v4398_v45  ;;  %v18552_v59 = vadd.f32 %v14667_v47, %v18244_v38  ;;  %v18568_v38 = vadd.f32 %v14671_v57, %v18256_v49  ;;  %v15968_v49 = vld [vmem:[%s17872_s29 + $0x1220] ss:$16 sps:$4 sm:$0xff]   ;;  %v16012_v35 = vld [vmem:[%s17872_s29 + $0x1304] ss:$16 sps:$4 sm:$0xff]   ;;  %v16019_v48 = vld [vmem:[%s17872_s29 + $0x1328] ss:$16 sps:$4 sm:$0xff]  }
 0x718   : > { %v18549_v58 = vadd.f32 %v14668_v52, %v18242_v36  ;;  %v15965_v36 = vld [vmem:[%s17872_s29 + $0x1208] ss:$16 sps:$4 sm:$0xff]   ;;  %v16018_v45 = vld [vmem:[%s17872_s29 + $0x1324] ss:$16 sps:$4 sm:$0xff]   ;;  %v16016_v47 = vld [vmem:[%s17872_s29 + $0x1320] ss:$16 sps:$4 sm:$0xff]  }
 0x719   : > { %v18555_v60 = vadd.f32 %v14669_v55, %v18246_v40  ;;  %v18561_v63 = vadd.f32 %v14673_v56, %v18250_v44  ;;  %v16024_v51 = vld [vmem:[%s17872_s29 + $0x1344] ss:$16 sps:$4 sm:$0xff]   ;;  %v16027_v52 = vld [vmem:[%s17872_s29 + $0x134c] ss:$16 sps:$4 sm:$0xff]   ;;  %v16022_v53 = vld [vmem:[%s17872_s29 + $0x1340] ss:$16 sps:$4 sm:$0xff]  }
 0x71a   : > { %v5223_v40 = vpack.c.bf16 %v18549_v58, %v18558_v61  ;;  %v16025_v54 = vld [vmem:[%s17872_s29 + $0x1348] ss:$16 sps:$4 sm:$0xff]   ;;  %v16030_v55 = vld [vmem:[%s17872_s29 + $0x1364] ss:$16 sps:$4 sm:$0xff]   ;;  %v16033_v56 = vld [vmem:[%s17872_s29 + $0x136c] ss:$16 sps:$4 sm:$0xff]  }
 0x71b   : > { %v5224_v13 = vpack.c.bf16 %v18555_v60, %v18552_v59  ;;  %v5226_v44 = vpack.c.bf16 %v18561_v63, %v18568_v38  ;;  %v16028_v57 = vld [vmem:[%s17872_s29 + $0x1360] ss:$16 sps:$4 sm:$0xff]  }
 0x71d   : > { %6051 = vmatprep.mubr.bf16.mxu0 %v5224_v13  ;;  %6137 = vmatprep.mubr.bf16.mxu1 %v5224_v13  ;;  %v16031_v13 = vld [vmem:[%s17872_s29 + $0x1368] ss:$16 sps:$4 sm:$0xff]  }
 0x71e   : > { %6052 = vmatmul.mubr.bf16.vlgmr.msra.gmra.mrb[16].mxu0 %v5223_v40  ;;  %6138 = vmatmul.mubr.bf16.vlgmr.msra.gmra.mrb[16].mxu1 %v5223_v40  ;;  %v16034_v40 = vld [vmem:[%s17872_s29 + $0x1380] ss:$16 sps:$4 sm:$0xff]  }
 0x71f   : > { %6063 = vmatpush1.bf16.msra.mxu0 %v15962_v0  ;;  %6149 = vmatpush1.bf16.msra.mxu1 %v15965_v36  ;;  %v16036_v0 = vld [vmem:[%s17872_s29 + $0x1384] ss:$16 sps:$4 sm:$0xff]   ;;  %v16039_v36 = vld [vmem:[%s17872_s29 + $0x138c] ss:$16 sps:$4 sm:$0xff]  }
 0x720   : > { %6094 = vmatprep.mubr.bf16.mxu0 %v5226_v44  ;;  %6180 = vmatprep.mubr.bf16.mxu1 %v5226_v44  ;;  %v16045_v44 = vld [vmem:[%s17872_s29 + $0x13ac] ss:$16 sps:$4 sm:$0xff]  }
 0x721   : > { %6064 = vmatprep.subr.bf16.mxu0 %v15970_v42  ;;  %6150 = vmatprep.subr.bf16.mxu1 %v15973_v22  ;;  %v16037_v42 = vld [vmem:[%s17872_s29 + $0x1388] ss:$16 sps:$4 sm:$0xff]   ;;  %v16042_v22 = vld [vmem:[%s17872_s29 + $0x13a4] ss:$16 sps:$4 sm:$0xff]  }
 0x723   : > { %6065 = vmatpush1.bf16.msra.mxu0 %v15968_v49  ;;  %6151 = vmatpush1.bf16.msra.mxu1 %v15971_v3  ;;  %v16040_v49 = vld [vmem:[%s17872_s29 + $0x13a0] ss:$16 sps:$4 sm:$0xff]   ;;  %v16043_v3 = vld [vmem:[%s17872_s29 + $0x13a8] ss:$16 sps:$4 sm:$0xff]  }
 0x724   : > { %6066 = vmatprep.subr.bf16.mxu0 %v15976_v4  ;;  %6152 = vmatprep.subr.bf16.mxu1 %v15979_v17  ;;  %v16048_v4 = vld [vmem:[%s17872_s29 + $0x13c4] ss:$16 sps:$4 sm:$0xff]   ;;  %v16051_v17 = vld [vmem:[%s17872_s29 + $0x13cc] ss:$16 sps:$4 sm:$0xff]  }
 0x727   : > { %6067 = vmatpush1.bf16.msra.mxu0 %v15974_v6  ;;  %6153 = vmatpush1.bf16.msra.mxu1 %v15977_v7  ;;  %v4394_v6 = vrot.slane %v18536_v34, %v18087_v31  ;;  %v16046_v7 = vld [vmem:[%s17872_s29 + $0x13c0] ss:$16 sps:$4 sm:$0xff]  }
 0x728   : > { %6068 = vmatprep.subr.bf16.mxu0 %v15982_v8  ;;  %6154 = vmatprep.subr.bf16.mxu1 %v15985_v9  ;;  %v16049_v8 = vld [vmem:[%s17872_s29 + $0x13c8] ss:$16 sps:$4 sm:$0xff]   ;;  %v16052_v34 = vld [vmem:[%s17872_s29 + $0x13e0] ss:$16 sps:$4 sm:$0xff]  }
 0x729   : > { %v14672_v9 = vadd.f32 %v18546_v50, %v4394_v6  ;;  %v16060_v50 = vld [vmem:[%s17872_s29 + $0x1404] ss:$16 sps:$4 sm:$0xff]  }
 0x72b   : > { %6069 = vmatpush1.bf16.msra.mxu0 %v15980_v10  ;;  %6155 = vmatpush1.bf16.msra.mxu1 %v15983_v11  ;;  %v16054_v10 = vld [vmem:[%s17872_s29 + $0x13e4] ss:$16 sps:$4 sm:$0xff]   ;;  %v16057_v11 = vld [vmem:[%s17872_s29 + $0x13ec] ss:$16 sps:$4 sm:$0xff]  }
 0x72c   : > { %6070 = vmatprep.subr.bf16.mxu0 %v15988_v12  ;;  %6156 = vmatprep.subr.bf16.mxu1 %v15991_v14  ;;  %v14670_v12 = vadd.f32 %v18542_v41, %v4394_v6  ;;  %v16055_v14 = vld [vmem:[%s17872_s29 + $0x13e8] ss:$16 sps:$4 sm:$0xff]   ;;  %v16058_v41 = vld [vmem:[%s17872_s29 + $0x1400] ss:$16 sps:$4 sm:$0xff]   ;;  %v16123_v6 = vld [vmem:[%s17872_s29 + $0x154c] ss:$16 sps:$4 sm:$0xff]  }
 0x72f   : > { %6071 = vmatpush1.bf16.msra.mxu0 %v15986_v15  ;;  %6157 = vmatpush1.bf16.msra.mxu1 %v15989_v16  ;;  %v18639_v15 = vadd.f32 %v14672_v9, %v18326_v2  ;;  %v16063_v16 = vld [vmem:[%s17872_s29 + $0x140c] ss:$16 sps:$4 sm:$0xff]   ;;  %v16066_v2 = vld [vmem:[%s17872_s29 + $0x1424] ss:$16 sps:$4 sm:$0xff]  }
 0x730   : > { %6072 = vmatprep.subr.bf16.mxu0 %v15994_v18  ;;  %6158 = vmatprep.subr.bf16.mxu1 %v15997_v19  ;;  %v18644_v18 = vadd.f32 %v14670_v12, %v18330_v5  ;;  %v16061_v19 = vld [vmem:[%s17872_s29 + $0x1408] ss:$16 sps:$4 sm:$0xff]   ;;  %v16064_v5 = vld [vmem:[%s17872_s29 + $0x1420] ss:$16 sps:$4 sm:$0xff]   ;;  %v16126_v9 = vld [vmem:[%s17872_s29 + $0x1564] ss:$16 sps:$4 sm:$0xff]  }
 0x731   : > { %v16127_v12 = vld [vmem:[%s17872_s29 + $0x1568] ss:$16 sps:$4 sm:$0xff]  }
 0x733   : > { %6073 = vmatpush1.bf16.msra.mxu0 %v15992_v1  ;;  %6159 = vmatpush1.bf16.msra.mxu1 %v15995_v20  ;;  %v5225_v1 = vpack.c.bf16 %v18639_v15, %v18644_v18  ;;  %v16069_v20 = vld [vmem:[%s17872_s29 + $0x142c] ss:$16 sps:$4 sm:$0xff]  }
 0x734   : > { %6074 = vmatprep.subr.bf16.mxu0 %v16000_v21  ;;  %6160 = vmatprep.subr.bf16.mxu1 %v16003_v23  ;;  %v16067_v21 = vld [vmem:[%s17872_s29 + $0x1428] ss:$16 sps:$4 sm:$0xff]   ;;  %v16072_v23 = vld [vmem:[%s17872_s29 + $0x1444] ss:$16 sps:$4 sm:$0xff]  }
 0x737   : > { %6075 = vmatpush1.bf16.msra.mxu0 %v15998_v24  ;;  %6161 = vmatpush1.bf16.msra.mxu1 %v16001_v25  ;;  %v16075_v24 = vld [vmem:[%s17872_s29 + $0x144c] ss:$16 sps:$4 sm:$0xff]   ;;  %v16070_v25 = vld [vmem:[%s17872_s29 + $0x1440] ss:$16 sps:$4 sm:$0xff]  }
 0x738   : > { %6076 = vmatprep.subr.bf16.mxu0 %v16006_v26  ;;  %6162 = vmatprep.subr.bf16.mxu1 %v16009_v62  ;;  %v16073_v26 = vld [vmem:[%s17872_s29 + $0x1448] ss:$16 sps:$4 sm:$0xff]   ;;  %v16078_v62 = vld [vmem:[%s17872_s29 + $0x1464] ss:$16 sps:$4 sm:$0xff]  }
 0x73b   : > { %6077 = vmatpush1.bf16.msra.mxu0 %v16004_v28  ;;  %6163 = vmatpush1.bf16.msra.mxu1 %v16007_v29  ;;  %v16081_v28 = vld [vmem:[%s17872_s29 + $0x146c] ss:$16 sps:$4 sm:$0xff]   ;;  %v16076_v29 = vld [vmem:[%s17872_s29 + $0x1460] ss:$16 sps:$4 sm:$0xff]  }
 0x73c   : > { %6078 = vmatprep.subr.bf16.mxu0 %v16012_v35  ;;  %6164 = vmatprep.subr.bf16.mxu1 %v16015_v37  ;;  %v16079_v35 = vld [vmem:[%s17872_s29 + $0x1468] ss:$16 sps:$4 sm:$0xff]   ;;  %v16084_v37 = vld [vmem:[%s17872_s29 + $0x1484] ss:$16 sps:$4 sm:$0xff]  }
 0x73f   : > { %6079 = vmatpush1.bf16.msra.mxu0 %v16010_v39  ;;  %6165 = vmatpush1.bf16.msra.mxu1 %v16013_v43  ;;  %v16087_v39 = vld [vmem:[%s17872_s29 + $0x148c] ss:$16 sps:$4 sm:$0xff]   ;;  %v16082_v43 = vld [vmem:[%s17872_s29 + $0x1480] ss:$16 sps:$4 sm:$0xff]  }
 0x740   : > { %6080 = vmatprep.subr.bf16.mxu0 %v16018_v45  ;;  %6166 = vmatprep.subr.bf16.mxu1 %v16021_v46  ;;  %v16085_v45 = vld [vmem:[%s17872_s29 + $0x1488] ss:$16 sps:$4 sm:$0xff]   ;;  %v16090_v46 = vld [vmem:[%s17872_s29 + $0x14a4] ss:$16 sps:$4 sm:$0xff]  }
 0x743   : > { %6081 = vmatpush1.bf16.msra.mxu0 %v16016_v47  ;;  %6167 = vmatpush1.bf16.msra.mxu1 %v16019_v48  ;;  %v16093_v47 = vld [vmem:[%s17872_s29 + $0x14ac] ss:$16 sps:$4 sm:$0xff]   ;;  %v16088_v48 = vld [vmem:[%s17872_s29 + $0x14a0] ss:$16 sps:$4 sm:$0xff]  }
 0x744   : > { %6082 = vmatprep.subr.bf16.mxu0 %v16024_v51  ;;  %6168 = vmatprep.subr.bf16.mxu1 %v16027_v52  ;;  %v16091_v51 = vld [vmem:[%s17872_s29 + $0x14a8] ss:$16 sps:$4 sm:$0xff]   ;;  %v16096_v52 = vld [vmem:[%s17872_s29 + $0x14c4] ss:$16 sps:$4 sm:$0xff]  }
 0x747   : > { %6083 = vmatpush1.bf16.msra.mxu0 %v16022_v53  ;;  %6169 = vmatpush1.bf16.msra.mxu1 %v16025_v54  ;;  %v16099_v53 = vld [vmem:[%s17872_s29 + $0x14cc] ss:$16 sps:$4 sm:$0xff]   ;;  %v16094_v54 = vld [vmem:[%s17872_s29 + $0x14c0] ss:$16 sps:$4 sm:$0xff]  }
 0x748   : > { %6084 = vmatprep.subr.bf16.mxu0 %v16030_v55  ;;  %6170 = vmatprep.subr.bf16.mxu1 %v16033_v56  ;;  %v16097_v55 = vld [vmem:[%s17872_s29 + $0x14c8] ss:$16 sps:$4 sm:$0xff]   ;;  %v16102_v56 = vld [vmem:[%s17872_s29 + $0x14e4] ss:$16 sps:$4 sm:$0xff]  }
 0x74b   : > { %6085 = vmatpush1.bf16.msra.mxu0 %v16028_v57  ;;  %6171 = vmatpush1.bf16.msra.mxu1 %v16031_v13  ;;  %v16105_v57 = vld [vmem:[%s17872_s29 + $0x14ec] ss:$16 sps:$4 sm:$0xff]   ;;  %v16100_v13 = vld [vmem:[%s17872_s29 + $0x14e0] ss:$16 sps:$4 sm:$0xff]  }
 0x74c   : > { %6086 = vmatprep.subr.bf16.mxu0 %v16036_v0  ;;  %6172 = vmatprep.subr.bf16.mxu1 %v16039_v36  ;;  %v16103_v0 = vld [vmem:[%s17872_s29 + $0x14e8] ss:$16 sps:$4 sm:$0xff]   ;;  %v16108_v36 = vld [vmem:[%s17872_s29 + $0x1504] ss:$16 sps:$4 sm:$0xff]  }
 0x74f   : > { %6087 = vmatpush1.bf16.msra.mxu0 %v16034_v40  ;;  %6173 = vmatpush1.bf16.msra.mxu1 %v16037_v42  ;;  %v16111_v40 = vld [vmem:[%s17872_s29 + $0x150c] ss:$16 sps:$4 sm:$0xff]   ;;  %v16106_v42 = vld [vmem:[%s17872_s29 + $0x1500] ss:$16 sps:$4 sm:$0xff]  }
 0x750   : > { %6088 = vmatprep.subr.bf16.mxu0 %v16042_v22  ;;  %6174 = vmatprep.subr.bf16.mxu1 %v16045_v44  ;;  %v16109_v22 = vld [vmem:[%s17872_s29 + $0x1508] ss:$16 sps:$4 sm:$0xff]   ;;  %v16114_v44 = vld [vmem:[%s17872_s29 + $0x1524] ss:$16 sps:$4 sm:$0xff]  }
 0x753   : > { %6089 = vmatpush1.bf16.msra.mxu0 %v16040_v49  ;;  %6175 = vmatpush1.bf16.msra.mxu1 %v16043_v3  ;;  %v16117_v49 = vld [vmem:[%s17872_s29 + $0x152c] ss:$16 sps:$4 sm:$0xff]   ;;  %v16112_v3 = vld [vmem:[%s17872_s29 + $0x1520] ss:$16 sps:$4 sm:$0xff]  }
 0x754   : > { %6090 = vmatprep.subr.bf16.mxu0 %v16048_v4  ;;  %6176 = vmatprep.subr.bf16.mxu1 %v16051_v17  ;;  %v16115_v4 = vld [vmem:[%s17872_s29 + $0x1528] ss:$16 sps:$4 sm:$0xff]   ;;  %v16120_v17 = vld [vmem:[%s17872_s29 + $0x1544] ss:$16 sps:$4 sm:$0xff]  }
 0x757   : > { %6091 = vmatpush1.bf16.msra.mxu0 %v16046_v7  ;;  %6177 = vmatpush1.bf16.msra.mxu1 %v16049_v8  ;;  %v16118_v7 = vld [vmem:[%s17872_s29 + $0x1540] ss:$16 sps:$4 sm:$0xff]   ;;  %v16121_v8 = vld [vmem:[%s17872_s29 + $0x1548] ss:$16 sps:$4 sm:$0xff]  }
 0x758   : > { %6092 = vmatprep.subr.bf16.mxu0 %v16054_v10  ;;  %6178 = vmatprep.subr.bf16.mxu1 %v16057_v11  ;;  %v16129_v10 = vld [vmem:[%s17872_s29 + $0x156c] ss:$16 sps:$4 sm:$0xff]   ;;  %v16124_v11 = vld [vmem:[%s17872_s29 + $0x1560] ss:$16 sps:$4 sm:$0xff]  }
 0x75b   : > { %6093 = vmatpush1.bf16.msra.mxu0 %v16052_v34  ;;  %6179 = vmatpush1.bf16.msra.mxu1 %v16055_v14  ;;  %v16132_v34 = vld [vmem:[%s17872_s29 + $0x1584] ss:$16 sps:$4 sm:$0xff]   ;;  %v16135_v14 = vld [vmem:[%s17872_s29 + $0x158c] ss:$16 sps:$4 sm:$0xff]  }
 0x75c   : > { %6995 = vmatprep.subr.bf16.mxu0 %v16060_v50  ;;  %7081 = vmatprep.subr.bf16.mxu1 %v16063_v16  ;;  %v16130_v50 = vld [vmem:[%s17872_s29 + $0x1580] ss:$16 sps:$4 sm:$0xff]   ;;  %v16133_v16 = vld [vmem:[%s17872_s29 + $0x1588] ss:$16 sps:$4 sm:$0xff]  }
 0x75e   : > { %6095 = vmatmul.mubr.bf16.vlgmr.msra.gmra.mrb[16].mxu0 %v5225_v1  ;;  %6181 = vmatmul.mubr.bf16.vlgmr.msra.gmra.mrb[16].mxu1 %v5225_v1  ;;  %v16136_v1 = vld [vmem:[%s17872_s29 + $0x15a0] ss:$16 sps:$4 sm:$0xff]  }
 0x75f   : > { %6996 = vmatpush1.bf16.msra.mxu0 %v16058_v41  ;;  %7082 = vmatpush1.bf16.msra.mxu1 %v16061_v19  ;;  %v16138_v41 = vld [vmem:[%s17872_s29 + $0x15a4] ss:$16 sps:$4 sm:$0xff]   ;;  %v16141_v19 = vld [vmem:[%s17872_s29 + $0x15ac] ss:$16 sps:$4 sm:$0xff]  }
 0x760   : > { %6997 = vmatprep.subr.bf16.mxu0 %v16066_v2  ;;  %7083 = vmatprep.subr.bf16.mxu1 %v16069_v20  ;;  %v16139_v2 = vld [vmem:[%s17872_s29 + $0x15a8] ss:$16 sps:$4 sm:$0xff]   ;;  %v16144_v20 = vld [vmem:[%s17872_s29 + $0x15c4] ss:$16 sps:$4 sm:$0xff]  }
 0x763   : > { %6998 = vmatpush1.bf16.msra.mxu0 %v16064_v5  ;;  %7084 = vmatpush1.bf16.msra.mxu1 %v16067_v21  ;;  %v16147_v5 = vld [vmem:[%s17872_s29 + $0x15cc] ss:$16 sps:$4 sm:$0xff]   ;;  %v16142_v21 = vld [vmem:[%s17872_s29 + $0x15c0] ss:$16 sps:$4 sm:$0xff]  }
 0x764   : > { %6999 = vmatprep.subr.bf16.mxu0 %v16072_v23  ;;  %7085 = vmatprep.subr.bf16.mxu1 %v16075_v24  ;;  %v16145_v23 = vld [vmem:[%s17872_s29 + $0x15c8] ss:$16 sps:$4 sm:$0xff]   ;;  %v16150_v24 = vld [vmem:[%s17872_s29 + $0x15e4] ss:$16 sps:$4 sm:$0xff]  }
 0x767   : > { %7000 = vmatpush1.bf16.msra.mxu0 %v16070_v25  ;;  %7086 = vmatpush1.bf16.msra.mxu1 %v16073_v26  ;;  %v16153_v25 = vld [vmem:[%s17872_s29 + $0x15ec] ss:$16 sps:$4 sm:$0xff]   ;;  %v16148_v26 = vld [vmem:[%s17872_s29 + $0x15e0] ss:$16 sps:$4 sm:$0xff]  }
 0x768   : > { %7001 = vmatprep.subr.bf16.mxu0 %v16078_v62  ;;  %7087 = vmatprep.subr.bf16.mxu1 %v16081_v28  ;;  %v16151_v62 = vld [vmem:[%s17872_s29 + $0x15e8] ss:$16 sps:$4 sm:$0xff]   ;;  %v16156_v28 = vld [vmem:[%s17872_s29 + $0x1604] ss:$16 sps:$4 sm:$0xff]  }
 0x76b   : > { %7002 = vmatpush1.bf16.msra.mxu0 %v16076_v29  ;;  %7088 = vmatpush1.bf16.msra.mxu1 %v16079_v35  ;;  %v16159_v29 = vld [vmem:[%s17872_s29 + $0x160c] ss:$16 sps:$4 sm:$0xff]   ;;  %v13098_v35 = vld [vmem:[%s17878_s24 + $0x10] sm:$0xf] }
 0x76c   : > { %7003 = vmatprep.subr.bf16.mxu0 %v16084_v37  ;;  %7089 = vmatprep.subr.bf16.mxu1 %v16087_v39  ;;  %v5362_v37 = vrot.slane %v13098_v35, %v18085_v30  ;;  %v5370_v39 = vrot.slane %v13098_v35, %v18087_v31 }
 0x76f   : > { %7004 = vmatpush1.bf16.msra.mxu0 %v16082_v43  ;;  %7090 = vmatpush1.bf16.msra.mxu1 %v16085_v45  ;;  %v5366_v43 = vrot.slane %v13098_v35, %v18089_v32  ;;  %v5374_v45 = vrot.slane %v13098_v35, %v18091_v33  ;;  %v16186_v35 = vld [vmem:[%s17872_s29 + $0x16a4] ss:$16 sps:$4 sm:$0xff]  }
 0x770   : > { %7005 = vmatprep.subr.bf16.mxu0 %v16090_v46  ;;  %7091 = vmatprep.subr.bf16.mxu1 %v16093_v47 }
 0x773   : > { %7006 = vmatpush1.bf16.msra.mxu0 %v16088_v48  ;;  %7092 = vmatpush1.bf16.msra.mxu1 %v16091_v51 }
 0x774   : > { %7007 = vmatprep.subr.bf16.mxu0 %v16096_v52  ;;  %7093 = vmatprep.subr.bf16.mxu1 %v16099_v53 }
 0x777   : > { %7008 = vmatpush1.bf16.msra.mxu0 %v16094_v54  ;;  %7094 = vmatpush1.bf16.msra.mxu1 %v16097_v55 }
 0x778   : > { %7009 = vmatprep.subr.bf16.mxu0 %v16102_v56  ;;  %7095 = vmatprep.subr.bf16.mxu1 %v16105_v57 }
 0x77b   : > { %7010 = vmatpush1.bf16.msra.mxu0 %v16100_v13  ;;  %7096 = vmatpush1.bf16.msra.mxu1 %v16103_v0 }
 0x77c   : > { %7011 = vmatprep.subr.bf16.mxu0 %v16108_v36  ;;  %7097 = vmatprep.subr.bf16.mxu1 %v16111_v40 }
 0x77f   : > { %7012 = vmatpush1.bf16.msra.mxu0 %v16106_v42  ;;  %7098 = vmatpush1.bf16.msra.mxu1 %v16109_v22 }
 0x780   : > { %7013 = vmatprep.subr.bf16.mxu0 %v16114_v44  ;;  %7099 = vmatprep.subr.bf16.mxu1 %v16117_v49 }
 0x783   : > { %7014 = vmatpush1.bf16.msra.mxu0 %v16112_v3  ;;  %7100 = vmatpush1.bf16.msra.mxu1 %v16115_v4 }
 0x784   : > { %7015 = vmatprep.subr.bf16.mxu0 %v16120_v17  ;;  %7101 = vmatprep.subr.bf16.mxu1 %v16123_v6 }
 0x787   : > { %7016 = vmatpush1.bf16.msra.mxu0 %v16118_v7  ;;  %7102 = vmatpush1.bf16.msra.mxu1 %v16121_v8 }
 0x788   : > { %7017 = vmatprep.subr.bf16.mxu0 %v16126_v9  ;;  %7103 = vmatprep.subr.bf16.mxu1 %v16129_v10 }
 0x78b   : > { %7018 = vmatpush1.bf16.msra.mxu0 %v16124_v11  ;;  %7104 = vmatpush1.bf16.msra.mxu1 %v16127_v12 }
 0x78c   : > { %7019 = vmatprep.subr.bf16.mxu0 %v16132_v34  ;;  %7105 = vmatprep.subr.bf16.mxu1 %v16135_v14  ;;  %v16154_v34 = vld [vmem:[%s17872_s29 + $0x1600] ss:$16 sps:$4 sm:$0xff]   ;;  %v16157_v14 = vld [vmem:[%s17872_s29 + $0x1608] ss:$16 sps:$4 sm:$0xff]  }
 0x78f   : > { %7020 = vmatpush1.bf16.msra.mxu0 %v16130_v50  ;;  %7106 = vmatpush1.bf16.msra.mxu1 %v16133_v16  ;;  %v16162_v50 = vld [vmem:[%s17872_s29 + $0x1624] ss:$16 sps:$4 sm:$0xff]   ;;  %v16165_v16 = vld [vmem:[%s17872_s29 + $0x162c] ss:$16 sps:$4 sm:$0xff]  }
 0x790   : > { %7021 = vmatprep.subr.bf16.mxu0 %v16138_v41  ;;  %7107 = vmatprep.subr.bf16.mxu1 %v16141_v19  ;;  %v16160_v41 = vld [vmem:[%s17872_s29 + $0x1620] ss:$16 sps:$4 sm:$0xff]   ;;  %v16163_v19 = vld [vmem:[%s17872_s29 + $0x1628] ss:$16 sps:$4 sm:$0xff]  }
 0x793   : > { %7022 = vmatpush1.bf16.msra.mxu0 %v16136_v1  ;;  %7108 = vmatpush1.bf16.msra.mxu1 %v16139_v2  ;;  %v16168_v1 = vld [vmem:[%s17872_s29 + $0x1644] ss:$16 sps:$4 sm:$0xff]   ;;  %v16171_v2 = vld [vmem:[%s17872_s29 + $0x164c] ss:$16 sps:$4 sm:$0xff]  }
 0x794   : > { %7023 = vmatprep.subr.bf16.mxu0 %v16144_v20  ;;  %7109 = vmatprep.subr.bf16.mxu1 %v16147_v5  ;;  %v16166_v20 = vld [vmem:[%s17872_s29 + $0x1640] ss:$16 sps:$4 sm:$0xff]   ;;  %v16169_v5 = vld [vmem:[%s17872_s29 + $0x1648] ss:$16 sps:$4 sm:$0xff]  }
 0x797   : > { %7024 = vmatpush1.bf16.msra.mxu0 %v16142_v21  ;;  %7110 = vmatpush1.bf16.msra.mxu1 %v16145_v23  ;;  %v16174_v21 = vld [vmem:[%s17872_s29 + $0x1664] ss:$16 sps:$4 sm:$0xff]   ;;  %v16177_v23 = vld [vmem:[%s17872_s29 + $0x166c] ss:$16 sps:$4 sm:$0xff]  }
 0x798   : > { %7025 = vmatprep.subr.bf16.mxu0 %v16150_v24  ;;  %7111 = vmatprep.subr.bf16.mxu1 %v16153_v25  ;;  %v16172_v24 = vld [vmem:[%s17872_s29 + $0x1660] ss:$16 sps:$4 sm:$0xff]   ;;  %v16175_v25 = vld [vmem:[%s17872_s29 + $0x1668] ss:$16 sps:$4 sm:$0xff]  }
 0x79b   : > { %7026 = vmatpush1.bf16.msra.mxu0 %v16148_v26  ;;  %7112 = vmatpush1.bf16.msra.mxu1 %v16151_v62  ;;  %v16180_v26 = vld [vmem:[%s17872_s29 + $0x1684] ss:$16 sps:$4 sm:$0xff]   ;;  %v16183_v62 = vld [vmem:[%s17872_s29 + $0x168c] ss:$16 sps:$4 sm:$0xff]  }
 0x79c   : > { %7038 = vmatprep.subr.bf16.mxu0 %v16156_v28  ;;  %7124 = vmatprep.subr.bf16.mxu1 %v16159_v29  ;;  %v16178_v28 = vld [vmem:[%s17872_s29 + $0x1680] ss:$16 sps:$4 sm:$0xff]   ;;  %v16181_v29 = vld [vmem:[%s17872_s29 + $0x1688] ss:$16 sps:$4 sm:$0xff]  }
 0x831   : > { %v6096_v46 = vpop.f32.mrb[16].mxu0  ;;  %v6182_v47 = vpop.f32.mrb[16].mxu1 }
 0x832   : > { %v14674_v48 = vadd.f32 %v6096_v46, %v5362_v37  ;;  %v14678_v51 = vadd.f32 %v6182_v47, %v5370_v39  ;;  %v6098_v52 = vpop.f32.mrb[17].mxu0  ;;  %v6184_v53 = vpop.f32.mrb[17].mxu1  ;;  %v16195_v46 = vld [vmem:[%s17872_s29 + $0x16cc] ss:$16 sps:$4 sm:$0xff]   ;;  %v16190_v47 = vld [vmem:[%s17872_s29 + $0x16c0] ss:$16 sps:$4 sm:$0xff]  }
 0x833   : > { %v14675_v54 = vadd.f32 %v6098_v52, %v5366_v43  ;;  %v14679_v55 = vadd.f32 %v6184_v53, %v5374_v45  ;;  %v6100_v56 = vpop.f32.mrb[18].mxu0  ;;  %v6186_v57 = vpop.f32.mrb[18].mxu1  ;;  %v16201_v52 = vld [vmem:[%s17872_s29 + $0x16ec] ss:$16 sps:$4 sm:$0xff]   ;;  %v16196_v53 = vld [vmem:[%s17872_s29 + $0x16e0] ss:$16 sps:$4 sm:$0xff]  }
 0x834   : > { %v14676_v13 = vadd.f32 %v6100_v56, %v5362_v37  ;;  %v14680_v0 = vadd.f32 %v6186_v57, %v5370_v39  ;;  %v6102_v36 = vpop.f32.mrb[19].mxu0  ;;  %v6188_v40 = vpop.f32.mrb[19].mxu1  ;;  %v6191_v44 = vmax.f32 %v14674_v48, 0.0  ;;  %v6193_v49 = vmax.f32 %v14678_v51, 0.0  ;;  %v16189_v37 = vld [vmem:[%s17872_s29 + $0x16ac] ss:$16 sps:$4 sm:$0xff]  }
 0x835   : > { %v14677_v42 = vadd.f32 %v6102_v36, %v5366_v43  ;;  %v14681_v22 = vadd.f32 %v6188_v40, %v5374_v45  ;;  %v6192_v17 = vmax.f32 %v14675_v54, 0.0  ;;  %v6194_v6 = vmax.f32 %v14679_v55, 0.0  ;;  %v16184_v39 = vld [vmem:[%s17872_s29 + $0x16a0] ss:$16 sps:$4 sm:$0xff]   ;;  %v16187_v43 = vld [vmem:[%s17872_s29 + $0x16a8] ss:$16 sps:$4 sm:$0xff]  }
 0x836   : > { %v6195_v3 = vmax.f32 %v14676_v13, 0.0  ;;  %v6197_v4 = vmax.f32 %v14680_v0, 0.0  ;;  %v16192_v45 = vld [vmem:[%s17872_s29 + $0x16c4] ss:$16 sps:$4 sm:$0xff]   ;;  %v16193_v48 = vld [vmem:[%s17872_s29 + $0x16c8] ss:$16 sps:$4 sm:$0xff]  }
 0x837   : > { %v6196_v7 = vmax.f32 %v14677_v42, 0.0  ;;  %v6198_v8 = vmax.f32 %v14681_v22, 0.0  ;;  %v16198_v51 = vld [vmem:[%s17872_s29 + $0x16e4] ss:$16 sps:$4 sm:$0xff]   ;;  %v16199_v54 = vld [vmem:[%s17872_s29 + $0x16e8] ss:$16 sps:$4 sm:$0xff]  }
 0x838   : > { %v6199_v9 = vpack.c.bf16 %v6195_v3, %v6191_v44  ;;  %v18717_v10 = vpack.c.bf16 %v6197_v4, %v6193_v49  ;;  %v16204_v55 = vld [vmem:[%s17872_s29 + $0x1704] ss:$16 sps:$4 sm:$0xff]   ;;  %v16207_v56 = vld [vmem:[%s17872_s29 + $0x170c] ss:$16 sps:$4 sm:$0xff]   ;;  %v16202_v57 = vld [vmem:[%s17872_s29 + $0x1700] ss:$16 sps:$4 sm:$0xff]  }
 0x839   : > { %v6200_v11 = vpack.c.bf16 %v6196_v7, %v6192_v17  ;;  %v6202_v12 = vpack.c.bf16 %v6198_v8, %v6194_v6  ;;  %v16205_v13 = vld [vmem:[%s17872_s29 + $0x1708] ss:$16 sps:$4 sm:$0xff]   ;;  %v16210_v0 = vld [vmem:[%s17872_s29 + $0x1724] ss:$16 sps:$4 sm:$0xff]   ;;  %v16213_v36 = vld [vmem:[%s17872_s29 + $0x172c] ss:$16 sps:$4 sm:$0xff]  }
 0x83a   : > { %v16208_v40 = vld [vmem:[%s17872_s29 + $0x1720] ss:$16 sps:$4 sm:$0xff]   ;;  %v16211_v42 = vld [vmem:[%s17872_s29 + $0x1728] ss:$16 sps:$4 sm:$0xff]   ;;  %v16216_v22 = vld [vmem:[%s17872_s29 + $0x1744] ss:$16 sps:$4 sm:$0xff]  }
 0x83b   : > { %7027 = vmatprep.mubr.bf16.mxu0 %v6200_v11  ;;  %7113 = vmatprep.mubr.bf16.mxu1 %v6200_v11  ;;  %v16219_v44 = vld [vmem:[%s17872_s29 + $0x174c] ss:$16 sps:$4 sm:$0xff]   ;;  %v16214_v49 = vld [vmem:[%s17872_s29 + $0x1740] ss:$16 sps:$4 sm:$0xff]   ;;  %v16217_v3 = vld [vmem:[%s17872_s29 + $0x1748] ss:$16 sps:$4 sm:$0xff]  }
 0x83c   : > { %7028 = vmatmul.mubr.bf16.vlgmr.msra.gmra.mrb[20].mxu0 %v6199_v9  ;;  %7114 = vmatmul.mubr.bf16.vlgmr.msra.gmra.mrb[20].mxu1 %v6199_v9  ;;  %v16222_v4 = vld [vmem:[%s17872_s29 + $0x1764] ss:$16 sps:$4 sm:$0xff]   ;;  %v16225_v17 = vld [vmem:[%s17872_s29 + $0x176c] ss:$16 sps:$4 sm:$0xff]   ;;  %v16220_v6 = vld [vmem:[%s17872_s29 + $0x1760] ss:$16 sps:$4 sm:$0xff]  }
 0x83d   : > { %7039 = vmatpush1.bf16.msra.mxu0 %v16154_v34  ;;  %7125 = vmatpush1.bf16.msra.mxu1 %v16157_v14  ;;  %v16223_v7 = vld [vmem:[%s17872_s29 + $0x1768] ss:$16 sps:$4 sm:$0xff]   ;;  %v16228_v8 = vld [vmem:[%s17872_s29 + $0x1784] ss:$16 sps:$4 sm:$0xff]   ;;  %v16231_v9 = vld [vmem:[%s17872_s29 + $0x178c] ss:$16 sps:$4 sm:$0xff]  }
 0x83e   : > { %7070 = vmatprep.mubr.bf16.mxu0 %v6202_v12  ;;  %7156 = vmatprep.mubr.bf16.mxu1 %v6202_v12  ;;  %v16226_v11 = vld [vmem:[%s17872_s29 + $0x1780] ss:$16 sps:$4 sm:$0xff]   ;;  %v16229_v12 = vld [vmem:[%s17872_s29 + $0x1788] ss:$16 sps:$4 sm:$0xff]   ;;  %v16234_v34 = vld [vmem:[%s17872_s29 + $0x17a4] ss:$16 sps:$4 sm:$0xff]  }
 0x83f   : > { %7040 = vmatprep.subr.bf16.mxu0 %v16162_v50  ;;  %7126 = vmatprep.subr.bf16.mxu1 %v16165_v16  ;;  %v16237_v14 = vld [vmem:[%s17872_s29 + $0x17ac] ss:$16 sps:$4 sm:$0xff]   ;;  %v16232_v50 = vld [vmem:[%s17872_s29 + $0x17a0] ss:$16 sps:$4 sm:$0xff]   ;;  %v16235_v16 = vld [vmem:[%s17872_s29 + $0x17a8] ss:$16 sps:$4 sm:$0xff]  }
 0x841   : > { %7041 = vmatpush1.bf16.msra.mxu0 %v16160_v41  ;;  %7127 = vmatpush1.bf16.msra.mxu1 %v16163_v19  ;;  %v16240_v41 = vld [vmem:[%s17872_s29 + $0x17c4] ss:$16 sps:$4 sm:$0xff]   ;;  %v16243_v19 = vld [vmem:[%s17872_s29 + $0x17cc] ss:$16 sps:$4 sm:$0xff]  }
 0x842   : > { %7042 = vmatprep.subr.bf16.mxu0 %v16168_v1  ;;  %7128 = vmatprep.subr.bf16.mxu1 %v16171_v2  ;;  %v16238_v1 = vld [vmem:[%s17872_s29 + $0x17c0] ss:$16 sps:$4 sm:$0xff]   ;;  %v16241_v2 = vld [vmem:[%s17872_s29 + $0x17c8] ss:$16 sps:$4 sm:$0xff]  }
 0x845   : > { %7043 = vmatpush1.bf16.msra.mxu0 %v16166_v20  ;;  %7129 = vmatpush1.bf16.msra.mxu1 %v16169_v5  ;;  %v16246_v20 = vld [vmem:[%s17872_s29 + $0x17e4] ss:$16 sps:$4 sm:$0xff]   ;;  %v16249_v5 = vld [vmem:[%s17872_s29 + $0x17ec] ss:$16 sps:$4 sm:$0xff]  }
 0x846   : > { %7044 = vmatprep.subr.bf16.mxu0 %v16174_v21  ;;  %7130 = vmatprep.subr.bf16.mxu1 %v16177_v23  ;;  %v16244_v21 = vld [vmem:[%s17872_s29 + $0x17e0] ss:$16 sps:$4 sm:$0xff]   ;;  %v16247_v23 = vld [vmem:[%s17872_s29 + $0x17e8] ss:$16 sps:$4 sm:$0xff]  }
 0x849   : > { %7045 = vmatpush1.bf16.msra.mxu0 %v16172_v24  ;;  %7131 = vmatpush1.bf16.msra.mxu1 %v16175_v25  ;;  %v16252_v24 = vld [vmem:[%s17872_s29 + $0x1804] ss:$16 sps:$4 sm:$0xff]   ;;  %v16255_v25 = vld [vmem:[%s17872_s29 + $0x180c] ss:$16 sps:$4 sm:$0xff]  }
 0x84a   : > { %7046 = vmatprep.subr.bf16.mxu0 %v16180_v26  ;;  %7132 = vmatprep.subr.bf16.mxu1 %v16183_v62  ;;  %v16250_v26 = vld [vmem:[%s17872_s29 + $0x1800] ss:$16 sps:$4 sm:$0xff]   ;;  %v16253_v62 = vld [vmem:[%s17872_s29 + $0x1808] ss:$16 sps:$4 sm:$0xff]  }
 0x84d   : > { %7047 = vmatpush1.bf16.msra.mxu0 %v16178_v28  ;;  %7133 = vmatpush1.bf16.msra.mxu1 %v16181_v29  ;;  %v16258_v28 = vld [vmem:[%s17872_s29 + $0x1824] ss:$16 sps:$4 sm:$0xff]   ;;  %v16261_v29 = vld [vmem:[%s17872_s29 + $0x182c] ss:$16 sps:$4 sm:$0xff]  }
 0x84e   : > { %7048 = vmatprep.subr.bf16.mxu0 %v16186_v35  ;;  %7134 = vmatprep.subr.bf16.mxu1 %v16189_v37  ;;  %v16256_v35 = vld [vmem:[%s17872_s29 + $0x1820] ss:$16 sps:$4 sm:$0xff]   ;;  %v16259_v37 = vld [vmem:[%s17872_s29 + $0x1828] ss:$16 sps:$4 sm:$0xff]  }
 0x851   : > { %7049 = vmatpush1.bf16.msra.mxu0 %v16184_v39  ;;  %7135 = vmatpush1.bf16.msra.mxu1 %v16187_v43  ;;  %v16264_v39 = vld [vmem:[%s17872_s29 + $0x1844] ss:$16 sps:$4 sm:$0xff]   ;;  %v16267_v43 = vld [vmem:[%s17872_s29 + $0x184c] ss:$16 sps:$4 sm:$0xff]  }
 0x852   : > { %7050 = vmatprep.subr.bf16.mxu0 %v16192_v45  ;;  %7136 = vmatprep.subr.bf16.mxu1 %v16195_v46  ;;  %v16262_v45 = vld [vmem:[%s17872_s29 + $0x1840] ss:$16 sps:$4 sm:$0xff]   ;;  %v16265_v46 = vld [vmem:[%s17872_s29 + $0x1848] ss:$16 sps:$4 sm:$0xff]  }
 0x855   : > { %7051 = vmatpush1.bf16.msra.mxu0 %v16190_v47  ;;  %7137 = vmatpush1.bf16.msra.mxu1 %v16193_v48  ;;  %v16273_v47 = vld [vmem:[%s17872_s29 + $0x186c] ss:$16 sps:$4 sm:$0xff]   ;;  %v16268_v48 = vld [vmem:[%s17872_s29 + $0x1860] ss:$16 sps:$4 sm:$0xff]  }
 0x856   : > { %7052 = vmatprep.subr.bf16.mxu0 %v16198_v51  ;;  %7138 = vmatprep.subr.bf16.mxu1 %v16201_v52  ;;  %v16271_v51 = vld [vmem:[%s17872_s29 + $0x1868] ss:$16 sps:$4 sm:$0xff]   ;;  %v16276_v52 = vld [vmem:[%s17872_s29 + $0x1884] ss:$16 sps:$4 sm:$0xff]  }
 0x859   : > { %7053 = vmatpush1.bf16.msra.mxu0 %v16196_v53  ;;  %7139 = vmatpush1.bf16.msra.mxu1 %v16199_v54  ;;  %v16279_v53 = vld [vmem:[%s17872_s29 + $0x188c] ss:$16 sps:$4 sm:$0xff]   ;;  %v16274_v54 = vld [vmem:[%s17872_s29 + $0x1880] ss:$16 sps:$4 sm:$0xff]  }
 0x85a   : > { %7054 = vmatprep.subr.bf16.mxu0 %v16204_v55  ;;  %7140 = vmatprep.subr.bf16.mxu1 %v16207_v56  ;;  %v16277_v55 = vld [vmem:[%s17872_s29 + $0x1888] ss:$16 sps:$4 sm:$0xff]   ;;  %v16282_v56 = vld [vmem:[%s17872_s29 + $0x18a4] ss:$16 sps:$4 sm:$0xff]  }
 0x85d   : > { %7055 = vmatpush1.bf16.msra.mxu0 %v16202_v57  ;;  %7141 = vmatpush1.bf16.msra.mxu1 %v16205_v13  ;;  %v16285_v57 = vld [vmem:[%s17872_s29 + $0x18ac] ss:$16 sps:$4 sm:$0xff]   ;;  %v16280_v13 = vld [vmem:[%s17872_s29 + $0x18a0] ss:$16 sps:$4 sm:$0xff]  }
 0x85e   : > { %7056 = vmatprep.subr.bf16.mxu0 %v16210_v0  ;;  %7142 = vmatprep.subr.bf16.mxu1 %v16213_v36  ;;  %v16283_v0 = vld [vmem:[%s17872_s29 + $0x18a8] ss:$16 sps:$4 sm:$0xff]   ;;  %v16288_v36 = vld [vmem:[%s17872_s29 + $0x18c4] ss:$16 sps:$4 sm:$0xff]  }
 0x861   : > { %7057 = vmatpush1.bf16.msra.mxu0 %v16208_v40  ;;  %7143 = vmatpush1.bf16.msra.mxu1 %v16211_v42  ;;  %v16291_v40 = vld [vmem:[%s17872_s29 + $0x18cc] ss:$16 sps:$4 sm:$0xff]   ;;  %v16286_v42 = vld [vmem:[%s17872_s29 + $0x18c0] ss:$16 sps:$4 sm:$0xff]  }
 0x862   : > { %7058 = vmatprep.subr.bf16.mxu0 %v16216_v22  ;;  %7144 = vmatprep.subr.bf16.mxu1 %v16219_v44  ;;  %v16289_v22 = vld [vmem:[%s17872_s29 + $0x18c8] ss:$16 sps:$4 sm:$0xff]   ;;  %v16294_v44 = vld [vmem:[%s17872_s29 + $0x18e4] ss:$16 sps:$4 sm:$0xff]  }
 0x865   : > { %7059 = vmatpush1.bf16.msra.mxu0 %v16214_v49  ;;  %7145 = vmatpush1.bf16.msra.mxu1 %v16217_v3  ;;  %v16297_v49 = vld [vmem:[%s17872_s29 + $0x18ec] ss:$16 sps:$4 sm:$0xff]   ;;  %v16292_v3 = vld [vmem:[%s17872_s29 + $0x18e0] ss:$16 sps:$4 sm:$0xff]  }
 0x866   : > { %7060 = vmatprep.subr.bf16.mxu0 %v16222_v4  ;;  %7146 = vmatprep.subr.bf16.mxu1 %v16225_v17  ;;  %v16295_v4 = vld [vmem:[%s17872_s29 + $0x18e8] ss:$16 sps:$4 sm:$0xff]   ;;  %v16300_v17 = vld [vmem:[%s17872_s29 + $0x1904] ss:$16 sps:$4 sm:$0xff]  }
 0x869   : > { %7061 = vmatpush1.bf16.msra.mxu0 %v16220_v6  ;;  %7147 = vmatpush1.bf16.msra.mxu1 %v16223_v7  ;;  %v16303_v6 = vld [vmem:[%s17872_s29 + $0x190c] ss:$16 sps:$4 sm:$0xff]   ;;  %v16298_v7 = vld [vmem:[%s17872_s29 + $0x1900] ss:$16 sps:$4 sm:$0xff]  }
 0x86a   : > { %7062 = vmatprep.subr.bf16.mxu0 %v16228_v8  ;;  %7148 = vmatprep.subr.bf16.mxu1 %v16231_v9  ;;  %v16301_v8 = vld [vmem:[%s17872_s29 + $0x1908] ss:$16 sps:$4 sm:$0xff]   ;;  %v16306_v9 = vld [vmem:[%s17872_s29 + $0x1924] ss:$16 sps:$4 sm:$0xff]  }
 0x86d   : > { %7063 = vmatpush1.bf16.msra.mxu0 %v16226_v11  ;;  %7149 = vmatpush1.bf16.msra.mxu1 %v16229_v12  ;;  %v16309_v11 = vld [vmem:[%s17872_s29 + $0x192c] ss:$16 sps:$4 sm:$0xff]   ;;  %v16304_v12 = vld [vmem:[%s17872_s29 + $0x1920] ss:$16 sps:$4 sm:$0xff]  }
 0x86e   : > { %7064 = vmatprep.subr.bf16.mxu0 %v16234_v34  ;;  %7150 = vmatprep.subr.bf16.mxu1 %v16237_v14  ;;  %v16307_v34 = vld [vmem:[%s17872_s29 + $0x1928] ss:$16 sps:$4 sm:$0xff]   ;;  %v16312_v14 = vld [vmem:[%s17872_s29 + $0x1944] ss:$16 sps:$4 sm:$0xff]  }
 0x871   : > { %7065 = vmatpush1.bf16.msra.mxu0 %v16232_v50  ;;  %7151 = vmatpush1.bf16.msra.mxu1 %v16235_v16  ;;  %v16315_v50 = vld [vmem:[%s17872_s29 + $0x194c] ss:$16 sps:$4 sm:$0xff]   ;;  %v16310_v16 = vld [vmem:[%s17872_s29 + $0x1940] ss:$16 sps:$4 sm:$0xff]  }
 0x872   : > { %7066 = vmatprep.subr.bf16.mxu0 %v16240_v41  ;;  %7152 = vmatprep.subr.bf16.mxu1 %v16243_v19  ;;  %v16313_v41 = vld [vmem:[%s17872_s29 + $0x1948] ss:$16 sps:$4 sm:$0xff]   ;;  %v16318_v19 = vld [vmem:[%s17872_s29 + $0x1964] ss:$16 sps:$4 sm:$0xff]  }
 0x875   : > { %7067 = vmatpush1.bf16.msra.mxu0 %v16238_v1  ;;  %7153 = vmatpush1.bf16.msra.mxu1 %v16241_v2  ;;  %v16321_v1 = vld [vmem:[%s17872_s29 + $0x196c] ss:$16 sps:$4 sm:$0xff]   ;;  %v16316_v2 = vld [vmem:[%s17872_s29 + $0x1960] ss:$16 sps:$4 sm:$0xff]  }
 0x876   : > { %7068 = vmatprep.subr.bf16.mxu0 %v16246_v20  ;;  %7154 = vmatprep.subr.bf16.mxu1 %v16249_v5  ;;  %v16319_v20 = vld [vmem:[%s17872_s29 + $0x1968] ss:$16 sps:$4 sm:$0xff]   ;;  %v16324_v5 = vld [vmem:[%s17872_s29 + $0x1984] ss:$16 sps:$4 sm:$0xff]  }
 0x879   : > { %7069 = vmatpush1.bf16.msra.mxu0 %v16244_v21  ;;  %7155 = vmatpush1.bf16.msra.mxu1 %v16247_v23  ;;  %v16327_v21 = vld [vmem:[%s17872_s29 + $0x198c] ss:$16 sps:$4 sm:$0xff]   ;;  %v16322_v23 = vld [vmem:[%s17872_s29 + $0x1980] ss:$16 sps:$4 sm:$0xff]  }
 0x87a   : > { %7971 = vmatprep.subr.bf16.mxu0 %v16252_v24  ;;  %8057 = vmatprep.subr.bf16.mxu1 %v16255_v25  ;;  %v16325_v24 = vld [vmem:[%s17872_s29 + $0x1988] ss:$16 sps:$4 sm:$0xff]   ;;  %v16330_v25 = vld [vmem:[%s17872_s29 + $0x19a4] ss:$16 sps:$4 sm:$0xff]  }
 0x87c   : > { %7071 = vmatmul.mubr.bf16.vlgmr.msra.gmra.mrb[20].mxu0 %v18717_v10  ;;  %7157 = vmatmul.mubr.bf16.vlgmr.msra.gmra.mrb[20].mxu1 %v18717_v10  ;;  %v16270_v10 = vld [vmem:[%s17872_s29 + $0x1864] ss:$16 sps:$4 sm:$0xff]  }
 0x87d   : > { %7972 = vmatpush1.bf16.msra.mxu0 %v16250_v26  ;;  %8058 = vmatpush1.bf16.msra.mxu1 %v16253_v62  ;;  %v16333_v26 = vld [vmem:[%s17872_s29 + $0x19ac] ss:$16 sps:$4 sm:$0xff]   ;;  %v16328_v62 = vld [vmem:[%s17872_s29 + $0x19a0] ss:$16 sps:$4 sm:$0xff]  }
 0x87e   : > { %7973 = vmatprep.subr.bf16.mxu0 %v16258_v28  ;;  %8059 = vmatprep.subr.bf16.mxu1 %v16261_v29  ;;  %v16331_v28 = vld [vmem:[%s17872_s29 + $0x19a8] ss:$16 sps:$4 sm:$0xff]   ;;  %v16336_v29 = vld [vmem:[%s17872_s29 + $0x19c4] ss:$16 sps:$4 sm:$0xff]  }
 0x881   : > { %7974 = vmatpush1.bf16.msra.mxu0 %v16256_v35  ;;  %8060 = vmatpush1.bf16.msra.mxu1 %v16259_v37  ;;  %v16339_v35 = vld [vmem:[%s17872_s29 + $0x19cc] ss:$16 sps:$4 sm:$0xff]   ;;  %v16334_v37 = vld [vmem:[%s17872_s29 + $0x19c0] ss:$16 sps:$4 sm:$0xff]  }
 0x882   : > { %7975 = vmatprep.subr.bf16.mxu0 %v16264_v39  ;;  %8061 = vmatprep.subr.bf16.mxu1 %v16267_v43  ;;  %v16337_v39 = vld [vmem:[%s17872_s29 + $0x19c8] ss:$16 sps:$4 sm:$0xff]   ;;  %v16342_v43 = vld [vmem:[%s17872_s29 + $0x19e4] ss:$16 sps:$4 sm:$0xff]  }
 0x885   : > { %7976 = vmatpush1.bf16.msra.mxu0 %v16262_v45  ;;  %8062 = vmatpush1.bf16.msra.mxu1 %v16265_v46  ;;  %v16345_v45 = vld [vmem:[%s17872_s29 + $0x19ec] ss:$16 sps:$4 sm:$0xff]   ;;  %v16340_v46 = vld [vmem:[%s17872_s29 + $0x19e0] ss:$16 sps:$4 sm:$0xff]  }
 0x886   : > { %7977 = vmatprep.subr.bf16.mxu0 %v16270_v10  ;;  %8063 = vmatprep.subr.bf16.mxu1 %v16273_v47  ;;  %v16343_v10 = vld [vmem:[%s17872_s29 + $0x19e8] ss:$16 sps:$4 sm:$0xff]   ;;  %v16348_v47 = vld [vmem:[%s17872_s29 + $0x1a04] ss:$16 sps:$4 sm:$0xff]  }
 0x889   : > { %7978 = vmatpush1.bf16.msra.mxu0 %v16268_v48  ;;  %8064 = vmatpush1.bf16.msra.mxu1 %v16271_v51  ;;  %v16351_v48 = vld [vmem:[%s17872_s29 + $0x1a0c] ss:$16 sps:$4 sm:$0xff]  }
 0x88a   : > { %7979 = vmatprep.subr.bf16.mxu0 %v16276_v52  ;;  %8065 = vmatprep.subr.bf16.mxu1 %v16279_v53  ;;  %v18850_v51 = vld [vmem:[%s17878_s24 + $0x14] sm:$0xf] }
 0x88b   : > { %v6342_v52 = vrot.slane %v18850_v51, %v18089_v32  ;;  %v6338_v53 = vrot.slane %v18850_v51, %v18085_v30 }
 0x88d   : > { %7980 = vmatpush1.bf16.msra.mxu0 %v16274_v54  ;;  %8066 = vmatpush1.bf16.msra.mxu1 %v16277_v55 }
 0x88e   : > { %7981 = vmatprep.subr.bf16.mxu0 %v16282_v56  ;;  %8067 = vmatprep.subr.bf16.mxu1 %v16285_v57  ;;  %v6350_v57 = vrot.slane %v18850_v51, %v18091_v33 }
 0x891   : > { %7982 = vmatpush1.bf16.msra.mxu0 %v16280_v13  ;;  %8068 = vmatpush1.bf16.msra.mxu1 %v16283_v0 }
 0x892   : > { %7983 = vmatprep.subr.bf16.mxu0 %v16288_v36  ;;  %8069 = vmatprep.subr.bf16.mxu1 %v16291_v40 }
 0x895   : > { %7984 = vmatpush1.bf16.msra.mxu0 %v16286_v42  ;;  %8070 = vmatpush1.bf16.msra.mxu1 %v16289_v22 }
 0x896   : > { %7985 = vmatprep.subr.bf16.mxu0 %v16294_v44  ;;  %8071 = vmatprep.subr.bf16.mxu1 %v16297_v49 }
 0x899   : > { %7986 = vmatpush1.bf16.msra.mxu0 %v16292_v3  ;;  %8072 = vmatpush1.bf16.msra.mxu1 %v16295_v4 }
 0x89a   : > { %7987 = vmatprep.subr.bf16.mxu0 %v16300_v17  ;;  %8073 = vmatprep.subr.bf16.mxu1 %v16303_v6 }
 0x89d   : > { %7988 = vmatpush1.bf16.msra.mxu0 %v16298_v7  ;;  %8074 = vmatpush1.bf16.msra.mxu1 %v16301_v8 }
 0x89e   : > { %7989 = vmatprep.subr.bf16.mxu0 %v16306_v9  ;;  %8075 = vmatprep.subr.bf16.mxu1 %v16309_v11 }
 0x8a1   : > { %7990 = vmatpush1.bf16.msra.mxu0 %v16304_v12  ;;  %8076 = vmatpush1.bf16.msra.mxu1 %v16307_v34  ;;  %v16346_v34 = vld [vmem:[%s17872_s29 + $0x1a00] ss:$16 sps:$4 sm:$0xff]  }
 0x8a2   : > { %7991 = vmatprep.subr.bf16.mxu0 %v16312_v14  ;;  %8077 = vmatprep.subr.bf16.mxu1 %v16315_v50  ;;  %v16357_v14 = vld [vmem:[%s17872_s29 + $0x1a2c] ss:$16 sps:$4 sm:$0xff]   ;;  %v16355_v50 = vld [vmem:[%s17872_s29 + $0x1a28] ss:$16 sps:$4 sm:$0xff]  }
 0x8a5   : > { %7992 = vmatpush1.bf16.msra.mxu0 %v16310_v16  ;;  %8078 = vmatpush1.bf16.msra.mxu1 %v16313_v41  ;;  %v16360_v16 = vld [vmem:[%s17872_s29 + $0x1a44] ss:$16 sps:$4 sm:$0xff]   ;;  %v16363_v41 = vld [vmem:[%s17872_s29 + $0x1a4c] ss:$16 sps:$4 sm:$0xff]  }
 0x8a6   : > { %7993 = vmatprep.subr.bf16.mxu0 %v16318_v19  ;;  %8079 = vmatprep.subr.bf16.mxu1 %v16321_v1  ;;  %v16358_v19 = vld [vmem:[%s17872_s29 + $0x1a40] ss:$16 sps:$4 sm:$0xff]   ;;  %v16361_v1 = vld [vmem:[%s17872_s29 + $0x1a48] ss:$16 sps:$4 sm:$0xff]  }
 0x8a9   : > { %7994 = vmatpush1.bf16.msra.mxu0 %v16316_v2  ;;  %8080 = vmatpush1.bf16.msra.mxu1 %v16319_v20  ;;  %v16366_v2 = vld [vmem:[%s17872_s29 + $0x1a64] ss:$16 sps:$4 sm:$0xff]   ;;  %v16369_v20 = vld [vmem:[%s17872_s29 + $0x1a6c] ss:$16 sps:$4 sm:$0xff]  }
 0x8aa   : > { %7995 = vmatprep.subr.bf16.mxu0 %v16324_v5  ;;  %8081 = vmatprep.subr.bf16.mxu1 %v16327_v21  ;;  %v16364_v5 = vld [vmem:[%s17872_s29 + $0x1a60] ss:$16 sps:$4 sm:$0xff]   ;;  %v16367_v21 = vld [vmem:[%s17872_s29 + $0x1a68] ss:$16 sps:$4 sm:$0xff]  }
 0x8ad   : > { %7996 = vmatpush1.bf16.msra.mxu0 %v16322_v23  ;;  %8082 = vmatpush1.bf16.msra.mxu1 %v16325_v24  ;;  %v16372_v23 = vld [vmem:[%s17872_s29 + $0x1a84] ss:$16 sps:$4 sm:$0xff]   ;;  %v16375_v24 = vld [vmem:[%s17872_s29 + $0x1a8c] ss:$16 sps:$4 sm:$0xff]  }
 0x8ae   : > { %7997 = vmatprep.subr.bf16.mxu0 %v16330_v25  ;;  %8083 = vmatprep.subr.bf16.mxu1 %v16333_v26  ;;  %v16370_v25 = vld [vmem:[%s17872_s29 + $0x1a80] ss:$16 sps:$4 sm:$0xff]   ;;  %v16373_v26 = vld [vmem:[%s17872_s29 + $0x1a88] ss:$16 sps:$4 sm:$0xff]  }
 0x8b1   : > { %7998 = vmatpush1.bf16.msra.mxu0 %v16328_v62  ;;  %8084 = vmatpush1.bf16.msra.mxu1 %v16331_v28  ;;  %v16378_v62 = vld [vmem:[%s17872_s29 + $0x1aa4] ss:$16 sps:$4 sm:$0xff]   ;;  %v16381_v28 = vld [vmem:[%s17872_s29 + $0x1aac] ss:$16 sps:$4 sm:$0xff]  }
 0x8b2   : > { %7999 = vmatprep.subr.bf16.mxu0 %v16336_v29  ;;  %8085 = vmatprep.subr.bf16.mxu1 %v16339_v35  ;;  %v16376_v29 = vld [vmem:[%s17872_s29 + $0x1aa0] ss:$16 sps:$4 sm:$0xff]   ;;  %v16379_v35 = vld [vmem:[%s17872_s29 + $0x1aa8] ss:$16 sps:$4 sm:$0xff]  }
 0x8b5   : > { %8000 = vmatpush1.bf16.msra.mxu0 %v16334_v37  ;;  %8086 = vmatpush1.bf16.msra.mxu1 %v16337_v39  ;;  %v16384_v37 = vld [vmem:[%s17872_s29 + $0x1ac4] ss:$16 sps:$4 sm:$0xff]   ;;  %v16387_v39 = vld [vmem:[%s17872_s29 + $0x1acc] ss:$16 sps:$4 sm:$0xff]  }
 0x8b6   : > { %8001 = vmatprep.subr.bf16.mxu0 %v16342_v43  ;;  %8087 = vmatprep.subr.bf16.mxu1 %v16345_v45  ;;  %v16382_v43 = vld [vmem:[%s17872_s29 + $0x1ac0] ss:$16 sps:$4 sm:$0xff]   ;;  %v16385_v45 = vld [vmem:[%s17872_s29 + $0x1ac8] ss:$16 sps:$4 sm:$0xff]  }
 0x8b9   : > { %8002 = vmatpush1.bf16.msra.mxu0 %v16340_v46  ;;  %8088 = vmatpush1.bf16.msra.mxu1 %v16343_v10  ;;  %v16390_v46 = vld [vmem:[%s17872_s29 + $0x1ae4] ss:$16 sps:$4 sm:$0xff]   ;;  %v16393_v10 = vld [vmem:[%s17872_s29 + $0x1aec] ss:$16 sps:$4 sm:$0xff]  }
 0x8ba   : > { %8014 = vmatprep.subr.bf16.mxu0 %v16348_v47  ;;  %8100 = vmatprep.subr.bf16.mxu1 %v16351_v48  ;;  %v16388_v47 = vld [vmem:[%s17872_s29 + $0x1ae0] ss:$16 sps:$4 sm:$0xff]   ;;  %v16391_v48 = vld [vmem:[%s17872_s29 + $0x1ae8] ss:$16 sps:$4 sm:$0xff]  }
 0x94f   : > { %v7072_v54 = vpop.f32.mrb[20].mxu0  ;;  %v18856_v55 = vpop.f32.mrb[20].mxu1 }
 0x950   : > { %v7074_v56 = vpop.f32.mrb[21].mxu0  ;;  %v7160_v13 = vpop.f32.mrb[21].mxu1  ;;  %v14682_v42 = vadd.f32 %v7072_v54, %v6338_v53  ;;  %v16394_v54 = vld [vmem:[%s17872_s29 + $0x1b00] ss:$16 sps:$4 sm:$0xff]  }
 0x951   : > { %v14683_v0 = vadd.f32 %v7074_v56, %v6342_v52  ;;  %v7076_v36 = vpop.f32.mrb[22].mxu0  ;;  %v18860_v40 = vpop.f32.mrb[22].mxu1  ;;  %v14687_v17 = vadd.f32 %v7160_v13, %v6350_v57  ;;  %v16397_v56 = vld [vmem:[%s17872_s29 + $0x1b08] ss:$16 sps:$4 sm:$0xff]   ;;  %v16405_v13 = vld [vmem:[%s17872_s29 + $0x1b2c] ss:$16 sps:$4 sm:$0xff]  }
 0x952   : > { %v14684_v22 = vadd.f32 %v7076_v36, %v6338_v53  ;;  %v7078_v44 = vpop.f32.mrb[23].mxu0  ;;  %v7164_v49 = vpop.f32.mrb[23].mxu1  ;;  %v18872_v9 = vadd.f32 %v14682_v42, %v18558_v61  ;;  %v16354_v61 = vld [vmem:[%s17872_s29 + $0x1a24] ss:$16 sps:$4 sm:$0xff]   ;;  %v16399_v53 = vld [vmem:[%s17872_s29 + $0x1b0c] ss:$16 sps:$4 sm:$0xff]  }
 0x953   : > { %v14685_v3 = vadd.f32 %v7078_v44, %v6342_v52  ;;  %v14689_v4 = vadd.f32 %v7164_v49, %v6350_v57  ;;  %v18866_v7 = vadd.f32 %v14683_v0, %v18552_v59  ;;  %v18882_v59 = vadd.f32 %v14687_v17, %v18568_v38  ;;  %v16352_v38 = vld [vmem:[%s17872_s29 + $0x1a20] ss:$16 sps:$4 sm:$0xff]   ;;  %v16396_v52 = vld [vmem:[%s17872_s29 + $0x1b04] ss:$16 sps:$4 sm:$0xff]   ;;  %v16403_v36 = vld [vmem:[%s17872_s29 + $0x1b28] ss:$16 sps:$4 sm:$0xff]  }
 0x954   : > { %v18863_v6 = vadd.f32 %v14684_v22, %v18549_v58  ;;  %v16349_v58 = vld [vmem:[%s17872_s29 + $0x1a08] ss:$16 sps:$4 sm:$0xff]   ;;  %v16402_v57 = vld [vmem:[%s17872_s29 + $0x1b24] ss:$16 sps:$4 sm:$0xff]   ;;  %v16400_v0 = vld [vmem:[%s17872_s29 + $0x1b20] ss:$16 sps:$4 sm:$0xff]  }
 0x955   : > { %v18869_v8 = vadd.f32 %v14685_v3, %v18555_v60  ;;  %v18875_v11 = vadd.f32 %v14689_v4, %v18561_v63  ;;  %v16408_v42 = vld [vmem:[%s17872_s29 + $0x1b44] ss:$16 sps:$4 sm:$0xff]   ;;  %v16411_v22 = vld [vmem:[%s17872_s29 + $0x1b4c] ss:$16 sps:$4 sm:$0xff]   ;;  %v16406_v44 = vld [vmem:[%s17872_s29 + $0x1b40] ss:$16 sps:$4 sm:$0xff]  }
 0x956   : > { %v7175_v60 = vpack.c.bf16 %v18863_v6, %v18872_v9  ;;  %v16409_v49 = vld [vmem:[%s17872_s29 + $0x1b48] ss:$16 sps:$4 sm:$0xff]   ;;  %v16414_v3 = vld [vmem:[%s17872_s29 + $0x1b64] ss:$16 sps:$4 sm:$0xff]   ;;  %v16417_v4 = vld [vmem:[%s17872_s29 + $0x1b6c] ss:$16 sps:$4 sm:$0xff]  }
 0x957   : > { %v7176_v12 = vpack.c.bf16 %v18869_v8, %v18866_v7  ;;  %v7178_v63 = vpack.c.bf16 %v18875_v11, %v18882_v59  ;;  %v16412_v17 = vld [vmem:[%s17872_s29 + $0x1b60] ss:$16 sps:$4 sm:$0xff]  }
 0x959   : > { %8003 = vmatprep.mubr.bf16.mxu0 %v7176_v12  ;;  %8089 = vmatprep.mubr.bf16.mxu1 %v7176_v12  ;;  %v16415_v12 = vld [vmem:[%s17872_s29 + $0x1b68] ss:$16 sps:$4 sm:$0xff]  }
 0x95a   : > { %8004 = vmatmul.mubr.bf16.vlgmr.msra.gmra.mrb[24].mxu0 %v7175_v60  ;;  %8090 = vmatmul.mubr.bf16.vlgmr.msra.gmra.mrb[24].mxu1 %v7175_v60  ;;  %v16418_v60 = vld [vmem:[%s17872_s29 + $0x1b80] ss:$16 sps:$4 sm:$0xff]  }
 0x95b   : > { %8015 = vmatpush1.bf16.msra.mxu0 %v16346_v34  ;;  %8101 = vmatpush1.bf16.msra.mxu1 %v16349_v58  ;;  %v16420_v34 = vld [vmem:[%s17872_s29 + $0x1b84] ss:$16 sps:$4 sm:$0xff]   ;;  %v16423_v58 = vld [vmem:[%s17872_s29 + $0x1b8c] ss:$16 sps:$4 sm:$0xff]  }
 0x95c   : > { %8046 = vmatprep.mubr.bf16.mxu0 %v7178_v63  ;;  %8132 = vmatprep.mubr.bf16.mxu1 %v7178_v63  ;;  %v16429_v63 = vld [vmem:[%s17872_s29 + $0x1bac] ss:$16 sps:$4 sm:$0xff]  }
 0x95d   : > { %8016 = vmatprep.subr.bf16.mxu0 %v16354_v61  ;;  %8102 = vmatprep.subr.bf16.mxu1 %v16357_v14  ;;  %v16421_v61 = vld [vmem:[%s17872_s29 + $0x1b88] ss:$16 sps:$4 sm:$0xff]   ;;  %v16426_v14 = vld [vmem:[%s17872_s29 + $0x1ba4] ss:$16 sps:$4 sm:$0xff]  }
 0x95f   : > { %8017 = vmatpush1.bf16.msra.mxu0 %v16352_v38  ;;  %8103 = vmatpush1.bf16.msra.mxu1 %v16355_v50  ;;  %v16424_v38 = vld [vmem:[%s17872_s29 + $0x1ba0] ss:$16 sps:$4 sm:$0xff]   ;;  %v16427_v50 = vld [vmem:[%s17872_s29 + $0x1ba8] ss:$16 sps:$4 sm:$0xff]  }
 0x960   : > { %8018 = vmatprep.subr.bf16.mxu0 %v16360_v16  ;;  %8104 = vmatprep.subr.bf16.mxu1 %v16363_v41  ;;  %v16432_v16 = vld [vmem:[%s17872_s29 + $0x1bc4] ss:$16 sps:$4 sm:$0xff]   ;;  %v16435_v41 = vld [vmem:[%s17872_s29 + $0x1bcc] ss:$16 sps:$4 sm:$0xff]  }
 0x963   : > { %8019 = vmatpush1.bf16.msra.mxu0 %v16358_v19  ;;  %8105 = vmatpush1.bf16.msra.mxu1 %v16361_v1  ;;  %v6346_v19 = vrot.slane %v18850_v51, %v18087_v31  ;;  %v16430_v1 = vld [vmem:[%s17872_s29 + $0x1bc0] ss:$16 sps:$4 sm:$0xff]  }
 0x964   : > { %8020 = vmatprep.subr.bf16.mxu0 %v16366_v2  ;;  %8106 = vmatprep.subr.bf16.mxu1 %v16369_v20  ;;  %v16433_v2 = vld [vmem:[%s17872_s29 + $0x1bc8] ss:$16 sps:$4 sm:$0xff]   ;;  %v16436_v51 = vld [vmem:[%s17872_s29 + $0x1be0] ss:$16 sps:$4 sm:$0xff]  }
 0x965   : > { %v14688_v20 = vadd.f32 %v18860_v40, %v6346_v19  ;;  %v16444_v40 = vld [vmem:[%s17872_s29 + $0x1c04] ss:$16 sps:$4 sm:$0xff]  }
 0x967   : > { %8021 = vmatpush1.bf16.msra.mxu0 %v16364_v5  ;;  %8107 = vmatpush1.bf16.msra.mxu1 %v16367_v21  ;;  %v16438_v5 = vld [vmem:[%s17872_s29 + $0x1be4] ss:$16 sps:$4 sm:$0xff]   ;;  %v16441_v21 = vld [vmem:[%s17872_s29 + $0x1bec] ss:$16 sps:$4 sm:$0xff]  }
 0x968   : > { %8022 = vmatprep.subr.bf16.mxu0 %v16372_v23  ;;  %8108 = vmatprep.subr.bf16.mxu1 %v16375_v24  ;;  %v14686_v23 = vadd.f32 %v18856_v55, %v6346_v19  ;;  %v16439_v24 = vld [vmem:[%s17872_s29 + $0x1be8] ss:$16 sps:$4 sm:$0xff]   ;;  %v16442_v55 = vld [vmem:[%s17872_s29 + $0x1c00] ss:$16 sps:$4 sm:$0xff]   ;;  %v16507_v19 = vld [vmem:[%s17872_s29 + $0x1d4c] ss:$16 sps:$4 sm:$0xff]  }
 0x96b   : > { %8023 = vmatpush1.bf16.msra.mxu0 %v16370_v25  ;;  %8109 = vmatpush1.bf16.msra.mxu1 %v16373_v26  ;;  %v18953_v25 = vadd.f32 %v14688_v20, %v18639_v15  ;;  %v16447_v26 = vld [vmem:[%s17872_s29 + $0x1c0c] ss:$16 sps:$4 sm:$0xff]   ;;  %v16450_v15 = vld [vmem:[%s17872_s29 + $0x1c24] ss:$16 sps:$4 sm:$0xff]  }
 0x96c   : > { %8024 = vmatprep.subr.bf16.mxu0 %v16378_v62  ;;  %8110 = vmatprep.subr.bf16.mxu1 %v16381_v28  ;;  %v18958_v62 = vadd.f32 %v14686_v23, %v18644_v18  ;;  %v16445_v28 = vld [vmem:[%s17872_s29 + $0x1c08] ss:$16 sps:$4 sm:$0xff]   ;;  %v16448_v18 = vld [vmem:[%s17872_s29 + $0x1c20] ss:$16 sps:$4 sm:$0xff]   ;;  %v16510_v20 = vld [vmem:[%s17872_s29 + $0x1d64] ss:$16 sps:$4 sm:$0xff]  }
 0x96d   : > { %v16511_v23 = vld [vmem:[%s17872_s29 + $0x1d68] ss:$16 sps:$4 sm:$0xff]  }
 0x96f   : > { %8025 = vmatpush1.bf16.msra.mxu0 %v16376_v29  ;;  %8111 = vmatpush1.bf16.msra.mxu1 %v16379_v35  ;;  %v7177_v29 = vpack.c.bf16 %v18953_v25, %v18958_v62  ;;  %v16453_v35 = vld [vmem:[%s17872_s29 + $0x1c2c] ss:$16 sps:$4 sm:$0xff]  }
 0x970   : > { %8026 = vmatprep.subr.bf16.mxu0 %v16384_v37  ;;  %8112 = vmatprep.subr.bf16.mxu1 %v16387_v39  ;;  %v16451_v37 = vld [vmem:[%s17872_s29 + $0x1c28] ss:$16 sps:$4 sm:$0xff]   ;;  %v16456_v39 = vld [vmem:[%s17872_s29 + $0x1c44] ss:$16 sps:$4 sm:$0xff]  }
 0x973   : > { %8027 = vmatpush1.bf16.msra.mxu0 %v16382_v43  ;;  %8113 = vmatpush1.bf16.msra.mxu1 %v16385_v45  ;;  %v16459_v43 = vld [vmem:[%s17872_s29 + $0x1c4c] ss:$16 sps:$4 sm:$0xff]   ;;  %v16454_v45 = vld [vmem:[%s17872_s29 + $0x1c40] ss:$16 sps:$4 sm:$0xff]  }
 0x974   : > { %8028 = vmatprep.subr.bf16.mxu0 %v16390_v46  ;;  %8114 = vmatprep.subr.bf16.mxu1 %v16393_v10  ;;  %v16457_v46 = vld [vmem:[%s17872_s29 + $0x1c48] ss:$16 sps:$4 sm:$0xff]   ;;  %v16462_v10 = vld [vmem:[%s17872_s29 + $0x1c64] ss:$16 sps:$4 sm:$0xff]  }
 0x977   : > { %8029 = vmatpush1.bf16.msra.mxu0 %v16388_v47  ;;  %8115 = vmatpush1.bf16.msra.mxu1 %v16391_v48  ;;  %v16465_v47 = vld [vmem:[%s17872_s29 + $0x1c6c] ss:$16 sps:$4 sm:$0xff]   ;;  %v16460_v48 = vld [vmem:[%s17872_s29 + $0x1c60] ss:$16 sps:$4 sm:$0xff]  }
 0x978   : > { %8030 = vmatprep.subr.bf16.mxu0 %v16396_v52  ;;  %8116 = vmatprep.subr.bf16.mxu1 %v16399_v53  ;;  %v16463_v52 = vld [vmem:[%s17872_s29 + $0x1c68] ss:$16 sps:$4 sm:$0xff]   ;;  %v16468_v53 = vld [vmem:[%s17872_s29 + $0x1c84] ss:$16 sps:$4 sm:$0xff]  }
 0x97b   : > { %8031 = vmatpush1.bf16.msra.mxu0 %v16394_v54  ;;  %8117 = vmatpush1.bf16.msra.mxu1 %v16397_v56  ;;  %v16471_v54 = vld [vmem:[%s17872_s29 + $0x1c8c] ss:$16 sps:$4 sm:$0xff]   ;;  %v16466_v56 = vld [vmem:[%s17872_s29 + $0x1c80] ss:$16 sps:$4 sm:$0xff]  }
 0x97c   : > { %8032 = vmatprep.subr.bf16.mxu0 %v16402_v57  ;;  %8118 = vmatprep.subr.bf16.mxu1 %v16405_v13  ;;  %v16469_v57 = vld [vmem:[%s17872_s29 + $0x1c88] ss:$16 sps:$4 sm:$0xff]   ;;  %v16474_v13 = vld [vmem:[%s17872_s29 + $0x1ca4] ss:$16 sps:$4 sm:$0xff]  }
 0x97f   : > { %8033 = vmatpush1.bf16.msra.mxu0 %v16400_v0  ;;  %8119 = vmatpush1.bf16.msra.mxu1 %v16403_v36  ;;  %v16477_v0 = vld [vmem:[%s17872_s29 + $0x1cac] ss:$16 sps:$4 sm:$0xff]   ;;  %v16472_v36 = vld [vmem:[%s17872_s29 + $0x1ca0] ss:$16 sps:$4 sm:$0xff]  }
 0x980   : > { %8034 = vmatprep.subr.bf16.mxu0 %v16408_v42  ;;  %8120 = vmatprep.subr.bf16.mxu1 %v16411_v22  ;;  %v16475_v42 = vld [vmem:[%s17872_s29 + $0x1ca8] ss:$16 sps:$4 sm:$0xff]   ;;  %v16480_v22 = vld [vmem:[%s17872_s29 + $0x1cc4] ss:$16 sps:$4 sm:$0xff]  }
 0x983   : > { %8035 = vmatpush1.bf16.msra.mxu0 %v16406_v44  ;;  %8121 = vmatpush1.bf16.msra.mxu1 %v16409_v49  ;;  %v16483_v44 = vld [vmem:[%s17872_s29 + $0x1ccc] ss:$16 sps:$4 sm:$0xff]   ;;  %v16478_v49 = vld [vmem:[%s17872_s29 + $0x1cc0] ss:$16 sps:$4 sm:$0xff]  }
 0x984   : > { %8036 = vmatprep.subr.bf16.mxu0 %v16414_v3  ;;  %8122 = vmatprep.subr.bf16.mxu1 %v16417_v4  ;;  %v16481_v3 = vld [vmem:[%s17872_s29 + $0x1cc8] ss:$16 sps:$4 sm:$0xff]   ;;  %v16486_v4 = vld [vmem:[%s17872_s29 + $0x1ce4] ss:$16 sps:$4 sm:$0xff]  }
 0x987   : > { %8037 = vmatpush1.bf16.msra.mxu0 %v16412_v17  ;;  %8123 = vmatpush1.bf16.msra.mxu1 %v16415_v12  ;;  %v16489_v17 = vld [vmem:[%s17872_s29 + $0x1cec] ss:$16 sps:$4 sm:$0xff]   ;;  %v16484_v12 = vld [vmem:[%s17872_s29 + $0x1ce0] ss:$16 sps:$4 sm:$0xff]  }
 0x988   : > { %8038 = vmatprep.subr.bf16.mxu0 %v16420_v34  ;;  %8124 = vmatprep.subr.bf16.mxu1 %v16423_v58  ;;  %v16487_v34 = vld [vmem:[%s17872_s29 + $0x1ce8] ss:$16 sps:$4 sm:$0xff]   ;;  %v16492_v58 = vld [vmem:[%s17872_s29 + $0x1d04] ss:$16 sps:$4 sm:$0xff]  }
 0x98b   : > { %8039 = vmatpush1.bf16.msra.mxu0 %v16418_v60  ;;  %8125 = vmatpush1.bf16.msra.mxu1 %v16421_v61  ;;  %v16495_v60 = vld [vmem:[%s17872_s29 + $0x1d0c] ss:$16 sps:$4 sm:$0xff]   ;;  %v16490_v61 = vld [vmem:[%s17872_s29 + $0x1d00] ss:$16 sps:$4 sm:$0xff]  }
 0x98c   : > { %8040 = vmatprep.subr.bf16.mxu0 %v16426_v14  ;;  %8126 = vmatprep.subr.bf16.mxu1 %v16429_v63  ;;  %v16493_v14 = vld [vmem:[%s17872_s29 + $0x1d08] ss:$16 sps:$4 sm:$0xff]   ;;  %v16498_v63 = vld [vmem:[%s17872_s29 + $0x1d24] ss:$16 sps:$4 sm:$0xff]  }
 0x98f   : > { %8041 = vmatpush1.bf16.msra.mxu0 %v16424_v38  ;;  %8127 = vmatpush1.bf16.msra.mxu1 %v16427_v50  ;;  %v16501_v38 = vld [vmem:[%s17872_s29 + $0x1d2c] ss:$16 sps:$4 sm:$0xff]   ;;  %v16496_v50 = vld [vmem:[%s17872_s29 + $0x1d20] ss:$16 sps:$4 sm:$0xff]  }
 0x990   : > { %8042 = vmatprep.subr.bf16.mxu0 %v16432_v16  ;;  %8128 = vmatprep.subr.bf16.mxu1 %v16435_v41  ;;  %v16499_v16 = vld [vmem:[%s17872_s29 + $0x1d28] ss:$16 sps:$4 sm:$0xff]   ;;  %v16504_v41 = vld [vmem:[%s17872_s29 + $0x1d44] ss:$16 sps:$4 sm:$0xff]  }
 0x993   : > { %8043 = vmatpush1.bf16.msra.mxu0 %v16430_v1  ;;  %8129 = vmatpush1.bf16.msra.mxu1 %v16433_v2  ;;  %v16502_v1 = vld [vmem:[%s17872_s29 + $0x1d40] ss:$16 sps:$4 sm:$0xff]   ;;  %v16505_v2 = vld [vmem:[%s17872_s29 + $0x1d48] ss:$16 sps:$4 sm:$0xff]  }
 0x994   : > { %8044 = vmatprep.subr.bf16.mxu0 %v16438_v5  ;;  %8130 = vmatprep.subr.bf16.mxu1 %v16441_v21  ;;  %v16513_v5 = vld [vmem:[%s17872_s29 + $0x1d6c] ss:$16 sps:$4 sm:$0xff]   ;;  %v16508_v21 = vld [vmem:[%s17872_s29 + $0x1d60] ss:$16 sps:$4 sm:$0xff]  }
 0x997   : > { %8045 = vmatpush1.bf16.msra.mxu0 %v16436_v51  ;;  %8131 = vmatpush1.bf16.msra.mxu1 %v16439_v24  ;;  %v16516_v51 = vld [vmem:[%s17872_s29 + $0x1d84] ss:$16 sps:$4 sm:$0xff]   ;;  %v16519_v24 = vld [vmem:[%s17872_s29 + $0x1d8c] ss:$16 sps:$4 sm:$0xff]  }
 0x998   : > { %8947 = vmatprep.subr.bf16.mxu0 %v16444_v40  ;;  %9033 = vmatprep.subr.bf16.mxu1 %v16447_v26  ;;  %v16514_v40 = vld [vmem:[%s17872_s29 + $0x1d80] ss:$16 sps:$4 sm:$0xff]   ;;  %v16517_v26 = vld [vmem:[%s17872_s29 + $0x1d88] ss:$16 sps:$4 sm:$0xff]  }
 0x99a   : > { %8047 = vmatmul.mubr.bf16.vlgmr.msra.gmra.mrb[24].mxu0 %v7177_v29  ;;  %8133 = vmatmul.mubr.bf16.vlgmr.msra.gmra.mrb[24].mxu1 %v7177_v29  ;;  %v16520_v29 = vld [vmem:[%s17872_s29 + $0x1da0] ss:$16 sps:$4 sm:$0xff]  }
 0x99b   : > { %8948 = vmatpush1.bf16.msra.mxu0 %v16442_v55  ;;  %9034 = vmatpush1.bf16.msra.mxu1 %v16445_v28  ;;  %v16522_v55 = vld [vmem:[%s17872_s29 + $0x1da4] ss:$16 sps:$4 sm:$0xff]   ;;  %v16525_v28 = vld [vmem:[%s17872_s29 + $0x1dac] ss:$16 sps:$4 sm:$0xff]  }
 0x99c   : > { %8949 = vmatprep.subr.bf16.mxu0 %v16450_v15  ;;  %9035 = vmatprep.subr.bf16.mxu1 %v16453_v35  ;;  %v16523_v15 = vld [vmem:[%s17872_s29 + $0x1da8] ss:$16 sps:$4 sm:$0xff]   ;;  %v16528_v35 = vld [vmem:[%s17872_s29 + $0x1dc4] ss:$16 sps:$4 sm:$0xff]  }
 0x99f   : > { %8950 = vmatpush1.bf16.msra.mxu0 %v16448_v18  ;;  %9036 = vmatpush1.bf16.msra.mxu1 %v16451_v37  ;;  %v16531_v18 = vld [vmem:[%s17872_s29 + $0x1dcc] ss:$16 sps:$4 sm:$0xff]   ;;  %v16526_v37 = vld [vmem:[%s17872_s29 + $0x1dc0] ss:$16 sps:$4 sm:$0xff]  }
 0x9a0   : > { %8951 = vmatprep.subr.bf16.mxu0 %v16456_v39  ;;  %9037 = vmatprep.subr.bf16.mxu1 %v16459_v43  ;;  %v16529_v39 = vld [vmem:[%s17872_s29 + $0x1dc8] ss:$16 sps:$4 sm:$0xff]   ;;  %v16534_v43 = vld [vmem:[%s17872_s29 + $0x1de4] ss:$16 sps:$4 sm:$0xff]  }
 0x9a3   : > { %8952 = vmatpush1.bf16.msra.mxu0 %v16454_v45  ;;  %9038 = vmatpush1.bf16.msra.mxu1 %v16457_v46  ;;  %v16537_v45 = vld [vmem:[%s17872_s29 + $0x1dec] ss:$16 sps:$4 sm:$0xff]   ;;  %v16532_v46 = vld [vmem:[%s17872_s29 + $0x1de0] ss:$16 sps:$4 sm:$0xff]  }
 0x9a4   : > { %8953 = vmatprep.subr.bf16.mxu0 %v16462_v10  ;;  %9039 = vmatprep.subr.bf16.mxu1 %v16465_v47  ;;  %v16535_v10 = vld [vmem:[%s17872_s29 + $0x1de8] ss:$16 sps:$4 sm:$0xff]   ;;  %v16540_v47 = vld [vmem:[%s17872_s29 + $0x1e04] ss:$16 sps:$4 sm:$0xff]  }
 0x9a7   : > { %8954 = vmatpush1.bf16.msra.mxu0 %v16460_v48  ;;  %9040 = vmatpush1.bf16.msra.mxu1 %v16463_v52  ;;  %v16543_v48 = vld [vmem:[%s17872_s29 + $0x1e0c] ss:$16 sps:$4 sm:$0xff]   ;;  %v13612_v52 = vld [vmem:[%s17878_s24 + $0x18] sm:$0xf] }
 0x9a8   : > { %8955 = vmatprep.subr.bf16.mxu0 %v16468_v53  ;;  %9041 = vmatprep.subr.bf16.mxu1 %v16471_v54  ;;  %v7314_v53 = vrot.slane %v13612_v52, %v18085_v30  ;;  %v7322_v54 = vrot.slane %v13612_v52, %v18087_v31 }
 0x9ab   : > { %8956 = vmatpush1.bf16.msra.mxu0 %v16466_v56  ;;  %9042 = vmatpush1.bf16.msra.mxu1 %v16469_v57  ;;  %v7318_v56 = vrot.slane %v13612_v52, %v18089_v32  ;;  %v7326_v57 = vrot.slane %v13612_v52, %v18091_v33  ;;  %v16570_v52 = vld [vmem:[%s17872_s29 + $0x1ea4] ss:$16 sps:$4 sm:$0xff]  }
 0x9ac   : > { %8957 = vmatprep.subr.bf16.mxu0 %v16474_v13  ;;  %9043 = vmatprep.subr.bf16.mxu1 %v16477_v0 }
 0x9af   : > { %8958 = vmatpush1.bf16.msra.mxu0 %v16472_v36  ;;  %9044 = vmatpush1.bf16.msra.mxu1 %v16475_v42 }
 0x9b0   : > { %8959 = vmatprep.subr.bf16.mxu0 %v16480_v22  ;;  %9045 = vmatprep.subr.bf16.mxu1 %v16483_v44 }
 0x9b3   : > { %8960 = vmatpush1.bf16.msra.mxu0 %v16478_v49  ;;  %9046 = vmatpush1.bf16.msra.mxu1 %v16481_v3 }
 0x9b4   : > { %8961 = vmatprep.subr.bf16.mxu0 %v16486_v4  ;;  %9047 = vmatprep.subr.bf16.mxu1 %v16489_v17 }
 0x9b7   : > { %8962 = vmatpush1.bf16.msra.mxu0 %v16484_v12  ;;  %9048 = vmatpush1.bf16.msra.mxu1 %v16487_v34 }
 0x9b8   : > { %8963 = vmatprep.subr.bf16.mxu0 %v16492_v58  ;;  %9049 = vmatprep.subr.bf16.mxu1 %v16495_v60 }
 0x9bb   : > { %8964 = vmatpush1.bf16.msra.mxu0 %v16490_v61  ;;  %9050 = vmatpush1.bf16.msra.mxu1 %v16493_v14 }
 0x9bc   : > { %8965 = vmatprep.subr.bf16.mxu0 %v16498_v63  ;;  %9051 = vmatprep.subr.bf16.mxu1 %v16501_v38 }
 0x9bf   : > { %8966 = vmatpush1.bf16.msra.mxu0 %v16496_v50  ;;  %9052 = vmatpush1.bf16.msra.mxu1 %v16499_v16 }
 0x9c0   : > { %8967 = vmatprep.subr.bf16.mxu0 %v16504_v41  ;;  %9053 = vmatprep.subr.bf16.mxu1 %v16507_v19 }
 0x9c3   : > { %8968 = vmatpush1.bf16.msra.mxu0 %v16502_v1  ;;  %9054 = vmatpush1.bf16.msra.mxu1 %v16505_v2 }
 0x9c4   : > { %8969 = vmatprep.subr.bf16.mxu0 %v16510_v20  ;;  %9055 = vmatprep.subr.bf16.mxu1 %v16513_v5 }
 0x9c7   : > { %8970 = vmatpush1.bf16.msra.mxu0 %v16508_v21  ;;  %9056 = vmatpush1.bf16.msra.mxu1 %v16511_v23 }
 0x9c8   : > { %8971 = vmatprep.subr.bf16.mxu0 %v16516_v51  ;;  %9057 = vmatprep.subr.bf16.mxu1 %v16519_v24  ;;  %v16538_v51 = vld [vmem:[%s17872_s29 + $0x1e00] ss:$16 sps:$4 sm:$0xff]   ;;  %v16541_v24 = vld [vmem:[%s17872_s29 + $0x1e08] ss:$16 sps:$4 sm:$0xff]  }
 0x9cb   : > { %8972 = vmatpush1.bf16.msra.mxu0 %v16514_v40  ;;  %9058 = vmatpush1.bf16.msra.mxu1 %v16517_v26  ;;  %v16546_v40 = vld [vmem:[%s17872_s29 + $0x1e24] ss:$16 sps:$4 sm:$0xff]   ;;  %v16549_v26 = vld [vmem:[%s17872_s29 + $0x1e2c] ss:$16 sps:$4 sm:$0xff]  }
 0x9cc   : > { %8973 = vmatprep.subr.bf16.mxu0 %v16522_v55  ;;  %9059 = vmatprep.subr.bf16.mxu1 %v16525_v28  ;;  %v16544_v55 = vld [vmem:[%s17872_s29 + $0x1e20] ss:$16 sps:$4 sm:$0xff]   ;;  %v16547_v28 = vld [vmem:[%s17872_s29 + $0x1e28] ss:$16 sps:$4 sm:$0xff]  }
 0x9cf   : > { %8974 = vmatpush1.bf16.msra.mxu0 %v16520_v29  ;;  %9060 = vmatpush1.bf16.msra.mxu1 %v16523_v15  ;;  %v16552_v29 = vld [vmem:[%s17872_s29 + $0x1e44] ss:$16 sps:$4 sm:$0xff]   ;;  %v16555_v15 = vld [vmem:[%s17872_s29 + $0x1e4c] ss:$16 sps:$4 sm:$0xff]  }
 0x9d0   : > { %8975 = vmatprep.subr.bf16.mxu0 %v16528_v35  ;;  %9061 = vmatprep.subr.bf16.mxu1 %v16531_v18  ;;  %v16550_v35 = vld [vmem:[%s17872_s29 + $0x1e40] ss:$16 sps:$4 sm:$0xff]   ;;  %v16553_v18 = vld [vmem:[%s17872_s29 + $0x1e48] ss:$16 sps:$4 sm:$0xff]  }
 0x9d3   : > { %8976 = vmatpush1.bf16.msra.mxu0 %v16526_v37  ;;  %9062 = vmatpush1.bf16.msra.mxu1 %v16529_v39  ;;  %v16558_v37 = vld [vmem:[%s17872_s29 + $0x1e64] ss:$16 sps:$4 sm:$0xff]   ;;  %v16561_v39 = vld [vmem:[%s17872_s29 + $0x1e6c] ss:$16 sps:$4 sm:$0xff]  }
 0x9d4   : > { %8977 = vmatprep.subr.bf16.mxu0 %v16534_v43  ;;  %9063 = vmatprep.subr.bf16.mxu1 %v16537_v45  ;;  %v16556_v43 = vld [vmem:[%s17872_s29 + $0x1e60] ss:$16 sps:$4 sm:$0xff]   ;;  %v16559_v45 = vld [vmem:[%s17872_s29 + $0x1e68] ss:$16 sps:$4 sm:$0xff]  }
 0x9d7   : > { %8978 = vmatpush1.bf16.msra.mxu0 %v16532_v46  ;;  %9064 = vmatpush1.bf16.msra.mxu1 %v16535_v10  ;;  %v16564_v46 = vld [vmem:[%s17872_s29 + $0x1e84] ss:$16 sps:$4 sm:$0xff]   ;;  %v16567_v10 = vld [vmem:[%s17872_s29 + $0x1e8c] ss:$16 sps:$4 sm:$0xff]  }
 0x9d8   : > { %8990 = vmatprep.subr.bf16.mxu0 %v16540_v47  ;;  %9076 = vmatprep.subr.bf16.mxu1 %v16543_v48  ;;  %v16562_v47 = vld [vmem:[%s17872_s29 + $0x1e80] ss:$16 sps:$4 sm:$0xff]   ;;  %v16565_v48 = vld [vmem:[%s17872_s29 + $0x1e88] ss:$16 sps:$4 sm:$0xff]  }
 0xa6d   : > { %v8048_v13 = vpop.f32.mrb[24].mxu0  ;;  %v8134_v0 = vpop.f32.mrb[24].mxu1 }
 0xa6e   : > { %v14690_v36 = vadd.f32 %v8048_v13, %v7314_v53  ;;  %v14694_v42 = vadd.f32 %v8134_v0, %v7322_v54  ;;  %v8050_v22 = vpop.f32.mrb[25].mxu0  ;;  %v8136_v44 = vpop.f32.mrb[25].mxu1  ;;  %v16579_v13 = vld [vmem:[%s17872_s29 + $0x1ecc] ss:$16 sps:$4 sm:$0xff]   ;;  %v16574_v0 = vld [vmem:[%s17872_s29 + $0x1ec0] ss:$16 sps:$4 sm:$0xff]  }
 0xa6f   : > { %v14691_v49 = vadd.f32 %v8050_v22, %v7318_v56  ;;  %v14695_v3 = vadd.f32 %v8136_v44, %v7326_v57  ;;  %v8052_v4 = vpop.f32.mrb[26].mxu0  ;;  %v8138_v17 = vpop.f32.mrb[26].mxu1  ;;  %v16585_v22 = vld [vmem:[%s17872_s29 + $0x1eec] ss:$16 sps:$4 sm:$0xff]   ;;  %v16580_v44 = vld [vmem:[%s17872_s29 + $0x1ee0] ss:$16 sps:$4 sm:$0xff]  }
 0xa70   : > { %v14692_v12 = vadd.f32 %v8052_v4, %v7314_v53  ;;  %v14696_v34 = vadd.f32 %v8138_v17, %v7322_v54  ;;  %v8054_v58 = vpop.f32.mrb[27].mxu0  ;;  %v8140_v60 = vpop.f32.mrb[27].mxu1  ;;  %v8143_v63 = vmax.f32 %v14690_v36, 0.0  ;;  %v8145_v38 = vmax.f32 %v14694_v42, 0.0  ;;  %v16573_v53 = vld [vmem:[%s17872_s29 + $0x1eac] ss:$16 sps:$4 sm:$0xff]  }
 0xa71   : > { %v14693_v61 = vadd.f32 %v8054_v58, %v7318_v56  ;;  %v14697_v14 = vadd.f32 %v8140_v60, %v7326_v57  ;;  %v8144_v41 = vmax.f32 %v14691_v49, 0.0  ;;  %v8146_v19 = vmax.f32 %v14695_v3, 0.0  ;;  %v16568_v54 = vld [vmem:[%s17872_s29 + $0x1ea0] ss:$16 sps:$4 sm:$0xff]   ;;  %v16571_v56 = vld [vmem:[%s17872_s29 + $0x1ea8] ss:$16 sps:$4 sm:$0xff]  }
 0xa72   : > { %v8147_v50 = vmax.f32 %v14692_v12, 0.0  ;;  %v8149_v16 = vmax.f32 %v14696_v34, 0.0  ;;  %v16576_v57 = vld [vmem:[%s17872_s29 + $0x1ec4] ss:$16 sps:$4 sm:$0xff]   ;;  %v16577_v36 = vld [vmem:[%s17872_s29 + $0x1ec8] ss:$16 sps:$4 sm:$0xff]  }
 0xa73   : > { %v8148_v1 = vmax.f32 %v14693_v61, 0.0  ;;  %v8150_v2 = vmax.f32 %v14697_v14, 0.0  ;;  %v16582_v42 = vld [vmem:[%s17872_s29 + $0x1ee4] ss:$16 sps:$4 sm:$0xff]   ;;  %v16583_v49 = vld [vmem:[%s17872_s29 + $0x1ee8] ss:$16 sps:$4 sm:$0xff]  }
 0xa74   : > { %v8151_v20 = vpack.c.bf16 %v8147_v50, %v8143_v63  ;;  %v19031_v5 = vpack.c.bf16 %v8149_v16, %v8145_v38  ;;  %v16588_v3 = vld [vmem:[%s17872_s29 + $0x1f04] ss:$16 sps:$4 sm:$0xff]   ;;  %v16591_v4 = vld [vmem:[%s17872_s29 + $0x1f0c] ss:$16 sps:$4 sm:$0xff]   ;;  %v16586_v17 = vld [vmem:[%s17872_s29 + $0x1f00] ss:$16 sps:$4 sm:$0xff]  }
 0xa75   : > { %v8152_v21 = vpack.c.bf16 %v8148_v1, %v8144_v41  ;;  %v8154_v23 = vpack.c.bf16 %v8150_v2, %v8146_v19  ;;  %v16589_v12 = vld [vmem:[%s17872_s29 + $0x1f08] ss:$16 sps:$4 sm:$0xff]   ;;  %v16594_v34 = vld [vmem:[%s17872_s29 + $0x1f24] ss:$16 sps:$4 sm:$0xff]   ;;  %v16597_v58 = vld [vmem:[%s17872_s29 + $0x1f2c] ss:$16 sps:$4 sm:$0xff]  }
 0xa76   : > { %v16592_v60 = vld [vmem:[%s17872_s29 + $0x1f20] ss:$16 sps:$4 sm:$0xff]   ;;  %v16595_v61 = vld [vmem:[%s17872_s29 + $0x1f28] ss:$16 sps:$4 sm:$0xff]   ;;  %v16600_v14 = vld [vmem:[%s17872_s29 + $0x1f44] ss:$16 sps:$4 sm:$0xff]  }
 0xa77   : > { %8979 = vmatprep.mubr.bf16.mxu0 %v8152_v21  ;;  %9065 = vmatprep.mubr.bf16.mxu1 %v8152_v21  ;;  %v16603_v63 = vld [vmem:[%s17872_s29 + $0x1f4c] ss:$16 sps:$4 sm:$0xff]   ;;  %v16598_v38 = vld [vmem:[%s17872_s29 + $0x1f40] ss:$16 sps:$4 sm:$0xff]   ;;  %v16601_v50 = vld [vmem:[%s17872_s29 + $0x1f48] ss:$16 sps:$4 sm:$0xff]  }
 0xa78   : > { %8980 = vmatmul.mubr.bf16.vlgmr.msra.gmra.mrb[28].mxu0 %v8151_v20  ;;  %9066 = vmatmul.mubr.bf16.vlgmr.msra.gmra.mrb[28].mxu1 %v8151_v20  ;;  %v16606_v16 = vld [vmem:[%s17872_s29 + $0x1f64] ss:$16 sps:$4 sm:$0xff]   ;;  %v16609_v41 = vld [vmem:[%s17872_s29 + $0x1f6c] ss:$16 sps:$4 sm:$0xff]   ;;  %v16604_v19 = vld [vmem:[%s17872_s29 + $0x1f60] ss:$16 sps:$4 sm:$0xff]  }
 0xa79   : > { %8991 = vmatpush1.bf16.msra.mxu0 %v16538_v51  ;;  %9077 = vmatpush1.bf16.msra.mxu1 %v16541_v24  ;;  %v16607_v1 = vld [vmem:[%s17872_s29 + $0x1f68] ss:$16 sps:$4 sm:$0xff]   ;;  %v16612_v2 = vld [vmem:[%s17872_s29 + $0x1f84] ss:$16 sps:$4 sm:$0xff]   ;;  %v16615_v20 = vld [vmem:[%s17872_s29 + $0x1f8c] ss:$16 sps:$4 sm:$0xff]  }
 0xa7a   : > { %9022 = vmatprep.mubr.bf16.mxu0 %v8154_v23  ;;  %9108 = vmatprep.mubr.bf16.mxu1 %v8154_v23  ;;  %v16610_v21 = vld [vmem:[%s17872_s29 + $0x1f80] ss:$16 sps:$4 sm:$0xff]   ;;  %v16613_v23 = vld [vmem:[%s17872_s29 + $0x1f88] ss:$16 sps:$4 sm:$0xff]   ;;  %v16618_v51 = vld [vmem:[%s17872_s29 + $0x1fa4] ss:$16 sps:$4 sm:$0xff]  }
 0xa7b   : > { %8992 = vmatprep.subr.bf16.mxu0 %v16546_v40  ;;  %9078 = vmatprep.subr.bf16.mxu1 %v16549_v26  ;;  %v16621_v24 = vld [vmem:[%s17872_s29 + $0x1fac] ss:$16 sps:$4 sm:$0xff]   ;;  %v16616_v40 = vld [vmem:[%s17872_s29 + $0x1fa0] ss:$16 sps:$4 sm:$0xff]   ;;  %v16619_v26 = vld [vmem:[%s17872_s29 + $0x1fa8] ss:$16 sps:$4 sm:$0xff]  }
 0xa7d   : > { %8993 = vmatpush1.bf16.msra.mxu0 %v16544_v55  ;;  %9079 = vmatpush1.bf16.msra.mxu1 %v16547_v28  ;;  %v16624_v55 = vld [vmem:[%s17872_s29 + $0x1fc4] ss:$16 sps:$4 sm:$0xff]   ;;  %v16627_v28 = vld [vmem:[%s17872_s29 + $0x1fcc] ss:$16 sps:$4 sm:$0xff]  }
 0xa7e   : > { %8994 = vmatprep.subr.bf16.mxu0 %v16552_v29  ;;  %9080 = vmatprep.subr.bf16.mxu1 %v16555_v15  ;;  %v16622_v29 = vld [vmem:[%s17872_s29 + $0x1fc0] ss:$16 sps:$4 sm:$0xff]   ;;  %v16625_v15 = vld [vmem:[%s17872_s29 + $0x1fc8] ss:$16 sps:$4 sm:$0xff]  }
 0xa81   : > { %8995 = vmatpush1.bf16.msra.mxu0 %v16550_v35  ;;  %9081 = vmatpush1.bf16.msra.mxu1 %v16553_v18  ;;  %v16630_v35 = vld [vmem:[%s17872_s29 + $0x1fe4] ss:$16 sps:$4 sm:$0xff]   ;;  %v16633_v18 = vld [vmem:[%s17872_s29 + $0x1fec] ss:$16 sps:$4 sm:$0xff]  }
 0xa82   : > { %8996 = vmatprep.subr.bf16.mxu0 %v16558_v37  ;;  %9082 = vmatprep.subr.bf16.mxu1 %v16561_v39  ;;  %v16628_v37 = vld [vmem:[%s17872_s29 + $0x1fe0] ss:$16 sps:$4 sm:$0xff]   ;;  %v16631_v39 = vld [vmem:[%s17872_s29 + $0x1fe8] ss:$16 sps:$4 sm:$0xff]  }
 0xa85   : > { %8997 = vmatpush1.bf16.msra.mxu0 %v16556_v43  ;;  %9083 = vmatpush1.bf16.msra.mxu1 %v16559_v45  ;;  %v16636_v43 = vld [vmem:[%s17872_s29 + $0x2004] ss:$16 sps:$4 sm:$0xff]   ;;  %v16639_v45 = vld [vmem:[%s17872_s29 + $0x200c] ss:$16 sps:$4 sm:$0xff]  }
 0xa86   : > { %8998 = vmatprep.subr.bf16.mxu0 %v16564_v46  ;;  %9084 = vmatprep.subr.bf16.mxu1 %v16567_v10  ;;  %v16634_v46 = vld [vmem:[%s17872_s29 + $0x2000] ss:$16 sps:$4 sm:$0xff]   ;;  %v16637_v10 = vld [vmem:[%s17872_s29 + $0x2008] ss:$16 sps:$4 sm:$0xff]  }
 0xa89   : > { %8999 = vmatpush1.bf16.msra.mxu0 %v16562_v47  ;;  %9085 = vmatpush1.bf16.msra.mxu1 %v16565_v48  ;;  %v16642_v47 = vld [vmem:[%s17872_s29 + $0x2024] ss:$16 sps:$4 sm:$0xff]   ;;  %v16645_v48 = vld [vmem:[%s17872_s29 + $0x202c] ss:$16 sps:$4 sm:$0xff]  }
 0xa8a   : > { %9000 = vmatprep.subr.bf16.mxu0 %v16570_v52  ;;  %9086 = vmatprep.subr.bf16.mxu1 %v16573_v53  ;;  %v16640_v52 = vld [vmem:[%s17872_s29 + $0x2020] ss:$16 sps:$4 sm:$0xff]   ;;  %v16643_v53 = vld [vmem:[%s17872_s29 + $0x2028] ss:$16 sps:$4 sm:$0xff]  }
 0xa8d   : > { %9001 = vmatpush1.bf16.msra.mxu0 %v16568_v54  ;;  %9087 = vmatpush1.bf16.msra.mxu1 %v16571_v56  ;;  %v16648_v54 = vld [vmem:[%s17872_s29 + $0x2044] ss:$16 sps:$4 sm:$0xff]   ;;  %v16651_v56 = vld [vmem:[%s17872_s29 + $0x204c] ss:$16 sps:$4 sm:$0xff]  }
 0xa8e   : > { %9002 = vmatprep.subr.bf16.mxu0 %v16576_v57  ;;  %9088 = vmatprep.subr.bf16.mxu1 %v16579_v13  ;;  %v16646_v57 = vld [vmem:[%s17872_s29 + $0x2040] ss:$16 sps:$4 sm:$0xff]   ;;  %v16649_v13 = vld [vmem:[%s17872_s29 + $0x2048] ss:$16 sps:$4 sm:$0xff]  }
 0xa91   : > { %9003 = vmatpush1.bf16.msra.mxu0 %v16574_v0  ;;  %9089 = vmatpush1.bf16.msra.mxu1 %v16577_v36  ;;  %v16657_v0 = vld [vmem:[%s17872_s29 + $0x206c] ss:$16 sps:$4 sm:$0xff]   ;;  %v16652_v36 = vld [vmem:[%s17872_s29 + $0x2060] ss:$16 sps:$4 sm:$0xff]  }
 0xa92   : > { %9004 = vmatprep.subr.bf16.mxu0 %v16582_v42  ;;  %9090 = vmatprep.subr.bf16.mxu1 %v16585_v22  ;;  %v16655_v42 = vld [vmem:[%s17872_s29 + $0x2068] ss:$16 sps:$4 sm:$0xff]   ;;  %v16660_v22 = vld [vmem:[%s17872_s29 + $0x2084] ss:$16 sps:$4 sm:$0xff]  }
 0xa95   : > { %9005 = vmatpush1.bf16.msra.mxu0 %v16580_v44  ;;  %9091 = vmatpush1.bf16.msra.mxu1 %v16583_v49  ;;  %v16663_v44 = vld [vmem:[%s17872_s29 + $0x208c] ss:$16 sps:$4 sm:$0xff]   ;;  %v16658_v49 = vld [vmem:[%s17872_s29 + $0x2080] ss:$16 sps:$4 sm:$0xff]  }
 0xa96   : > { %9006 = vmatprep.subr.bf16.mxu0 %v16588_v3  ;;  %9092 = vmatprep.subr.bf16.mxu1 %v16591_v4  ;;  %v16661_v3 = vld [vmem:[%s17872_s29 + $0x2088] ss:$16 sps:$4 sm:$0xff]   ;;  %v16666_v4 = vld [vmem:[%s17872_s29 + $0x20a4] ss:$16 sps:$4 sm:$0xff]  }
 0xa99   : > { %9007 = vmatpush1.bf16.msra.mxu0 %v16586_v17  ;;  %9093 = vmatpush1.bf16.msra.mxu1 %v16589_v12  ;;  %v16669_v17 = vld [vmem:[%s17872_s29 + $0x20ac] ss:$16 sps:$4 sm:$0xff]   ;;  %v16664_v12 = vld [vmem:[%s17872_s29 + $0x20a0] ss:$16 sps:$4 sm:$0xff]  }
 0xa9a   : > { %9008 = vmatprep.subr.bf16.mxu0 %v16594_v34  ;;  %9094 = vmatprep.subr.bf16.mxu1 %v16597_v58  ;;  %v16667_v34 = vld [vmem:[%s17872_s29 + $0x20a8] ss:$16 sps:$4 sm:$0xff]   ;;  %v16672_v58 = vld [vmem:[%s17872_s29 + $0x20c4] ss:$16 sps:$4 sm:$0xff]  }
 0xa9d   : > { %9009 = vmatpush1.bf16.msra.mxu0 %v16592_v60  ;;  %9095 = vmatpush1.bf16.msra.mxu1 %v16595_v61  ;;  %v16675_v60 = vld [vmem:[%s17872_s29 + $0x20cc] ss:$16 sps:$4 sm:$0xff]   ;;  %v16670_v61 = vld [vmem:[%s17872_s29 + $0x20c0] ss:$16 sps:$4 sm:$0xff]  }
 0xa9e   : > { %9010 = vmatprep.subr.bf16.mxu0 %v16600_v14  ;;  %9096 = vmatprep.subr.bf16.mxu1 %v16603_v63  ;;  %v16673_v14 = vld [vmem:[%s17872_s29 + $0x20c8] ss:$16 sps:$4 sm:$0xff]   ;;  %v16678_v63 = vld [vmem:[%s17872_s29 + $0x20e4] ss:$16 sps:$4 sm:$0xff]  }
 0xaa1   : > { %9011 = vmatpush1.bf16.msra.mxu0 %v16598_v38  ;;  %9097 = vmatpush1.bf16.msra.mxu1 %v16601_v50  ;;  %v16681_v38 = vld [vmem:[%s17872_s29 + $0x20ec] ss:$16 sps:$4 sm:$0xff]   ;;  %v16676_v50 = vld [vmem:[%s17872_s29 + $0x20e0] ss:$16 sps:$4 sm:$0xff]  }
 0xaa2   : > { %9012 = vmatprep.subr.bf16.mxu0 %v16606_v16  ;;  %9098 = vmatprep.subr.bf16.mxu1 %v16609_v41  ;;  %v16679_v16 = vld [vmem:[%s17872_s29 + $0x20e8] ss:$16 sps:$4 sm:$0xff]   ;;  %v16684_v41 = vld [vmem:[%s17872_s29 + $0x2104] ss:$16 sps:$4 sm:$0xff]  }
 0xaa5   : > { %9013 = vmatpush1.bf16.msra.mxu0 %v16604_v19  ;;  %9099 = vmatpush1.bf16.msra.mxu1 %v16607_v1  ;;  %v16687_v19 = vld [vmem:[%s17872_s29 + $0x210c] ss:$16 sps:$4 sm:$0xff]   ;;  %v16682_v1 = vld [vmem:[%s17872_s29 + $0x2100] ss:$16 sps:$4 sm:$0xff]  }
 0xaa6   : > { %9014 = vmatprep.subr.bf16.mxu0 %v16612_v2  ;;  %9100 = vmatprep.subr.bf16.mxu1 %v16615_v20  ;;  %v16685_v2 = vld [vmem:[%s17872_s29 + $0x2108] ss:$16 sps:$4 sm:$0xff]   ;;  %v16690_v20 = vld [vmem:[%s17872_s29 + $0x2124] ss:$16 sps:$4 sm:$0xff]  }
 0xaa9   : > { %9015 = vmatpush1.bf16.msra.mxu0 %v16610_v21  ;;  %9101 = vmatpush1.bf16.msra.mxu1 %v16613_v23  ;;  %v16693_v21 = vld [vmem:[%s17872_s29 + $0x212c] ss:$16 sps:$4 sm:$0xff]   ;;  %v16688_v23 = vld [vmem:[%s17872_s29 + $0x2120] ss:$16 sps:$4 sm:$0xff]  }
 0xaaa   : > { %9016 = vmatprep.subr.bf16.mxu0 %v16618_v51  ;;  %9102 = vmatprep.subr.bf16.mxu1 %v16621_v24  ;;  %v16691_v51 = vld [vmem:[%s17872_s29 + $0x2128] ss:$16 sps:$4 sm:$0xff]   ;;  %v16696_v24 = vld [vmem:[%s17872_s29 + $0x2144] ss:$16 sps:$4 sm:$0xff]  }
 0xaad   : > { %9017 = vmatpush1.bf16.msra.mxu0 %v16616_v40  ;;  %9103 = vmatpush1.bf16.msra.mxu1 %v16619_v26  ;;  %v16699_v40 = vld [vmem:[%s17872_s29 + $0x214c] ss:$16 sps:$4 sm:$0xff]   ;;  %v16694_v26 = vld [vmem:[%s17872_s29 + $0x2140] ss:$16 sps:$4 sm:$0xff]  }
 0xaae   : > { %9018 = vmatprep.subr.bf16.mxu0 %v16624_v55  ;;  %9104 = vmatprep.subr.bf16.mxu1 %v16627_v28  ;;  %v16697_v55 = vld [vmem:[%s17872_s29 + $0x2148] ss:$16 sps:$4 sm:$0xff]   ;;  %v16702_v28 = vld [vmem:[%s17872_s29 + $0x2164] ss:$16 sps:$4 sm:$0xff]  }
 0xab1   : > { %9019 = vmatpush1.bf16.msra.mxu0 %v16622_v29  ;;  %9105 = vmatpush1.bf16.msra.mxu1 %v16625_v15  ;;  %v16705_v29 = vld [vmem:[%s17872_s29 + $0x216c] ss:$16 sps:$4 sm:$0xff]   ;;  %v16700_v15 = vld [vmem:[%s17872_s29 + $0x2160] ss:$16 sps:$4 sm:$0xff]  }
 0xab2   : > { %9020 = vmatprep.subr.bf16.mxu0 %v16630_v35  ;;  %9106 = vmatprep.subr.bf16.mxu1 %v16633_v18  ;;  %v16703_v35 = vld [vmem:[%s17872_s29 + $0x2168] ss:$16 sps:$4 sm:$0xff]   ;;  %v16708_v18 = vld [vmem:[%s17872_s29 + $0x2184] ss:$16 sps:$4 sm:$0xff]  }
 0xab5   : > { %9021 = vmatpush1.bf16.msra.mxu0 %v16628_v37  ;;  %9107 = vmatpush1.bf16.msra.mxu1 %v16631_v39  ;;  %v16711_v37 = vld [vmem:[%s17872_s29 + $0x218c] ss:$16 sps:$4 sm:$0xff]   ;;  %v16706_v39 = vld [vmem:[%s17872_s29 + $0x2180] ss:$16 sps:$4 sm:$0xff]  }
 0xab6   : > { %9923 = vmatprep.subr.bf16.mxu0 %v16636_v43  ;;  %10009 = vmatprep.subr.bf16.mxu1 %v16639_v45  ;;  %v16709_v43 = vld [vmem:[%s17872_s29 + $0x2188] ss:$16 sps:$4 sm:$0xff]   ;;  %v16714_v45 = vld [vmem:[%s17872_s29 + $0x21a4] ss:$16 sps:$4 sm:$0xff]  }
 0xab8   : > { %9023 = vmatmul.mubr.bf16.vlgmr.msra.gmra.mrb[28].mxu0 %v19031_v5  ;;  %9109 = vmatmul.mubr.bf16.vlgmr.msra.gmra.mrb[28].mxu1 %v19031_v5  ;;  %v16654_v5 = vld [vmem:[%s17872_s29 + $0x2064] ss:$16 sps:$4 sm:$0xff]  }
 0xab9   : > { %9924 = vmatpush1.bf16.msra.mxu0 %v16634_v46  ;;  %10010 = vmatpush1.bf16.msra.mxu1 %v16637_v10  ;;  %v16717_v46 = vld [vmem:[%s17872_s29 + $0x21ac] ss:$16 sps:$4 sm:$0xff]   ;;  %v16712_v10 = vld [vmem:[%s17872_s29 + $0x21a0] ss:$16 sps:$4 sm:$0xff]  }
 0xaba   : > { %9925 = vmatprep.subr.bf16.mxu0 %v16642_v47  ;;  %10011 = vmatprep.subr.bf16.mxu1 %v16645_v48  ;;  %v16715_v47 = vld [vmem:[%s17872_s29 + $0x21a8] ss:$16 sps:$4 sm:$0xff]   ;;  %v16720_v48 = vld [vmem:[%s17872_s29 + $0x21c4] ss:$16 sps:$4 sm:$0xff]  }
 0xabd   : > { %9926 = vmatpush1.bf16.msra.mxu0 %v16640_v52  ;;  %10012 = vmatpush1.bf16.msra.mxu1 %v16643_v53  ;;  %v16723_v52 = vld [vmem:[%s17872_s29 + $0x21cc] ss:$16 sps:$4 sm:$0xff]   ;;  %v16718_v53 = vld [vmem:[%s17872_s29 + $0x21c0] ss:$16 sps:$4 sm:$0xff]  }
 0xabe   : > { %9927 = vmatprep.subr.bf16.mxu0 %v16648_v54  ;;  %10013 = vmatprep.subr.bf16.mxu1 %v16651_v56  ;;  %v16721_v54 = vld [vmem:[%s17872_s29 + $0x21c8] ss:$16 sps:$4 sm:$0xff]   ;;  %v16726_v56 = vld [vmem:[%s17872_s29 + $0x21e4] ss:$16 sps:$4 sm:$0xff]  }
 0xac1   : > { %9928 = vmatpush1.bf16.msra.mxu0 %v16646_v57  ;;  %10014 = vmatpush1.bf16.msra.mxu1 %v16649_v13  ;;  %v16729_v57 = vld [vmem:[%s17872_s29 + $0x21ec] ss:$16 sps:$4 sm:$0xff]   ;;  %v16724_v13 = vld [vmem:[%s17872_s29 + $0x21e0] ss:$16 sps:$4 sm:$0xff]  }
 0xac2   : > { %9929 = vmatprep.subr.bf16.mxu0 %v16654_v5  ;;  %10015 = vmatprep.subr.bf16.mxu1 %v16657_v0  ;;  %v16727_v5 = vld [vmem:[%s17872_s29 + $0x21e8] ss:$16 sps:$4 sm:$0xff]   ;;  %v16732_v0 = vld [vmem:[%s17872_s29 + $0x2204] ss:$16 sps:$4 sm:$0xff]  }
 0xac5   : > { %9930 = vmatpush1.bf16.msra.mxu0 %v16652_v36  ;;  %10016 = vmatpush1.bf16.msra.mxu1 %v16655_v42  ;;  %v16735_v36 = vld [vmem:[%s17872_s29 + $0x220c] ss:$16 sps:$4 sm:$0xff]  }
 0xac6   : > { %9931 = vmatprep.subr.bf16.mxu0 %v16660_v22  ;;  %10017 = vmatprep.subr.bf16.mxu1 %v16663_v44  ;;  %v19164_v42 = vld [vmem:[%s17878_s24 + $0x1c] sm:$0xf] }
 0xac7   : > { %v8294_v22 = vrot.slane %v19164_v42, %v18089_v32  ;;  %v8290_v44 = vrot.slane %v19164_v42, %v18085_v30 }
 0xac9   : > { %9932 = vmatpush1.bf16.msra.mxu0 %v16658_v49  ;;  %10018 = vmatpush1.bf16.msra.mxu1 %v16661_v3 }
 0xaca   : > { %9933 = vmatprep.subr.bf16.mxu0 %v16666_v4  ;;  %10019 = vmatprep.subr.bf16.mxu1 %v16669_v17  ;;  %v8302_v17 = vrot.slane %v19164_v42, %v18091_v33 }
 0xacd   : > { %9934 = vmatpush1.bf16.msra.mxu0 %v16664_v12  ;;  %10020 = vmatpush1.bf16.msra.mxu1 %v16667_v34 }
 0xace   : > { %9935 = vmatprep.subr.bf16.mxu0 %v16672_v58  ;;  %10021 = vmatprep.subr.bf16.mxu1 %v16675_v60 }
 0xad1   : > { %9936 = vmatpush1.bf16.msra.mxu0 %v16670_v61  ;;  %10022 = vmatpush1.bf16.msra.mxu1 %v16673_v14 }
 0xad2   : > { %9937 = vmatprep.subr.bf16.mxu0 %v16678_v63  ;;  %10023 = vmatprep.subr.bf16.mxu1 %v16681_v38 }
 0xad5   : > { %9938 = vmatpush1.bf16.msra.mxu0 %v16676_v50  ;;  %10024 = vmatpush1.bf16.msra.mxu1 %v16679_v16 }
 0xad6   : > { %9939 = vmatprep.subr.bf16.mxu0 %v16684_v41  ;;  %10025 = vmatprep.subr.bf16.mxu1 %v16687_v19 }
 0xad9   : > { %9940 = vmatpush1.bf16.msra.mxu0 %v16682_v1  ;;  %10026 = vmatpush1.bf16.msra.mxu1 %v16685_v2 }
 0xada   : > { %9941 = vmatprep.subr.bf16.mxu0 %v16690_v20  ;;  %10027 = vmatprep.subr.bf16.mxu1 %v16693_v21 }
 0xadd   : > { %9942 = vmatpush1.bf16.msra.mxu0 %v16688_v23  ;;  %10028 = vmatpush1.bf16.msra.mxu1 %v16691_v51  ;;  %v16730_v51 = vld [vmem:[%s17872_s29 + $0x2200] ss:$16 sps:$4 sm:$0xff]  }
 0xade   : > { %9943 = vmatprep.subr.bf16.mxu0 %v16696_v24  ;;  %10029 = vmatprep.subr.bf16.mxu1 %v16699_v40  ;;  %v16741_v24 = vld [vmem:[%s17872_s29 + $0x222c] ss:$16 sps:$4 sm:$0xff]   ;;  %v16739_v40 = vld [vmem:[%s17872_s29 + $0x2228] ss:$16 sps:$4 sm:$0xff]  }
 0xae1   : > { %9944 = vmatpush1.bf16.msra.mxu0 %v16694_v26  ;;  %10030 = vmatpush1.bf16.msra.mxu1 %v16697_v55  ;;  %v16744_v26 = vld [vmem:[%s17872_s29 + $0x2244] ss:$16 sps:$4 sm:$0xff]   ;;  %v16747_v55 = vld [vmem:[%s17872_s29 + $0x224c] ss:$16 sps:$4 sm:$0xff]  }
 0xae2   : > { %9945 = vmatprep.subr.bf16.mxu0 %v16702_v28  ;;  %10031 = vmatprep.subr.bf16.mxu1 %v16705_v29  ;;  %v16742_v28 = vld [vmem:[%s17872_s29 + $0x2240] ss:$16 sps:$4 sm:$0xff]   ;;  %v16745_v29 = vld [vmem:[%s17872_s29 + $0x2248] ss:$16 sps:$4 sm:$0xff]  }
 0xae5   : > { %9946 = vmatpush1.bf16.msra.mxu0 %v16700_v15  ;;  %10032 = vmatpush1.bf16.msra.mxu1 %v16703_v35  ;;  %v16750_v15 = vld [vmem:[%s17872_s29 + $0x2264] ss:$16 sps:$4 sm:$0xff]   ;;  %v16753_v35 = vld [vmem:[%s17872_s29 + $0x226c] ss:$16 sps:$4 sm:$0xff]  }
 0xae6   : > { %9947 = vmatprep.subr.bf16.mxu0 %v16708_v18  ;;  %10033 = vmatprep.subr.bf16.mxu1 %v16711_v37  ;;  %v16748_v18 = vld [vmem:[%s17872_s29 + $0x2260] ss:$16 sps:$4 sm:$0xff]   ;;  %v16751_v37 = vld [vmem:[%s17872_s29 + $0x2268] ss:$16 sps:$4 sm:$0xff]  }
 0xae9   : > { %9948 = vmatpush1.bf16.msra.mxu0 %v16706_v39  ;;  %10034 = vmatpush1.bf16.msra.mxu1 %v16709_v43  ;;  %v16756_v39 = vld [vmem:[%s17872_s29 + $0x2284] ss:$16 sps:$4 sm:$0xff]   ;;  %v16759_v43 = vld [vmem:[%s17872_s29 + $0x228c] ss:$16 sps:$4 sm:$0xff]  }
 0xaea   : > { %9949 = vmatprep.subr.bf16.mxu0 %v16714_v45  ;;  %10035 = vmatprep.subr.bf16.mxu1 %v16717_v46  ;;  %v16754_v45 = vld [vmem:[%s17872_s29 + $0x2280] ss:$16 sps:$4 sm:$0xff]   ;;  %v16757_v46 = vld [vmem:[%s17872_s29 + $0x2288] ss:$16 sps:$4 sm:$0xff]  }
 0xaed   : > { %9950 = vmatpush1.bf16.msra.mxu0 %v16712_v10  ;;  %10036 = vmatpush1.bf16.msra.mxu1 %v16715_v47  ;;  %v16762_v10 = vld [vmem:[%s17872_s29 + $0x22a4] ss:$16 sps:$4 sm:$0xff]   ;;  %v16765_v47 = vld [vmem:[%s17872_s29 + $0x22ac] ss:$16 sps:$4 sm:$0xff]  }
 0xaee   : > { %9951 = vmatprep.subr.bf16.mxu0 %v16720_v48  ;;  %10037 = vmatprep.subr.bf16.mxu1 %v16723_v52  ;;  %v16760_v48 = vld [vmem:[%s17872_s29 + $0x22a0] ss:$16 sps:$4 sm:$0xff]   ;;  %v16763_v52 = vld [vmem:[%s17872_s29 + $0x22a8] ss:$16 sps:$4 sm:$0xff]  }
 0xaf1   : > { %9952 = vmatpush1.bf16.msra.mxu0 %v16718_v53  ;;  %10038 = vmatpush1.bf16.msra.mxu1 %v16721_v54  ;;  %v16768_v53 = vld [vmem:[%s17872_s29 + $0x22c4] ss:$16 sps:$4 sm:$0xff]   ;;  %v16771_v54 = vld [vmem:[%s17872_s29 + $0x22cc] ss:$16 sps:$4 sm:$0xff]  }
 0xaf2   : > { %9953 = vmatprep.subr.bf16.mxu0 %v16726_v56  ;;  %10039 = vmatprep.subr.bf16.mxu1 %v16729_v57  ;;  %v16766_v56 = vld [vmem:[%s17872_s29 + $0x22c0] ss:$16 sps:$4 sm:$0xff]   ;;  %v16769_v57 = vld [vmem:[%s17872_s29 + $0x22c8] ss:$16 sps:$4 sm:$0xff]  }
 0xaf5   : > { %9954 = vmatpush1.bf16.msra.mxu0 %v16724_v13  ;;  %10040 = vmatpush1.bf16.msra.mxu1 %v16727_v5  ;;  %v16774_v13 = vld [vmem:[%s17872_s29 + $0x22e4] ss:$16 sps:$4 sm:$0xff]   ;;  %v16777_v5 = vld [vmem:[%s17872_s29 + $0x22ec] ss:$16 sps:$4 sm:$0xff]  }
 0xaf6   : > { %9966 = vmatprep.subr.bf16.mxu0 %v16732_v0  ;;  %10052 = vmatprep.subr.bf16.mxu1 %v16735_v36  ;;  %v16772_v0 = vld [vmem:[%s17872_s29 + $0x22e0] ss:$16 sps:$4 sm:$0xff]   ;;  %v16775_v36 = vld [vmem:[%s17872_s29 + $0x22e8] ss:$16 sps:$4 sm:$0xff]  }
 0xb8b   : > { %v9024_v49 = vpop.f32.mrb[28].mxu0  ;;  %v19170_v3 = vpop.f32.mrb[28].mxu1 }
 0xb8c   : > { %v9026_v4 = vpop.f32.mrb[29].mxu0  ;;  %v9112_v12 = vpop.f32.mrb[29].mxu1  ;;  %v14698_v61 = vadd.f32 %v9024_v49, %v8290_v44  ;;  %v16778_v49 = vld [vmem:[%s17872_s29 + $0x2300] ss:$16 sps:$4 sm:$0xff]  }
 0xb8d   : > { %v14699_v34 = vadd.f32 %v9026_v4, %v8294_v22  ;;  %v9028_v58 = vpop.f32.mrb[30].mxu0  ;;  %v19174_v60 = vpop.f32.mrb[30].mxu1  ;;  %v14703_v41 = vadd.f32 %v9112_v12, %v8302_v17  ;;  %v16781_v4 = vld [vmem:[%s17872_s29 + $0x2308] ss:$16 sps:$4 sm:$0xff]   ;;  %v16789_v12 = vld [vmem:[%s17872_s29 + $0x232c] ss:$16 sps:$4 sm:$0xff]  }
 0xb8e   : > { %v14700_v14 = vadd.f32 %v9028_v58, %v8290_v44  ;;  %v9030_v63 = vpop.f32.mrb[31].mxu0  ;;  %v9116_v38 = vpop.f32.mrb[31].mxu1  ;;  %v19186_v20 = vadd.f32 %v14698_v61, %v18872_v9  ;;  %v16738_v9 = vld [vmem:[%s17872_s29 + $0x2224] ss:$16 sps:$4 sm:$0xff]   ;;  %v16783_v44 = vld [vmem:[%s17872_s29 + $0x230c] ss:$16 sps:$4 sm:$0xff]  }
 0xb8f   : > { %v14701_v50 = vadd.f32 %v9030_v63, %v8294_v22  ;;  %v14705_v16 = vadd.f32 %v9116_v38, %v8302_v17  ;;  %v19180_v1 = vadd.f32 %v14699_v34, %v18866_v7  ;;  %v19196_v7 = vadd.f32 %v14703_v41, %v18882_v59  ;;  %v16736_v59 = vld [vmem:[%s17872_s29 + $0x2220] ss:$16 sps:$4 sm:$0xff]   ;;  %v16780_v22 = vld [vmem:[%s17872_s29 + $0x2304] ss:$16 sps:$4 sm:$0xff]   ;;  %v16787_v58 = vld [vmem:[%s17872_s29 + $0x2328] ss:$16 sps:$4 sm:$0xff]  }
 0xb90   : > { %v19177_v19 = vadd.f32 %v14700_v14, %v18863_v6  ;;  %v16733_v6 = vld [vmem:[%s17872_s29 + $0x2208] ss:$16 sps:$4 sm:$0xff]   ;;  %v16786_v17 = vld [vmem:[%s17872_s29 + $0x2324] ss:$16 sps:$4 sm:$0xff]   ;;  %v16784_v34 = vld [vmem:[%s17872_s29 + $0x2320] ss:$16 sps:$4 sm:$0xff]  }
 0xb91   : > { %v19183_v2 = vadd.f32 %v14701_v50, %v18869_v8  ;;  %v19189_v21 = vadd.f32 %v14705_v16, %v18875_v11  ;;  %v16792_v61 = vld [vmem:[%s17872_s29 + $0x2344] ss:$16 sps:$4 sm:$0xff]   ;;  %v16795_v14 = vld [vmem:[%s17872_s29 + $0x234c] ss:$16 sps:$4 sm:$0xff]   ;;  %v16790_v63 = vld [vmem:[%s17872_s29 + $0x2340] ss:$16 sps:$4 sm:$0xff]  }
 0xb92   : > { %v9127_v8 = vpack.c.bf16 %v19177_v19, %v19186_v20  ;;  %v16793_v38 = vld [vmem:[%s17872_s29 + $0x2348] ss:$16 sps:$4 sm:$0xff]   ;;  %v16798_v50 = vld [vmem:[%s17872_s29 + $0x2364] ss:$16 sps:$4 sm:$0xff]   ;;  %v16801_v16 = vld [vmem:[%s17872_s29 + $0x236c] ss:$16 sps:$4 sm:$0xff]  }
 0xb93   : > { %v9128_v23 = vpack.c.bf16 %v19183_v2, %v19180_v1  ;;  %v9130_v11 = vpack.c.bf16 %v19189_v21, %v19196_v7  ;;  %v16796_v41 = vld [vmem:[%s17872_s29 + $0x2360] ss:$16 sps:$4 sm:$0xff]  }
 0xb95   : > { %9955 = vmatprep.mubr.bf16.mxu0 %v9128_v23  ;;  %10041 = vmatprep.mubr.bf16.mxu1 %v9128_v23  ;;  %v16799_v23 = vld [vmem:[%s17872_s29 + $0x2368] ss:$16 sps:$4 sm:$0xff]  }
 0xb96   : > { %9956 = vmatmul.mubr.bf16.vlgmr.msra.gmra.mrb[32].mxu0 %v9127_v8  ;;  %10042 = vmatmul.mubr.bf16.vlgmr.msra.gmra.mrb[32].mxu1 %v9127_v8  ;;  %v16802_v8 = vld [vmem:[%s17872_s29 + $0x2380] ss:$16 sps:$4 sm:$0xff]  }
 0xb97   : > { %9967 = vmatpush1.bf16.msra.mxu0 %v16730_v51  ;;  %10053 = vmatpush1.bf16.msra.mxu1 %v16733_v6  ;;  %v16804_v51 = vld [vmem:[%s17872_s29 + $0x2384] ss:$16 sps:$4 sm:$0xff]   ;;  %v16807_v6 = vld [vmem:[%s17872_s29 + $0x238c] ss:$16 sps:$4 sm:$0xff]  }
 0xb98   : > { %9998 = vmatprep.mubr.bf16.mxu0 %v9130_v11  ;;  %10084 = vmatprep.mubr.bf16.mxu1 %v9130_v11  ;;  %v16813_v11 = vld [vmem:[%s17872_s29 + $0x23ac] ss:$16 sps:$4 sm:$0xff]  }
 0xb99   : > { %9968 = vmatprep.subr.bf16.mxu0 %v16738_v9  ;;  %10054 = vmatprep.subr.bf16.mxu1 %v16741_v24  ;;  %v16805_v9 = vld [vmem:[%s17872_s29 + $0x2388] ss:$16 sps:$4 sm:$0xff]   ;;  %v16810_v24 = vld [vmem:[%s17872_s29 + $0x23a4] ss:$16 sps:$4 sm:$0xff]  }
 0xb9b   : > { %9969 = vmatpush1.bf16.msra.mxu0 %v16736_v59  ;;  %10055 = vmatpush1.bf16.msra.mxu1 %v16739_v40  ;;  %v16808_v59 = vld [vmem:[%s17872_s29 + $0x23a0] ss:$16 sps:$4 sm:$0xff]   ;;  %v16811_v40 = vld [vmem:[%s17872_s29 + $0x23a8] ss:$16 sps:$4 sm:$0xff]  }
 0xb9c   : > { %9970 = vmatprep.subr.bf16.mxu0 %v16744_v26  ;;  %10056 = vmatprep.subr.bf16.mxu1 %v16747_v55  ;;  %v16816_v26 = vld [vmem:[%s17872_s29 + $0x23c4] ss:$16 sps:$4 sm:$0xff]   ;;  %v16819_v55 = vld [vmem:[%s17872_s29 + $0x23cc] ss:$16 sps:$4 sm:$0xff]  }
 0xb9f   : > { %9971 = vmatpush1.bf16.msra.mxu0 %v16742_v28  ;;  %10057 = vmatpush1.bf16.msra.mxu1 %v16745_v29  ;;  %v8298_v28 = vrot.slane %v19164_v42, %v18087_v31  ;;  %v16814_v29 = vld [vmem:[%s17872_s29 + $0x23c0] ss:$16 sps:$4 sm:$0xff]  }
 0xba0   : > { %9972 = vmatprep.subr.bf16.mxu0 %v16750_v15  ;;  %10058 = vmatprep.subr.bf16.mxu1 %v16753_v35  ;;  %v16817_v15 = vld [vmem:[%s17872_s29 + $0x23c8] ss:$16 sps:$4 sm:$0xff]   ;;  %v16820_v42 = vld [vmem:[%s17872_s29 + $0x23e0] ss:$16 sps:$4 sm:$0xff]  }
 0xba1   : > { %v14704_v35 = vadd.f32 %v19174_v60, %v8298_v28  ;;  %v16828_v60 = vld [vmem:[%s17872_s29 + $0x2404] ss:$16 sps:$4 sm:$0xff]  }
 0xba3   : > { %9973 = vmatpush1.bf16.msra.mxu0 %v16748_v18  ;;  %10059 = vmatpush1.bf16.msra.mxu1 %v16751_v37  ;;  %v16822_v18 = vld [vmem:[%s17872_s29 + $0x23e4] ss:$16 sps:$4 sm:$0xff]   ;;  %v16825_v37 = vld [vmem:[%s17872_s29 + $0x23ec] ss:$16 sps:$4 sm:$0xff]  }
 0xba4   : > { %9974 = vmatprep.subr.bf16.mxu0 %v16756_v39  ;;  %10060 = vmatprep.subr.bf16.mxu1 %v16759_v43  ;;  %v14702_v39 = vadd.f32 %v19170_v3, %v8298_v28  ;;  %v16823_v43 = vld [vmem:[%s17872_s29 + $0x23e8] ss:$16 sps:$4 sm:$0xff]   ;;  %v16826_v3 = vld [vmem:[%s17872_s29 + $0x2400] ss:$16 sps:$4 sm:$0xff]   ;;  %v16891_v28 = vld [vmem:[%s17872_s29 + $0x254c] ss:$16 sps:$4 sm:$0xff]  }
 0xba7   : > { %9975 = vmatpush1.bf16.msra.mxu0 %v16754_v45  ;;  %10061 = vmatpush1.bf16.msra.mxu1 %v16757_v46  ;;  %v19267_v45 = vadd.f32 %v14704_v35, %v18953_v25  ;;  %v16831_v46 = vld [vmem:[%s17872_s29 + $0x240c] ss:$16 sps:$4 sm:$0xff]   ;;  %v16834_v25 = vld [vmem:[%s17872_s29 + $0x2424] ss:$16 sps:$4 sm:$0xff]  }
 0xba8   : > { %9976 = vmatprep.subr.bf16.mxu0 %v16762_v10  ;;  %10062 = vmatprep.subr.bf16.mxu1 %v16765_v47  ;;  %v19272_v10 = vadd.f32 %v14702_v39, %v18958_v62  ;;  %v16829_v47 = vld [vmem:[%s17872_s29 + $0x2408] ss:$16 sps:$4 sm:$0xff]   ;;  %v16832_v62 = vld [vmem:[%s17872_s29 + $0x2420] ss:$16 sps:$4 sm:$0xff]   ;;  %v16894_v35 = vld [vmem:[%s17872_s29 + $0x2564] ss:$16 sps:$4 sm:$0xff]  }
 0xba9   : > { %v16895_v39 = vld [vmem:[%s17872_s29 + $0x2568] ss:$16 sps:$4 sm:$0xff]  }
 0xbab   : > { %9977 = vmatpush1.bf16.msra.mxu0 %v16760_v48  ;;  %10063 = vmatpush1.bf16.msra.mxu1 %v16763_v52  ;;  %v9129_v48 = vpack.c.bf16 %v19267_v45, %v19272_v10  ;;  %v16837_v52 = vld [vmem:[%s17872_s29 + $0x242c] ss:$16 sps:$4 sm:$0xff]  }
 0xbac   : > { %9978 = vmatprep.subr.bf16.mxu0 %v16768_v53  ;;  %10064 = vmatprep.subr.bf16.mxu1 %v16771_v54  ;;  %v16835_v53 = vld [vmem:[%s17872_s29 + $0x2428] ss:$16 sps:$4 sm:$0xff]   ;;  %v16840_v54 = vld [vmem:[%s17872_s29 + $0x2444] ss:$16 sps:$4 sm:$0xff]  }
 0xbaf   : > { %9979 = vmatpush1.bf16.msra.mxu0 %v16766_v56  ;;  %10065 = vmatpush1.bf16.msra.mxu1 %v16769_v57  ;;  %v16843_v56 = vld [vmem:[%s17872_s29 + $0x244c] ss:$16 sps:$4 sm:$0xff]   ;;  %v16838_v57 = vld [vmem:[%s17872_s29 + $0x2440] ss:$16 sps:$4 sm:$0xff]  }
 0xbb0   : > { %9980 = vmatprep.subr.bf16.mxu0 %v16774_v13  ;;  %10066 = vmatprep.subr.bf16.mxu1 %v16777_v5  ;;  %v16841_v13 = vld [vmem:[%s17872_s29 + $0x2448] ss:$16 sps:$4 sm:$0xff]   ;;  %v16846_v5 = vld [vmem:[%s17872_s29 + $0x2464] ss:$16 sps:$4 sm:$0xff]  }
 0xbb3   : > { %9981 = vmatpush1.bf16.msra.mxu0 %v16772_v0  ;;  %10067 = vmatpush1.bf16.msra.mxu1 %v16775_v36  ;;  %v16849_v0 = vld [vmem:[%s17872_s29 + $0x246c] ss:$16 sps:$4 sm:$0xff]   ;;  %v16844_v36 = vld [vmem:[%s17872_s29 + $0x2460] ss:$16 sps:$4 sm:$0xff]  }
 0xbb4   : > { %9982 = vmatprep.subr.bf16.mxu0 %v16780_v22  ;;  %10068 = vmatprep.subr.bf16.mxu1 %v16783_v44  ;;  %v16847_v22 = vld [vmem:[%s17872_s29 + $0x2468] ss:$16 sps:$4 sm:$0xff]   ;;  %v16852_v44 = vld [vmem:[%s17872_s29 + $0x2484] ss:$16 sps:$4 sm:$0xff]  }
 0xbb7   : > { %9983 = vmatpush1.bf16.msra.mxu0 %v16778_v49  ;;  %10069 = vmatpush1.bf16.msra.mxu1 %v16781_v4  ;;  %v16855_v49 = vld [vmem:[%s17872_s29 + $0x248c] ss:$16 sps:$4 sm:$0xff]   ;;  %v16850_v4 = vld [vmem:[%s17872_s29 + $0x2480] ss:$16 sps:$4 sm:$0xff]  }
 0xbb8   : > { %9984 = vmatprep.subr.bf16.mxu0 %v16786_v17  ;;  %10070 = vmatprep.subr.bf16.mxu1 %v16789_v12  ;;  %v16853_v17 = vld [vmem:[%s17872_s29 + $0x2488] ss:$16 sps:$4 sm:$0xff]   ;;  %v16858_v12 = vld [vmem:[%s17872_s29 + $0x24a4] ss:$16 sps:$4 sm:$0xff]  }
 0xbbb   : > { %9985 = vmatpush1.bf16.msra.mxu0 %v16784_v34  ;;  %10071 = vmatpush1.bf16.msra.mxu1 %v16787_v58  ;;  %v16861_v34 = vld [vmem:[%s17872_s29 + $0x24ac] ss:$16 sps:$4 sm:$0xff]   ;;  %v16856_v58 = vld [vmem:[%s17872_s29 + $0x24a0] ss:$16 sps:$4 sm:$0xff]  }
 0xbbc   : > { %9986 = vmatprep.subr.bf16.mxu0 %v16792_v61  ;;  %10072 = vmatprep.subr.bf16.mxu1 %v16795_v14  ;;  %v16859_v61 = vld [vmem:[%s17872_s29 + $0x24a8] ss:$16 sps:$4 sm:$0xff]   ;;  %v16864_v14 = vld [vmem:[%s17872_s29 + $0x24c4] ss:$16 sps:$4 sm:$0xff]  }
 0xbbf   : > { %9987 = vmatpush1.bf16.msra.mxu0 %v16790_v63  ;;  %10073 = vmatpush1.bf16.msra.mxu1 %v16793_v38  ;;  %v16867_v63 = vld [vmem:[%s17872_s29 + $0x24cc] ss:$16 sps:$4 sm:$0xff]   ;;  %v16862_v38 = vld [vmem:[%s17872_s29 + $0x24c0] ss:$16 sps:$4 sm:$0xff]  }
 0xbc0   : > { %9988 = vmatprep.subr.bf16.mxu0 %v16798_v50  ;;  %10074 = vmatprep.subr.bf16.mxu1 %v16801_v16  ;;  %v16865_v50 = vld [vmem:[%s17872_s29 + $0x24c8] ss:$16 sps:$4 sm:$0xff]   ;;  %v16870_v16 = vld [vmem:[%s17872_s29 + $0x24e4] ss:$16 sps:$4 sm:$0xff]  }
 0xbc3   : > { %9989 = vmatpush1.bf16.msra.mxu0 %v16796_v41  ;;  %10075 = vmatpush1.bf16.msra.mxu1 %v16799_v23  ;;  %v16873_v41 = vld [vmem:[%s17872_s29 + $0x24ec] ss:$16 sps:$4 sm:$0xff]   ;;  %v16868_v23 = vld [vmem:[%s17872_s29 + $0x24e0] ss:$16 sps:$4 sm:$0xff]  }
 0xbc4   : > { %9990 = vmatprep.subr.bf16.mxu0 %v16804_v51  ;;  %10076 = vmatprep.subr.bf16.mxu1 %v16807_v6  ;;  %v16871_v51 = vld [vmem:[%s17872_s29 + $0x24e8] ss:$16 sps:$4 sm:$0xff]   ;;  %v16876_v6 = vld [vmem:[%s17872_s29 + $0x2504] ss:$16 sps:$4 sm:$0xff]  }
 0xbc7   : > { %9991 = vmatpush1.bf16.msra.mxu0 %v16802_v8  ;;  %10077 = vmatpush1.bf16.msra.mxu1 %v16805_v9  ;;  %v16879_v8 = vld [vmem:[%s17872_s29 + $0x250c] ss:$16 sps:$4 sm:$0xff]   ;;  %v16874_v9 = vld [vmem:[%s17872_s29 + $0x2500] ss:$16 sps:$4 sm:$0xff]  }
 0xbc8   : > { %9992 = vmatprep.subr.bf16.mxu0 %v16810_v24  ;;  %10078 = vmatprep.subr.bf16.mxu1 %v16813_v11  ;;  %v16877_v24 = vld [vmem:[%s17872_s29 + $0x2508] ss:$16 sps:$4 sm:$0xff]   ;;  %v16882_v11 = vld [vmem:[%s17872_s29 + $0x2524] ss:$16 sps:$4 sm:$0xff]  }
 0xbcb   : > { %9993 = vmatpush1.bf16.msra.mxu0 %v16808_v59  ;;  %10079 = vmatpush1.bf16.msra.mxu1 %v16811_v40  ;;  %v16885_v59 = vld [vmem:[%s17872_s29 + $0x252c] ss:$16 sps:$4 sm:$0xff]   ;;  %v16880_v40 = vld [vmem:[%s17872_s29 + $0x2520] ss:$16 sps:$4 sm:$0xff]  }
 0xbcc   : > { %9994 = vmatprep.subr.bf16.mxu0 %v16816_v26  ;;  %10080 = vmatprep.subr.bf16.mxu1 %v16819_v55  ;;  %v16883_v26 = vld [vmem:[%s17872_s29 + $0x2528] ss:$16 sps:$4 sm:$0xff]   ;;  %v16888_v55 = vld [vmem:[%s17872_s29 + $0x2544] ss:$16 sps:$4 sm:$0xff]  }
 0xbcf   : > { %9995 = vmatpush1.bf16.msra.mxu0 %v16814_v29  ;;  %10081 = vmatpush1.bf16.msra.mxu1 %v16817_v15  ;;  %v16886_v29 = vld [vmem:[%s17872_s29 + $0x2540] ss:$16 sps:$4 sm:$0xff]   ;;  %v16889_v15 = vld [vmem:[%s17872_s29 + $0x2548] ss:$16 sps:$4 sm:$0xff]  }
 0xbd0   : > { %9996 = vmatprep.subr.bf16.mxu0 %v16822_v18  ;;  %10082 = vmatprep.subr.bf16.mxu1 %v16825_v37  ;;  %v16897_v18 = vld [vmem:[%s17872_s29 + $0x256c] ss:$16 sps:$4 sm:$0xff]   ;;  %v16892_v37 = vld [vmem:[%s17872_s29 + $0x2560] ss:$16 sps:$4 sm:$0xff]  }
 0xbd3   : > { %9997 = vmatpush1.bf16.msra.mxu0 %v16820_v42  ;;  %10083 = vmatpush1.bf16.msra.mxu1 %v16823_v43  ;;  %v16900_v42 = vld [vmem:[%s17872_s29 + $0x2584] ss:$16 sps:$4 sm:$0xff]   ;;  %v16903_v43 = vld [vmem:[%s17872_s29 + $0x258c] ss:$16 sps:$4 sm:$0xff]  }
 0xbd4   : > { %10899 = vmatprep.subr.bf16.mxu0 %v16828_v60  ;;  %10985 = vmatprep.subr.bf16.mxu1 %v16831_v46  ;;  %v16898_v60 = vld [vmem:[%s17872_s29 + $0x2580] ss:$16 sps:$4 sm:$0xff]   ;;  %v16901_v46 = vld [vmem:[%s17872_s29 + $0x2588] ss:$16 sps:$4 sm:$0xff]  }
 0xbd6   : > { %9999 = vmatmul.mubr.bf16.vlgmr.msra.gmra.mrb[32].mxu0 %v9129_v48  ;;  %10085 = vmatmul.mubr.bf16.vlgmr.msra.gmra.mrb[32].mxu1 %v9129_v48  ;;  %v16904_v48 = vld [vmem:[%s17872_s29 + $0x25a0] ss:$16 sps:$4 sm:$0xff]  }
 0xbd7   : > { %10900 = vmatpush1.bf16.msra.mxu0 %v16826_v3  ;;  %10986 = vmatpush1.bf16.msra.mxu1 %v16829_v47  ;;  %v16906_v3 = vld [vmem:[%s17872_s29 + $0x25a4] ss:$16 sps:$4 sm:$0xff]   ;;  %v16909_v47 = vld [vmem:[%s17872_s29 + $0x25ac] ss:$16 sps:$4 sm:$0xff]  }
 0xbd8   : > { %10901 = vmatprep.subr.bf16.mxu0 %v16834_v25  ;;  %10987 = vmatprep.subr.bf16.mxu1 %v16837_v52  ;;  %v16907_v25 = vld [vmem:[%s17872_s29 + $0x25a8] ss:$16 sps:$4 sm:$0xff]   ;;  %v16912_v52 = vld [vmem:[%s17872_s29 + $0x25c4] ss:$16 sps:$4 sm:$0xff]  }
 0xbdb   : > { %10902 = vmatpush1.bf16.msra.mxu0 %v16832_v62  ;;  %10988 = vmatpush1.bf16.msra.mxu1 %v16835_v53  ;;  %v16915_v62 = vld [vmem:[%s17872_s29 + $0x25cc] ss:$16 sps:$4 sm:$0xff]   ;;  %v16910_v53 = vld [vmem:[%s17872_s29 + $0x25c0] ss:$16 sps:$4 sm:$0xff]  }
 0xbdc   : > { %10903 = vmatprep.subr.bf16.mxu0 %v16840_v54  ;;  %10989 = vmatprep.subr.bf16.mxu1 %v16843_v56  ;;  %v16913_v54 = vld [vmem:[%s17872_s29 + $0x25c8] ss:$16 sps:$4 sm:$0xff]   ;;  %v16918_v56 = vld [vmem:[%s17872_s29 + $0x25e4] ss:$16 sps:$4 sm:$0xff]  }
 0xbdf   : > { %10904 = vmatpush1.bf16.msra.mxu0 %v16838_v57  ;;  %10990 = vmatpush1.bf16.msra.mxu1 %v16841_v13  ;;  %v16921_v57 = vld [vmem:[%s17872_s29 + $0x25ec] ss:$16 sps:$4 sm:$0xff]   ;;  %v16916_v13 = vld [vmem:[%s17872_s29 + $0x25e0] ss:$16 sps:$4 sm:$0xff]  }
 0xbe0   : > { %10905 = vmatprep.subr.bf16.mxu0 %v16846_v5  ;;  %10991 = vmatprep.subr.bf16.mxu1 %v16849_v0  ;;  %v16919_v5 = vld [vmem:[%s17872_s29 + $0x25e8] ss:$16 sps:$4 sm:$0xff]   ;;  %v16924_v0 = vld [vmem:[%s17872_s29 + $0x2604] ss:$16 sps:$4 sm:$0xff]  }
 0xbe3   : > { %10906 = vmatpush1.bf16.msra.mxu0 %v16844_v36  ;;  %10992 = vmatpush1.bf16.msra.mxu1 %v16847_v22  ;;  %v16927_v36 = vld [vmem:[%s17872_s29 + $0x260c] ss:$16 sps:$4 sm:$0xff]   ;;  %v14126_v22 = vld [vmem:[%s17878_s24 + $0x20] sm:$0xf] }
 0xbe4   : > { %10907 = vmatprep.subr.bf16.mxu0 %v16852_v44  ;;  %10993 = vmatprep.subr.bf16.mxu1 %v16855_v49  ;;  %v9266_v44 = vrot.slane %v14126_v22, %v18085_v30  ;;  %v9274_v49 = vrot.slane %v14126_v22, %v18087_v31 }
 0xbe7   : > { %10908 = vmatpush1.bf16.msra.mxu0 %v16850_v4  ;;  %10994 = vmatpush1.bf16.msra.mxu1 %v16853_v17  ;;  %v9270_v4 = vrot.slane %v14126_v22, %v18089_v32  ;;  %v9278_v17 = vrot.slane %v14126_v22, %v18091_v33  ;;  %v16954_v22 = vld [vmem:[%s17872_s29 + $0x26a4] ss:$16 sps:$4 sm:$0xff]  }
 0xbe8   : > { %10909 = vmatprep.subr.bf16.mxu0 %v16858_v12  ;;  %10995 = vmatprep.subr.bf16.mxu1 %v16861_v34 }
 0xbeb   : > { %10910 = vmatpush1.bf16.msra.mxu0 %v16856_v58  ;;  %10996 = vmatpush1.bf16.msra.mxu1 %v16859_v61 }
 0xbec   : > { %10911 = vmatprep.subr.bf16.mxu0 %v16864_v14  ;;  %10997 = vmatprep.subr.bf16.mxu1 %v16867_v63 }
 0xbef   : > { %10912 = vmatpush1.bf16.msra.mxu0 %v16862_v38  ;;  %10998 = vmatpush1.bf16.msra.mxu1 %v16865_v50 }
 0xbf0   : > { %10913 = vmatprep.subr.bf16.mxu0 %v16870_v16  ;;  %10999 = vmatprep.subr.bf16.mxu1 %v16873_v41 }
 0xbf3   : > { %10914 = vmatpush1.bf16.msra.mxu0 %v16868_v23  ;;  %11000 = vmatpush1.bf16.msra.mxu1 %v16871_v51 }
 0xbf4   : > { %10915 = vmatprep.subr.bf16.mxu0 %v16876_v6  ;;  %11001 = vmatprep.subr.bf16.mxu1 %v16879_v8 }
 0xbf7   : > { %10916 = vmatpush1.bf16.msra.mxu0 %v16874_v9  ;;  %11002 = vmatpush1.bf16.msra.mxu1 %v16877_v24 }
 0xbf8   : > { %10917 = vmatprep.subr.bf16.mxu0 %v16882_v11  ;;  %11003 = vmatprep.subr.bf16.mxu1 %v16885_v59 }
 0xbfb   : > { %10918 = vmatpush1.bf16.msra.mxu0 %v16880_v40  ;;  %11004 = vmatpush1.bf16.msra.mxu1 %v16883_v26 }
 0xbfc   : > { %10919 = vmatprep.subr.bf16.mxu0 %v16888_v55  ;;  %11005 = vmatprep.subr.bf16.mxu1 %v16891_v28 }
 0xbff   : > { %10920 = vmatpush1.bf16.msra.mxu0 %v16886_v29  ;;  %11006 = vmatpush1.bf16.msra.mxu1 %v16889_v15 }
 0xc00   : > { %10921 = vmatprep.subr.bf16.mxu0 %v16894_v35  ;;  %11007 = vmatprep.subr.bf16.mxu1 %v16897_v18 }
 0xc03   : > { %10922 = vmatpush1.bf16.msra.mxu0 %v16892_v37  ;;  %11008 = vmatpush1.bf16.msra.mxu1 %v16895_v39 }
 0xc04   : > { %10923 = vmatprep.subr.bf16.mxu0 %v16900_v42  ;;  %11009 = vmatprep.subr.bf16.mxu1 %v16903_v43  ;;  %v16922_v42 = vld [vmem:[%s17872_s29 + $0x2600] ss:$16 sps:$4 sm:$0xff]   ;;  %v16925_v43 = vld [vmem:[%s17872_s29 + $0x2608] ss:$16 sps:$4 sm:$0xff]  }
 0xc07   : > { %10924 = vmatpush1.bf16.msra.mxu0 %v16898_v60  ;;  %11010 = vmatpush1.bf16.msra.mxu1 %v16901_v46  ;;  %v16930_v60 = vld [vmem:[%s17872_s29 + $0x2624] ss:$16 sps:$4 sm:$0xff]   ;;  %v16933_v46 = vld [vmem:[%s17872_s29 + $0x262c] ss:$16 sps:$4 sm:$0xff]  }
 0xc08   : > { %10925 = vmatprep.subr.bf16.mxu0 %v16906_v3  ;;  %11011 = vmatprep.subr.bf16.mxu1 %v16909_v47  ;;  %v16928_v3 = vld [vmem:[%s17872_s29 + $0x2620] ss:$16 sps:$4 sm:$0xff]   ;;  %v16931_v47 = vld [vmem:[%s17872_s29 + $0x2628] ss:$16 sps:$4 sm:$0xff]  }
 0xc0b   : > { %10926 = vmatpush1.bf16.msra.mxu0 %v16904_v48  ;;  %11012 = vmatpush1.bf16.msra.mxu1 %v16907_v25  ;;  %v16936_v48 = vld [vmem:[%s17872_s29 + $0x2644] ss:$16 sps:$4 sm:$0xff]   ;;  %v16939_v25 = vld [vmem:[%s17872_s29 + $0x264c] ss:$16 sps:$4 sm:$0xff]  }
 0xc0c   : > { %10927 = vmatprep.subr.bf16.mxu0 %v16912_v52  ;;  %11013 = vmatprep.subr.bf16.mxu1 %v16915_v62  ;;  %v16934_v52 = vld [vmem:[%s17872_s29 + $0x2640] ss:$16 sps:$4 sm:$0xff]   ;;  %v16937_v62 = vld [vmem:[%s17872_s29 + $0x2648] ss:$16 sps:$4 sm:$0xff]  }
 0xc0f   : > { %10928 = vmatpush1.bf16.msra.mxu0 %v16910_v53  ;;  %11014 = vmatpush1.bf16.msra.mxu1 %v16913_v54  ;;  %v16942_v53 = vld [vmem:[%s17872_s29 + $0x2664] ss:$16 sps:$4 sm:$0xff]   ;;  %v16945_v54 = vld [vmem:[%s17872_s29 + $0x266c] ss:$16 sps:$4 sm:$0xff]  }
 0xc10   : > { %10929 = vmatprep.subr.bf16.mxu0 %v16918_v56  ;;  %11015 = vmatprep.subr.bf16.mxu1 %v16921_v57  ;;  %v16940_v56 = vld [vmem:[%s17872_s29 + $0x2660] ss:$16 sps:$4 sm:$0xff]   ;;  %v16943_v57 = vld [vmem:[%s17872_s29 + $0x2668] ss:$16 sps:$4 sm:$0xff]  }
 0xc13   : > { %10930 = vmatpush1.bf16.msra.mxu0 %v16916_v13  ;;  %11016 = vmatpush1.bf16.msra.mxu1 %v16919_v5  ;;  %v16948_v13 = vld [vmem:[%s17872_s29 + $0x2684] ss:$16 sps:$4 sm:$0xff]   ;;  %v16951_v5 = vld [vmem:[%s17872_s29 + $0x268c] ss:$16 sps:$4 sm:$0xff]  }
 0xc14   : > { %10942 = vmatprep.subr.bf16.mxu0 %v16924_v0  ;;  %11028 = vmatprep.subr.bf16.mxu1 %v16927_v36  ;;  %v16946_v0 = vld [vmem:[%s17872_s29 + $0x2680] ss:$16 sps:$4 sm:$0xff]   ;;  %v16949_v36 = vld [vmem:[%s17872_s29 + $0x2688] ss:$16 sps:$4 sm:$0xff]  }
 0xca9   : > { %v10000_v12 = vpop.f32.mrb[32].mxu0  ;;  %v10086_v34 = vpop.f32.mrb[32].mxu1 }
 0xcaa   : > { %v14706_v58 = vadd.f32 %v10000_v12, %v9266_v44  ;;  %v14710_v61 = vadd.f32 %v10086_v34, %v9274_v49  ;;  %v10002_v14 = vpop.f32.mrb[33].mxu0  ;;  %v10088_v63 = vpop.f32.mrb[33].mxu1  ;;  %v16963_v12 = vld [vmem:[%s17872_s29 + $0x26cc] ss:$16 sps:$4 sm:$0xff]   ;;  %v16958_v34 = vld [vmem:[%s17872_s29 + $0x26c0] ss:$16 sps:$4 sm:$0xff]  }
 0xcab   : > { %v14707_v38 = vadd.f32 %v10002_v14, %v9270_v4  ;;  %v14711_v50 = vadd.f32 %v10088_v63, %v9278_v17  ;;  %v10004_v16 = vpop.f32.mrb[34].mxu0  ;;  %v10090_v41 = vpop.f32.mrb[34].mxu1  ;;  %v16969_v14 = vld [vmem:[%s17872_s29 + $0x26ec] ss:$16 sps:$4 sm:$0xff]   ;;  %v16964_v63 = vld [vmem:[%s17872_s29 + $0x26e0] ss:$16 sps:$4 sm:$0xff]  }
 0xcac   : > { %v14708_v23 = vadd.f32 %v10004_v16, %v9266_v44  ;;  %v14712_v51 = vadd.f32 %v10090_v41, %v9274_v49  ;;  %v10006_v6 = vpop.f32.mrb[35].mxu0  ;;  %v10092_v8 = vpop.f32.mrb[35].mxu1  ;;  %v10095_v11 = vmax.f32 %v14706_v58, 0.0  ;;  %v10097_v59 = vmax.f32 %v14710_v61, 0.0  ;;  %v16957_v44 = vld [vmem:[%s17872_s29 + $0x26ac] ss:$16 sps:$4 sm:$0xff]  }
 0xcad   : > { %v14709_v9 = vadd.f32 %v10006_v6, %v9270_v4  ;;  %v14713_v24 = vadd.f32 %v10092_v8, %v9278_v17  ;;  %v10096_v55 = vmax.f32 %v14707_v38, 0.0  ;;  %v10098_v28 = vmax.f32 %v14711_v50, 0.0  ;;  %v16952_v49 = vld [vmem:[%s17872_s29 + $0x26a0] ss:$16 sps:$4 sm:$0xff]   ;;  %v16955_v4 = vld [vmem:[%s17872_s29 + $0x26a8] ss:$16 sps:$4 sm:$0xff]  }
 0xcae   : > { %v10099_v40 = vmax.f32 %v14708_v23, 0.0  ;;  %v10101_v26 = vmax.f32 %v14712_v51, 0.0  ;;  %v16960_v17 = vld [vmem:[%s17872_s29 + $0x26c4] ss:$16 sps:$4 sm:$0xff]   ;;  %v16961_v58 = vld [vmem:[%s17872_s29 + $0x26c8] ss:$16 sps:$4 sm:$0xff]  }
 0xcaf   : > { %v10100_v29 = vmax.f32 %v14709_v9, 0.0  ;;  %v10102_v15 = vmax.f32 %v14713_v24, 0.0  ;;  %v16966_v61 = vld [vmem:[%s17872_s29 + $0x26e4] ss:$16 sps:$4 sm:$0xff]   ;;  %v16967_v38 = vld [vmem:[%s17872_s29 + $0x26e8] ss:$16 sps:$4 sm:$0xff]  }
 0xcb0   : > { %v10103_v35 = vpack.c.bf16 %v10099_v40, %v10095_v11  ;;  %v19345_v18 = vpack.c.bf16 %v10101_v26, %v10097_v59  ;;  %v16972_v50 = vld [vmem:[%s17872_s29 + $0x2704] ss:$16 sps:$4 sm:$0xff]   ;;  %v16975_v16 = vld [vmem:[%s17872_s29 + $0x270c] ss:$16 sps:$4 sm:$0xff]   ;;  %v16970_v41 = vld [vmem:[%s17872_s29 + $0x2700] ss:$16 sps:$4 sm:$0xff]  }
 0xcb1   : > { %v10104_v37 = vpack.c.bf16 %v10100_v29, %v10096_v55  ;;  %v10106_v39 = vpack.c.bf16 %v10102_v15, %v10098_v28  ;;  %v16973_v23 = vld [vmem:[%s17872_s29 + $0x2708] ss:$16 sps:$4 sm:$0xff]   ;;  %v16978_v51 = vld [vmem:[%s17872_s29 + $0x2724] ss:$16 sps:$4 sm:$0xff]   ;;  %v16981_v6 = vld [vmem:[%s17872_s29 + $0x272c] ss:$16 sps:$4 sm:$0xff]  }
 0xcb2   : > { %v16976_v8 = vld [vmem:[%s17872_s29 + $0x2720] ss:$16 sps:$4 sm:$0xff]   ;;  %v16979_v9 = vld [vmem:[%s17872_s29 + $0x2728] ss:$16 sps:$4 sm:$0xff]   ;;  %v16984_v24 = vld [vmem:[%s17872_s29 + $0x2744] ss:$16 sps:$4 sm:$0xff]  }
 0xcb3   : > { %10931 = vmatprep.mubr.bf16.mxu0 %v10104_v37  ;;  %11017 = vmatprep.mubr.bf16.mxu1 %v10104_v37  ;;  %v16987_v11 = vld [vmem:[%s17872_s29 + $0x274c] ss:$16 sps:$4 sm:$0xff]   ;;  %v16982_v59 = vld [vmem:[%s17872_s29 + $0x2740] ss:$16 sps:$4 sm:$0xff]   ;;  %v16985_v40 = vld [vmem:[%s17872_s29 + $0x2748] ss:$16 sps:$4 sm:$0xff]  }
 0xcb4   : > { %10932 = vmatmul.mubr.bf16.vlgmr.msra.gmra.mrb[36].mxu0 %v10103_v35  ;;  %11018 = vmatmul.mubr.bf16.vlgmr.msra.gmra.mrb[36].mxu1 %v10103_v35  ;;  %v16990_v26 = vld [vmem:[%s17872_s29 + $0x2764] ss:$16 sps:$4 sm:$0xff]   ;;  %v16993_v55 = vld [vmem:[%s17872_s29 + $0x276c] ss:$16 sps:$4 sm:$0xff]   ;;  %v16988_v28 = vld [vmem:[%s17872_s29 + $0x2760] ss:$16 sps:$4 sm:$0xff]  }
 0xcb5   : > { %10943 = vmatpush1.bf16.msra.mxu0 %v16922_v42  ;;  %11029 = vmatpush1.bf16.msra.mxu1 %v16925_v43  ;;  %v16991_v29 = vld [vmem:[%s17872_s29 + $0x2768] ss:$16 sps:$4 sm:$0xff]   ;;  %v16996_v15 = vld [vmem:[%s17872_s29 + $0x2784] ss:$16 sps:$4 sm:$0xff]   ;;  %v16999_v35 = vld [vmem:[%s17872_s29 + $0x278c] ss:$16 sps:$4 sm:$0xff]  }
 0xcb6   : > { %10974 = vmatprep.mubr.bf16.mxu0 %v10106_v39  ;;  %11060 = vmatprep.mubr.bf16.mxu1 %v10106_v39  ;;  %v16994_v37 = vld [vmem:[%s17872_s29 + $0x2780] ss:$16 sps:$4 sm:$0xff]   ;;  %v16997_v39 = vld [vmem:[%s17872_s29 + $0x2788] ss:$16 sps:$4 sm:$0xff]   ;;  %v17002_v42 = vld [vmem:[%s17872_s29 + $0x27a4] ss:$16 sps:$4 sm:$0xff]  }
 0xcb7   : > { %10944 = vmatprep.subr.bf16.mxu0 %v16930_v60  ;;  %11030 = vmatprep.subr.bf16.mxu1 %v16933_v46  ;;  %v17005_v43 = vld [vmem:[%s17872_s29 + $0x27ac] ss:$16 sps:$4 sm:$0xff]   ;;  %v17000_v60 = vld [vmem:[%s17872_s29 + $0x27a0] ss:$16 sps:$4 sm:$0xff]   ;;  %v17003_v46 = vld [vmem:[%s17872_s29 + $0x27a8] ss:$16 sps:$4 sm:$0xff]  }
 0xcb9   : > { %10945 = vmatpush1.bf16.msra.mxu0 %v16928_v3  ;;  %11031 = vmatpush1.bf16.msra.mxu1 %v16931_v47  ;;  %v17008_v3 = vld [vmem:[%s17872_s29 + $0x27c4] ss:$16 sps:$4 sm:$0xff]   ;;  %v17011_v47 = vld [vmem:[%s17872_s29 + $0x27cc] ss:$16 sps:$4 sm:$0xff]  }
 0xcba   : > { %10946 = vmatprep.subr.bf16.mxu0 %v16936_v48  ;;  %11032 = vmatprep.subr.bf16.mxu1 %v16939_v25  ;;  %v17006_v48 = vld [vmem:[%s17872_s29 + $0x27c0] ss:$16 sps:$4 sm:$0xff]   ;;  %v17009_v25 = vld [vmem:[%s17872_s29 + $0x27c8] ss:$16 sps:$4 sm:$0xff]  }
 0xcbd   : > { %10947 = vmatpush1.bf16.msra.mxu0 %v16934_v52  ;;  %11033 = vmatpush1.bf16.msra.mxu1 %v16937_v62  ;;  %v17014_v52 = vld [vmem:[%s17872_s29 + $0x27e4] ss:$16 sps:$4 sm:$0xff]   ;;  %v17017_v62 = vld [vmem:[%s17872_s29 + $0x27ec] ss:$16 sps:$4 sm:$0xff]  }
 0xcbe   : > { %10948 = vmatprep.subr.bf16.mxu0 %v16942_v53  ;;  %11034 = vmatprep.subr.bf16.mxu1 %v16945_v54  ;;  %v17012_v53 = vld [vmem:[%s17872_s29 + $0x27e0] ss:$16 sps:$4 sm:$0xff]   ;;  %v17015_v54 = vld [vmem:[%s17872_s29 + $0x27e8] ss:$16 sps:$4 sm:$0xff]  }
 0xcc1   : > { %10949 = vmatpush1.bf16.msra.mxu0 %v16940_v56  ;;  %11035 = vmatpush1.bf16.msra.mxu1 %v16943_v57  ;;  %v14383_v56 = vld [vmem:[%s17878_s24 + $0x24] sm:$0xf] }
 0xcc2   : > { %10950 = vmatprep.subr.bf16.mxu0 %v16948_v13  ;;  %11036 = vmatprep.subr.bf16.mxu1 %v16951_v5  ;;  %v10242_v57 = vrot.slane %v14383_v56, %v18085_v30  ;;  %v10250_v13 = vrot.slane %v14383_v56, %v18087_v31  ;;  %v10246_v5 = vrot.slane %v14383_v56, %v18089_v32 }
 0xcc5   : > { %10951 = vmatpush1.bf16.msra.mxu0 %v16946_v0  ;;  %11037 = vmatpush1.bf16.msra.mxu1 %v16949_v36  ;;  %v10254_v0 = vrot.slane %v14383_v56, %v18091_v33  ;;  %v17072_v56 = vld [vmem:[#allocation11 + $0x70] ss:$8 sps:$4 sm:$0xff] (!%p14512_p5)  }
 0xcc6   : > { %10952 = vmatprep.subr.bf16.mxu0 %v16954_v22  ;;  %11038 = vmatprep.subr.bf16.mxu1 %v16957_v44 }
 0xcc9   : > { %10953 = vmatpush1.bf16.msra.mxu0 %v16952_v49  ;;  %11039 = vmatpush1.bf16.msra.mxu1 %v16955_v4 }
 0xcca   : > { %10954 = vmatprep.subr.bf16.mxu0 %v16960_v17  ;;  %11040 = vmatprep.subr.bf16.mxu1 %v16963_v12 }
 0xccd   : > { %10955 = vmatpush1.bf16.msra.mxu0 %v16958_v34  ;;  %11041 = vmatpush1.bf16.msra.mxu1 %v16961_v58 }
 0xcce   : > { %10956 = vmatprep.subr.bf16.mxu0 %v16966_v61  ;;  %11042 = vmatprep.subr.bf16.mxu1 %v16969_v14 }
 0xcd1   : > { %10957 = vmatpush1.bf16.msra.mxu0 %v16964_v63  ;;  %11043 = vmatpush1.bf16.msra.mxu1 %v16967_v38 }
 0xcd2   : > { %10958 = vmatprep.subr.bf16.mxu0 %v16972_v50  ;;  %11044 = vmatprep.subr.bf16.mxu1 %v16975_v16 }
 0xcd5   : > { %10959 = vmatpush1.bf16.msra.mxu0 %v16970_v41  ;;  %11045 = vmatpush1.bf16.msra.mxu1 %v16973_v23 }
 0xcd6   : > { %10960 = vmatprep.subr.bf16.mxu0 %v16978_v51  ;;  %11046 = vmatprep.subr.bf16.mxu1 %v16981_v6 }
 0xcd9   : > { %10961 = vmatpush1.bf16.msra.mxu0 %v16976_v8  ;;  %11047 = vmatpush1.bf16.msra.mxu1 %v16979_v9  ;;  %v17030_v8 = vld [vmem:[#allocation11] ss:$8 sps:$4 sm:$0xff] (!%p14512_p5)  }
 0xcda   : > { %10962 = vmatprep.subr.bf16.mxu0 %v16984_v24  ;;  %11048 = vmatprep.subr.bf16.mxu1 %v16987_v11  ;;  %v17031_v9 = vld [vmem:[#allocation11 + $0x100] ss:$8 sps:$4 sm:$0xff] (!%p14512_p5)   ;;  %v17036_v24 = vld [vmem:[#allocation11 + $0x10] ss:$8 sps:$4 sm:$0xff] (!%p14512_p5)  }
 0xcdb   : > { %v17037_v11 = vld [vmem:[#allocation11 + $0x110] ss:$8 sps:$4 sm:$0xff] (!%p14512_p5)  }
 0xcdd   : > { %10963 = vmatpush1.bf16.msra.mxu0 %v16982_v59  ;;  %11049 = vmatpush1.bf16.msra.mxu1 %v16985_v40  ;;  %v17038_v59 = vld [vmem:[#allocation11 + $0x24] ss:$8 sps:$4 sm:$0xff] (!%p14512_p5)  }
 0xcde   : > { %10964 = vmatprep.subr.bf16.mxu0 %v16990_v26  ;;  %11050 = vmatprep.subr.bf16.mxu1 %v16993_v55  ;;  %v17040_v40 = vld [vmem:[#allocation11 + $0x124] ss:$8 sps:$4 sm:$0xff] (!%p14512_p5)   ;;  %v17042_v26 = vld [vmem:[#allocation11 + $0x20] ss:$8 sps:$4 sm:$0xff] (!%p14512_p5)  }
 0xcdf   : > { %v17043_v55 = vld [vmem:[#allocation11 + $0x120] ss:$8 sps:$4 sm:$0xff] (!%p14512_p5)  }
 0xce1   : > { %10965 = vmatpush1.bf16.msra.mxu0 %v16988_v28  ;;  %11051 = vmatpush1.bf16.msra.mxu1 %v16991_v29  ;;  %v17044_v28 = vld [vmem:[#allocation11 + $0x34] ss:$8 sps:$4 sm:$0xff] (!%p14512_p5)  }
 0xce2   : > { %10966 = vmatprep.subr.bf16.mxu0 %v16996_v15  ;;  %11052 = vmatprep.subr.bf16.mxu1 %v16999_v35  ;;  %v17046_v29 = vld [vmem:[#allocation11 + $0x134] ss:$8 sps:$4 sm:$0xff] (!%p14512_p5)   ;;  %v17048_v15 = vld [vmem:[#allocation11 + $0x30] ss:$8 sps:$4 sm:$0xff] (!%p14512_p5)  }
 0xce3   : > { %v17049_v35 = vld [vmem:[#allocation11 + $0x130] ss:$8 sps:$4 sm:$0xff] (!%p14512_p5)  }
 0xce5   : > { %10967 = vmatpush1.bf16.msra.mxu0 %v16994_v37  ;;  %11053 = vmatpush1.bf16.msra.mxu1 %v16997_v39  ;;  %v17050_v37 = vld [vmem:[#allocation11 + $0x44] ss:$8 sps:$4 sm:$0xff] (!%p14512_p5)  }
 0xce6   : > { %10968 = vmatprep.subr.bf16.mxu0 %v17002_v42  ;;  %11054 = vmatprep.subr.bf16.mxu1 %v17005_v43  ;;  %v17052_v39 = vld [vmem:[#allocation11 + $0x144] ss:$8 sps:$4 sm:$0xff] (!%p14512_p5)   ;;  %v17054_v42 = vld [vmem:[#allocation11 + $0x40] ss:$8 sps:$4 sm:$0xff] (!%p14512_p5)  }
 0xce7   : > { %v17055_v43 = vld [vmem:[#allocation11 + $0x140] ss:$8 sps:$4 sm:$0xff] (!%p14512_p5)  }
 0xce9   : > { %10969 = vmatpush1.bf16.msra.mxu0 %v17000_v60  ;;  %11055 = vmatpush1.bf16.msra.mxu1 %v17003_v46  ;;  %v17056_v60 = vld [vmem:[#allocation11 + $0x54] ss:$8 sps:$4 sm:$0xff] (!%p14512_p5)  }
 0xcea   : > { %10970 = vmatprep.subr.bf16.mxu0 %v17008_v3  ;;  %11056 = vmatprep.subr.bf16.mxu1 %v17011_v47  ;;  %v17058_v46 = vld [vmem:[#allocation11 + $0x154] ss:$8 sps:$4 sm:$0xff] (!%p14512_p5)   ;;  %v17060_v3 = vld [vmem:[#allocation11 + $0x50] ss:$8 sps:$4 sm:$0xff] (!%p14512_p5)  }
 0xceb   : > { %v17061_v47 = vld [vmem:[#allocation11 + $0x150] ss:$8 sps:$4 sm:$0xff] (!%p14512_p5)  }
 0xced   : > { %10971 = vmatpush1.bf16.msra.mxu0 %v17006_v48  ;;  %11057 = vmatpush1.bf16.msra.mxu1 %v17009_v25  ;;  %v17062_v48 = vld [vmem:[#allocation11 + $0x64] ss:$8 sps:$4 sm:$0xff] (!%p14512_p5)  }
 0xcee   : > { %10972 = vmatprep.subr.bf16.mxu0 %v17014_v52  ;;  %11058 = vmatprep.subr.bf16.mxu1 %v17017_v62  ;;  %v17064_v25 = vld [vmem:[#allocation11 + $0x164] ss:$8 sps:$4 sm:$0xff] (!%p14512_p5)   ;;  %v17066_v52 = vld [vmem:[#allocation11 + $0x60] ss:$8 sps:$4 sm:$0xff] (!%p14512_p5)  }
 0xcef   : > { %v17067_v62 = vld [vmem:[#allocation11 + $0x160] ss:$8 sps:$4 sm:$0xff] (!%p14512_p5)  }
 0xcf1   : > { %10973 = vmatpush1.bf16.msra.mxu0 %v17012_v53  ;;  %11059 = vmatpush1.bf16.msra.mxu1 %v17015_v54  ;;  %v17068_v53 = vld [vmem:[#allocation11 + $0x74] ss:$8 sps:$4 sm:$0xff] (!%p14512_p5)  }
 0xcf2   : > { %v17070_v54 = vld [vmem:[#allocation11 + $0x174] ss:$8 sps:$4 sm:$0xff] (!%p14512_p5)  }
 0xcf4   : > { %10975 = vmatmul.mubr.bf16.vlgmr.msra.gmra.mrb[36].mxu0 %v19345_v18  ;;  %11061 = vmatmul.mubr.bf16.vlgmr.msra.gmra.mrb[36].mxu1 %v19345_v18 }
 0xdc7   : > { %v10976_v36 = vpop.f32.mrb[36].mxu0  ;;  %v11062_v22 = vpop.f32.mrb[36].mxu1 }
 0xdc8   : > { %v14714_v44 = vadd.f32 %v10976_v36, %v10242_v57  ;;  %v14718_v49 = vadd.f32 %v11062_v22, %v10250_v13  ;;  %v10978_v4 = vpop.f32.mrb[37].mxu0  ;;  %v11064_v17 = vpop.f32.mrb[37].mxu1  ;;  %v17079_v36 = vld [vmem:[#allocation11 + $0x180] ss:$8 sps:$4 sm:$0xff] (!%p14512_p5)   ;;  %v17080_v22 = vld [vmem:[#allocation11 + $0x94] ss:$8 sps:$4 sm:$0xff] (!%p14512_p5)  }
 0xdc9   : > { %v14715_v12 = vadd.f32 %v10978_v4, %v10246_v5  ;;  %v14719_v34 = vadd.f32 %v11064_v17, %v10254_v0  ;;  %v10980_v58 = vpop.f32.mrb[38].mxu0  ;;  %v11066_v61 = vpop.f32.mrb[38].mxu1  ;;  %11090 = sbr.rel (%p14512_p5) target bundleno = 4357 (0x1105), region = 100  ;;  %v17085_v4 = vld [vmem:[#allocation11 + $0x190] ss:$8 sps:$4 sm:$0xff] (!%p14512_p5)  }
 0xdca   : > { %v19417_v18 = vadd.f32 %v14714_v44, %v19186_v20  ;;  %v19420_v14 = vadd.f32 %v14718_v49, %v19272_v10  ;;  %v14716_v31 = vadd.f32 %v10980_v58, %v10242_v57  ;;  %v14720_v63 = vadd.f32 %v11066_v61, %v10250_v13  ;;  %v10982_v38 = vpop.f32.mrb[39].mxu0  ;;  %v11068_v33 = vpop.f32.mrb[39].mxu1  ;;  %v17073_v57 = vld [vmem:[#allocation11 + $0x170] ss:$8 sps:$4 sm:$0xff] (!%p14512_p5)   ;;  %v17074_v13 = vld [vmem:[#allocation11 + $0x84] ss:$8 sps:$4 sm:$0xff] (!%p14512_p5)  }
 0xdcb   : > { %v11072_v50 = vadd.f32 %v14715_v12, %v19180_v1  ;;  %v11074_v16 = vadd.f32 %v14719_v34, %v19196_v7  ;;  %v14717_v41 = vadd.f32 %v10982_v38, %v10246_v5  ;;  %v14721_v23 = vadd.f32 %v11068_v33, %v10254_v0  ;;  %v17076_v5 = vld [vmem:[#allocation11 + $0x184] ss:$8 sps:$4 sm:$0xff] (!%p14512_p5)   ;;  %v17078_v0 = vld [vmem:[#allocation11 + $0x80] ss:$8 sps:$4 sm:$0xff] (!%p14512_p5)   ;;  %v17082_v44 = vld [vmem:[#allocation11 + $0x194] ss:$8 sps:$4 sm:$0xff] (!%p14512_p5)  }
 0xdcc   : > { %11079 = vst [vmem:[#allocation2] sm:$0xff] %v19417_v18  ;;  %11081 = vst [vmem:[#allocation2 + $0x10] sm:$0xff] %v19420_v14  ;;  %v19427_v20 = vadd.f32 %v14716_v31, %v19177_v19  ;;  %v19430_v10 = vadd.f32 %v14720_v63, %v19267_v45  ;;  %v17026_v19 = vld [vmem:[#allocation11 + $0x4] ss:$8 sps:$4 sm:$0xff] (!%p14512_p5)   ;;  %v17084_v49 = vld [vmem:[#allocation11 + $0x90] ss:$8 sps:$4 sm:$0xff] (!%p14512_p5)  }
 0xdcd   : > { %11080 = vst [vmem:[#allocation2 + $0x8] sm:$0xff] %v11072_v50  ;;  %11082 = vst [vmem:[#allocation2 + $0x18] sm:$0xff] %v11074_v16  ;;  %v11076_v51 = vadd.f32 %v14717_v41, %v19183_v2  ;;  %v11078_v1 = vadd.f32 %v14721_v23, %v19189_v21  ;;  %v17028_v45 = vld [vmem:[#allocation11 + $0x104] ss:$8 sps:$4 sm:$0xff] (!%p14512_p5)   ;;  %11491 = vmatprep.subr.bf16.mxu1 (!%p14512_p5), %v17026_v19  ;;  %v17032_v2 = vld [vmem:[#allocation11 + $0x14] ss:$8 sps:$4 sm:$0xff] (!%p14512_p5)  }
 0xdce   : > { %11083 = vst [vmem:[#allocation2 + $0x20] sm:$0xff] %v19427_v20  ;;  %11085 = vst [vmem:[#allocation2 + $0x30] sm:$0xff] %v19430_v10  ;;  %11534 = vmatprep.subr.bf16.mxu0 (!%p14512_p5), %v17028_v45  ;;  %11492 = vmatpush1.bf16.msra.mxu1 (!%p14512_p5), %v17030_v8  ;;  %v17034_v21 = vld [vmem:[#allocation11 + $0x114] ss:$8 sps:$4 sm:$0xff] (!%p14512_p5)   ;;  %v17086_v17 = vld [vmem:[#allocation11 + $0xa4] ss:$8 sps:$4 sm:$0xff] (!%p14512_p5)  }
 0xdcf   : > { %11084 = vst [vmem:[#allocation2 + $0x28] sm:$0xff] %v11076_v51  ;;  %11086 = vst [vmem:[#allocation2 + $0x38] sm:$0xff] %v11078_v1  ;;  %v11092_v7 = vpack.c.bf16 (!%p14512_p5), %v11076_v51, %v11072_v50  ;;  %v11094_v6 = vpack.c.bf16 (!%p14512_p5), %v11078_v1, %v11074_v16  ;;  %11535 = vmatpush1.bf16.msra.mxu0 (!%p14512_p5), %v17031_v9  ;;  %11493 = vmatprep.subr.bf16.mxu1 (!%p14512_p5), %v17032_v2  ;;  %v17088_v12 = vld [vmem:[#allocation11 + $0x1a4] ss:$8 sps:$4 sm:$0xff] (!%p14512_p5)   ;;  %v17090_v34 = vld [vmem:[#allocation11 + $0xa0] ss:$8 sps:$4 sm:$0xff] (!%p14512_p5)  }
 0xdd0   : > { %11536 = vmatprep.subr.bf16.mxu0 %v17034_v21  ;;  %v17091_v58 = vld [vmem:[#allocation11 + $0x1a0] ss:$8 sps:$4 sm:$0xff]   ;;  %v17092_v61 = vld [vmem:[#allocation11 + $0xb4] ss:$8 sps:$4 sm:$0xff]   ;;  %v17096_v63 = vld [vmem:[#allocation11 + $0xb0] ss:$8 sps:$4 sm:$0xff]  }
 0xdd1   : > { %11523 = vmatprep.mubr.bf16.mxu1 %v11092_v7  ;;  %11566 = vmatprep.mubr.bf16.mxu0 %v11094_v6  ;;  %v17094_v31 = vld [vmem:[#allocation11 + $0x1b4] ss:$8 sps:$4 sm:$0xff]   ;;  %v17097_v38 = vld [vmem:[#allocation11 + $0x1b0] ss:$8 sps:$4 sm:$0xff]   ;;  %v17098_v33 = vld [vmem:[#allocation11 + $0xc4] ss:$8 sps:$4 sm:$0xff]  }
 0xdd2   : > { %11494 = vmatpush1.bf16.msra.mxu1 %v17036_v24  ;;  %v17100_v50 = vld [vmem:[#allocation11 + $0x1c4] ss:$8 sps:$4 sm:$0xff]   ;;  %v17102_v16 = vld [vmem:[#allocation11 + $0xc0] ss:$8 sps:$4 sm:$0xff]   ;;  %v17104_v23 = vld [vmem:[#allocation11 + $0xd4] ss:$8 sps:$4 sm:$0xff]  }
 0xdd3   : > { %11537 = vmatpush1.bf16.msra.mxu0 %v17037_v11  ;;  %11495 = vmatprep.subr.bf16.mxu1 %v17038_v59  ;;  %v17103_v41 = vld [vmem:[#allocation11 + $0x1c0] ss:$8 sps:$4 sm:$0xff]   ;;  %v17106_v51 = vld [vmem:[#allocation11 + $0x1d4] ss:$8 sps:$4 sm:$0xff]   ;;  %v17108_v1 = vld [vmem:[#allocation11 + $0xd0] ss:$8 sps:$4 sm:$0xff]   ;;  %v11091_v59 = vpack.c.bf16 %v19427_v20, %v19417_v18 }
 0xdd4   : > { %11538 = vmatprep.subr.bf16.mxu0 %v17040_v40  ;;  %v17109_v19 = vld [vmem:[#allocation11 + $0x1d0] ss:$8 sps:$4 sm:$0xff]   ;;  %v17110_v7 = vld [vmem:[#allocation11 + $0xe4] ss:$8 sps:$4 sm:$0xff]   ;;  %v17114_v45 = vld [vmem:[#allocation11 + $0xe0] ss:$8 sps:$4 sm:$0xff]   ;;  %v11093_v40 = vpack.c.bf16 %v19430_v10, %v19420_v14 }
 0xdd5   : > { %v17112_v6 = vld [vmem:[#allocation11 + $0x1e4] ss:$8 sps:$4 sm:$0xff]   ;;  %v17115_v8 = vld [vmem:[#allocation11 + $0x1e0] ss:$8 sps:$4 sm:$0xff]   ;;  %v17116_v9 = vld [vmem:[#allocation11 + $0xf4] ss:$8 sps:$4 sm:$0xff]  }
 0xdd6   : > { %11496 = vmatpush1.bf16.msra.mxu1 %v17042_v26  ;;  %v17118_v2 = vld [vmem:[#allocation11 + $0x1f4] ss:$8 sps:$4 sm:$0xff]   ;;  %v17120_v21 = vld [vmem:[#allocation11 + $0xf0] ss:$8 sps:$4 sm:$0xff]   ;;  %v17122_v11 = vld [vmem:[#allocation14 + $0x40] sm:$0xff]  }
 0xdd7   : > { %11539 = vmatpush1.bf16.msra.mxu0 %v17043_v55  ;;  %11497 = vmatprep.subr.bf16.mxu1 %v17044_v28  ;;  %v17121_v24 = vld [vmem:[#allocation11 + $0x1f0] ss:$8 sps:$4 sm:$0xff]   ;;  %v17123_v26 = vld [vmem:[#allocation14] sm:$0xff]  }
 0xdd8   : > { %11540 = vmatprep.subr.bf16.mxu0 %v17046_v29  ;;  %v17124_v55 = vld [vmem:[#allocation14 + $0x48] sm:$0xff]   ;;  %v17126_v29 = vld [vmem:[#allocation14 + $0x50] sm:$0xff]   ;;  %v17129_v18 = vld [vmem:[#allocation14 + $0x18] sm:$0xff]  }
 0xdd9   : > { %v17125_v28 = vld [vmem:[#allocation14 + $0x8] sm:$0xff]   ;;  %v17130_v20 = vld [vmem:[#allocation14 + $0x60] sm:$0xff]  }
 0xdda   : > { %11498 = vmatpush1.bf16.msra.mxu1 %v17048_v15  ;;  %v17127_v15 = vld [vmem:[#allocation14 + $0x10] sm:$0xff]   ;;  %v17131_v14 = vld [vmem:[#allocation14 + $0x20] sm:$0xff]   ;;  %v17132_v10 = vld [vmem:[#allocation14 + $0x68] sm:$0xff]  }
 0xddb   : > { %11541 = vmatpush1.bf16.msra.mxu0 %v17049_v35  ;;  %11499 = vmatprep.subr.bf16.mxu1 %v17050_v37  ;;  %v17128_v35 = vld [vmem:[#allocation14 + $0x58] sm:$0xff]   ;;  %v17133_v37 = vld [vmem:[#allocation14 + $0x28] sm:$0xff]  }
 0xddc   : > { %11542 = vmatprep.subr.bf16.mxu0 %v17052_v39  ;;  %v17134_v39 = vld [vmem:[#allocation14 + $0x70] sm:$0xff]  }
 0xdde   : > { %11500 = vmatpush1.bf16.msra.mxu1 %v17054_v42  ;;  %v17135_v42 = vld [vmem:[#allocation14 + $0x30] sm:$0xff]  }
 0xddf   : > { %11543 = vmatpush1.bf16.msra.mxu0 %v17055_v43  ;;  %11501 = vmatprep.subr.bf16.mxu1 %v17056_v60  ;;  %v17136_v43 = vld [vmem:[#allocation14 + $0x78] sm:$0xff]  }
 0xde0   : > { %11544 = vmatprep.subr.bf16.mxu0 %v17058_v46  ;;  %v17137_v60 = vld [vmem:[#allocation14 + $0x38] sm:$0xff]  }
 0xde1   : > { %v11159_v46 = vld [vmem:[#allocation13] sm:$0x3] }
 0xde2   : > { %11502 = vmatpush1.bf16.msra.mxu1 %v17060_v3  ;;  %v11164_v3 = vrot.slane %v11159_v46, %v18085_v30 }
 0xde3   : > { %11545 = vmatpush1.bf16.msra.mxu0 %v17061_v47  ;;  %11503 = vmatprep.subr.bf16.mxu1 %v17062_v48  ;;  %v11168_v47 = vrot.slane %v11159_v46, %v18089_v32 }
 0xde4   : > { %11546 = vmatprep.subr.bf16.mxu0 %v17064_v25 }
 0xde6   : > { %11504 = vmatpush1.bf16.msra.mxu1 %v17066_v52 }
 0xde7   : > { %11547 = vmatpush1.bf16.msra.mxu0 %v17067_v62  ;;  %11505 = vmatprep.subr.bf16.mxu1 %v17068_v53 }
 0xde8   : > { %11548 = vmatprep.subr.bf16.mxu0 %v17070_v54 }
 0xdea   : > { %11506 = vmatpush1.bf16.msra.mxu1 %v17072_v56 }
 0xdeb   : > { %11549 = vmatpush1.bf16.msra.mxu0 %v17073_v57  ;;  %11507 = vmatprep.subr.bf16.mxu1 %v17074_v13 }
 0xdec   : > { %11550 = vmatprep.subr.bf16.mxu0 %v17076_v5 }
 0xdee   : > { %11508 = vmatpush1.bf16.msra.mxu1 %v17078_v0 }
 0xdef   : > { %11551 = vmatpush1.bf16.msra.mxu0 %v17079_v36  ;;  %11509 = vmatprep.subr.bf16.mxu1 %v17080_v22 }
 0xdf0   : > { %11552 = vmatprep.subr.bf16.mxu0 %v17082_v44 }
 0xdf2   : > { %11510 = vmatpush1.bf16.msra.mxu1 %v17084_v49 }
 0xdf3   : > { %11553 = vmatpush1.bf16.msra.mxu0 %v17085_v4  ;;  %11511 = vmatprep.subr.bf16.mxu1 %v17086_v17 }
 0xdf4   : > { %11554 = vmatprep.subr.bf16.mxu0 %v17088_v12 }
 0xdf6   : > { %11512 = vmatpush1.bf16.msra.mxu1 %v17090_v34 }
 0xdf7   : > { %11555 = vmatpush1.bf16.msra.mxu0 %v17091_v58  ;;  %11513 = vmatprep.subr.bf16.mxu1 %v17092_v61  ;;  %v11760_v61 = vand.u32 127, %v1455_v27 }
 0xdf8   : > { %11556 = vmatprep.subr.bf16.mxu0 %v17094_v31 }
 0xdf9   : > { %vm11761_vm0 = vcmp.lt.s32.totalorder %v11760_v61, 64 }
 0xdfa   : > { %11514 = vmatpush1.bf16.msra.mxu1 %v17096_v63 }
 0xdfb   : > { %11557 = vmatpush1.bf16.msra.mxu0 %v17097_v38  ;;  %11515 = vmatprep.subr.bf16.mxu1 %v17098_v33  ;;  %v14577_v38 = vld [vmem:[#allocation16] ss:$0 sm:$0xff] }
 0xdfc   : > { %11558 = vmatprep.subr.bf16.mxu0 %v17100_v50 }
 0xdfe   : > { %11516 = vmatpush1.bf16.msra.mxu1 %v17102_v16 }
 0xdff   : > { %11559 = vmatpush1.bf16.msra.mxu0 %v17103_v41  ;;  %11517 = vmatprep.subr.bf16.mxu1 %v17104_v23 }
 0xe00   : > { %11560 = vmatprep.subr.bf16.mxu0 %v17106_v51 }
 0xe02   : > { %11518 = vmatpush1.bf16.msra.mxu1 %v17108_v1 }
 0xe03   : > { %11561 = vmatpush1.bf16.msra.mxu0 %v17109_v19  ;;  %11519 = vmatprep.subr.bf16.mxu1 %v17110_v7 }
 0xe04   : > { %11562 = vmatprep.subr.bf16.mxu0 %v17112_v6 }
 0xe06   : > { %11520 = vmatpush1.bf16.msra.mxu1 %v17114_v45 }
 0xe07   : > { %11563 = vmatpush1.bf16.msra.mxu0 %v17115_v8  ;;  %11521 = vmatprep.subr.bf16.mxu1 %v17116_v9 }
 0xe08   : > { %11564 = vmatprep.subr.bf16.mxu0 %v17118_v2 }
 0xe0a   : > { %11522 = vmatpush1.bf16.msra.mxu1 %v17120_v21 }
 0xe0b   : > { %11565 = vmatpush1.bf16.msra.mxu0 %v17121_v24  ;;  %14604 = vmatprep.subr.bf16.mxu1 %v17122_v11 }
 0xe0d   : > { %11524 = vmatmul.mubr.bf16.vlgmr.msra.gmra.mrb[0].mxu1 %v11091_v59 }
 0xe0e   : > { %11567 = vmatmul.mubr.bf16.vlgmr.msra.gmra.mrb[0].mxu0 %v11093_v40  ;;  %14605 = vmatpush3.bf16.msra.mxu1 %v17123_v26 }
 0xe0f   : > { %14606 = vmatprep.subr.bf16.mxu1 %v17124_v55 }
 0xe12   : > { %14607 = vmatpush3.bf16.msra.mxu1 %v17125_v28 }
 0xe13   : > { %14608 = vmatprep.subr.bf16.mxu1 %v17126_v29 }
 0xe16   : > { %14609 = vmatpush3.bf16.msra.mxu1 %v17127_v15 }
 0xe17   : > { %14610 = vmatprep.subr.bf16.mxu1 %v17128_v35 }
 0xe1a   : > { %14611 = vmatpush3.bf16.msra.mxu1 %v17129_v18 }
 0xe1b   : > { %14612 = vmatprep.subr.bf16.mxu1 %v17130_v20 }
 0xe1e   : > { %14613 = vmatpush3.bf16.msra.mxu1 %v17131_v14 }
 0xe1f   : > { %14614 = vmatprep.subr.bf16.mxu1 %v17132_v10 }
 0xe22   : > { %14615 = vmatpush3.bf16.msra.mxu1 %v17133_v37 }
 0xe23   : > { %14616 = vmatprep.subr.bf16.mxu1 %v17134_v39 }
 0xe26   : > { %14617 = vmatpush3.bf16.msra.mxu1 %v17135_v42 }
 0xe27   : > { %14618 = vmatprep.subr.bf16.mxu1 %v17136_v43 }
 0xe2a   : > { %14619 = vmatpush3.bf16.msra.mxu1 %v17137_v60 }
 0xee0   : > { %v11525_v48 = vpop.f32.mrb[0].mxu1 }
 0xee1   : > { %v11568_v25 = vpop.f32.mrb[0].mxu0  ;;  %v11526_v52 = vadd.f32 %v11525_v48, %v11164_v3  ;;  %v11527_v62 = vpop.f32.mrb[1].mxu1 }
 0xee2   : > { %v11570_v53 = vpop.f32.mrb[1].mxu0  ;;  %v11528_v54 = vadd.f32 %v11527_v62, %v11168_v47  ;;  %v11529_v56 = vpop.f32.mrb[2].mxu1 }
 0xee3   : > { %v11572_v57 = vpop.f32.mrb[2].mxu0  ;;  %v11569_v13 = vadd.f32 %v11568_v25, %v11526_v52  ;;  %v11530_v5 = vadd.f32 %v11529_v56, %v11164_v3  ;;  %v11531_v0 = vpop.f32.mrb[3].mxu1 }
 0xee4   : > { %v11574_v36 = vpop.f32.mrb[3].mxu0  ;;  %v11571_v22 = vadd.f32 %v11570_v53, %v11528_v54  ;;  %v11532_v44 = vadd.f32 %v11531_v0, %v11168_v47 }
 0xee5   : > { %v11573_v49 = vadd.f32 %v11572_v57, %v11530_v5  ;;  %v11577_v17 = vmax.f32 %v11569_v13, 0.0 }
 0xee6   : > { %v11575_v4 = vadd.f32 %v11574_v36, %v11532_v44  ;;  %v11578_v12 = vmax.f32 %v11571_v22, 0.0 }
 0xee7   : > { %v11579_v30 = vmax.f32 %v11573_v49, 0.0 }
 0xee8   : > { %v11580_v32 = vmax.f32 %v11575_v4, 0.0 }
 0xee9   : > { %v11581_v34 = vpack.c.bf16 %v11579_v30, %v11577_v17 }
 0xeea   : > { %v11582_v58 = vpack.c.bf16 %v11580_v32, %v11578_v12 }
 0xeec   : > { %11750 = vmatprep.mubr.bf16.mxu1 %v11582_v58 }
 0xeed   : > { %11751 = vmatmul.mubr.bf16.vlgmr.msra.gmra.mrb[4].mxu1 %v11581_v34 }
 0xfc0   : > { %v14620_v31 = vpop.f32.mrb[4].mxu1 }
 0xfc1   : > { %v14621_v63 = vpop.f32.mrb[5].mxu1 }
 0xfc2   : > { %v14622_v33 = vadd.f32 %v14621_v63, %v14620_v31  ;;  %v14623_v50 = vpop.f32.mrb[6].mxu1 }
 0xfc3   : > { %v14624_v16 = vpop.f32.mrb[7].mxu1 }
 0xfc4   : > { %v14625_v41 = vadd.f32 %v14624_v16, %v14623_v50  ;;  %v11753_v23 = vadd.f32 %v14622_v33, %v14577_v38 }
 0xfc6   : > { %v11762_v51 = vsel %vm11761_vm0, %v11753_v23, -inf  ;;  %v11756_v1 = vadd.f32 %v14625_v41, %v14577_v38 }
 0xfc7   : > { %11764 = vmax.xlane.f32.xlu0 %v11762_v51 }
 0xfc8   : > { %v11763_v19 = vsel %vm11761_vm0, %v11756_v1, -inf }
 0xfcb   : > { %11766 = vmax.xlane.f32.xlu0 %v11763_v19 }
0x1054   : > { %v11765_v7 = vpop.xlane.xlu0 %11764 }
0x1055   : > { %v11768_v6 = vsub.f32 %v11762_v51, %v11765_v7 }
0x1057   : > { %v11770_v45 = vmul.f32 1.442695, %v11768_v6 }
0x1058   : > { %v11767_v27 = vpop.xlane.xlu0 %11766 }
0x1059   : > { %17138 = vpow2.f32 %v11770_v45  ;;  %v11769_v8 = vsub.f32 %v11763_v19, %v11767_v27 }
0x105b   : > { %v11772_v9 = vmul.f32 1.442695, %v11769_v8 }
0x105d   : > { %17140 = vpow2.f32 %v11772_v9 }
0x1063   : > { %v17139_v2 = vpop.eup %17138 }
0x1064   : > { %11774 = vadd.xlane.f32.xlu1 %v17139_v2 }
0x1067   : > { %v17141_v21 = vpop.eup %17140 }
0x1068   : > { %11776 = vadd.xlane.f32.xlu1 %v17141_v21 }
0x10f1   : > { %v11775_v24 = vpop.xlane.xlu1 %11774 }
0x10f2   : > { %17142 = vrcp.f32 %v11775_v24 }
0x10f3   : > { %17144 = vtanh.f32 %v11753_v23 }
0x10f5   : > { %v11777_v11 = vpop.xlane.xlu1 %11776 }
0x10f6   : > { %17146 = vrcp.f32 %v11777_v11 }
0x10f7   : > { %17148 = vtanh.f32 %v11756_v1 }
0x10fc   : > { %v17143_v59 = vpop.eup %17142 }
0x10fd   : > { %v11779_v40 = vmul.f32 %v17143_v59, %v17139_v2  ;;  %v17145_v26 = vpop.eup %17144 }
0x10ff   : > { %v11784_v55 = vsel %vm11761_vm0, %v11779_v40, %v17145_v26 }
0x1100   : > { %v17147_v28 = vpop.eup %17146  ;;  %11786 = vst [vmem:[%s19533_s21] sm:$0xff] %v11784_v55 }
0x1101   : > { %v11781_v29 = vmul.f32 %v17147_v28, %v17141_v21  ;;  %v17149_v15 = vpop.eup %17148 }
0x1103   : > { %v11785_v35 = vsel %vm11761_vm0, %v11781_v29, %v17149_v15 }
0x1104   : > { %11787 = vst [vmem:[%s19533_s21 + $0x8] sm:$0xff] %v11785_v35 }
0x1105 PF: > { %s26_s14 = sadd.s32 1, %s17472_s14   ;;  %s19534_s3 = sld [smem:[#allocation24_spill]] }
0x1106   : > { %p23_p1 = scmp.ge.s32.totalorder %s26_s14, 4   ;;  %s19535_s30 = smov %s17456_s10 }
0x1107   : > { %s19536_s10 = smov %s17460_s11  ;;  %s19537_s11 = smov %s17697_s25 }
0x1108   : > { %s19538_s12 = smov %s17468_s13  ;;  %25 = sbr.rel (!%p23_p1) target bundleno = 14 (0xe), region = 163 }
0x110b   : > { %s19539_s13 = smov %s19534_s3 }
0x110f   :  { %11810 = vsyncpa [#allocation4], 1 }
0x1110   :  { %11812 = vsyncpa [#allocation4 + $0x1], 1 }
0x1111   :  { %11813 = vsyncpa [#allocation6], 1 }
0x1112   :  { %11814 = vsyncpa [#allocation9], 1 }
0x1113   :  { %11816 = vsyncpa [#allocation9 + $0x1], 1 }
0x1114   :  { %11817 = vsyncpa [#allocation12], 1 }
0x1115   :  { %11818 = vsyncpa [#allocation15], 1 }

</bundles_post_ra>
